<compile_context>
chip_gen: v7x
topology: tpu7x:2x2x1
jax: 0.10.0
libtpu: 0.0.40
codegen_flags: <defaults>
</compile_context>

<pallas_src>
import functools
import math

import jax
import jax.numpy as jnp
from jax.experimental import pallas as pl
from jax.experimental.pallas import tpu as pltpu

# ----------------------- synthetic RoBERTa-style config -----------------------
VOCAB      = 1000
MAX_POS    = 64
HIDDEN     = 768          # matches the 768 hard-coded in the heads of MyModel
N_HEADS    = 12
HEAD_DIM   = HIDDEN // N_HEADS
FFN        = 3072
N_LAYERS   = 2            # reduced depth for the synthetic backbone
ATT_HIDDEN = 512
LN_EPS     = 1e-7
PAD_IDX    = 1

_GELU_C = math.sqrt(2.0 / math.pi)
_VMEM_LIMIT = 32 * 1024 * 1024   # safe on v5e/v6e (128 MiB) and v7x (64 MiB)


# ============================ Pallas kernels ==================================
# ---- fused matmul + bias (+ activation), bf16 inputs, f32 accumulate ---------
def _matmul_bias_kernel(x_ref, w_ref, b_ref, o_ref, acc_ref, *, activation):
    k = pl.program_id(2)

    @pl.when(k == 0)
    def _():
        acc_ref[...] = jnp.zeros_like(acc_ref)

    acc_ref[...] += jnp.dot(x_ref[...], w_ref[...],
                            preferred_element_type=jnp.float32)

    @pl.when(k == pl.num_programs(2) - 1)
    def _():
        y = acc_ref[...] + b_ref[...]               # f32 epilogue (v5e-safe)
        if activation == "gelu":
            # TODO(synk): HF RoBERTa uses erf-GELU; tanh approximation used here.
            y = 0.5 * y * (1.0 + jnp.tanh(_GELU_C * (y + 0.044715 * y * y * y)))
        elif activation == "tanh":
            y = jnp.tanh(y)
        o_ref[...] = y.astype(o_ref.dtype)


def matmul_bias(x, w, b, activation=None, out_dtype=None):
    """y = act(x @ w + b); x:(M,K) bf16, w:(K,N) bf16, b:(N,) f32."""
    M, K = x.shape
    Kw, N = w.shape
    assert K == Kw
    out_dtype = out_dtype or x.dtype
    tm = 256 if M % 256 == 0 else (128 if M % 128 == 0 else M)
    tn = 256 if N % 256 == 0 else N
    tk = 256 if K % 256 == 0 else K
    grid = (M // tm, N // tn, K // tk)
    kernel = functools.partial(_matmul_bias_kernel, activation=activation)
    return pl.pallas_call(
        kernel,
        out_shape=jax.ShapeDtypeStruct((M, N), out_dtype),
        grid_spec=pltpu.PrefetchScalarGridSpec(
            num_scalar_prefetch=0,
            grid=grid,
            in_specs=[
                pl.BlockSpec((tm, tk), lambda i, j, k: (i, k)),
                pl.BlockSpec((tk, tn), lambda i, j, k: (k, j)),
                pl.BlockSpec((1, tn), lambda i, j, k: (0, j)),
            ],
            out_specs=pl.BlockSpec((tm, tn), lambda i, j, k: (i, j)),
            scratch_shapes=[pltpu.VMEM((tm, tn), jnp.float32)],
        ),
        compiler_params=pltpu.CompilerParams(
            dimension_semantics=("parallel", "parallel", "arbitrary"),
            vmem_limit_bytes=_VMEM_LIMIT),
    )(x, w, b.reshape(1, N))


# ---- LayerNorm (optionally fused with the residual add), tiled over rows -----
def _ln_core(x, g, b):
    mu = jnp.mean(x, axis=-1, keepdims=True)
    var = jnp.mean(jnp.square(x - mu), axis=-1, keepdims=True)
    return (x - mu) * jax.lax.rsqrt(var + LN_EPS) * g + b


def _ln_kernel(x_ref, g_ref, b_ref, o_ref):
    x = x_ref[...].astype(jnp.float32)
    o_ref[...] = _ln_core(x, g_ref[...], b_ref[...]).astype(o_ref.dtype)


def _ln_res_kernel(x_ref, r_ref, g_ref, b_ref, o_ref):
    x = x_ref[...].astype(jnp.float32) + r_ref[...].astype(jnp.float32)
    o_ref[...] = _ln_core(x, g_ref[...], b_ref[...]).astype(o_ref.dtype)


def layernorm(x, gamma, beta, residual=None, out_dtype=None):
    M, D = x.shape
    out_dtype = out_dtype or x.dtype
    tm = 256 if M % 256 == 0 else M
    row_spec = pl.BlockSpec((tm, D), lambda i: (i, 0))
    vec_spec = pl.BlockSpec((1, D), lambda i: (0, 0))
    g2, b2 = gamma.reshape(1, D), beta.reshape(1, D)
    if residual is None:
        kernel, ins, args = _ln_kernel, [row_spec, vec_spec, vec_spec], (x, g2, b2)
    else:
        kernel = _ln_res_kernel
        ins = [row_spec, row_spec, vec_spec, vec_spec]
        args = (x, residual, g2, b2)
    return pl.pallas_call(
        kernel,
        out_shape=jax.ShapeDtypeStruct((M, D), out_dtype),
        grid=(M // tm,),
        in_specs=ins,
        out_specs=row_spec,
        compiler_params=pltpu.CompilerParams(
            dimension_semantics=("parallel",)),
    )(*args)


# ---- multi-head self-attention: one grid step per batch, packed QKV ----------
def _mha_kernel(qkv_ref, bias_ref, o_ref):
    qkv = qkv_ref[0]                                  # (S, 3*HIDDEN) bf16
    bias = bias_ref[0].astype(jnp.float32)            # (1, S) additive key mask
    scale = 1.0 / math.sqrt(HEAD_DIM)
    outs = []
    for h in range(N_HEADS):                          # static unroll, heads packed in lanes
        lo = h * HEAD_DIM
        q = qkv[:, lo:lo + HEAD_DIM]
        k = qkv[:, HIDDEN + lo:HIDDEN + lo + HEAD_DIM]
        v = qkv[:, 2 * HIDDEN + lo:2 * HIDDEN + lo + HEAD_DIM]
        s = jax.lax.dot_general(q, k, (((1,), (1,)), ((), ())),
                                preferred_element_type=jnp.float32) * scale
        s = s + bias
        s = s - jnp.max(s, axis=-1, keepdims=True)
        e = jnp.exp(s)
        p = e * pl.reciprocal(jnp.sum(e, axis=-1, keepdims=True), approx=True)
        outs.append(jnp.dot(p.astype(v.dtype), v,
                            preferred_element_type=jnp.float32))
    o_ref[0] = jnp.concatenate(outs, axis=-1).astype(o_ref.dtype)


def multihead_attention(qkv, mask_bias):
    """qkv: (B, S, 3*HIDDEN) packed projections; mask_bias: (B, S) additive."""
    B, S, _ = qkv.shape
    bias3 = mask_bias.reshape(B, 1, S)
    return pl.pallas_call(
        _mha_kernel,
        out_shape=jax.ShapeDtypeStruct((B, S, HIDDEN), qkv.dtype),
        grid=(B,),
        in_specs=[pl.BlockSpec((1, S, 3 * HIDDEN), lambda b: (b, 0, 0)),
                  pl.BlockSpec((1, 1, S), lambda b: (b, 0, 0))],
        out_specs=pl.BlockSpec((1, S, HIDDEN), lambda b: (b, 0, 0)),
        compiler_params=pltpu.CompilerParams(
            dimension_semantics=("parallel",)),
    )(qkv, bias3)


# ---- fused pooling head: tanh-dense -> scores -> softmax(seq) -> ctx -> reg --
def _pool_head_kernel(h_ref, w1_ref, b1_ref, w2_ref, b2_ref, wr_ref, br_ref,
                      o_ref):
    w1 = w1_ref[...]                                  # (D, ATT) bf16
    b1 = b1_ref[...]                                  # (1, ATT) f32
    w2 = w2_ref[...]                                  # (1, ATT) f32
    b2 = b2_ref[...]                                  # (1, 1)   f32
    wr = wr_ref[...]                                  # (1, D)   f32
    br = br_ref[...]                                  # (1, 1)   f32
    outs = []
    for b in range(h_ref.shape[0]):                   # static batch unroll
        hid = h_ref[b]                                # (S, D) bf16
        a = jnp.tanh(jnp.dot(hid, w1, preferred_element_type=jnp.float32) + b1)
        scores = jnp.sum(a * w2, axis=-1, keepdims=True) + b2      # (S, 1)
        # NOTE: matches the reference nn.Softmax(dim=1): no attention_mask here.
        m = jnp.max(scores, axis=0, keepdims=True)
        e = jnp.exp(scores - m)
        w = e * pl.reciprocal(jnp.sum(e, axis=0, keepdims=True), approx=True)
        ctx = jnp.sum(w * hid.astype(jnp.float32), axis=0, keepdims=True)  # (1, D)
        outs.append(jnp.sum(ctx * wr, axis=-1, keepdims=True) + br)        # (1, 1)
    o_ref[...] = jnp.concatenate(outs, axis=0).astype(o_ref.dtype)


def pooling_head(hidden, w1, b1, w2_row, b2, wr_row, br):
    B, S, D = hidden.shape
    A = w1.shape[1]
    full = lambda shape: pl.BlockSpec(shape, lambda i: (0,) * len(shape))
    return pl.pallas_call(
        _pool_head_kernel,
        out_shape=jax.ShapeDtypeStruct((B, 1), jnp.float32),
        grid=(1,),
        in_specs=[full((B, S, D)), full((D, A)), full((1, A)),
                  full((1, A)), full((1, 1)), full((1, D)), full((1, 1))],
        out_specs=full((B, 1)),
    )(hidden, w1, b1.reshape(1, A), w2_row, b2, wr_row, br)


# ============================= model (glue) ===================================
def init_params(key):
    cnt = [0]

    def nxt():
        cnt[0] += 1
        return jax.random.fold_in(key, cnt[0])

    def w(shape, dtype=jnp.bfloat16):
        return (0.02 * jax.random.normal(nxt(), shape, jnp.float32)).astype(dtype)

    params = {
        'word_emb': w((VOCAB, HIDDEN), jnp.float32),
        'pos_emb':  w((MAX_POS, HIDDEN), jnp.float32),
        'type_emb': w((1, HIDDEN), jnp.float32),
        'emb_ln_g': jnp.ones((HIDDEN,), jnp.float32),
        'emb_ln_b': jnp.zeros((HIDDEN,), jnp.float32),
        'layers': [],
    }
    for _ in range(N_LAYERS):
        params['layers'].append(dict(
            wqkv=w((HIDDEN, 3 * HIDDEN)), bqkv=jnp.zeros((3 * HIDDEN,), jnp.float32),
            wo=w((HIDDEN, HIDDEN)), bo=jnp.zeros((HIDDEN,), jnp.float32),
            ln1_g=jnp.ones((HIDDEN,), jnp.float32),
            ln1_b=jnp.zeros((HIDDEN,), jnp.float32),
            w1=w((HIDDEN, FFN)), b1=jnp.zeros((FFN,), jnp.float32),
            w2=w((FFN, HIDDEN)), b2=jnp.zeros((HIDDEN,), jnp.float32),
            ln2_g=jnp.ones((HIDDEN,), jnp.float32),
            ln2_b=jnp.zeros((HIDDEN,), jnp.float32),
        ))
    params['head'] = dict(
        w_att1=w((HIDDEN, ATT_HIDDEN)),
        b_att1=jnp.zeros((ATT_HIDDEN,), jnp.float32),
        w_att2=w((1, ATT_HIDDEN), jnp.float32),   # stored as a row vector
        b_att2=jnp.zeros((1, 1), jnp.float32),
        w_reg=w((1, HIDDEN), jnp.float32),        # stored as a row vector
        b_reg=jnp.zeros((1, 1), jnp.float32),
    )
    return params


def forward(params, input_ids, attention_mask):
    B, S = input_ids.shape
    M = B * S
    mask_i = attention_mask.astype(jnp.int32)
    mask_f = attention_mask.astype(jnp.float32)

    # ---- RoBERTa-style embeddings (lookup is glue; LayerNorm is a kernel) ----
    pos_ids = jnp.cumsum(mask_i, axis=1) * mask_i + PAD_IDX
    emb = (params['word_emb'][input_ids]
           + params['pos_emb'][pos_ids]
           + params['type_emb'][0])
    x = layernorm(emb.reshape(M, HIDDEN),
                  params['emb_ln_g'], params['emb_ln_b'],
                  out_dtype=jnp.bfloat16)

    mask_bias = (1.0 - mask_f) * (-1e9)          # (B, S) additive attention bias

    # ----------------------------- encoder layers -----------------------------
    for lp in params['layers']:
        qkv = matmul_bias(x, lp['wqkv'], lp['bqkv'])             # fused Q/K/V
        attn = multihead_attention(qkv.reshape(B, S, 3 * HIDDEN), mask_bias)
        attn = matmul_bias(attn.reshape(M, HIDDEN), lp['wo'], lp['bo'])
        x = layernorm(attn, lp['ln1_g'], lp['ln1_b'], residual=x)

        h = matmul_bias(x, lp['w1'], lp['b1'], activation='gelu')
        h = matmul_bias(h, lp['w2'], lp['b2'])
        x = layernorm(h, lp['ln2_g'], lp['ln2_b'], residual=x)

    # -------------------- fused attention-pooling head + regressor ------------
    hp = params['head']
    out = pooling_head(x.reshape(B, S, HIDDEN),
                       hp['w_att1'], hp['b_att1'],
                       hp['w_att2'], hp['b_att2'],
                       hp['w_reg'], hp['b_reg'])                 # (B, 1) f32
    return out


# ================================== main ======================================
if __name__ == "__main__":
    B, S = 2, 8
    key = jax.random.PRNGKey(0)
    k_params, k_ids = jax.random.split(key)

    params = init_params(k_params)
    input_ids = jax.random.randint(k_ids, (B, S), 0, VOCAB, dtype=jnp.int32)
    attention_mask = jnp.array([[1, 1, 1, 1, 1, 1, 1, 1],
                                [1, 1, 1, 1, 1, 1, 0, 0]], dtype=jnp.int32)

    out = jax.jit(forward)(params, input_ids, attention_mask)
    out = jax.block_until_ready(out)
    assert out.shape == (B, 1)
    assert bool(jnp.all(jnp.isfinite(out)))
    print("KERNEL_OK")
</pallas_src>

<mosaic_0001>
module attributes {stable_mosaic.version = 11 : i64} {
  func.func @_ln_kernel(%arg0: i32, %arg1: memref<16x768xf32, #tpu.memory_space<vmem>>, %arg2: memref<1x768xf32, #tpu.memory_space<vmem>>, %arg3: memref<1x768xf32, #tpu.memory_space<vmem>>, %arg4: memref<16x768xbf16, #tpu.memory_space<vmem>>) attributes {dimension_semantics = [#tpu.dimension_semantics<parallel>], iteration_bounds = array<i64: 1>, scalar_prefetch = 0 : i64, scratch_operands = 0 : i64, tpu.core_type = #tpu.core_type<tc>, window_params = [{transform_indices = @transform_0, window_bounds = array<i64: 16, 768>}, {pipeline_mode = #tpu.pipeline_mode<synchronous>, transform_indices = @transform_1, window_bounds = array<i64: 1, 768>}, {pipeline_mode = #tpu.pipeline_mode<synchronous>, transform_indices = @transform_2, window_bounds = array<i64: 1, 768>}, {transform_indices = @transform_3, window_bounds = array<i64: 16, 768>}]} {
    %c0 = arith.constant 0 : index
    %c0_0 = arith.constant 0 : index
    %0 = vector.load %arg1[%c0, %c0_0] : memref<16x768xf32, #tpu.memory_space<vmem>>, vector<16x768xf32>
    %c0_1 = arith.constant 0 : index
    %c0_2 = arith.constant 0 : index
    %1 = vector.load %arg2[%c0_1, %c0_2] : memref<1x768xf32, #tpu.memory_space<vmem>>, vector<1x768xf32>
    %c0_3 = arith.constant 0 : index
    %c0_4 = arith.constant 0 : index
    %2 = vector.load %arg3[%c0_3, %c0_4] : memref<1x768xf32, #tpu.memory_space<vmem>>, vector<1x768xf32>
    %cst = arith.constant dense<0.000000e+00> : vector<16xf32>
    %3 = vector.multi_reduction <add>, %0, %cst [1] : vector<16x768xf32> to vector<16xf32>
    %4 = vector.shape_cast %3 : vector<16xf32> to vector<16x1xf32>
    %cst_5 = arith.constant 7.680000e+02 : f32
    %5 = vector.broadcast %cst_5 : f32 to vector<16x1xf32>
    %6 = arith.divf %4, %5 : vector<16x1xf32>
    %7 = vector.broadcast %6 : vector<16x1xf32> to vector<16x768xf32>
    %8 = arith.subf %0, %7 : vector<16x768xf32>
    %9 = arith.mulf %8, %8 : vector<16x768xf32>
    %cst_6 = arith.constant dense<0.000000e+00> : vector<16xf32>
    %10 = vector.multi_reduction <add>, %9, %cst_6 [1] : vector<16x768xf32> to vector<16xf32>
    %11 = vector.shape_cast %10 : vector<16xf32> to vector<16x1xf32>
    %cst_7 = arith.constant 7.680000e+02 : f32
    %12 = vector.broadcast %cst_7 : f32 to vector<16x1xf32>
    %13 = arith.divf %11, %12 : vector<16x1xf32>
    %14 = vector.broadcast %6 : vector<16x1xf32> to vector<16x768xf32>
    %15 = arith.subf %0, %14 : vector<16x768xf32>
    %cst_8 = arith.constant 1.000000e-07 : f32
    %16 = vector.broadcast %cst_8 : f32 to vector<16x1xf32>
    %17 = arith.addf %13, %16 : vector<16x1xf32>
    %18 = math.rsqrt %17 : vector<16x1xf32>
    %19 = vector.broadcast %18 : vector<16x1xf32> to vector<16x768xf32>
    %20 = arith.mulf %15, %19 : vector<16x768xf32>
    %21 = vector.broadcast %1 : vector<1x768xf32> to vector<16x768xf32>
    %22 = arith.mulf %20, %21 : vector<16x768xf32>
    %23 = vector.broadcast %2 : vector<1x768xf32> to vector<16x768xf32>
    %24 = arith.addf %22, %23 : vector<16x768xf32>
    %25 = arith.truncf %24 : vector<16x768xf32> to vector<16x768xbf16>
    %c0_9 = arith.constant 0 : index
    %c0_10 = arith.constant 0 : index
    %26 = vector.load %arg4[%c0_9, %c0_10] : memref<16x768xbf16, #tpu.memory_space<vmem>>, vector<16x768xbf16>
    tpu.vector_store %arg4[%c0_9, %c0_10], %25 {strides = array<i32>} : memref<16x768xbf16, #tpu.memory_space<vmem>>, vector<16x768xbf16>,
    return
  }
  func.func @transform_0(%arg0: i32) -> (i32, i32) {
    %c0_i32 = arith.constant 0 : i32
    %c0_i32_0 = arith.constant 0 : i32
    return %arg0, %c0_i32 : i32, i32
  }
  func.func @transform_1(%arg0: i32) -> (i32, i32) {
    %c0_i32 = arith.constant 0 : i32
    %c0_i32_0 = arith.constant 0 : i32
    %c0_i32_1 = arith.constant 0 : i32
    return %c0_i32, %c0_i32_0 : i32, i32
  }
  func.func @transform_2(%arg0: i32) -> (i32, i32) {
    %c0_i32 = arith.constant 0 : i32
    %c0_i32_0 = arith.constant 0 : i32
    %c0_i32_1 = arith.constant 0 : i32
    return %c0_i32, %c0_i32_0 : i32, i32
  }
  func.func @transform_3(%arg0: i32) -> (i32, i32) {
    %c0_i32 = arith.constant 0 : i32
    %c0_i32_0 = arith.constant 0 : i32
    return %arg0, %c0_i32 : i32, i32
  }
}

module attributes {stable_mosaic.version = 11 : i64} {
  func.func @_matmul_bias_kernel(%arg0: i32, %arg1: i32, %arg2: i32, %arg3: memref<16x256xbf16, #tpu.memory_space<vmem>>, %arg4: memref<256x256xbf16, #tpu.memory_space<vmem>>, %arg5: memref<1x256xf32, #tpu.memory_space<vmem>>, %arg6: memref<16x256xbf16, #tpu.memory_space<vmem>>, %arg7: memref<16x256xf32, #tpu.memory_space<vmem>>) attributes {dimension_semantics = [#tpu.dimension_semantics<parallel>, #tpu.dimension_semantics<parallel>, #tpu.dimension_semantics<arbitrary>], iteration_bounds = array<i64: 1, 9, 3>, scalar_prefetch = 0 : i64, scratch_operands = 1 : i64, tpu.core_type = #tpu.core_type<tc>, window_params = [{transform_indices = @transform_0, window_bounds = array<i64: 16, 256>}, {transform_indices = @transform_1, window_bounds = array<i64: 256, 256>}, {transform_indices = @transform_2, window_bounds = array<i64: 1, 256>}, {transform_indices = @transform_3, window_bounds = array<i64: 16, 256>}]} {
    %c0_i32 = arith.constant 0 : i32
    %0 = arith.cmpi eq, %arg2, %c0_i32 : i32
    %1 = arith.extui %0 : i1 to i32
    %c0_i32_0 = arith.constant 0 : i32
    %2 = arith.cmpi ne, %1, %c0_i32_0 : i32
    scf.if %2 {
      %cst_9 = arith.constant 0.000000e+00 : f32
      %12 = vector.broadcast %cst_9 : f32 to vector<16x256xf32>
      %c0_10 = arith.constant 0 : index
      %c0_11 = arith.constant 0 : index
      %13 = vector.load %arg7[%c0_10, %c0_11] : memref<16x256xf32, #tpu.memory_space<vmem>>, vector<16x256xf32>
      tpu.vector_store %arg7[%c0_10, %c0_11], %12 {strides = array<i32>} : memref<16x256xf32, #tpu.memory_space<vmem>>, vector<16x256xf32>,
    } else {
    }
    %c0 = arith.constant 0 : index
    %c0_1 = arith.constant 0 : index
    %3 = vector.load %arg7[%c0, %c0_1] : memref<16x256xf32, #tpu.memory_space<vmem>>, vector<16x256xf32>
    %c0_2 = arith.constant 0 : index
    %c0_3 = arith.constant 0 : index
    %4 = vector.load %arg3[%c0_2, %c0_3] : memref<16x256xbf16, #tpu.memory_space<vmem>>, vector<16x256xbf16>
    %c0_4 = arith.constant 0 : index
    %c0_5 = arith.constant 0 : index
    %5 = vector.load %arg4[%c0_4, %c0_5] : memref<256x256xbf16, #tpu.memory_space<vmem>>, vector<256x256xbf16>
    %cst = arith.constant dense<0.000000e+00> : vector<16x256xf32>
    %6 = tpu.matmul %4, %5, %cst {dimension_numbers = #tpu.dot_dimension_numbers<[1], [0], [0], [1], [0, 0, 1, 1], [], []>} : vector<16x256xbf16>, vector<256x256xbf16>, vector<16x256xf32> -> vector<16x256xf32>
    %7 = arith.addf %3, %6 : vector<16x256xf32>
    %c0_6 = arith.constant 0 : index
    %c0_7 = arith.constant 0 : index
    %8 = vector.load %arg7[%c0_6, %c0_7] : memref<16x256xf32, #tpu.memory_space<vmem>>, vector<16x256xf32>
    tpu.vector_store %arg7[%c0_6, %c0_7], %7 {strides = array<i32>} : memref<16x256xf32, #tpu.memory_space<vmem>>, vector<16x256xf32>,
    %c2_i32 = arith.constant 2 : i32
    %9 = arith.cmpi eq, %arg2, %c2_i32 : i32
    %10 = arith.extui %9 : i1 to i32
    %c0_i32_8 = arith.constant 0 : i32
    %11 = arith.cmpi ne, %10, %c0_i32_8 : i32
    scf.if %11 {
      %c0_9 = arith.constant 0 : index
      %c0_10 = arith.constant 0 : index
      %12 = vector.load %arg7[%c0_9, %c0_10] : memref<16x256xf32, #tpu.memory_space<vmem>>, vector<16x256xf32>
      %c0_11 = arith.constant 0 : index
      %c0_12 = arith.constant 0 : index
      %13 = vector.load %arg5[%c0_11, %c0_12] : memref<1x256xf32, #tpu.memory_space<vmem>>, vector<1x256xf32>
      %14 = vector.broadcast %13 : vector<1x256xf32> to vector<16x256xf32>
      %15 = arith.addf %12, %14 : vector<16x256xf32>
      %16 = arith.truncf %15 : vector<16x256xf32> to vector<16x256xbf16>
      %c0_13 = arith.constant 0 : index
      %c0_14 = arith.constant 0 : index
      %17 = vector.load %arg6[%c0_13, %c0_14] : memref<16x256xbf16, #tpu.memory_space<vmem>>, vector<16x256xbf16>
      tpu.vector_store %arg6[%c0_13, %c0_14], %16 {strides = array<i32>} : memref<16x256xbf16, #tpu.memory_space<vmem>>, vector<16x256xbf16>,
    } else {
    }
    return
  }
  func.func @transform_0(%arg0: i32, %arg1: i32, %arg2: i32) -> (i32, i32) {
    %c0_i32 = arith.constant 0 : i32
    return %arg0, %arg2 : i32, i32
  }
  func.func @transform_1(%arg0: i32, %arg1: i32, %arg2: i32) -> (i32, i32) {
    %c0_i32 = arith.constant 0 : i32
    return %arg2, %arg1 : i32, i32
  }
  func.func @transform_2(%arg0: i32, %arg1: i32, %arg2: i32) -> (i32, i32) {
    %c0_i32 = arith.constant 0 : i32
    %c0_i32_0 = arith.constant 0 : i32
    return %c0_i32, %arg1 : i32, i32
  }
  func.func @transform_3(%arg0: i32, %arg1: i32, %arg2: i32) -> (i32, i32) {
    %c0_i32 = arith.constant 0 : i32
    return %arg0, %arg1 : i32, i32
  }
}

module attributes {stable_mosaic.version = 11 : i64} {
  func.func @_mha_kernel(%arg0: i32, %arg1: memref<1x8x2304xbf16, #tpu.memory_space<vmem>>, %arg2: memref<1x1x8xf32, #tpu.memory_space<vmem>>, %arg3: memref<1x8x768xbf16, #tpu.memory_space<vmem>>) attributes {dimension_semantics = [#tpu.dimension_semantics<parallel>], iteration_bounds = array<i64: 2>, scalar_prefetch = 0 : i64, scratch_operands = 0 : i64, tpu.core_type = #tpu.core_type<tc>, window_params = [{transform_indices = @transform_0, window_bounds = array<i64: 1, 8, 2304>}, {transform_indices = @transform_1, window_bounds = array<i64: 1, 1, 8>}, {transform_indices = @transform_2, window_bounds = array<i64: 1, 8, 768>}]} {
    %c0 = arith.constant 0 : index
    %c0_0 = arith.constant 0 : index
    %c0_1 = arith.constant 0 : index
    %0 = vector.load %arg1[%c0, %c0_0, %c0_1] : memref<1x8x2304xbf16, #tpu.memory_space<vmem>>, vector<1x8x2304xbf16>
    %1 = vector.shape_cast %0 : vector<1x8x2304xbf16> to vector<8x2304xbf16>
    %c0_2 = arith.constant 0 : index
    %c0_3 = arith.constant 0 : index
    %c0_4 = arith.constant 0 : index
    %2 = vector.load %arg2[%c0_2, %c0_3, %c0_4] : memref<1x1x8xf32, #tpu.memory_space<vmem>>, vector<1x1x8xf32>
    %3 = vector.shape_cast %2 : vector<1x1x8xf32> to vector<1x8xf32>
    %4 = vector.extract_strided_slice %1 {offsets = [0, 0], sizes = [8, 64], strides = [1, 1]} : vector<8x2304xbf16> to vector<8x64xbf16>
    %5 = vector.extract_strided_slice %1 {offsets = [0, 768], sizes = [8, 64], strides = [1, 1]} : vector<8x2304xbf16> to vector<8x64xbf16>
    %6 = vector.extract_strided_slice %1 {offsets = [0, 1536], sizes = [8, 64], strides = [1, 1]} : vector<8x2304xbf16> to vector<8x64xbf16>
    %cst = arith.constant dense<0.000000e+00> : vector<8x8xf32>
    %7 = tpu.matmul %4, %5, %cst {dimension_numbers = #tpu.dot_dimension_numbers<[1], [1], [0], [0], [0, 0, 1, 0], [], []>} : vector<8x64xbf16>, vector<8x64xbf16>, vector<8x8xf32> -> vector<8x8xf32>
    %cst_5 = arith.constant 1.250000e-01 : f32
    %8 = vector.broadcast %cst_5 : f32 to vector<8x8xf32>
    %9 = arith.mulf %7, %8 : vector<8x8xf32>
    %10 = vector.broadcast %3 : vector<1x8xf32> to vector<8x8xf32>
    %11 = arith.addf %9, %10 : vector<8x8xf32>
    %cst_6 = arith.constant dense<0xFF800000> : vector<8xf32>
    %12 = vector.multi_reduction <maximumf>, %11, %cst_6 [1] : vector<8x8xf32> to vector<8xf32>
    %13 = vector.shape_cast %12 : vector<8xf32> to vector<8x1xf32>
    %14 = vector.broadcast %13 : vector<8x1xf32> to vector<8x8xf32>
    %15 = arith.subf %11, %14 : vector<8x8xf32>
    %16 = math.exp %15 : vector<8x8xf32>
    %cst_7 = arith.constant dense<0.000000e+00> : vector<8xf32>
    %17 = vector.multi_reduction <add>, %16, %cst_7 [1] : vector<8x8xf32> to vector<8xf32>
    %18 = vector.shape_cast %17 : vector<8xf32> to vector<8x1xf32>
    %19 = tpu.reciprocal %18 {approx = true} : vector<8x1xf32> -> vector<8x1xf32>
    %20 = vector.broadcast %19 : vector<8x1xf32> to vector<8x8xf32>
    %21 = arith.mulf %16, %20 : vector<8x8xf32>
    %22 = arith.truncf %21 : vector<8x8xf32> to vector<8x8xbf16>
    %cst_8 = arith.constant dense<0.000000e+00> : vector<8x64xf32>
    %23 = tpu.matmul %22, %6, %cst_8 {dimension_numbers = #tpu.dot_dimension_numbers<[1], [0], [0], [1], [0, 0, 1, 1], [], []>} : vector<8x8xbf16>, vector<8x64xbf16>, vector<8x64xf32> -> vector<8x64xf32>
    %24 = vector.extract_strided_slice %1 {offsets = [0, 64], sizes = [8, 64], strides = [1, 1]} : vector<8x2304xbf16> to vector<8x64xbf16>
    %25 = vector.extract_strided_slice %1 {offsets = [0, 832], sizes = [8, 64], strides = [1, 1]} : vector<8x2304xbf16> to vector<8x64xbf16>
    %26 = vector.extract_strided_slice %1 {offsets = [0, 1600], sizes = [8, 64], strides = [1, 1]} : vector<8x2304xbf16> to vector<8x64xbf16>
    %cst_9 = arith.constant dense<0.000000e+00> : vector<8x8xf32>
    %27 = tpu.matmul %24, %25, %cst_9 {dimension_numbers = #tpu.dot_dimension_numbers<[1], [1], [0], [0], [0, 0, 1, 0], [], []>} : vector<8x64xbf16>, vector<8x64xbf16>, vector<8x8xf32> -> vector<8x8xf32>
    %cst_10 = arith.constant 1.250000e-01 : f32
    %28 = vector.broadcast %cst_10 : f32 to vector<8x8xf32>
    %29 = arith.mulf %27, %28 : vector<8x8xf32>
    %30 = vector.broadcast %3 : vector<1x8xf32> to vector<8x8xf32>
    %31 = arith.addf %29, %30 : vector<8x8xf32>
    %cst_11 = arith.constant dense<0xFF800000> : vector<8xf32>
    %32 = vector.multi_reduction <maximumf>, %31, %cst_11 [1] : vector<8x8xf32> to vector<8xf32>
    %33 = vector.shape_cast %32 : vector<8xf32> to vector<8x1xf32>
    %34 = vector.broadcast %33 : vector<8x1xf32> to vector<8x8xf32>
    %35 = arith.subf %31, %34 : vector<8x8xf32>
    %36 = math.exp %35 : vector<8x8xf32>
    %cst_12 = arith.constant dense<0.000000e+00> : vector<8xf32>
    %37 = vector.multi_reduction <add>, %36, %cst_12 [1] : vector<8x8xf32> to vector<8xf32>
    %38 = vector.shape_cast %37 : vector<8xf32> to vector<8x1xf32>
    %39 = tpu.reciprocal %38 {approx = true} : vector<8x1xf32> -> vector<8x1xf32>
    %40 = vector.broadcast %39 : vector<8x1xf32> to vector<8x8xf32>
    %41 = arith.mulf %36, %40 : vector<8x8xf32>
    %42 = arith.truncf %41 : vector<8x8xf32> to vector<8x8xbf16>
    %cst_13 = arith.constant dense<0.000000e+00> : vector<8x64xf32>
    %43 = tpu.matmul %42, %26, %cst_13 {dimension_numbers = #tpu.dot_dimension_numbers<[1], [0], [0], [1], [0, 0, 1, 1], [], []>} : vector<8x8xbf16>, vector<8x64xbf16>, vector<8x64xf32> -> vector<8x64xf32>
    %44 = vector.extract_strided_slice %1 {offsets = [0, 128], sizes = [8, 64], strides = [1, 1]} : vector<8x2304xbf16> to vector<8x64xbf16>
    %45 = vector.extract_strided_slice %1 {offsets = [0, 896], sizes = [8, 64], strides = [1, 1]} : vector<8x2304xbf16> to vector<8x64xbf16>
    %46 = vector.extract_strided_slice %1 {offsets = [0, 1664], sizes = [8, 64], strides = [1, 1]} : vector<8x2304xbf16> to vector<8x64xbf16>
    %cst_14 = arith.constant dense<0.000000e+00> : vector<8x8xf32>
    %47 = tpu.matmul %44, %45, %cst_14 {dimension_numbers = #tpu.dot_dimension_numbers<[1], [1], [0], [0], [0, 0, 1, 0], [], []>} : vector<8x64xbf16>, vector<8x64xbf16>, vector<8x8xf32> -> vector<8x8xf32>
    %cst_15 = arith.constant 1.250000e-01 : f32
    %48 = vector.broadcast %cst_15 : f32 to vector<8x8xf32>
    %49 = arith.mulf %47, %48 : vector<8x8xf32>
    %50 = vector.broadcast %3 : vector<1x8xf32> to vector<8x8xf32>
    %51 = arith.addf %49, %50 : vector<8x8xf32>
    %cst_16 = arith.constant dense<0xFF800000> : vector<8xf32>
    %52 = vector.multi_reduction <maximumf>, %51, %cst_16 [1] : vector<8x8xf32> to vector<8xf32>
    %53 = vector.shape_cast %52 : vector<8xf32> to vector<8x1xf32>
    %54 = vector.broadcast %53 : vector<8x1xf32> to vector<8x8xf32>
    %55 = arith.subf %51, %54 : vector<8x8xf32>
    %56 = math.exp %55 : vector<8x8xf32>
    %cst_17 = arith.constant dense<0.000000e+00> : vector<8xf32>
    %57 = vector.multi_reduction <add>, %56, %cst_17 [1] : vector<8x8xf32> to vector<8xf32>
    %58 = vector.shape_cast %57 : vector<8xf32> to vector<8x1xf32>
    %59 = tpu.reciprocal %58 {approx = true} : vector<8x1xf32> -> vector<8x1xf32>
    %60 = vector.broadcast %59 : vector<8x1xf32> to vector<8x8xf32>
    %61 = arith.mulf %56, %60 : vector<8x8xf32>
    %62 = arith.truncf %61 : vector<8x8xf32> to vector<8x8xbf16>
    %cst_18 = arith.constant dense<0.000000e+00> : vector<8x64xf32>
    %63 = tpu.matmul %62, %46, %cst_18 {dimension_numbers = #tpu.dot_dimension_numbers<[1], [0], [0], [1], [0, 0, 1, 1], [], []>} : vector<8x8xbf16>, vector<8x64xbf16>, vector<8x64xf32> -> vector<8x64xf32>
    %64 = vector.extract_strided_slice %1 {offsets = [0, 192], sizes = [8, 64], strides = [1, 1]} : vector<8x2304xbf16> to vector<8x64xbf16>
    %65 = vector.extract_strided_slice %1 {offsets = [0, 960], sizes = [8, 64], strides = [1, 1]} : vector<8x2304xbf16> to vector<8x64xbf16>
    %66 = vector.extract_strided_slice %1 {offsets = [0, 1728], sizes = [8, 64], strides = [1, 1]} : vector<8x2304xbf16> to vector<8x64xbf16>
    %cst_19 = arith.constant dense<0.000000e+00> : vector<8x8xf32>
    %67 = tpu.matmul %64, %65, %cst_19 {dimension_numbers = #tpu.dot_dimension_numbers<[1], [1], [0], [0], [0, 0, 1, 0], [], []>} : vector<8x64xbf16>, vector<8x64xbf16>, vector<8x8xf32> -> vector<8x8xf32>
    %cst_20 = arith.constant 1.250000e-01 : f32
    %68 = vector.broadcast %cst_20 : f32 to vector<8x8xf32>
    %69 = arith.mulf %67, %68 : vector<8x8xf32>
    %70 = vector.broadcast %3 : vector<1x8xf32> to vector<8x8xf32>
    %71 = arith.addf %69, %70 : vector<8x8xf32>
    %cst_21 = arith.constant dense<0xFF800000> : vector<8xf32>
    %72 = vector.multi_reduction <maximumf>, %71, %cst_21 [1] : vector<8x8xf32> to vector<8xf32>
    %73 = vector.shape_cast %72 : vector<8xf32> to vector<8x1xf32>
    %74 = vector.broadcast %73 : vector<8x1xf32> to vector<8x8xf32>
    %75 = arith.subf %71, %74 : vector<8x8xf32>
    %76 = math.exp %75 : vector<8x8xf32>
    %cst_22 = arith.constant dense<0.000000e+00> : vector<8xf32>
    %77 = vector.multi_reduction <add>, %76, %cst_22 [1] : vector<8x8xf32> to vector<8xf32>
    %78 = vector.shape_cast %77 : vector<8xf32> to vector<8x1xf32>
    %79 = tpu.reciprocal %78 {approx = true} : vector<8x1xf32> -> vector<8x1xf32>
    %80 = vector.broadcast %79 : vector<8x1xf32> to vector<8x8xf32>
    %81 = arith.mulf %76, %80 : vector<8x8xf32>
    %82 = arith.truncf %81 : vector<8x8xf32> to vector<8x8xbf16>
    %cst_23 = arith.constant dense<0.000000e+00> : vector<8x64xf32>
    %83 = tpu.matmul %82, %66, %cst_23 {dimension_numbers = #tpu.dot_dimension_numbers<[1], [0], [0], [1], [0, 0, 1, 1], [], []>} : vector<8x8xbf16>, vector<8x64xbf16>, vector<8x64xf32> -> vector<8x64xf32>
    %84 = vector.extract_strided_slice %1 {offsets = [0, 256], sizes = [8, 64], strides = [1, 1]} : vector<8x2304xbf16> to vector<8x64xbf16>
    %85 = vector.extract_strided_slice %1 {offsets = [0, 1024], sizes = [8, 64], strides = [1, 1]} : vector<8x2304xbf16> to vector<8x64xbf16>
    %86 = vector.extract_strided_slice %1 {offsets = [0, 1792], sizes = [8, 64], strides = [1, 1]} : vector<8x2304xbf16> to vector<8x64xbf16>
    %cst_24 = arith.constant dense<0.000000e+00> : vector<8x8xf32>
    %87 = tpu.matmul %84, %85, %cst_24 {dimension_numbers = #tpu.dot_dimension_numbers<[1], [1], [0], [0], [0, 0, 1, 0], [], []>} : vector<8x64xbf16>, vector<8x64xbf16>, vector<8x8xf32> -> vector<8x8xf32>
    %cst_25 = arith.constant 1.250000e-01 : f32
    %88 = vector.broadcast %cst_25 : f32 to vector<8x8xf32>
    %89 = arith.mulf %87, %88 : vector<8x8xf32>
    %90 = vector.broadcast %3 : vector<1x8xf32> to vector<8x8xf32>
    %91 = arith.addf %89, %90 : vector<8x8xf32>
    %cst_26 = arith.constant dense<0xFF800000> : vector<8xf32>
    %92 = vector.multi_reduction <maximumf>, %91, %cst_26 [1] : vector<8x8xf32> to vector<8xf32>
    %93 = vector.shape_cast %92 : vector<8xf32> to vector<8x1xf32>
    %94 = vector.broadcast %93 : vector<8x1xf32> to vector<8x8xf32>
    %95 = arith.subf %91, %94 : vector<8x8xf32>
    %96 = math.exp %95 : vector<8x8xf32>
    %cst_27 = arith.constant dense<0.000000e+00> : vector<8xf32>
    %97 = vector.multi_reduction <add>, %96, %cst_27 [1] : vector<8x8xf32> to vector<8xf32>
    %98 = vector.shape_cast %97 : vector<8xf32> to vector<8x1xf32>
    %99 = tpu.reciprocal %98 {approx = true} : vector<8x1xf32> -> vector<8x1xf32>
    %100 = vector.broadcast %99 : vector<8x1xf32> to vector<8x8xf32>
    %101 = arith.mulf %96, %100 : vector<8x8xf32>
    %102 = arith.truncf %101 : vector<8x8xf32> to vector<8x8xbf16>
    %cst_28 = arith.constant dense<0.000000e+00> : vector<8x64xf32>
    %103 = tpu.matmul %102, %86, %cst_28 {dimension_numbers = #tpu.dot_dimension_numbers<[1], [0], [0], [1], [0, 0, 1, 1], [], []>} : vector<8x8xbf16>, vector<8x64xbf16>, vector<8x64xf32> -> vector<8x64xf32>
    %104 = vector.extract_strided_slice %1 {offsets = [0, 320], sizes = [8, 64], strides = [1, 1]} : vector<8x2304xbf16> to vector<8x64xbf16>
    %105 = vector.extract_strided_slice %1 {offsets = [0, 1088], sizes = [8, 64], strides = [1, 1]} : vector<8x2304xbf16> to vector<8x64xbf16>
    %106 = vector.extract_strided_slice %1 {offsets = [0, 1856], sizes = [8, 64], strides = [1, 1]} : vector<8x2304xbf16> to vector<8x64xbf16>
    %cst_29 = arith.constant dense<0.000000e+00> : vector<8x8xf32>
    %107 = tpu.matmul %104, %105, %cst_29 {dimension_numbers = #tpu.dot_dimension_numbers<[1], [1], [0], [0], [0, 0, 1, 0], [], []>} : vector<8x64xbf16>, vector<8x64xbf16>, vector<8x8xf32> -> vector<8x8xf32>
    %cst_30 = arith.constant 1.250000e-01 : f32
    %108 = vector.broadcast %cst_30 : f32 to vector<8x8xf32>
    %109 = arith.mulf %107, %108 : vector<8x8xf32>
    %110 = vector.broadcast %3 : vector<1x8xf32> to vector<8x8xf32>
    %111 = arith.addf %109, %110 : vector<8x8xf32>
    %cst_31 = arith.constant dense<0xFF800000> : vector<8xf32>
    %112 = vector.multi_reduction <maximumf>, %111, %cst_31 [1] : vector<8x8xf32> to vector<8xf32>
    %113 = vector.shape_cast %112 : vector<8xf32> to vector<8x1xf32>
    %114 = vector.broadcast %113 : vector<8x1xf32> to vector<8x8xf32>
    %115 = arith.subf %111, %114 : vector<8x8xf32>
    %116 = math.exp %115 : vector<8x8xf32>
    %cst_32 = arith.constant dense<0.000000e+00> : vector<8xf32>
    %117 = vector.multi_reduction <add>, %116, %cst_32 [1] : vector<8x8xf32> to vector<8xf32>
    %118 = vector.shape_cast %117 : vector<8xf32> to vector<8x1xf32>
    %119 = tpu.reciprocal %118 {approx = true} : vector<8x1xf32> -> vector<8x1xf32>
    %120 = vector.broadcast %119 : vector<8x1xf32> to vector<8x8xf32>
    %121 = arith.mulf %116, %120 : vector<8x8xf32>
    %122 = arith.truncf %121 : vector<8x8xf32> to vector<8x8xbf16>
    %cst_33 = arith.constant dense<0.000000e+00> : vector<8x64xf32>
    %123 = tpu.matmul %122, %106, %cst_33 {dimension_numbers = #tpu.dot_dimension_numbers<[1], [0], [0], [1], [0, 0, 1, 1], [], []>} : vector<8x8xbf16>, vector<8x64xbf16>, vector<8x64xf32> -> vector<8x64xf32>
    %124 = vector.extract_strided_slice %1 {offsets = [0, 384], sizes = [8, 64], strides = [1, 1]} : vector<8x2304xbf16> to vector<8x64xbf16>
    %125 = vector.extract_strided_slice %1 {offsets = [0, 1152], sizes = [8, 64], strides = [1, 1]} : vector<8x2304xbf16> to vector<8x64xbf16>
    %126 = vector.extract_strided_slice %1 {offsets = [0, 1920], sizes = [8, 64], strides = [1, 1]} : vector<8x2304xbf16> to vector<8x64xbf16>
    %cst_34 = arith.constant dense<0.000000e+00> : vector<8x8xf32>
    %127 = tpu.matmul %124, %125, %cst_34 {dimension_numbers = #tpu.dot_dimension_numbers<[1], [1], [0], [0], [0, 0, 1, 0], [], []>} : vector<8x64xbf16>, vector<8x64xbf16>, vector<8x8xf32> -> vector<8x8xf32>
    %cst_35 = arith.constant 1.250000e-01 : f32
    %128 = vector.broadcast %cst_35 : f32 to vector<8x8xf32>
    %129 = arith.mulf %127, %128 : vector<8x8xf32>
    %130 = vector.broadcast %3 : vector<1x8xf32> to vector<8x8xf32>
    %131 = arith.addf %129, %130 : vector<8x8xf32>
    %cst_36 = arith.constant dense<0xFF800000> : vector<8xf32>
    %132 = vector.multi_reduction <maximumf>, %131, %cst_36 [1] : vector<8x8xf32> to vector<8xf32>
    %133 = vector.shape_cast %132 : vector<8xf32> to vector<8x1xf32>
    %134 = vector.broadcast %133 : vector<8x1xf32> to vector<8x8xf32>
    %135 = arith.subf %131, %134 : vector<8x8xf32>
    %136 = math.exp %135 : vector<8x8xf32>
    %cst_37 = arith.constant dense<0.000000e+00> : vector<8xf32>
    %137 = vector.multi_reduction <add>, %136, %cst_37 [1] : vector<8x8xf32> to vector<8xf32>
    %138 = vector.shape_cast %137 : vector<8xf32> to vector<8x1xf32>
    %139 = tpu.reciprocal %138 {approx = true} : vector<8x1xf32> -> vector<8x1xf32>
    %140 = vector.broadcast %139 : vector<8x1xf32> to vector<8x8xf32>
    %141 = arith.mulf %136, %140 : vector<8x8xf32>
    %142 = arith.truncf %141 : vector<8x8xf32> to vector<8x8xbf16>
    %cst_38 = arith.constant dense<0.000000e+00> : vector<8x64xf32>
    %143 = tpu.matmul %142, %126, %cst_38 {dimension_numbers = #tpu.dot_dimension_numbers<[1], [0], [0], [1], [0, 0, 1, 1], [], []>} : vector<8x8xbf16>, vector<8x64xbf16>, vector<8x64xf32> -> vector<8x64xf32>
    %144 = vector.extract_strided_slice %1 {offsets = [0, 448], sizes = [8, 64], strides = [1, 1]} : vector<8x2304xbf16> to vector<8x64xbf16>
    %145 = vector.extract_strided_slice %1 {offsets = [0, 1216], sizes = [8, 64], strides = [1, 1]} : vector<8x2304xbf16> to vector<8x64xbf16>
    %146 = vector.extract_strided_slice %1 {offsets = [0, 1984], sizes = [8, 64], strides = [1, 1]} : vector<8x2304xbf16> to vector<8x64xbf16>
    %cst_39 = arith.constant dense<0.000000e+00> : vector<8x8xf32>
    %147 = tpu.matmul %144, %145, %cst_39 {dimension_numbers = #tpu.dot_dimension_numbers<[1], [1], [0], [0], [0, 0, 1, 0], [], []>} : vector<8x64xbf16>, vector<8x64xbf16>, vector<8x8xf32> -> vector<8x8xf32>
    %cst_40 = arith.constant 1.250000e-01 : f32
    %148 = vector.broadcast %cst_40 : f32 to vector<8x8xf32>
    %149 = arith.mulf %147, %148 : vector<8x8xf32>
    %150 = vector.broadcast %3 : vector<1x8xf32> to vector<8x8xf32>
    %151 = arith.addf %149, %150 : vector<8x8xf32>
    %cst_41 = arith.constant dense<0xFF800000> : vector<8xf32>
    %152 = vector.multi_reduction <maximumf>, %151, %cst_41 [1] : vector<8x8xf32> to vector<8xf32>
    %153 = vector.shape_cast %152 : vector<8xf32> to vector<8x1xf32>
    %154 = vector.broadcast %153 : vector<8x1xf32> to vector<8x8xf32>
    %155 = arith.subf %151, %154 : vector<8x8xf32>
    %156 = math.exp %155 : vector<8x8xf32>
    %cst_42 = arith.constant dense<0.000000e+00> : vector<8xf32>
    %157 = vector.multi_reduction <add>, %156, %cst_42 [1] : vector<8x8xf32> to vector<8xf32>
    %158 = vector.shape_cast %157 : vector<8xf32> to vector<8x1xf32>
    %159 = tpu.reciprocal %158 {approx = true} : vector<8x1xf32> -> vector<8x1xf32>
    %160 = vector.broadcast %159 : vector<8x1xf32> to vector<8x8xf32>
    %161 = arith.mulf %156, %160 : vector<8x8xf32>
    %162 = arith.truncf %161 : vector<8x8xf32> to vector<8x8xbf16>
    %cst_43 = arith.constant dense<0.000000e+00> : vector<8x64xf32>
    %163 = tpu.matmul %162, %146, %cst_43 {dimension_numbers = #tpu.dot_dimension_numbers<[1], [0], [0], [1], [0, 0, 1, 1], [], []>} : vector<8x8xbf16>, vector<8x64xbf16>, vector<8x64xf32> -> vector<8x64xf32>
    %164 = vector.extract_strided_slice %1 {offsets = [0, 512], sizes = [8, 64], strides = [1, 1]} : vector<8x2304xbf16> to vector<8x64xbf16>
    %165 = vector.extract_strided_slice %1 {offsets = [0, 1280], sizes = [8, 64], strides = [1, 1]} : vector<8x2304xbf16> to vector<8x64xbf16>
    %166 = vector.extract_strided_slice %1 {offsets = [0, 2048], sizes = [8, 64], strides = [1, 1]} : vector<8x2304xbf16> to vector<8x64xbf16>
    %cst_44 = arith.constant dense<0.000000e+00> : vector<8x8xf32>
    %167 = tpu.matmul %164, %165, %cst_44 {dimension_numbers = #tpu.dot_dimension_numbers<[1], [1], [0], [0], [0, 0, 1, 0], [], []>} : vector<8x64xbf16>, vector<8x64xbf16>, vector<8x8xf32> -> vector<8x8xf32>
    %cst_45 = arith.constant 1.250000e-01 : f32
    %168 = vector.broadcast %cst_45 : f32 to vector<8x8xf32>
    %169 = arith.mulf %167, %168 : vector<8x8xf32>
    %170 = vector.broadcast %3 : vector<1x8xf32> to vector<8x8xf32>
    %171 = arith.addf %169, %170 : vector<8x8xf32>
    %cst_46 = arith.constant dense<0xFF800000> : vector<8xf32>
    %172 = vector.multi_reduction <maximumf>, %171, %cst_46 [1] : vector<8x8xf32> to vector<8xf32>
    %173 = vector.shape_cast %172 : vector<8xf32> to vector<8x1xf32>
    %174 = vector.broadcast %173 : vector<8x1xf32> to vector<8x8xf32>
    %175 = arith.subf %171, %174 : vector<8x8xf32>
    %176 = math.exp %175 : vector<8x8xf32>
    %cst_47 = arith.constant dense<0.000000e+00> : vector<8xf32>
    %177 = vector.multi_reduction <add>, %176, %cst_47 [1] : vector<8x8xf32> to vector<8xf32>
    %178 = vector.shape_cast %177 : vector<8xf32> to vector<8x1xf32>
    %179 = tpu.reciprocal %178 {approx = true} : vector<8x1xf32> -> vector<8x1xf32>
    %180 = vector.broadcast %179 : vector<8x1xf32> to vector<8x8xf32>
    %181 = arith.mulf %176, %180 : vector<8x8xf32>
    %182 = arith.truncf %181 : vector<8x8xf32> to vector<8x8xbf16>
    %cst_48 = arith.constant dense<0.000000e+00> : vector<8x64xf32>
    %183 = tpu.matmul %182, %166, %cst_48 {dimension_numbers = #tpu.dot_dimension_numbers<[1], [0], [0], [1], [0, 0, 1, 1], [], []>} : vector<8x8xbf16>, vector<8x64xbf16>, vector<8x64xf32> -> vector<8x64xf32>
    %184 = vector.extract_strided_slice %1 {offsets = [0, 576], sizes = [8, 64], strides = [1, 1]} : vector<8x2304xbf16> to vector<8x64xbf16>
    %185 = vector.extract_strided_slice %1 {offsets = [0, 1344], sizes = [8, 64], strides = [1, 1]} : vector<8x2304xbf16> to vector<8x64xbf16>
    %186 = vector.extract_strided_slice %1 {offsets = [0, 2112], sizes = [8, 64], strides = [1, 1]} : vector<8x2304xbf16> to vector<8x64xbf16>
    %cst_49 = arith.constant dense<0.000000e+00> : vector<8x8xf32>
    %187 = tpu.matmul %184, %185, %cst_49 {dimension_numbers = #tpu.dot_dimension_numbers<[1], [1], [0], [0], [0, 0, 1, 0], [], []>} : vector<8x64xbf16>, vector<8x64xbf16>, vector<8x8xf32> -> vector<8x8xf32>
    %cst_50 = arith.constant 1.250000e-01 : f32
    %188 = vector.broadcast %cst_50 : f32 to vector<8x8xf32>
    %189 = arith.mulf %187, %188 : vector<8x8xf32>
    %190 = vector.broadcast %3 : vector<1x8xf32> to vector<8x8xf32>
    %191 = arith.addf %189, %190 : vector<8x8xf32>
    %cst_51 = arith.constant dense<0xFF800000> : vector<8xf32>
    %192 = vector.multi_reduction <maximumf>, %191, %cst_51 [1] : vector<8x8xf32> to vector<8xf32>
    %193 = vector.shape_cast %192 : vector<8xf32> to vector<8x1xf32>
    %194 = vector.broadcast %193 : vector<8x1xf32> to vector<8x8xf32>
    %195 = arith.subf %191, %194 : vector<8x8xf32>
    %196 = math.exp %195 : vector<8x8xf32>
    %cst_52 = arith.constant dense<0.000000e+00> : vector<8xf32>
    %197 = vector.multi_reduction <add>, %196, %cst_52 [1] : vector<8x8xf32> to vector<8xf32>
    %198 = vector.shape_cast %197 : vector<8xf32> to vector<8x1xf32>
    %199 = tpu.reciprocal %198 {approx = true} : vector<8x1xf32> -> vector<8x1xf32>
    %200 = vector.broadcast %199 : vector<8x1xf32> to vector<8x8xf32>
    %201 = arith.mulf %196, %200 : vector<8x8xf32>
    %202 = arith.truncf %201 : vector<8x8xf32> to vector<8x8xbf16>
    %cst_53 = arith.constant dense<0.000000e+00> : vector<8x64xf32>
    %203 = tpu.matmul %202, %186, %cst_53 {dimension_numbers = #tpu.dot_dimension_numbers<[1], [0], [0], [1], [0, 0, 1, 1], [], []>} : vector<8x8xbf16>, vector<8x64xbf16>, vector<8x64xf32> -> vector<8x64xf32>
    %204 = vector.extract_strided_slice %1 {offsets = [0, 640], sizes = [8, 64], strides = [1, 1]} : vector<8x2304xbf16> to vector<8x64xbf16>
    %205 = vector.extract_strided_slice %1 {offsets = [0, 1408], sizes = [8, 64], strides = [1, 1]} : vector<8x2304xbf16> to vector<8x64xbf16>
    %206 = vector.extract_strided_slice %1 {offsets = [0, 2176], sizes = [8, 64], strides = [1, 1]} : vector<8x2304xbf16> to vector<8x64xbf16>
    %cst_54 = arith.constant dense<0.000000e+00> : vector<8x8xf32>
    %207 = tpu.matmul %204, %205, %cst_54 {dimension_numbers = #tpu.dot_dimension_numbers<[1], [1], [0], [0], [0, 0, 1, 0], [], []>} : vector<8x64xbf16>, vector<8x64xbf16>, vector<8x8xf32> -> vector<8x8xf32>
    %cst_55 = arith.constant 1.250000e-01 : f32
    %208 = vector.broadcast %cst_55 : f32 to vector<8x8xf32>
    %209 = arith.mulf %207, %208 : vector<8x8xf32>
    %210 = vector.broadcast %3 : vector<1x8xf32> to vector<8x8xf32>
    %211 = arith.addf %209, %210 : vector<8x8xf32>
    %cst_56 = arith.constant dense<0xFF800000> : vector<8xf32>
    %212 = vector.multi_reduction <maximumf>, %211, %cst_56 [1] : vector<8x8xf32> to vector<8xf32>
    %213 = vector.shape_cast %212 : vector<8xf32> to vector<8x1xf32>
    %214 = vector.broadcast %213 : vector<8x1xf32> to vector<8x8xf32>
    %215 = arith.subf %211, %214 : vector<8x8xf32>
    %216 = math.exp %215 : vector<8x8xf32>
    %cst_57 = arith.constant dense<0.000000e+00> : vector<8xf32>
    %217 = vector.multi_reduction <add>, %216, %cst_57 [1] : vector<8x8xf32> to vector<8xf32>
    %218 = vector.shape_cast %217 : vector<8xf32> to vector<8x1xf32>
    %219 = tpu.reciprocal %218 {approx = true} : vector<8x1xf32> -> vector<8x1xf32>
    %220 = vector.broadcast %219 : vector<8x1xf32> to vector<8x8xf32>
    %221 = arith.mulf %216, %220 : vector<8x8xf32>
    %222 = arith.truncf %221 : vector<8x8xf32> to vector<8x8xbf16>
    %cst_58 = arith.constant dense<0.000000e+00> : vector<8x64xf32>
    %223 = tpu.matmul %222, %206, %cst_58 {dimension_numbers = #tpu.dot_dimension_numbers<[1], [0], [0], [1], [0, 0, 1, 1], [], []>} : vector<8x8xbf16>, vector<8x64xbf16>, vector<8x64xf32> -> vector<8x64xf32>
    %224 = vector.extract_strided_slice %1 {offsets = [0, 704], sizes = [8, 64], strides = [1, 1]} : vector<8x2304xbf16> to vector<8x64xbf16>
    %225 = vector.extract_strided_slice %1 {offsets = [0, 1472], sizes = [8, 64], strides = [1, 1]} : vector<8x2304xbf16> to vector<8x64xbf16>
    %226 = vector.extract_strided_slice %1 {offsets = [0, 2240], sizes = [8, 64], strides = [1, 1]} : vector<8x2304xbf16> to vector<8x64xbf16>
    %cst_59 = arith.constant dense<0.000000e+00> : vector<8x8xf32>
    %227 = tpu.matmul %224, %225, %cst_59 {dimension_numbers = #tpu.dot_dimension_numbers<[1], [1], [0], [0], [0, 0, 1, 0], [], []>} : vector<8x64xbf16>, vector<8x64xbf16>, vector<8x8xf32> -> vector<8x8xf32>
    %cst_60 = arith.constant 1.250000e-01 : f32
    %228 = vector.broadcast %cst_60 : f32 to vector<8x8xf32>
    %229 = arith.mulf %227, %228 : vector<8x8xf32>
    %230 = vector.broadcast %3 : vector<1x8xf32> to vector<8x8xf32>
    %231 = arith.addf %229, %230 : vector<8x8xf32>
    %cst_61 = arith.constant dense<0xFF800000> : vector<8xf32>
    %232 = vector.multi_reduction <maximumf>, %231, %cst_61 [1] : vector<8x8xf32> to vector<8xf32>
    %233 = vector.shape_cast %232 : vector<8xf32> to vector<8x1xf32>
    %234 = vector.broadcast %233 : vector<8x1xf32> to vector<8x8xf32>
    %235 = arith.subf %231, %234 : vector<8x8xf32>
    %236 = math.exp %235 : vector<8x8xf32>
    %cst_62 = arith.constant dense<0.000000e+00> : vector<8xf32>
    %237 = vector.multi_reduction <add>, %236, %cst_62 [1] : vector<8x8xf32> to vector<8xf32>
    %238 = vector.shape_cast %237 : vector<8xf32> to vector<8x1xf32>
    %239 = tpu.reciprocal %238 {approx = true} : vector<8x1xf32> -> vector<8x1xf32>
    %240 = vector.broadcast %239 : vector<8x1xf32> to vector<8x8xf32>
    %241 = arith.mulf %236, %240 : vector<8x8xf32>
    %242 = arith.truncf %241 : vector<8x8xf32> to vector<8x8xbf16>
    %cst_63 = arith.constant dense<0.000000e+00> : vector<8x64xf32>
    %243 = tpu.matmul %242, %226, %cst_63 {dimension_numbers = #tpu.dot_dimension_numbers<[1], [0], [0], [1], [0, 0, 1, 1], [], []>} : vector<8x8xbf16>, vector<8x64xbf16>, vector<8x64xf32> -> vector<8x64xf32>
    %244 = tpu.concatenate %23, %43, %63, %83, %103, %123, %143, %163, %183, %203, %223, %243 in 1 : vector<8x64xf32>, vector<8x64xf32>, vector<8x64xf32>, vector<8x64xf32>, vector<8x64xf32>, vector<8x64xf32>, vector<8x64xf32>, vector<8x64xf32>, vector<8x64xf32>, vector<8x64xf32>, vector<8x64xf32>, vector<8x64xf32> -> vector<8x768xf32>
    %245 = arith.truncf %244 : vector<8x768xf32> to vector<8x768xbf16>
    %c0_64 = arith.constant 0 : index
    %c0_65 = arith.constant 0 : index
    %c0_66 = arith.constant 0 : index
    %246 = vector.load %arg3[%c0_64, %c0_65, %c0_66] : memref<1x8x768xbf16, #tpu.memory_space<vmem>>, vector<1x8x768xbf16>
    %247 = vector.shape_cast %246 : vector<1x8x768xbf16> to vector<8x768xbf16>
    %248 = vector.shape_cast %245 : vector<8x768xbf16> to vector<1x8x768xbf16>
    tpu.vector_store %arg3[%c0_64, %c0_65, %c0_66], %248 {strides = array<i32>} : memref<1x8x768xbf16, #tpu.memory_space<vmem>>, vector<1x8x768xbf16>,
    return
  }
  func.func @transform_0(%arg0: i32) -> (i32, i32, i32) {
    %c0_i32 = arith.constant 0 : i32
    %c0_i32_0 = arith.constant 0 : i32
    %c0_i32_1 = arith.constant 0 : i32
    return %arg0, %c0_i32, %c0_i32_0 : i32, i32, i32
  }
  func.func @transform_1(%arg0: i32) -> (i32, i32, i32) {
    %c0_i32 = arith.constant 0 : i32
    %c0_i32_0 = arith.constant 0 : i32
    %c0_i32_1 = arith.constant 0 : i32
    return %arg0, %c0_i32, %c0_i32_0 : i32, i32, i32
  }
  func.func @transform_2(%arg0: i32) -> (i32, i32, i32) {
    %c0_i32 = arith.constant 0 : i32
    %c0_i32_0 = arith.constant 0 : i32
    %c0_i32_1 = arith.constant 0 : i32
    return %arg0, %c0_i32, %c0_i32_0 : i32, i32, i32
  }
}

module attributes {stable_mosaic.version = 11 : i64} {
  func.func @_matmul_bias_kernel(%arg0: i32, %arg1: i32, %arg2: i32, %arg3: memref<16x256xbf16, #tpu.memory_space<vmem>>, %arg4: memref<256x256xbf16, #tpu.memory_space<vmem>>, %arg5: memref<1x256xf32, #tpu.memory_space<vmem>>, %arg6: memref<16x256xbf16, #tpu.memory_space<vmem>>, %arg7: memref<16x256xf32, #tpu.memory_space<vmem>>) attributes {dimension_semantics = [#tpu.dimension_semantics<parallel>, #tpu.dimension_semantics<parallel>, #tpu.dimension_semantics<arbitrary>], iteration_bounds = array<i64: 1, 3, 3>, scalar_prefetch = 0 : i64, scratch_operands = 1 : i64, tpu.core_type = #tpu.core_type<tc>, window_params = [{transform_indices = @transform_0, window_bounds = array<i64: 16, 256>}, {transform_indices = @transform_1, window_bounds = array<i64: 256, 256>}, {transform_indices = @transform_2, window_bounds = array<i64: 1, 256>}, {transform_indices = @transform_3, window_bounds = array<i64: 16, 256>}]} {
    %c0_i32 = arith.constant 0 : i32
    %0 = arith.cmpi eq, %arg2, %c0_i32 : i32
    %1 = arith.extui %0 : i1 to i32
    %c0_i32_0 = arith.constant 0 : i32
    %2 = arith.cmpi ne, %1, %c0_i32_0 : i32
    scf.if %2 {
      %cst_9 = arith.constant 0.000000e+00 : f32
      %12 = vector.broadcast %cst_9 : f32 to vector<16x256xf32>
      %c0_10 = arith.constant 0 : index
      %c0_11 = arith.constant 0 : index
      %13 = vector.load %arg7[%c0_10, %c0_11] : memref<16x256xf32, #tpu.memory_space<vmem>>, vector<16x256xf32>
      tpu.vector_store %arg7[%c0_10, %c0_11], %12 {strides = array<i32>} : memref<16x256xf32, #tpu.memory_space<vmem>>, vector<16x256xf32>,
    } else {
    }
    %c0 = arith.constant 0 : index
    %c0_1 = arith.constant 0 : index
    %3 = vector.load %arg7[%c0, %c0_1] : memref<16x256xf32, #tpu.memory_space<vmem>>, vector<16x256xf32>
    %c0_2 = arith.constant 0 : index
    %c0_3 = arith.constant 0 : index
    %4 = vector.load %arg3[%c0_2, %c0_3] : memref<16x256xbf16, #tpu.memory_space<vmem>>, vector<16x256xbf16>
    %c0_4 = arith.constant 0 : index
    %c0_5 = arith.constant 0 : index
    %5 = vector.load %arg4[%c0_4, %c0_5] : memref<256x256xbf16, #tpu.memory_space<vmem>>, vector<256x256xbf16>
    %cst = arith.constant dense<0.000000e+00> : vector<16x256xf32>
    %6 = tpu.matmul %4, %5, %cst {dimension_numbers = #tpu.dot_dimension_numbers<[1], [0], [0], [1], [0, 0, 1, 1], [], []>} : vector<16x256xbf16>, vector<256x256xbf16>, vector<16x256xf32> -> vector<16x256xf32>
    %7 = arith.addf %3, %6 : vector<16x256xf32>
    %c0_6 = arith.constant 0 : index
    %c0_7 = arith.constant 0 : index
    %8 = vector.load %arg7[%c0_6, %c0_7] : memref<16x256xf32, #tpu.memory_space<vmem>>, vector<16x256xf32>
    tpu.vector_store %arg7[%c0_6, %c0_7], %7 {strides = array<i32>} : memref<16x256xf32, #tpu.memory_space<vmem>>, vector<16x256xf32>,
    %c2_i32 = arith.constant 2 : i32
    %9 = arith.cmpi eq, %arg2, %c2_i32 : i32
    %10 = arith.extui %9 : i1 to i32
    %c0_i32_8 = arith.constant 0 : i32
    %11 = arith.cmpi ne, %10, %c0_i32_8 : i32
    scf.if %11 {
      %c0_9 = arith.constant 0 : index
      %c0_10 = arith.constant 0 : index
      %12 = vector.load %arg7[%c0_9, %c0_10] : memref<16x256xf32, #tpu.memory_space<vmem>>, vector<16x256xf32>
      %c0_11 = arith.constant 0 : index
      %c0_12 = arith.constant 0 : index
      %13 = vector.load %arg5[%c0_11, %c0_12] : memref<1x256xf32, #tpu.memory_space<vmem>>, vector<1x256xf32>
      %14 = vector.broadcast %13 : vector<1x256xf32> to vector<16x256xf32>
      %15 = arith.addf %12, %14 : vector<16x256xf32>
      %16 = arith.truncf %15 : vector<16x256xf32> to vector<16x256xbf16>
      %c0_13 = arith.constant 0 : index
      %c0_14 = arith.constant 0 : index
      %17 = vector.load %arg6[%c0_13, %c0_14] : memref<16x256xbf16, #tpu.memory_space<vmem>>, vector<16x256xbf16>
      tpu.vector_store %arg6[%c0_13, %c0_14], %16 {strides = array<i32>} : memref<16x256xbf16, #tpu.memory_space<vmem>>, vector<16x256xbf16>,
    } else {
    }
    return
  }
  func.func @transform_0(%arg0: i32, %arg1: i32, %arg2: i32) -> (i32, i32) {
    %c0_i32 = arith.constant 0 : i32
    return %arg0, %arg2 : i32, i32
  }
  func.func @transform_1(%arg0: i32, %arg1: i32, %arg2: i32) -> (i32, i32) {
    %c0_i32 = arith.constant 0 : i32
    return %arg2, %arg1 : i32, i32
  }
  func.func @transform_2(%arg0: i32, %arg1: i32, %arg2: i32) -> (i32, i32) {
    %c0_i32 = arith.constant 0 : i32
    %c0_i32_0 = arith.constant 0 : i32
    return %c0_i32, %arg1 : i32, i32
  }
  func.func @transform_3(%arg0: i32, %arg1: i32, %arg2: i32) -> (i32, i32) {
    %c0_i32 = arith.constant 0 : i32
    return %arg0, %arg1 : i32, i32
  }
}

module attributes {stable_mosaic.version = 11 : i64} {
  func.func @_ln_res_kernel(%arg0: i32, %arg1: memref<16x768xbf16, #tpu.memory_space<vmem>>, %arg2: memref<16x768xbf16, #tpu.memory_space<vmem>>, %arg3: memref<1x768xf32, #tpu.memory_space<vmem>>, %arg4: memref<1x768xf32, #tpu.memory_space<vmem>>, %arg5: memref<16x768xbf16, #tpu.memory_space<vmem>>) attributes {dimension_semantics = [#tpu.dimension_semantics<parallel>], iteration_bounds = array<i64: 1>, scalar_prefetch = 0 : i64, scratch_operands = 0 : i64, tpu.core_type = #tpu.core_type<tc>, window_params = [{transform_indices = @transform_0, window_bounds = array<i64: 16, 768>}, {transform_indices = @transform_1, window_bounds = array<i64: 16, 768>}, {pipeline_mode = #tpu.pipeline_mode<synchronous>, transform_indices = @transform_2, window_bounds = array<i64: 1, 768>}, {pipeline_mode = #tpu.pipeline_mode<synchronous>, transform_indices = @transform_3, window_bounds = array<i64: 1, 768>}, {transform_indices = @transform_4, window_bounds = array<i64: 16, 768>}]} {
    %c0 = arith.constant 0 : index
    %c0_0 = arith.constant 0 : index
    %0 = vector.load %arg1[%c0, %c0_0] : memref<16x768xbf16, #tpu.memory_space<vmem>>, vector<16x768xbf16>
    %1 = arith.extf %0 : vector<16x768xbf16> to vector<16x768xf32>
    %c0_1 = arith.constant 0 : index
    %c0_2 = arith.constant 0 : index
    %2 = vector.load %arg2[%c0_1, %c0_2] : memref<16x768xbf16, #tpu.memory_space<vmem>>, vector<16x768xbf16>
    %3 = arith.extf %2 : vector<16x768xbf16> to vector<16x768xf32>
    %4 = arith.addf %1, %3 : vector<16x768xf32>
    %c0_3 = arith.constant 0 : index
    %c0_4 = arith.constant 0 : index
    %5 = vector.load %arg3[%c0_3, %c0_4] : memref<1x768xf32, #tpu.memory_space<vmem>>, vector<1x768xf32>
    %c0_5 = arith.constant 0 : index
    %c0_6 = arith.constant 0 : index
    %6 = vector.load %arg4[%c0_5, %c0_6] : memref<1x768xf32, #tpu.memory_space<vmem>>, vector<1x768xf32>
    %cst = arith.constant dense<0.000000e+00> : vector<16xf32>
    %7 = vector.multi_reduction <add>, %4, %cst [1] : vector<16x768xf32> to vector<16xf32>
    %8 = vector.shape_cast %7 : vector<16xf32> to vector<16x1xf32>
    %cst_7 = arith.constant 7.680000e+02 : f32
    %9 = vector.broadcast %cst_7 : f32 to vector<16x1xf32>
    %10 = arith.divf %8, %9 : vector<16x1xf32>
    %11 = vector.broadcast %10 : vector<16x1xf32> to vector<16x768xf32>
    %12 = arith.subf %4, %11 : vector<16x768xf32>
    %13 = arith.mulf %12, %12 : vector<16x768xf32>
    %cst_8 = arith.constant dense<0.000000e+00> : vector<16xf32>
    %14 = vector.multi_reduction <add>, %13, %cst_8 [1] : vector<16x768xf32> to vector<16xf32>
    %15 = vector.shape_cast %14 : vector<16xf32> to vector<16x1xf32>
    %cst_9 = arith.constant 7.680000e+02 : f32
    %16 = vector.broadcast %cst_9 : f32 to vector<16x1xf32>
    %17 = arith.divf %15, %16 : vector<16x1xf32>
    %18 = vector.broadcast %10 : vector<16x1xf32> to vector<16x768xf32>
    %19 = arith.subf %4, %18 : vector<16x768xf32>
    %cst_10 = arith.constant 1.000000e-07 : f32
    %20 = vector.broadcast %cst_10 : f32 to vector<16x1xf32>
    %21 = arith.addf %17, %20 : vector<16x1xf32>
    %22 = math.rsqrt %21 : vector<16x1xf32>
    %23 = vector.broadcast %22 : vector<16x1xf32> to vector<16x768xf32>
    %24 = arith.mulf %19, %23 : vector<16x768xf32>
    %25 = vector.broadcast %5 : vector<1x768xf32> to vector<16x768xf32>
    %26 = arith.mulf %24, %25 : vector<16x768xf32>
    %27 = vector.broadcast %6 : vector<1x768xf32> to vector<16x768xf32>
    %28 = arith.addf %26, %27 : vector<16x768xf32>
    %29 = arith.truncf %28 : vector<16x768xf32> to vector<16x768xbf16>
    %c0_11 = arith.constant 0 : index
    %c0_12 = arith.constant 0 : index
    %30 = vector.load %arg5[%c0_11, %c0_12] : memref<16x768xbf16, #tpu.memory_space<vmem>>, vector<16x768xbf16>
    tpu.vector_store %arg5[%c0_11, %c0_12], %29 {strides = array<i32>} : memref<16x768xbf16, #tpu.memory_space<vmem>>, vector<16x768xbf16>,
    return
  }
  func.func @transform_0(%arg0: i32) -> (i32, i32) {
    %c0_i32 = arith.constant 0 : i32
    %c0_i32_0 = arith.constant 0 : i32
    return %arg0, %c0_i32 : i32, i32
  }
  func.func @transform_1(%arg0: i32) -> (i32, i32) {
    %c0_i32 = arith.constant 0 : i32
    %c0_i32_0 = arith.constant 0 : i32
    return %arg0, %c0_i32 : i32, i32
  }
  func.func @transform_2(%arg0: i32) -> (i32, i32) {
    %c0_i32 = arith.constant 0 : i32
    %c0_i32_0 = arith.constant 0 : i32
    %c0_i32_1 = arith.constant 0 : i32
    return %c0_i32, %c0_i32_0 : i32, i32
  }
  func.func @transform_3(%arg0: i32) -> (i32, i32) {
    %c0_i32 = arith.constant 0 : i32
    %c0_i32_0 = arith.constant 0 : i32
    %c0_i32_1 = arith.constant 0 : i32
    return %c0_i32, %c0_i32_0 : i32, i32
  }
  func.func @transform_4(%arg0: i32) -> (i32, i32) {
    %c0_i32 = arith.constant 0 : i32
    %c0_i32_0 = arith.constant 0 : i32
    return %arg0, %c0_i32 : i32, i32
  }
}

module attributes {stable_mosaic.version = 11 : i64} {
  func.func @_matmul_bias_kernel(%arg0: i32, %arg1: i32, %arg2: i32, %arg3: memref<16x256xbf16, #tpu.memory_space<vmem>>, %arg4: memref<256x256xbf16, #tpu.memory_space<vmem>>, %arg5: memref<1x256xf32, #tpu.memory_space<vmem>>, %arg6: memref<16x256xbf16, #tpu.memory_space<vmem>>, %arg7: memref<16x256xf32, #tpu.memory_space<vmem>>) attributes {dimension_semantics = [#tpu.dimension_semantics<parallel>, #tpu.dimension_semantics<parallel>, #tpu.dimension_semantics<arbitrary>], iteration_bounds = array<i64: 1, 12, 3>, scalar_prefetch = 0 : i64, scratch_operands = 1 : i64, tpu.core_type = #tpu.core_type<tc>, window_params = [{transform_indices = @transform_0, window_bounds = array<i64: 16, 256>}, {transform_indices = @transform_1, window_bounds = array<i64: 256, 256>}, {transform_indices = @transform_2, window_bounds = array<i64: 1, 256>}, {transform_indices = @transform_3, window_bounds = array<i64: 16, 256>}]} {
    %c0_i32 = arith.constant 0 : i32
    %0 = arith.cmpi eq, %arg2, %c0_i32 : i32
    %1 = arith.extui %0 : i1 to i32
    %c0_i32_0 = arith.constant 0 : i32
    %2 = arith.cmpi ne, %1, %c0_i32_0 : i32
    scf.if %2 {
      %cst_9 = arith.constant 0.000000e+00 : f32
      %12 = vector.broadcast %cst_9 : f32 to vector<16x256xf32>
      %c0_10 = arith.constant 0 : index
      %c0_11 = arith.constant 0 : index
      %13 = vector.load %arg7[%c0_10, %c0_11] : memref<16x256xf32, #tpu.memory_space<vmem>>, vector<16x256xf32>
      tpu.vector_store %arg7[%c0_10, %c0_11], %12 {strides = array<i32>} : memref<16x256xf32, #tpu.memory_space<vmem>>, vector<16x256xf32>,
    } else {
    }
    %c0 = arith.constant 0 : index
    %c0_1 = arith.constant 0 : index
    %3 = vector.load %arg7[%c0, %c0_1] : memref<16x256xf32, #tpu.memory_space<vmem>>, vector<16x256xf32>
    %c0_2 = arith.constant 0 : index
    %c0_3 = arith.constant 0 : index
    %4 = vector.load %arg3[%c0_2, %c0_3] : memref<16x256xbf16, #tpu.memory_space<vmem>>, vector<16x256xbf16>
    %c0_4 = arith.constant 0 : index
    %c0_5 = arith.constant 0 : index
    %5 = vector.load %arg4[%c0_4, %c0_5] : memref<256x256xbf16, #tpu.memory_space<vmem>>, vector<256x256xbf16>
    %cst = arith.constant dense<0.000000e+00> : vector<16x256xf32>
    %6 = tpu.matmul %4, %5, %cst {dimension_numbers = #tpu.dot_dimension_numbers<[1], [0], [0], [1], [0, 0, 1, 1], [], []>} : vector<16x256xbf16>, vector<256x256xbf16>, vector<16x256xf32> -> vector<16x256xf32>
    %7 = arith.addf %3, %6 : vector<16x256xf32>
    %c0_6 = arith.constant 0 : index
    %c0_7 = arith.constant 0 : index
    %8 = vector.load %arg7[%c0_6, %c0_7] : memref<16x256xf32, #tpu.memory_space<vmem>>, vector<16x256xf32>
    tpu.vector_store %arg7[%c0_6, %c0_7], %7 {strides = array<i32>} : memref<16x256xf32, #tpu.memory_space<vmem>>, vector<16x256xf32>,
    %c2_i32 = arith.constant 2 : i32
    %9 = arith.cmpi eq, %arg2, %c2_i32 : i32
    %10 = arith.extui %9 : i1 to i32
    %c0_i32_8 = arith.constant 0 : i32
    %11 = arith.cmpi ne, %10, %c0_i32_8 : i32
    scf.if %11 {
      %c0_9 = arith.constant 0 : index
      %c0_10 = arith.constant 0 : index
      %12 = vector.load %arg7[%c0_9, %c0_10] : memref<16x256xf32, #tpu.memory_space<vmem>>, vector<16x256xf32>
      %c0_11 = arith.constant 0 : index
      %c0_12 = arith.constant 0 : index
      %13 = vector.load %arg5[%c0_11, %c0_12] : memref<1x256xf32, #tpu.memory_space<vmem>>, vector<1x256xf32>
      %14 = vector.broadcast %13 : vector<1x256xf32> to vector<16x256xf32>
      %15 = arith.addf %12, %14 : vector<16x256xf32>
      %cst_13 = arith.constant 5.000000e-01 : f32
      %16 = vector.broadcast %cst_13 : f32 to vector<16x256xf32>
      %17 = arith.mulf %16, %15 : vector<16x256xf32>
      %cst_14 = arith.constant 4.471500e-02 : f32
      %18 = vector.broadcast %cst_14 : f32 to vector<16x256xf32>
      %19 = arith.mulf %18, %15 : vector<16x256xf32>
      %20 = arith.mulf %19, %15 : vector<16x256xf32>
      %21 = arith.mulf %20, %15 : vector<16x256xf32>
      %22 = arith.addf %15, %21 : vector<16x256xf32>
      %cst_15 = arith.constant 0.797884583 : f32
      %23 = vector.broadcast %cst_15 : f32 to vector<16x256xf32>
      %24 = arith.mulf %23, %22 : vector<16x256xf32>
      %25 = math.tanh %24 : vector<16x256xf32>
      %cst_16 = arith.constant 1.000000e+00 : f32
      %26 = vector.broadcast %cst_16 : f32 to vector<16x256xf32>
      %27 = arith.addf %26, %25 : vector<16x256xf32>
      %28 = arith.mulf %17, %27 : vector<16x256xf32>
      %29 = arith.truncf %28 : vector<16x256xf32> to vector<16x256xbf16>
      %c0_17 = arith.constant 0 : index
      %c0_18 = arith.constant 0 : index
      %30 = vector.load %arg6[%c0_17, %c0_18] : memref<16x256xbf16, #tpu.memory_space<vmem>>, vector<16x256xbf16>
      tpu.vector_store %arg6[%c0_17, %c0_18], %29 {strides = array<i32>} : memref<16x256xbf16, #tpu.memory_space<vmem>>, vector<16x256xbf16>,
    } else {
    }
    return
  }
  func.func @transform_0(%arg0: i32, %arg1: i32, %arg2: i32) -> (i32, i32) {
    %c0_i32 = arith.constant 0 : i32
    return %arg0, %arg2 : i32, i32
  }
  func.func @transform_1(%arg0: i32, %arg1: i32, %arg2: i32) -> (i32, i32) {
    %c0_i32 = arith.constant 0 : i32
    return %arg2, %arg1 : i32, i32
  }
  func.func @transform_2(%arg0: i32, %arg1: i32, %arg2: i32) -> (i32, i32) {
    %c0_i32 = arith.constant 0 : i32
    %c0_i32_0 = arith.constant 0 : i32
    return %c0_i32, %arg1 : i32, i32
  }
  func.func @transform_3(%arg0: i32, %arg1: i32, %arg2: i32) -> (i32, i32) {
    %c0_i32 = arith.constant 0 : i32
    return %arg0, %arg1 : i32, i32
  }
}

module attributes {stable_mosaic.version = 11 : i64} {
  func.func @_matmul_bias_kernel(%arg0: i32, %arg1: i32, %arg2: i32, %arg3: memref<16x256xbf16, #tpu.memory_space<vmem>>, %arg4: memref<256x256xbf16, #tpu.memory_space<vmem>>, %arg5: memref<1x256xf32, #tpu.memory_space<vmem>>, %arg6: memref<16x256xbf16, #tpu.memory_space<vmem>>, %arg7: memref<16x256xf32, #tpu.memory_space<vmem>>) attributes {dimension_semantics = [#tpu.dimension_semantics<parallel>, #tpu.dimension_semantics<parallel>, #tpu.dimension_semantics<arbitrary>], iteration_bounds = array<i64: 1, 3, 12>, scalar_prefetch = 0 : i64, scratch_operands = 1 : i64, tpu.core_type = #tpu.core_type<tc>, window_params = [{transform_indices = @transform_0, window_bounds = array<i64: 16, 256>}, {transform_indices = @transform_1, window_bounds = array<i64: 256, 256>}, {transform_indices = @transform_2, window_bounds = array<i64: 1, 256>}, {transform_indices = @transform_3, window_bounds = array<i64: 16, 256>}]} {
    %c0_i32 = arith.constant 0 : i32
    %0 = arith.cmpi eq, %arg2, %c0_i32 : i32
    %1 = arith.extui %0 : i1 to i32
    %c0_i32_0 = arith.constant 0 : i32
    %2 = arith.cmpi ne, %1, %c0_i32_0 : i32
    scf.if %2 {
      %cst_9 = arith.constant 0.000000e+00 : f32
      %12 = vector.broadcast %cst_9 : f32 to vector<16x256xf32>
      %c0_10 = arith.constant 0 : index
      %c0_11 = arith.constant 0 : index
      %13 = vector.load %arg7[%c0_10, %c0_11] : memref<16x256xf32, #tpu.memory_space<vmem>>, vector<16x256xf32>
      tpu.vector_store %arg7[%c0_10, %c0_11], %12 {strides = array<i32>} : memref<16x256xf32, #tpu.memory_space<vmem>>, vector<16x256xf32>,
    } else {
    }
    %c0 = arith.constant 0 : index
    %c0_1 = arith.constant 0 : index
    %3 = vector.load %arg7[%c0, %c0_1] : memref<16x256xf32, #tpu.memory_space<vmem>>, vector<16x256xf32>
    %c0_2 = arith.constant 0 : index
    %c0_3 = arith.constant 0 : index
    %4 = vector.load %arg3[%c0_2, %c0_3] : memref<16x256xbf16, #tpu.memory_space<vmem>>, vector<16x256xbf16>
    %c0_4 = arith.constant 0 : index
    %c0_5 = arith.constant 0 : index
    %5 = vector.load %arg4[%c0_4, %c0_5] : memref<256x256xbf16, #tpu.memory_space<vmem>>, vector<256x256xbf16>
    %cst = arith.constant dense<0.000000e+00> : vector<16x256xf32>
    %6 = tpu.matmul %4, %5, %cst {dimension_numbers = #tpu.dot_dimension_numbers<[1], [0], [0], [1], [0, 0, 1, 1], [], []>} : vector<16x256xbf16>, vector<256x256xbf16>, vector<16x256xf32> -> vector<16x256xf32>
    %7 = arith.addf %3, %6 : vector<16x256xf32>
    %c0_6 = arith.constant 0 : index
    %c0_7 = arith.constant 0 : index
    %8 = vector.load %arg7[%c0_6, %c0_7] : memref<16x256xf32, #tpu.memory_space<vmem>>, vector<16x256xf32>
    tpu.vector_store %arg7[%c0_6, %c0_7], %7 {strides = array<i32>} : memref<16x256xf32, #tpu.memory_space<vmem>>, vector<16x256xf32>,
    %c11_i32 = arith.constant 11 : i32
    %9 = arith.cmpi eq, %arg2, %c11_i32 : i32
    %10 = arith.extui %9 : i1 to i32
    %c0_i32_8 = arith.constant 0 : i32
    %11 = arith.cmpi ne, %10, %c0_i32_8 : i32
    scf.if %11 {
      %c0_9 = arith.constant 0 : index
      %c0_10 = arith.constant 0 : index
      %12 = vector.load %arg7[%c0_9, %c0_10] : memref<16x256xf32, #tpu.memory_space<vmem>>, vector<16x256xf32>
      %c0_11 = arith.constant 0 : index
      %c0_12 = arith.constant 0 : index
      %13 = vector.load %arg5[%c0_11, %c0_12] : memref<1x256xf32, #tpu.memory_space<vmem>>, vector<1x256xf32>
      %14 = vector.broadcast %13 : vector<1x256xf32> to vector<16x256xf32>
      %15 = arith.addf %12, %14 : vector<16x256xf32>
      %16 = arith.truncf %15 : vector<16x256xf32> to vector<16x256xbf16>
      %c0_13 = arith.constant 0 : index
      %c0_14 = arith.constant 0 : index
      %17 = vector.load %arg6[%c0_13, %c0_14] : memref<16x256xbf16, #tpu.memory_space<vmem>>, vector<16x256xbf16>
      tpu.vector_store %arg6[%c0_13, %c0_14], %16 {strides = array<i32>} : memref<16x256xbf16, #tpu.memory_space<vmem>>, vector<16x256xbf16>,
    } else {
    }
    return
  }
  func.func @transform_0(%arg0: i32, %arg1: i32, %arg2: i32) -> (i32, i32) {
    %c0_i32 = arith.constant 0 : i32
    return %arg0, %arg2 : i32, i32
  }
  func.func @transform_1(%arg0: i32, %arg1: i32, %arg2: i32) -> (i32, i32) {
    %c0_i32 = arith.constant 0 : i32
    return %arg2, %arg1 : i32, i32
  }
  func.func @transform_2(%arg0: i32, %arg1: i32, %arg2: i32) -> (i32, i32) {
    %c0_i32 = arith.constant 0 : i32
    %c0_i32_0 = arith.constant 0 : i32
    return %c0_i32, %arg1 : i32, i32
  }
  func.func @transform_3(%arg0: i32, %arg1: i32, %arg2: i32) -> (i32, i32) {
    %c0_i32 = arith.constant 0 : i32
    return %arg0, %arg1 : i32, i32
  }
}

module attributes {stable_mosaic.version = 11 : i64} {
  func.func @_matmul_bias_kernel(%arg0: i32, %arg1: i32, %arg2: i32, %arg3: memref<16x256xbf16, #tpu.memory_space<vmem>>, %arg4: memref<256x256xbf16, #tpu.memory_space<vmem>>, %arg5: memref<1x256xf32, #tpu.memory_space<vmem>>, %arg6: memref<16x256xbf16, #tpu.memory_space<vmem>>, %arg7: memref<16x256xf32, #tpu.memory_space<vmem>>) attributes {dimension_semantics = [#tpu.dimension_semantics<parallel>, #tpu.dimension_semantics<parallel>, #tpu.dimension_semantics<arbitrary>], iteration_bounds = array<i64: 1, 9, 3>, scalar_prefetch = 0 : i64, scratch_operands = 1 : i64, tpu.core_type = #tpu.core_type<tc>, window_params = [{transform_indices = @transform_0, window_bounds = array<i64: 16, 256>}, {transform_indices = @transform_1, window_bounds = array<i64: 256, 256>}, {transform_indices = @transform_2, window_bounds = array<i64: 1, 256>}, {transform_indices = @transform_3, window_bounds = array<i64: 16, 256>}]} {
    %c0_i32 = arith.constant 0 : i32
    %0 = arith.cmpi eq, %arg2, %c0_i32 : i32
    %1 = arith.extui %0 : i1 to i32
    %c0_i32_0 = arith.constant 0 : i32
    %2 = arith.cmpi ne, %1, %c0_i32_0 : i32
    scf.if %2 {
      %cst_9 = arith.constant 0.000000e+00 : f32
      %12 = vector.broadcast %cst_9 : f32 to vector<16x256xf32>
      %c0_10 = arith.constant 0 : index
      %c0_11 = arith.constant 0 : index
      %13 = vector.load %arg7[%c0_10, %c0_11] : memref<16x256xf32, #tpu.memory_space<vmem>>, vector<16x256xf32>
      tpu.vector_store %arg7[%c0_10, %c0_11], %12 {strides = array<i32>} : memref<16x256xf32, #tpu.memory_space<vmem>>, vector<16x256xf32>,
    } else {
    }
    %c0 = arith.constant 0 : index
    %c0_1 = arith.constant 0 : index
    %3 = vector.load %arg7[%c0, %c0_1] : memref<16x256xf32, #tpu.memory_space<vmem>>, vector<16x256xf32>
    %c0_2 = arith.constant 0 : index
    %c0_3 = arith.constant 0 : index
    %4 = vector.load %arg3[%c0_2, %c0_3] : memref<16x256xbf16, #tpu.memory_space<vmem>>, vector<16x256xbf16>
    %c0_4 = arith.constant 0 : index
    %c0_5 = arith.constant 0 : index
    %5 = vector.load %arg4[%c0_4, %c0_5] : memref<256x256xbf16, #tpu.memory_space<vmem>>, vector<256x256xbf16>
    %cst = arith.constant dense<0.000000e+00> : vector<16x256xf32>
    %6 = tpu.matmul %4, %5, %cst {dimension_numbers = #tpu.dot_dimension_numbers<[1], [0], [0], [1], [0, 0, 1, 1], [], []>} : vector<16x256xbf16>, vector<256x256xbf16>, vector<16x256xf32> -> vector<16x256xf32>
    %7 = arith.addf %3, %6 : vector<16x256xf32>
    %c0_6 = arith.constant 0 : index
    %c0_7 = arith.constant 0 : index
    %8 = vector.load %arg7[%c0_6, %c0_7] : memref<16x256xf32, #tpu.memory_space<vmem>>, vector<16x256xf32>
    tpu.vector_store %arg7[%c0_6, %c0_7], %7 {strides = array<i32>} : memref<16x256xf32, #tpu.memory_space<vmem>>, vector<16x256xf32>,
    %c2_i32 = arith.constant 2 : i32
    %9 = arith.cmpi eq, %arg2, %c2_i32 : i32
    %10 = arith.extui %9 : i1 to i32
    %c0_i32_8 = arith.constant 0 : i32
    %11 = arith.cmpi ne, %10, %c0_i32_8 : i32
    scf.if %11 {
      %c0_9 = arith.constant 0 : index
      %c0_10 = arith.constant 0 : index
      %12 = vector.load %arg7[%c0_9, %c0_10] : memref<16x256xf32, #tpu.memory_space<vmem>>, vector<16x256xf32>
      %c0_11 = arith.constant 0 : index
      %c0_12 = arith.constant 0 : index
      %13 = vector.load %arg5[%c0_11, %c0_12] : memref<1x256xf32, #tpu.memory_space<vmem>>, vector<1x256xf32>
      %14 = vector.broadcast %13 : vector<1x256xf32> to vector<16x256xf32>
      %15 = arith.addf %12, %14 : vector<16x256xf32>
      %16 = arith.truncf %15 : vector<16x256xf32> to vector<16x256xbf16>
      %c0_13 = arith.constant 0 : index
      %c0_14 = arith.constant 0 : index
      %17 = vector.load %arg6[%c0_13, %c0_14] : memref<16x256xbf16, #tpu.memory_space<vmem>>, vector<16x256xbf16>
      tpu.vector_store %arg6[%c0_13, %c0_14], %16 {strides = array<i32>} : memref<16x256xbf16, #tpu.memory_space<vmem>>, vector<16x256xbf16>,
    } else {
    }
    return
  }
  func.func @transform_0(%arg0: i32, %arg1: i32, %arg2: i32) -> (i32, i32) {
    %c0_i32 = arith.constant 0 : i32
    return %arg0, %arg2 : i32, i32
  }
  func.func @transform_1(%arg0: i32, %arg1: i32, %arg2: i32) -> (i32, i32) {
    %c0_i32 = arith.constant 0 : i32
    return %arg2, %arg1 : i32, i32
  }
  func.func @transform_2(%arg0: i32, %arg1: i32, %arg2: i32) -> (i32, i32) {
    %c0_i32 = arith.constant 0 : i32
    %c0_i32_0 = arith.constant 0 : i32
    return %c0_i32, %arg1 : i32, i32
  }
  func.func @transform_3(%arg0: i32, %arg1: i32, %arg2: i32) -> (i32, i32) {
    %c0_i32 = arith.constant 0 : i32
    return %arg0, %arg1 : i32, i32
  }
}

module attributes {stable_mosaic.version = 11 : i64} {
  func.func @_pool_head_kernel(%arg0: i32, %arg1: memref<2x8x768xbf16, #tpu.memory_space<vmem>>, %arg2: memref<768x512xbf16, #tpu.memory_space<vmem>>, %arg3: memref<1x512xf32, #tpu.memory_space<vmem>>, %arg4: memref<1x512xf32, #tpu.memory_space<vmem>>, %arg5: memref<1x1xf32, #tpu.memory_space<vmem>>, %arg6: memref<1x768xf32, #tpu.memory_space<vmem>>, %arg7: memref<1x1xf32, #tpu.memory_space<vmem>>, %arg8: memref<2x1xf32, #tpu.memory_space<vmem>>) attributes {dimension_semantics = [#tpu.dimension_semantics<arbitrary>], iteration_bounds = array<i64: 1>, scalar_prefetch = 0 : i64, scratch_operands = 0 : i64, tpu.core_type = #tpu.core_type<tc>, window_params = [{pipeline_mode = #tpu.pipeline_mode<synchronous>, transform_indices = @transform_0, window_bounds = array<i64: 2, 8, 768>}, {pipeline_mode = #tpu.pipeline_mode<synchronous>, transform_indices = @transform_1, window_bounds = array<i64: 768, 512>}, {pipeline_mode = #tpu.pipeline_mode<synchronous>, transform_indices = @transform_2, window_bounds = array<i64: 1, 512>}, {pipeline_mode = #tpu.pipeline_mode<synchronous>, transform_indices = @transform_3, window_bounds = array<i64: 1, 512>}, {pipeline_mode = #tpu.pipeline_mode<synchronous>, transform_indices = @transform_4, window_bounds = array<i64: 1, 1>}, {pipeline_mode = #tpu.pipeline_mode<synchronous>, transform_indices = @transform_5, window_bounds = array<i64: 1, 768>}, {pipeline_mode = #tpu.pipeline_mode<synchronous>, transform_indices = @transform_6, window_bounds = array<i64: 1, 1>}, {pipeline_mode = #tpu.pipeline_mode<synchronous>, transform_indices = @transform_7, window_bounds = array<i64: 2, 1>}]} {
    %c0 = arith.constant 0 : index
    %c0_0 = arith.constant 0 : index
    %0 = vector.load %arg2[%c0, %c0_0] : memref<768x512xbf16, #tpu.memory_space<vmem>>, vector<768x512xbf16>
    %c0_1 = arith.constant 0 : index
    %c0_2 = arith.constant 0 : index
    %1 = vector.load %arg3[%c0_1, %c0_2] : memref<1x512xf32, #tpu.memory_space<vmem>>, vector<1x512xf32>
    %c0_3 = arith.constant 0 : index
    %c0_4 = arith.constant 0 : index
    %2 = vector.load %arg4[%c0_3, %c0_4] : memref<1x512xf32, #tpu.memory_space<vmem>>, vector<1x512xf32>
    %c0_5 = arith.constant 0 : index
    %c0_6 = arith.constant 0 : index
    %3 = vector.load %arg5[%c0_5, %c0_6] : memref<1x1xf32, #tpu.memory_space<vmem>>, vector<1x1xf32>
    %c0_7 = arith.constant 0 : index
    %c0_8 = arith.constant 0 : index
    %4 = vector.load %arg6[%c0_7, %c0_8] : memref<1x768xf32, #tpu.memory_space<vmem>>, vector<1x768xf32>
    %c0_9 = arith.constant 0 : index
    %c0_10 = arith.constant 0 : index
    %5 = vector.load %arg7[%c0_9, %c0_10] : memref<1x1xf32, #tpu.memory_space<vmem>>, vector<1x1xf32>
    %c0_11 = arith.constant 0 : index
    %c0_12 = arith.constant 0 : index
    %c0_13 = arith.constant 0 : index
    %6 = vector.load %arg1[%c0_11, %c0_12, %c0_13] : memref<2x8x768xbf16, #tpu.memory_space<vmem>>, vector<1x8x768xbf16>
    %7 = vector.shape_cast %6 : vector<1x8x768xbf16> to vector<8x768xbf16>
    %cst = arith.constant dense<0.000000e+00> : vector<8x512xf32>
    %8 = tpu.matmul %7, %0, %cst {dimension_numbers = #tpu.dot_dimension_numbers<[1], [0], [0], [1], [0, 0, 1, 1], [], []>} : vector<8x768xbf16>, vector<768x512xbf16>, vector<8x512xf32> -> vector<8x512xf32>
    %9 = vector.broadcast %1 : vector<1x512xf32> to vector<8x512xf32>
    %10 = arith.addf %8, %9 : vector<8x512xf32>
    %11 = math.tanh %10 : vector<8x512xf32>
    %12 = vector.broadcast %2 : vector<1x512xf32> to vector<8x512xf32>
    %13 = arith.mulf %11, %12 : vector<8x512xf32>
    %cst_14 = arith.constant dense<0.000000e+00> : vector<8xf32>
    %14 = vector.multi_reduction <add>, %13, %cst_14 [1] : vector<8x512xf32> to vector<8xf32>
    %15 = vector.shape_cast %14 : vector<8xf32> to vector<8x1xf32>
    %16 = vector.broadcast %3 : vector<1x1xf32> to vector<8x1xf32>
    %17 = arith.addf %15, %16 : vector<8x1xf32>
    %cst_15 = arith.constant dense<0xFF800000> : vector<1xf32>
    %18 = vector.multi_reduction <maximumf>, %17, %cst_15 [0] : vector<8x1xf32> to vector<1xf32>
    %19 = vector.shape_cast %18 : vector<1xf32> to vector<1x1xf32>
    %20 = vector.broadcast %19 : vector<1x1xf32> to vector<8x1xf32>
    %21 = arith.subf %17, %20 : vector<8x1xf32>
    %22 = math.exp %21 : vector<8x1xf32>
    %cst_16 = arith.constant dense<0.000000e+00> : vector<1xf32>
    %23 = vector.multi_reduction <add>, %22, %cst_16 [0] : vector<8x1xf32> to vector<1xf32>
    %24 = vector.shape_cast %23 : vector<1xf32> to vector<1x1xf32>
    %25 = tpu.reciprocal %24 {approx = true} : vector<1x1xf32> -> vector<1x1xf32>
    %26 = vector.broadcast %25 : vector<1x1xf32> to vector<8x1xf32>
    %27 = arith.mulf %22, %26 : vector<8x1xf32>
    %28 = arith.extf %7 : vector<8x768xbf16> to vector<8x768xf32>
    %29 = vector.broadcast %27 : vector<8x1xf32> to vector<8x768xf32>
    %30 = arith.mulf %29, %28 : vector<8x768xf32>
    %cst_17 = arith.constant dense<0.000000e+00> : vector<768xf32>
    %31 = vector.multi_reduction <add>, %30, %cst_17 [0] : vector<8x768xf32> to vector<768xf32>
    %32 = vector.shape_cast %31 : vector<768xf32> to vector<1x768xf32>
    %33 = arith.mulf %32, %4 : vector<1x768xf32>
    %cst_18 = arith.constant dense<0.000000e+00> : vector<1xf32>
    %34 = vector.multi_reduction <add>, %33, %cst_18 [1] : vector<1x768xf32> to vector<1xf32>
    %35 = vector.shape_cast %34 : vector<1xf32> to vector<1x1xf32>
    %36 = arith.addf %35, %5 : vector<1x1xf32>
    %c1 = arith.constant 1 : index
    %c0_19 = arith.constant 0 : index
    %c0_20 = arith.constant 0 : index
    %37 = vector.load %arg1[%c1, %c0_19, %c0_20] : memref<2x8x768xbf16, #tpu.memory_space<vmem>>, vector<1x8x768xbf16>
    %38 = vector.shape_cast %37 : vector<1x8x768xbf16> to vector<8x768xbf16>
    %cst_21 = arith.constant dense<0.000000e+00> : vector<8x512xf32>
    %39 = tpu.matmul %38, %0, %cst_21 {dimension_numbers = #tpu.dot_dimension_numbers<[1], [0], [0], [1], [0, 0, 1, 1], [], []>} : vector<8x768xbf16>, vector<768x512xbf16>, vector<8x512xf32> -> vector<8x512xf32>
    %40 = vector.broadcast %1 : vector<1x512xf32> to vector<8x512xf32>
    %41 = arith.addf %39, %40 : vector<8x512xf32>
    %42 = math.tanh %41 : vector<8x512xf32>
    %43 = vector.broadcast %2 : vector<1x512xf32> to vector<8x512xf32>
    %44 = arith.mulf %42, %43 : vector<8x512xf32>
    %cst_22 = arith.constant dense<0.000000e+00> : vector<8xf32>
    %45 = vector.multi_reduction <add>, %44, %cst_22 [1] : vector<8x512xf32> to vector<8xf32>
    %46 = vector.shape_cast %45 : vector<8xf32> to vector<8x1xf32>
    %47 = vector.broadcast %3 : vector<1x1xf32> to vector<8x1xf32>
    %48 = arith.addf %46, %47 : vector<8x1xf32>
    %cst_23 = arith.constant dense<0xFF800000> : vector<1xf32>
    %49 = vector.multi_reduction <maximumf>, %48, %cst_23 [0] : vector<8x1xf32> to vector<1xf32>
    %50 = vector.shape_cast %49 : vector<1xf32> to vector<1x1xf32>
    %51 = vector.broadcast %50 : vector<1x1xf32> to vector<8x1xf32>
    %52 = arith.subf %48, %51 : vector<8x1xf32>
    %53 = math.exp %52 : vector<8x1xf32>
    %cst_24 = arith.constant dense<0.000000e+00> : vector<1xf32>
    %54 = vector.multi_reduction <add>, %53, %cst_24 [0] : vector<8x1xf32> to vector<1xf32>
    %55 = vector.shape_cast %54 : vector<1xf32> to vector<1x1xf32>
    %56 = tpu.reciprocal %55 {approx = true} : vector<1x1xf32> -> vector<1x1xf32>
    %57 = vector.broadcast %56 : vector<1x1xf32> to vector<8x1xf32>
    %58 = arith.mulf %53, %57 : vector<8x1xf32>
    %59 = arith.extf %38 : vector<8x768xbf16> to vector<8x768xf32>
    %60 = vector.broadcast %58 : vector<8x1xf32> to vector<8x768xf32>
    %61 = arith.mulf %60, %59 : vector<8x768xf32>
    %cst_25 = arith.constant dense<0.000000e+00> : vector<768xf32>
    %62 = vector.multi_reduction <add>, %61, %cst_25 [0] : vector<8x768xf32> to vector<768xf32>
    %63 = vector.shape_cast %62 : vector<768xf32> to vector<1x768xf32>
    %64 = arith.mulf %63, %4 : vector<1x768xf32>
    %cst_26 = arith.constant dense<0.000000e+00> : vector<1xf32>
    %65 = vector.multi_reduction <add>, %64, %cst_26 [1] : vector<1x768xf32> to vector<1xf32>
    %66 = vector.shape_cast %65 : vector<1xf32> to vector<1x1xf32>
    %67 = arith.addf %66, %5 : vector<1x1xf32>
    %68 = tpu.concatenate %36, %67 in 0 : vector<1x1xf32>, vector<1x1xf32> -> vector<2x1xf32>
    %c0_27 = arith.constant 0 : index
    %c0_28 = arith.constant 0 : index
    %69 = vector.load %arg8[%c0_27, %c0_28] : memref<2x1xf32, #tpu.memory_space<vmem>>, vector<2x1xf32>
    tpu.vector_store %arg8[%c0_27, %c0_28], %68 {strides = array<i32>} : memref<2x1xf32, #tpu.memory_space<vmem>>, vector<2x1xf32>,
    return
  }
  func.func @transform_0(%arg0: i32) -> (i32, i32, i32) {
    %c0_i32 = arith.constant 0 : i32
    %c0_i32_0 = arith.constant 0 : i32
    %c0_i32_1 = arith.constant 0 : i32
    %c0_i32_2 = arith.constant 0 : i32
    return %c0_i32, %c0_i32_0, %c0_i32_1 : i32, i32, i32
  }
  func.func @transform_1(%arg0: i32) -> (i32, i32) {
    %c0_i32 = arith.constant 0 : i32
    %c0_i32_0 = arith.constant 0 : i32
    %c0_i32_1 = arith.constant 0 : i32
    return %c0_i32, %c0_i32_0 : i32, i32
  }
  func.func @transform_2(%arg0: i32) -> (i32, i32) {
    %c0_i32 = arith.constant 0 : i32
    %c0_i32_0 = arith.constant 0 : i32
    %c0_i32_1 = arith.constant 0 : i32
    return %c0_i32, %c0_i32_0 : i32, i32
  }
  func.func @transform_3(%arg0: i32) -> (i32, i32) {
    %c0_i32 = arith.constant 0 : i32
    %c0_i32_0 = arith.constant 0 : i32
    %c0_i32_1 = arith.constant 0 : i32
    return %c0_i32, %c0_i32_0 : i32, i32
  }
  func.func @transform_4(%arg0: i32) -> (i32, i32) {
    %c0_i32 = arith.constant 0 : i32
    %c0_i32_0 = arith.constant 0 : i32
    %c0_i32_1 = arith.constant 0 : i32
    return %c0_i32, %c0_i32_0 : i32, i32
  }
  func.func @transform_5(%arg0: i32) -> (i32, i32) {
    %c0_i32 = arith.constant 0 : i32
    %c0_i32_0 = arith.constant 0 : i32
    %c0_i32_1 = arith.constant 0 : i32
    return %c0_i32, %c0_i32_0 : i32, i32
  }
  func.func @transform_6(%arg0: i32) -> (i32, i32) {
    %c0_i32 = arith.constant 0 : i32
    %c0_i32_0 = arith.constant 0 : i32
    %c0_i32_1 = arith.constant 0 : i32
    return %c0_i32, %c0_i32_0 : i32, i32
  }
  func.func @transform_7(%arg0: i32) -> (i32, i32) {
    %c0_i32 = arith.constant 0 : i32
    %c0_i32_0 = arith.constant 0 : i32
    %c0_i32_1 = arith.constant 0 : i32
    return %c0_i32, %c0_i32_0 : i32, i32
  }
}

</mosaic_0001>

<bundles_post_ra>
// kernel: forward.16
= control target key start
LH: loop header
LB: loop body
LE: loop exit
PB: predicated region body
PF: predicated region fallthrough
CT: control target
= control target key end

     0   :  { %v102_v61 = vlaneseq  ;;  %s384_s0 = inlined_call_operand.vmem [shape: f32[16,768], index: 0, kind: input, shape index: {}]   ;;  %s385_s1 = inlined_call_operand.vmem [shape: f32[1,768], index: 1, kind: input, shape index: {}]   ;;  %s386_s2 = inlined_call_operand.vmem [shape: f32[1,768], index: 2, kind: input, shape index: {}]   ;;  %s387_s3 = inlined_call_operand.vmem [shape: bf16[16,768], index: 3, kind: output, shape index: {}]  }
   0x1   :  { %v14_v0 = vld [vmem:[%s384_s0] sm:$0xff]  ;;  %v15_v1 = vld [vmem:[%s384_s0 + $0x8] sm:$0xff]  ;;  %v16_v2 = vld [vmem:[%s384_s0 + $0x10] sm:$0xff] }
   0x2   :  { %v17_v3 = vld [vmem:[%s384_s0 + $0x18] sm:$0xff]  ;;  %v28_v4 = vadd.f32 %v15_v1, %v14_v0  ;;  %v20_v5 = vld [vmem:[%s384_s0 + $0x30] sm:$0xff]  ;;  %v22_v7 = vld [vmem:[%s384_s0 + $0x40] sm:$0xff] }
   0x3   :  { %v21_v6 = vld [vmem:[%s384_s0 + $0x38] sm:$0xff]  ;;  %v18_v10 = vld [vmem:[%s384_s0 + $0x20] sm:$0xff]  ;;  %v23_v11 = vld [vmem:[%s384_s0 + $0x48] sm:$0xff] }
   0x4   :  { %v29_v8 = vadd.f32 %v28_v4, %v16_v2  ;;  %v35_v9 = vadd.f32 %v21_v6, %v20_v5  ;;  %v19_v14 = vld [vmem:[%s384_s0 + $0x28] sm:$0xff]  ;;  %v24_v15 = vld [vmem:[%s384_s0 + $0x50] sm:$0xff]  ;;  %v25_v18 = vld [vmem:[%s384_s0 + $0x58] sm:$0xff] }
   0x6   :  { %v30_v12 = vadd.f32 %v29_v8, %v17_v3  ;;  %v36_v13 = vadd.f32 %v35_v9, %v22_v7 }
   0x8   :  { %v31_v16 = vadd.f32 %v30_v12, %v18_v10  ;;  %v37_v17 = vadd.f32 %v36_v13, %v23_v11 }
   0xa   :  { %v32_v19 = vadd.f32 %v31_v16, %v19_v14  ;;  %v38_v20 = vadd.f32 %v37_v17, %v24_v15 }
   0xc   :  { %33 = vadd.xlane.f32.xlu0 %v32_v19  ;;  %v39_v21 = vadd.f32 %v38_v20, %v25_v18 }
  0x10   :  { %40 = vadd.xlane.f32.xlu0 %v39_v21 }
  0x99   :  { %v34_v22 = vpop.xlane.xlu0 %33 }
  0x9a   :  { %v43_v23 = vmul.f32 0.0013020834, %v34_v22 }
  0x9c   :  { %v305_v24 = vsub.f32 %v14_v0, %v43_v23  ;;  %v307_v25 = vsub.f32 %v15_v1, %v43_v23  ;;  %v309_v26 = vsub.f32 %v16_v2, %v43_v23  ;;  %v311_v28 = vsub.f32 %v17_v3, %v43_v23 }
  0x9d   :  { %v41_v27 = vpop.xlane.xlu0 %40  ;;  %v317_v32 = vsub.f32 %v18_v10, %v43_v23  ;;  %v50_v38 = vsub.f32 %v19_v14, %v43_v23  ;;  %v103_v1 = vshrl.u32 %v102_v61, 7 }
  0x9e   :  { %v44_v29 = vmul.f32 0.0013020834, %v41_v27  ;;  %v57_v30 = vmul.f32 %v305_v24, %v305_v24  ;;  %v58_v31 = vmul.f32 %v307_v25, %v307_v25  ;;  %v59_v33 = vmul.f32 %v309_v26, %v309_v26 }
  0x9f   :  { %v60_v39 = vmul.f32 %v311_v28, %v311_v28  ;;  %v61_v44 = vmul.f32 %v317_v32, %v317_v32  ;;  %v62_v49 = vmul.f32 %v50_v38, %v50_v38  ;;  %v104_v4 = vsub.s32 0, %v103_v1 }
  0xa0   :  { %v69_v34 = vadd.f32 %v58_v31, %v57_v30  ;;  %v321_v35 = vsub.f32 %v20_v5, %v44_v29  ;;  %v323_v36 = vsub.f32 %v21_v6, %v44_v29  ;;  %v325_v37 = vsub.f32 %v22_v7, %v44_v29  ;;  %v26_v6 = vld [vmem:[%s385_s1] sm:$0x3f] }
  0xa1   :  { %v329_v41 = vsub.f32 %v23_v11, %v44_v29  ;;  %v337_v46 = vsub.f32 %v24_v15, %v44_v29  ;;  %v341_v51 = vsub.f32 %v25_v18, %v44_v29  ;;  %v108_v5 = vsub.s32 1, %v103_v1  ;;  %v27_v11 = vld [vmem:[%s386_s2] sm:$0x3f] }
  0xa2   :  { %v70_v40 = vadd.f32 %v69_v34, %v59_v33  ;;  %v63_v42 = vmul.f32 %v321_v35, %v321_v35  ;;  %v64_v43 = vmul.f32 %v323_v36, %v323_v36  ;;  %v65_v47 = vmul.f32 %v325_v37, %v325_v37 }
  0xa3   :  { %v66_v52 = vmul.f32 %v329_v41, %v329_v41  ;;  %v67_v55 = vmul.f32 %v337_v46, %v337_v46  ;;  %v68_v57 = vmul.f32 %v341_v51, %v341_v51  ;;  %v112_v7 = vsub.s32 2, %v103_v1 }
  0xa4   :  { %v71_v45 = vadd.f32 %v70_v40, %v60_v39  ;;  %v76_v48 = vadd.f32 %v64_v43, %v63_v42  ;;  %v116_v8 = vsub.s32 3, %v103_v1  ;;  %v120_v9 = vsub.s32 4, %v103_v1 }
  0xa5   :  { %v124_v10 = vsub.s32 5, %v103_v1  ;;  %v105_v12 = vrot.slane %v26_v6, %v104_v4  ;;  %v109_v13 = vrot.slane %v26_v6, %v108_v5  ;;  %v113_v14 = vrot.slane %v26_v6, %v112_v7 }
  0xa6   :  { %v72_v50 = vadd.f32 %v71_v45, %v61_v44  ;;  %v77_v53 = vadd.f32 %v76_v48, %v65_v47  ;;  %v117_v15 = vrot.slane %v26_v6, %v116_v8  ;;  %v121_v16 = vrot.slane %v26_v6, %v120_v9 }
  0xa7   :  { %v125_v17 = vrot.slane %v26_v6, %v124_v10  ;;  %v148_v19 = vrot.slane %v27_v11, %v104_v4  ;;  %v152_v20 = vrot.slane %v27_v11, %v108_v5  ;;  %v156_v21 = vrot.slane %v27_v11, %v112_v7 }
  0xa8   :  { %v73_v54 = vadd.f32 %v72_v50, %v62_v49  ;;  %v78_v56 = vadd.f32 %v77_v53, %v66_v52  ;;  %v160_v22 = vrot.slane %v27_v11, %v116_v8  ;;  %v164_v31 = vrot.slane %v27_v11, %v120_v9 }
  0xa9   :  { %v168_v33 = vrot.slane %v27_v11, %v124_v10 }
  0xaa   :  { %74 = vadd.xlane.f32.xlu1 %v73_v54  ;;  %v79_v58 = vadd.f32 %v78_v56, %v67_v55 }
  0xac   :  { %v80_v59 = vadd.f32 %v79_v58, %v68_v57 }
  0xae   :  { %81 = vadd.xlane.f32.xlu1 %v80_v59 }
 0x137   :  { %v75_v60 = vpop.xlane.xlu1 %74 }
 0x138   :  { %v83_v62 = vmul.f32 0.0013020834, %v75_v60 }
 0x13a   :  { %v85_v63 = vadd.f32 1e-07, %v83_v62 }
 0x13b   :  { %v82_v0 = vpop.xlane.xlu1 %81 }
 0x13c   :  { %245 = vrsqrt.f32 %v85_v63  ;;  %v84_v2 = vmul.f32 0.0013020834, %v82_v0 }
 0x13e   :  { %v86_v3 = vadd.f32 1e-07, %v84_v2 }
 0x140   :  { %247 = vrsqrt.f32 %v86_v3 }
 0x146   :  { %v246_v18 = vpop.eup %245 }
 0x147   :  { %v89_v23 = vmul.f32 %v246_v18, %v305_v24  ;;  %v90_v27 = vmul.f32 %v246_v18, %v307_v25  ;;  %v91_v29 = vmul.f32 %v246_v18, %v309_v26  ;;  %v92_v30 = vmul.f32 %v246_v18, %v311_v28 }
 0x148   :  { %v93_v34 = vmul.f32 %v246_v18, %v317_v32  ;;  %v94_v39 = vmul.f32 %v246_v18, %v50_v38 }
 0x149   :  { %v132_v40 = vmul.f32 %v105_v12, %v89_v23  ;;  %v133_v42 = vmul.f32 %v109_v13, %v90_v27  ;;  %v134_v43 = vmul.f32 %v113_v14, %v91_v29  ;;  %v135_v44 = vmul.f32 %v117_v15, %v92_v30 }
 0x14a   :  { %v248_v45 = vpop.eup %247  ;;  %v136_v47 = vmul.f32 %v121_v16, %v93_v34  ;;  %v137_v48 = vmul.f32 %v125_v17, %v94_v39 }
 0x14b   :  { %v175_v49 = vadd.f32 %v148_v19, %v132_v40  ;;  %v176_v24 = vadd.f32 %v152_v20, %v133_v42  ;;  %v177_v50 = vadd.f32 %v156_v21, %v134_v43  ;;  %v178_v25 = vadd.f32 %v160_v22, %v135_v44 }
 0x14c   :  { %v179_v52 = vadd.f32 %v164_v31, %v136_v47  ;;  %v180_v26 = vadd.f32 %v168_v33, %v137_v48  ;;  %v95_v28 = vmul.f32 %v248_v45, %v321_v35  ;;  %v96_v53 = vmul.f32 %v248_v45, %v323_v36 }
 0x14d   :  { %v239_v54 = vpack.c.bf16 %v176_v24, %v175_v49  ;;  %v240_v32 = vpack.c.bf16 %v178_v25, %v177_v50  ;;  %v97_v38 = vmul.f32 %v248_v45, %v325_v37  ;;  %v98_v55 = vmul.f32 %v248_v45, %v329_v41 }
 0x14e   :  { %v241_v56 = vpack.c.bf16 %v180_v26, %v179_v52  ;;  %v99_v57 = vmul.f32 %v248_v45, %v337_v46  ;;  %v100_v58 = vmul.f32 %v248_v45, %v341_v51  ;;  %v138_v59 = vmul.f32 %v105_v12, %v95_v28 }
 0x14f   :  { %223 = vst [vmem:[%s387_s3] sm:$0xff] %v239_v54  ;;  %224 = vst [vmem:[%s387_s3 + $0x8] sm:$0xff] %v240_v32  ;;  %v139_v35 = vmul.f32 %v109_v13, %v96_v53  ;;  %v140_v36 = vmul.f32 %v113_v14, %v97_v38  ;;  %v141_v60 = vmul.f32 %v117_v15, %v98_v55 }
 0x150   :  { %225 = vst [vmem:[%s387_s3 + $0x10] sm:$0xff] %v241_v56  ;;  %v142_v37 = vmul.f32 %v121_v16, %v99_v57  ;;  %v143_v41 = vmul.f32 %v125_v17, %v100_v58  ;;  %v181_v46 = vadd.f32 %v148_v19, %v138_v59 }
 0x151   :  { %v182_v51 = vadd.f32 %v152_v20, %v139_v35  ;;  %v183_v61 = vadd.f32 %v156_v21, %v140_v36  ;;  %v184_v62 = vadd.f32 %v160_v22, %v141_v60 }
 0x152   :  { %v185_v63 = vadd.f32 %v164_v31, %v142_v37  ;;  %v186_v0 = vadd.f32 %v168_v33, %v143_v41 }
 0x153   :  { %v242_v1 = vpack.c.bf16 %v182_v51, %v181_v46  ;;  %v243_v2 = vpack.c.bf16 %v184_v62, %v183_v61 }
 0x154   :  { %v244_v3 = vpack.c.bf16 %v186_v0, %v185_v63 }
 0x155   :  { %226 = vst [vmem:[%s387_s3 + $0x18] sm:$0xff] %v242_v1  ;;  %227 = vst [vmem:[%s387_s3 + $0x20] sm:$0xff] %v243_v2 }
 0x156   :  { %228 = vst [vmem:[%s387_s3 + $0x28] sm:$0xff] %v244_v3 }

// kernel: forward.19
= control target key start
LH: loop header
LB: loop body
LE: loop exit
PB: predicated region body
PF: predicated region fallthrough
CT: control target
= control target key end

     0   :  { %s1214_s12 = smov 0   ;;  %s1216_s13 = smov 0   ;;  %s1501_s0 = inlined_call_operand.vmem [shape: bf16[16,768], index: 0, kind: input, shape index: {}]   ;;  %s1502_s1 = inlined_call_operand.vmem [shape: bf16[768,768], index: 1, kind: input, shape index: {}]   ;;  %s1503_s2 = inlined_call_operand.vmem [shape: f32[1,768], index: 2, kind: input, shape index: {}]   ;;  %s1504_s3 = inlined_call_operand.vmem [shape: bf16[16,768], index: 3, kind: output, shape index: {}]  }
   0x1   :  { %s1218_s14 = smov 0   ;;  %s1220_s15 = smov 0  }
   0x2   :  { %s1222_s16 = smov 0   ;;  %s1224_s17 = smov 0  }
   0x3   :  { %s1226_s18 = smov 0   ;;  %s1228_s19 = smov 0  }
   0x4   :  { %s1230_s20 = smov 0   ;;  %s1232_s21 = smov 0  }
   0x5   :  { %s1234_s22 = smov 0  }
   0x6 LB: > { %s900_s23 = sadd.s32 4294967295, %s1191_s22   ;;  %s25_s24 = sadd.s32 1, %s1183_s20  ;;  %s1191_s22 = sphi %s1234_s22, %s13_s22   ;;  %s1187_s21 = sphi %s1232_s21, %s1525_s21   ;;  %s1183_s20 = sphi %s1230_s20, %s1524_s20   ;;  %s1179_s19 = sphi %s1228_s19, %s1523_s19   ;;  %s1175_s18 = sphi %s1226_s18, %s1522_s18   ;;  %s1171_s17 = sphi %s1224_s17, %s1521_s17   ;;  %s1167_s16 = sphi %s1222_s16, %s1520_s16   ;;  %s1163_s15 = sphi %s1220_s15, %s1519_s15   ;;  %s1159_s14 = sphi %s1218_s14, %s1518_s14   ;;  %s1155_s13 = sphi %s1216_s13, %s1517_s13   ;;  %s1151_s12 = sphi %s1214_s12, %s1516_s12  }
   0x7   : > { %p26_p0 = scmp.ge.s32.totalorder %s25_s24, 3  ;;  %s28_s25 = sadd.s32 1, %s1187_s21 }
   0x8   : > { %s41_s26 = sadd.s32 1, %s1171_s17  ;;  %p48_p1 = scmp.ne.s32.totalorder %s1171_s17, %s1167_s16 }
   0x9   : > { %s1527_s24 = smov (%p26_p0, %s25_s24), 0  ;;  %s1529_s25 = smov (!%p26_p0, %s28_s25), %s1187_s21 }
   0xa   : > { %1507 = sst [smem:[#allocation6_spill]] %s1527_s24  ;;  %s37_s27 = ssub.s32 %s1183_s20, %s1527_s24 }
   0xb   : > { %p49_p2 = scmp.eq.s32.totalorder %s1191_s22, 0  ;;  %p30_p3 = scmp.ge.s32.totalorder %s1529_s25, 3 }
   0xc   : > { %p39_p4 = scmp.eq.s32.totalorder %s37_s27, 0  ;;  %s69_s29 = sadd.s32 1, %s1163_s15 }
   0xd   : > { %p1281_p5 = por %p49_p2, %p48_p1  ;;  %s1531_s25 = smov (%p30_p3, %s1529_s25), 0 }
   0xe   : > { %1509 = sst [smem:[#allocation7_spill]] %s1531_s25  ;;  %s65_s4 = ssub.s32 %s1187_s21, %s1531_s25 }
   0xf   : > { %s1289_s30 = scalar_select %p39_p4, %s1171_s17, %s41_s26  }
  0x10   : > { %p76_p6 = scmp.ne.s32.totalorder %s1163_s15, %s1159_s14  ;;  %s66_s5 = sor.u32 %s65_s4, %s37_s27 }
  0x11   : > { %1510 = sst [smem:[#allocation8_spill]] %s1289_s30  ;;  %p121_p7 = scmp.eq.s32.totalorder %s65_s4, 0 }
  0x12   : > { %p67_p8 = scmp.eq.s32.totalorder %s66_s5, 0  ;;  %p1295_p9 = por %p76_p6, %p49_p2 }
  0x13   : > { %s123_s7 = sadd.s32 1, %s1155_s13  ;;  %p133_p10 = scmp.ne.s32.totalorder %s1155_s13, %s1151_s12 }
  0x14   : > { %s1303_s8 = scalar_select %p67_p8, %s1163_s15, %s69_s29  }
  0x15   : > { %s1306_s9 = scalar_select %p121_p7, %s1155_s13, %s123_s7  }
  0x16   : > { %p134_p11 = scmp.eq.s32.totalorder %s900_s23, 8  ;;  %p903_p13 = scmp.ge.s32.totalorder %s1191_s22, 9 }
  0x18   : > { %p1308_p12 = por %p134_p11, %p133_p10  ;;  %156 = sbr.rel (%p903_p13) target bundleno = 62 (0x3e), region = 16 }
  0x1f   : > { %159 = sbr.rel (!%p1281_p5) target bundleno = 38 (0x26), region = 20  ;;  %s161_s11 = sand.u32 (%p1281_p5), 1, %s1171_s17  }
  0x20   : > { %s960_s26 = sshll.u32 (%p1281_p5), %s1183_s20, 3  ;;  %s904_s27 = sshll.u32 (%p1281_p5), %s161_s11, 4 }
  0x21   : > { %s169_s5 = scalar_lea.vmem (%p1281_p5), %s1501_s0, %s960_s26  ;;  %s163_s23 = scalar_lea.vmem (%p1281_p5), [#allocation3], %s904_s27 }
  0x22   : > { %v199_v0 = vld [vmem:[%s169_s5] sm:$0xff] (%p1281_p5)  ;;  %v201_v1 = vld [vmem:[%s169_s5 + $0x18] sm:$0xff] (%p1281_p5) }
  0x23   : > { %200 = vst [vmem:[%s163_s23] sm:$0xff] (%p1281_p5), %v199_v0  ;;  %202 = vst [vmem:[%s163_s23 + $0x8] sm:$0xff] (%p1281_p5), %v201_v1 }
  0x26 PF: > { %208 = sbr.rel (!%p1295_p9) target bundleno = 62 (0x3e), region = 58  ;;  %s210_s28 = sand.u32 (%p1295_p9), 1, %s1163_s15  }
  0x27   : > { %s909_s7 = sshll.u32 (%p1295_p9), %s1187_s21, 1  ;;  %s907_s25 = sshll.u32 (%p1295_p9), %s210_s28, 8 }
  0x28   : > { %s964_s11 = smul.u32 (%p1295_p9), 192, %s1183_s20  ;;  %s1333_s6 = scalar_lea.vmem (%p1295_p9), [#allocation4], %s907_s25 }
  0x2a   : > { %s216_s24 = sadd.s32 (%p1295_p9), %s964_s11, %s909_s7 }
  0x2b   : > { %s911_s30 = sshll.u32 (%p1295_p9), %s216_s24, 2 }
  0x2c   : > { %s1328_s4 = scalar_lea.vmem (%p1295_p9), %s1502_s1, %s911_s30 }
  0x2d   : > { %v308_v2 = vld [vmem:[%s1328_s4] sm:$0xff]  ;;  %v310_v3 = vld [vmem:[%s1328_s4 + $0x18] sm:$0xff]  ;;  %v312_v4 = vld [vmem:[%s1328_s4 + $0x30] sm:$0xff] }
  0x2e   : > { %309 = vst [vmem:[%s1333_s6] sm:$0xff] %v308_v2  ;;  %311 = vst [vmem:[%s1333_s6 + $0x8] sm:$0xff] %v310_v3  ;;  %v314_v5 = vld [vmem:[%s1328_s4 + $0x48] sm:$0xff]  ;;  %v316_v6 = vld [vmem:[%s1328_s4 + $0x60] sm:$0xff] }
  0x2f   : > { %313 = vst [vmem:[%s1333_s6 + $0x10] sm:$0xff] %v312_v4  ;;  %v318_v7 = vld [vmem:[%s1328_s4 + $0x78] sm:$0xff]  ;;  %315 = vst [vmem:[%s1333_s6 + $0x18] sm:$0xff] %v314_v5  ;;  %v320_v8 = vld [vmem:[%s1328_s4 + $0x90] sm:$0xff] }
  0x30   : > { %317 = vst [vmem:[%s1333_s6 + $0x20] sm:$0xff] %v316_v6  ;;  %319 = vst [vmem:[%s1333_s6 + $0x28] sm:$0xff] %v318_v7  ;;  %v322_v9 = vld [vmem:[%s1328_s4 + $0xa8] sm:$0xff]  ;;  %v324_v10 = vld [vmem:[%s1328_s4 + $0xc0] sm:$0xff] }
  0x31   : > { %321 = vst [vmem:[%s1333_s6 + $0x30] sm:$0xff] %v320_v8  ;;  %323 = vst [vmem:[%s1333_s6 + $0x38] sm:$0xff] %v322_v9  ;;  %v326_v11 = vld [vmem:[%s1328_s4 + $0xd8] sm:$0xff]  ;;  %v328_v12 = vld [vmem:[%s1328_s4 + $0xf0] sm:$0xff] }
  0x32   : > { %325 = vst [vmem:[%s1333_s6 + $0x40] sm:$0xff] %v324_v10  ;;  %v330_v13 = vld [vmem:[%s1328_s4 + $0x108] sm:$0xff]  ;;  %327 = vst [vmem:[%s1333_s6 + $0x48] sm:$0xff] %v326_v11  ;;  %v332_v14 = vld [vmem:[%s1328_s4 + $0x120] sm:$0xff] }
  0x33   : > { %329 = vst [vmem:[%s1333_s6 + $0x50] sm:$0xff] %v328_v12  ;;  %331 = vst [vmem:[%s1333_s6 + $0x58] sm:$0xff] %v330_v13  ;;  %v334_v15 = vld [vmem:[%s1328_s4 + $0x138] sm:$0xff]  ;;  %v336_v16 = vld [vmem:[%s1328_s4 + $0x150] sm:$0xff] }
  0x34   : > { %333 = vst [vmem:[%s1333_s6 + $0x60] sm:$0xff] %v332_v14  ;;  %335 = vst [vmem:[%s1333_s6 + $0x68] sm:$0xff] %v334_v15  ;;  %v338_v17 = vld [vmem:[%s1328_s4 + $0x168] sm:$0xff]  ;;  %v340_v18 = vld [vmem:[%s1328_s4 + $0x180] sm:$0xff] }
  0x35   : > { %337 = vst [vmem:[%s1333_s6 + $0x70] sm:$0xff] %v336_v16  ;;  %v342_v19 = vld [vmem:[%s1328_s4 + $0x198] sm:$0xff]  ;;  %339 = vst [vmem:[%s1333_s6 + $0x78] sm:$0xff] %v338_v17  ;;  %v344_v20 = vld [vmem:[%s1328_s4 + $0x1b0] sm:$0xff] }
  0x36   : > { %341 = vst [vmem:[%s1333_s6 + $0x80] sm:$0xff] %v340_v18  ;;  %343 = vst [vmem:[%s1333_s6 + $0x88] sm:$0xff] %v342_v19  ;;  %v346_v21 = vld [vmem:[%s1328_s4 + $0x1c8] sm:$0xff]  ;;  %v348_v22 = vld [vmem:[%s1328_s4 + $0x1e0] sm:$0xff] }
  0x37   : > { %345 = vst [vmem:[%s1333_s6 + $0x90] sm:$0xff] %v344_v20  ;;  %347 = vst [vmem:[%s1333_s6 + $0x98] sm:$0xff] %v346_v21  ;;  %v350_v23 = vld [vmem:[%s1328_s4 + $0x1f8] sm:$0xff]  ;;  %v352_v24 = vld [vmem:[%s1328_s4 + $0x210] sm:$0xff] }
  0x38   : > { %349 = vst [vmem:[%s1333_s6 + $0xa0] sm:$0xff] %v348_v22  ;;  %v354_v25 = vld [vmem:[%s1328_s4 + $0x228] sm:$0xff]  ;;  %351 = vst [vmem:[%s1333_s6 + $0xa8] sm:$0xff] %v350_v23  ;;  %v356_v26 = vld [vmem:[%s1328_s4 + $0x240] sm:$0xff] }
  0x39   : > { %353 = vst [vmem:[%s1333_s6 + $0xb0] sm:$0xff] %v352_v24  ;;  %355 = vst [vmem:[%s1333_s6 + $0xb8] sm:$0xff] %v354_v25  ;;  %v358_v27 = vld [vmem:[%s1328_s4 + $0x258] sm:$0xff]  ;;  %v360_v28 = vld [vmem:[%s1328_s4 + $0x270] sm:$0xff] }
  0x3a   : > { %357 = vst [vmem:[%s1333_s6 + $0xc0] sm:$0xff] %v356_v26  ;;  %359 = vst [vmem:[%s1333_s6 + $0xc8] sm:$0xff] %v358_v27  ;;  %v362_v29 = vld [vmem:[%s1328_s4 + $0x288] sm:$0xff]  ;;  %v364_v30 = vld [vmem:[%s1328_s4 + $0x2a0] sm:$0xff] }
  0x3b   : > { %361 = vst [vmem:[%s1333_s6 + $0xd0] sm:$0xff] %v360_v28  ;;  %v366_v31 = vld [vmem:[%s1328_s4 + $0x2b8] sm:$0xff]  ;;  %363 = vst [vmem:[%s1333_s6 + $0xd8] sm:$0xff] %v362_v29  ;;  %v368_v32 = vld [vmem:[%s1328_s4 + $0x2d0] sm:$0xff] }
  0x3c   : > { %365 = vst [vmem:[%s1333_s6 + $0xe0] sm:$0xff] %v364_v30  ;;  %367 = vst [vmem:[%s1333_s6 + $0xe8] sm:$0xff] %v366_v31  ;;  %v370_v33 = vld [vmem:[%s1328_s4 + $0x2e8] sm:$0xff] }
  0x3d   : > { %369 = vst [vmem:[%s1333_s6 + $0xf0] sm:$0xff] %v368_v32  ;;  %371 = vst [vmem:[%s1333_s6 + $0xf8] sm:$0xff] %v370_v33 }
  0x3e PF: > { %p912_p0 = scmp.ge.s32.totalorder %s1191_s22, 1  ;;  %p384_p1 = scmp.lt.s32.totalorder %s1191_s22, 10 }
  0x40   : > { %p385_p2 = pnand %p912_p0, %p384_p1 }
  0x41   : > { %s391_s24 = sand.u32 (!%p385_p2), 1, %s1167_s16   ;;  %s398_s25 = sand.u32 (!%p385_p2), 1, %s1159_s14  }
  0x42   : > { %388 = sbr.rel (%p385_p2) target bundleno = 383 (0x17f), region = 100  ;;  %s1400_s30 = sshll.u32 (!%p385_p2), %s391_s24, 4 }
  0x43   : > { %s914_s27 = sshll.u32 (!%p385_p2), %s398_s25, 8  ;;  %s425_s5 = sand.u32 (!%p385_p2), 1, %s1151_s12  }
  0x44   : > { %s916_s23 = sshll.u32 (!%p385_p2), %s1179_s19, 1  ;;  %s915_s28 = sshll.u32 (!%p385_p2), %s425_s5, 4 }
  0x45   : > { %p433_p3 = scmp.lt.s32.totalorder (!%p385_p2), %s916_s23, 5  ;;  %s393_s26 = scalar_lea.vmem (!%p385_p2), [#allocation3], %s1400_s30 }
  0x46   : > { %s1411_s4 = scalar_lea.vmem (!%p385_p2), [#allocation4], %s914_s27  ;;  %s1413_s16 = scalar_lea.vmem (!%p385_p2), [#allocation5], %s915_s28 }
  0x47   : > { %p917_p4 = scmp.ne.s32.totalorder (!%p385_p2), %s1175_s18, 0 }
  0x49   : > { %s1533_s23 = smov (!%p433_p3, %s916_s23), 5  ;;  %442 = sbr.rel (%p917_p4) target bundleno = 80 (0x50), region = 112 }
  0x4a   : > { %s435_s29 = scalar_lea.vmem %s1503_s2, %s1533_s23  ;;  %v1193_v34 = vmov (!%p917_p4), 0.0  }
  0x4b   : > { %443 = vst [vmem:[#allocation2] sm:$0xff] (!%p917_p4), %v1193_v34  ;;  %444 = vst [vmem:[#allocation2 + $0x8] sm:$0xff] (!%p917_p4), %v1193_v34 }
  0x4c   : > { %445 = vst [vmem:[#allocation2 + $0x10] sm:$0xff] (!%p917_p4), %v1193_v34  ;;  %446 = vst [vmem:[#allocation2 + $0x18] sm:$0xff] (!%p917_p4), %v1193_v34 }
  0x50 PF: > { %v1054_v35 = vld [vmem:[%s1411_s4 + $0x4] ss:$8 sps:$4 sm:$0xff]   ;;  %v1056_v36 = vld [vmem:[%s1411_s4] ss:$8 sps:$4 sm:$0xff]   ;;  %v1057_v37 = vld [vmem:[%s1411_s4 + $0x14] ss:$8 sps:$4 sm:$0xff]  }
  0x51   : > { %655 = vmatprep.subr.bf16.mxu0 %v1054_v35  ;;  %v1059_v38 = vld [vmem:[%s1411_s4 + $0x10] ss:$8 sps:$4 sm:$0xff]   ;;  %v1060_v39 = vld [vmem:[%s1411_s4 + $0x24] ss:$8 sps:$4 sm:$0xff]   ;;  %v1062_v40 = vld [vmem:[%s1411_s4 + $0x20] ss:$8 sps:$4 sm:$0xff]  }
  0x52   : > { %656 = vmatpush1.bf16.msra.mxu0 %v1056_v36  ;;  %v1063_v41 = vld [vmem:[%s1411_s4 + $0x34] ss:$8 sps:$4 sm:$0xff]   ;;  %v1065_v42 = vld [vmem:[%s1411_s4 + $0x30] ss:$8 sps:$4 sm:$0xff]   ;;  %v1066_v43 = vld [vmem:[%s1411_s4 + $0x44] ss:$8 sps:$4 sm:$0xff]  }
  0x53   : > { %657 = vmatprep.subr.bf16.mxu0 %v1057_v37  ;;  %v1068_v44 = vld [vmem:[%s1411_s4 + $0x40] ss:$8 sps:$4 sm:$0xff]   ;;  %v1069_v45 = vld [vmem:[%s1411_s4 + $0x54] ss:$8 sps:$4 sm:$0xff]   ;;  %v1071_v46 = vld [vmem:[%s1411_s4 + $0x50] ss:$8 sps:$4 sm:$0xff]  }
  0x54   : > { %v1072_v47 = vld [vmem:[%s1411_s4 + $0x64] ss:$8 sps:$4 sm:$0xff]   ;;  %v1074_v49 = vld [vmem:[%s1411_s4 + $0x60] ss:$8 sps:$4 sm:$0xff]   ;;  %v1075_v50 = vld [vmem:[%s1411_s4 + $0x74] ss:$8 sps:$4 sm:$0xff]  }
  0x55   : > { %v1104_v48 = vld [vmem:[%s393_s26 + $0x4] ss:$8 sps:$4 sm:$0xff]   ;;  %v1077_v51 = vld [vmem:[%s1411_s4 + $0x70] ss:$8 sps:$4 sm:$0xff]   ;;  %v1080_v53 = vld [vmem:[%s1411_s4 + $0x80] ss:$8 sps:$4 sm:$0xff]  }
  0x56   : > { %658 = vmatpush1.bf16.msra.mxu0 %v1059_v38  ;;  %687 = vmatprep.mubr.bf16.mxu0 %v1104_v48  ;;  %v1078_v52 = vld [vmem:[%s1411_s4 + $0x84] ss:$8 sps:$4 sm:$0xff]   ;;  %v1081_v54 = vld [vmem:[%s1411_s4 + $0x94] ss:$8 sps:$4 sm:$0xff]   ;;  %v1083_v55 = vld [vmem:[%s1411_s4 + $0x90] ss:$8 sps:$4 sm:$0xff]  }
  0x57   : > { %659 = vmatprep.subr.bf16.mxu0 %v1060_v39  ;;  %v1084_v56 = vld [vmem:[%s1411_s4 + $0xa4] ss:$8 sps:$4 sm:$0xff]   ;;  %v1086_v57 = vld [vmem:[%s1411_s4 + $0xa0] ss:$8 sps:$4 sm:$0xff]   ;;  %v1087_v58 = vld [vmem:[%s1411_s4 + $0xb4] ss:$8 sps:$4 sm:$0xff]  }
  0x58   : > { %v1089_v59 = vld [vmem:[%s1411_s4 + $0xb0] ss:$8 sps:$4 sm:$0xff]   ;;  %v1090_v60 = vld [vmem:[%s1411_s4 + $0xc4] ss:$8 sps:$4 sm:$0xff]   ;;  %v1092_v61 = vld [vmem:[%s1411_s4 + $0xc0] ss:$8 sps:$4 sm:$0xff]  }
  0x59   : > { %v1093_v62 = vld [vmem:[%s1411_s4 + $0xd4] ss:$8 sps:$4 sm:$0xff]   ;;  %v1095_v63 = vld [vmem:[%s1411_s4 + $0xd0] ss:$8 sps:$4 sm:$0xff]   ;;  %v1096_v0 = vld [vmem:[%s1411_s4 + $0xe4] ss:$8 sps:$4 sm:$0xff]  }
  0x5a   : > { %660 = vmatpush1.bf16.msra.mxu0 %v1062_v40  ;;  %v1098_v1 = vld [vmem:[%s1411_s4 + $0xe0] ss:$8 sps:$4 sm:$0xff]   ;;  %v1099_v2 = vld [vmem:[%s1411_s4 + $0xf4] ss:$8 sps:$4 sm:$0xff]   ;;  %v1101_v3 = vld [vmem:[%s1411_s4 + $0xf0] ss:$8 sps:$4 sm:$0xff]  }
  0x5b   : > { %661 = vmatprep.subr.bf16.mxu0 %v1063_v41  ;;  %v1102_v4 = vld [vmem:[%s393_s26] ss:$8 sps:$4 sm:$0xff]   ;;  %p952_p5 = scmp.ne.s32.totalorder %s1175_s18, 2 }
  0x5c   : > { %v447_v5 = vld [vmem:[#allocation2] sm:$0xff]  ;;  %v448_v6 = vld [vmem:[#allocation2 + $0x8] sm:$0xff]  ;;  %v449_v8 = vld [vmem:[#allocation2 + $0x10] sm:$0xff]  ;;  %v716_v17 = vlaneseq (!%p952_p5) }
  0x5d   : > { %v450_v11 = vld [vmem:[#allocation2 + $0x18] sm:$0xff]  ;;  %v714_v19 = vld [vmem:[%s435_s29] sm:$0x3] (!%p952_p5) }
  0x5e   : > { %662 = vmatpush1.bf16.msra.mxu0 %v1065_v42  ;;  %v717_v18 = vshrl.u32 (!%p952_p5), %v716_v17, 7 }
  0x5f   : > { %663 = vmatprep.subr.bf16.mxu0 %v1066_v43 }
  0x60   : > { %v718_v21 = vsub.s32 (!%p952_p5), 0, %v717_v18  ;;  %v722_v22 = vsub.s32 (!%p952_p5), 1, %v717_v18 }
  0x62   : > { %664 = vmatpush1.bf16.msra.mxu0 %v1068_v44  ;;  %v719_v26 = vrot.slane (!%p952_p5), %v714_v19, %v718_v21  ;;  %v723_v27 = vrot.slane (!%p952_p5), %v714_v19, %v722_v22 }
  0x63   : > { %665 = vmatprep.subr.bf16.mxu0 %v1069_v45 }
  0x66   : > { %666 = vmatpush1.bf16.msra.mxu0 %v1071_v46 }
  0x67   : > { %667 = vmatprep.subr.bf16.mxu0 %v1072_v47 }
  0x6a   : > { %668 = vmatpush1.bf16.msra.mxu0 %v1074_v49 }
  0x6b   : > { %669 = vmatprep.subr.bf16.mxu0 %v1075_v50 }
  0x6e   : > { %670 = vmatpush1.bf16.msra.mxu0 %v1077_v51 }
  0x6f   : > { %671 = vmatprep.subr.bf16.mxu0 %v1078_v52 }
  0x72   : > { %672 = vmatpush1.bf16.msra.mxu0 %v1080_v53 }
  0x73   : > { %673 = vmatprep.subr.bf16.mxu0 %v1081_v54 }
  0x76   : > { %674 = vmatpush1.bf16.msra.mxu0 %v1083_v55 }
  0x77   : > { %675 = vmatprep.subr.bf16.mxu0 %v1084_v56 }
  0x7a   : > { %676 = vmatpush1.bf16.msra.mxu0 %v1086_v57 }
  0x7b   : > { %677 = vmatprep.subr.bf16.mxu0 %v1087_v58 }
  0x7e   : > { %678 = vmatpush1.bf16.msra.mxu0 %v1089_v59 }
  0x7f   : > { %679 = vmatprep.subr.bf16.mxu0 %v1090_v60 }
  0x82   : > { %680 = vmatpush1.bf16.msra.mxu0 %v1092_v61 }
  0x83   : > { %681 = vmatprep.subr.bf16.mxu0 %v1093_v62 }
  0x86   : > { %682 = vmatpush1.bf16.msra.mxu0 %v1095_v63 }
  0x87   : > { %683 = vmatprep.subr.bf16.mxu0 %v1096_v0 }
  0x8a   : > { %684 = vmatpush1.bf16.msra.mxu0 %v1098_v1 }
  0x8b   : > { %685 = vmatprep.subr.bf16.mxu0 %v1099_v2 }
  0x8e   : > { %686 = vmatpush1.bf16.msra.mxu0 %v1101_v3 }
  0x91   : > { %688 = vmatmul.mubr.bf16.vlgmr.msra.gmra.mrb[0].mxu0 %v1102_v4 }
 0x164   : > { %v689_v7 = vpop.f32.mrb[0].mxu0  ;;  %709 = sbr.rel (%p952_p5) target bundleno = 375 (0x177), region = 116 }
 0x165   : > { %v698_v9 = vadd.f32 %v689_v7, %v447_v5  ;;  %v691_v10 = vpop.f32.mrb[1].mxu0 }
 0x166   : > { %v699_v12 = vadd.f32 %v691_v10, %v448_v6  ;;  %v693_v13 = vpop.f32.mrb[2].mxu0 }
 0x167   : > { %702 = vst [vmem:[#allocation2] sm:$0xff] %v698_v9  ;;  %v700_v14 = vadd.f32 %v693_v13, %v449_v8  ;;  %v695_v15 = vpop.f32.mrb[3].mxu0 }
 0x168   : > { %703 = vst [vmem:[#allocation2 + $0x8] sm:$0xff] %v699_v12  ;;  %v701_v16 = vadd.f32 %v695_v15, %v450_v11 }
 0x169   : > { %704 = vst [vmem:[#allocation2 + $0x10] sm:$0xff] %v700_v14 }
 0x16a   : > { %705 = vst [vmem:[#allocation2 + $0x18] sm:$0xff] %v701_v16 }
 0x16e   : > { %v710_v20 = vld [vmem:[#allocation2] sm:$0xff] }
 0x16f   : > { %v711_v23 = vld [vmem:[#allocation2 + $0x8] sm:$0xff]  ;;  %v726_v28 = vadd.f32 %v719_v26, %v710_v20 }
 0x170   : > { %v712_v24 = vld [vmem:[#allocation2 + $0x10] sm:$0xff]  ;;  %v727_v29 = vadd.f32 %v723_v27, %v711_v23 }
 0x171   : > { %v713_v25 = vld [vmem:[#allocation2 + $0x18] sm:$0xff]  ;;  %v728_v30 = vadd.f32 %v719_v26, %v712_v24 }
 0x172   : > { %v729_v31 = vadd.f32 %v723_v27, %v713_v25  ;;  %v961_v32 = vpack.c.bf16 %v727_v29, %v726_v28 }
 0x174   : > { %v962_v33 = vpack.c.bf16 %v729_v31, %v728_v30  ;;  %742 = vst [vmem:[%s1413_s16] sm:$0xff] %v961_v32 }
 0x176   : > { %743 = vst [vmem:[%s1413_s16 + $0x8] sm:$0xff] %v962_v33 }
 0x177 PF: > { %750 = sbr.rel (!%p1308_p12) target bundleno = 383 (0x17f), region = 120  ;;  %s963_s18 = sshll.u32 (%p1308_p12), %s1179_s19, 3 }
 0x178   : > { %s756_s25 = scalar_lea.vmem (%p1308_p12), %s1504_s3, %s963_s18 }
 0x17b   : > { %v786_v34 = vld [vmem:[%s1413_s16] sm:$0xff] (%p1308_p12) }
 0x17c   : > { %787 = vst [vmem:[%s756_s25] sm:$0xff] (%p1308_p12), %v786_v34 }
 0x17d   : > { %v788_v35 = vld [vmem:[%s1413_s16 + $0x8] sm:$0xff] (%p1308_p12) }
 0x17e   : > { %789 = vst [vmem:[%s756_s25 + $0x18] sm:$0xff] %v788_v35 }
 0x17f PF: > { %s13_s22 = sadd.s32 1, %s1191_s22   ;;  %s1513_s10 = sld [smem:[#allocation8_spill]] }
 0x180   : > { %p10_p6 = scmp.ge.s32.totalorder %s13_s22, 11   ;;  %s1514_s30 = sld [smem:[#allocation6_spill]] }
 0x181   : > { %s1515_s27 = sld [smem:[#allocation7_spill]]  ;;  %s1516_s12 = smov %s1155_s13 }
 0x182   : > { %s1517_s13 = smov %s1306_s9  ;;  %s1518_s14 = smov %s1163_s15 }
 0x183   : > { %s1519_s15 = smov %s1303_s8  ;;  %s1520_s16 = smov %s1171_s17 }
 0x184   : > { %s1522_s18 = smov %s1183_s20  ;;  %s1523_s19 = smov %s1187_s21 }
 0x185   : > { %s1521_s17 = smov %s1513_s10  ;;  %12 = sbr.rel (!%p10_p6) target bundleno = 6 (0x6), region = 200 }
 0x186   : > { %s1524_s20 = smov %s1514_s30 }
 0x187   : > { %s1525_s21 = smov %s1515_s27 }

// kernel: forward.17
= control target key start
LH: loop header
LB: loop body
LE: loop exit
PB: predicated region body
PF: predicated region fallthrough
CT: control target
= control target key end

     0   :  { %8 = vsyncpa [#allocation5], 0  ;;  %s1404_s0 = inlined_call_operand.vmem [shape: bf16[16,768], index: 0, kind: input, shape index: {}]   ;;  %s1405_s1 = inlined_call_operand.hbm [shape: bf16[768,2304], index: 1, kind: input, shape index: {}]   ;;  %s1406_s2 = inlined_call_operand.vmem [shape: f32[1,2304], index: 2, kind: input, shape index: {}]   ;;  %s1407_s3 = inlined_call_operand.vmem [shape: bf16[16,2304], index: 3, kind: output, shape index: {}]  }
   0x1   :  { %10 = vsyncpa [#allocation5 + $0x1], 0  ;;  %s1137_s12 = smov 0   ;;  %s1139_s13 = smov 0  }
   0x2   :  { %s1141_s14 = smov 0   ;;  %s1143_s15 = smov 0  }
   0x3   :  { %s1145_s16 = smov 0   ;;  %s1147_s17 = smov 0  }
   0x4   :  { %s1149_s18 = smov 0   ;;  %s1151_s19 = smov 0  }
   0x5   :  { %s1153_s20 = smov 0   ;;  %s1155_s21 = smov 0  }
   0x6   :  { %s1157_s22 = smov 0   ;;  %s1159_s23 = smov 0  }
   0x7 LB: > { %1411 = sst [smem:[#allocation8_spill]] %s1090_s18  ;;  %s766_s24 = sadd.s32 4294967295, %s1110_s23   ;;  %s1110_s23 = sphi %s1159_s23, %s16_s23   ;;  %s1106_s22 = sphi %s1157_s22, %s1434_s22   ;;  %s1102_s21 = sphi %s1155_s21, %s1433_s21   ;;  %s1098_s20 = sphi %s1153_s20, %s1432_s20   ;;  %s1094_s19 = sphi %s1151_s19, %s1431_s19   ;;  %s1090_s18 = sphi %s1149_s18, %s1423_s18   ;;  %s1086_s17 = sphi %s1147_s17, %s1422_s17   ;;  %s1082_s16 = sphi %s1145_s16, %s1430_s16   ;;  %s1078_s15 = sphi %s1143_s15, %s1429_s15   ;;  %s1074_s14 = sphi %s1141_s14, %s1428_s14   ;;  %s1070_s13 = sphi %s1139_s13, %s1427_s13   ;;  %s1066_s12 = sphi %s1137_s12, %s1426_s12  }
   0x8   : > { %s28_s25 = sadd.s32 1, %s1102_s21  ;;  %s31_s26 = sadd.s32 1, %s1106_s22 }
   0x9   : > { %p29_p0 = scmp.ge.s32.totalorder %s28_s25, 3  ;;  %s44_s27 = sadd.s32 1, %s1090_s18 }
   0xa   : > { %p51_p1 = scmp.ne.s32.totalorder %s1090_s18, %s1086_s17  ;;  %p52_p2 = scmp.eq.s32.totalorder %s1110_s23, 0 }
   0xb   : > { %s1436_s25 = smov (%p29_p0, %s28_s25), 0  ;;  %s1438_s26 = smov (!%p29_p0, %s31_s26), %s1106_s22 }
   0xc   : > { %1412 = sst [smem:[#allocation9_spill]] %s1436_s25  ;;  %s40_s28 = ssub.s32 %s1102_s21, %s1436_s25 }
   0xd   : > { %p33_p3 = scmp.ge.s32.totalorder %s1438_s26, 9  ;;  %p42_p4 = scmp.eq.s32.totalorder %s40_s28, 0 }
   0xe   : > { %p1209_p5 = por %p52_p2, %p51_p1  ;;  %s72_s30 = sadd.s32 1, %s1082_s16 }
   0xf   : > { %s1440_s26 = smov (%p33_p3, %s1438_s26), 0  ;;  %p79_p6 = scmp.ne.s32.totalorder %s1082_s16, %s1078_s15 }
  0x10   : > { %1414 = sst [smem:[#allocation10_spill]] %s1440_s26  ;;  %s68_s5 = ssub.s32 %s1106_s22, %s1440_s26 }
  0x11   : > { %s1217_s4 = scalar_select %p42_p4, %s1090_s18, %s44_s27  }
  0x12   : > { %s69_s6 = sor.u32 %s68_s5, %s40_s28  ;;  %p85_p7 = scmp.ne.s32.totalorder %s1078_s15, %s1074_s14 }
  0x13   : > { %1415 = sst [smem:[#allocation11_spill]] %s1217_s4  ;;  %p70_p8 = scmp.eq.s32.totalorder %s69_s6, 0 }
  0x14   : > { %p1225_p9 = por %p79_p6, %p52_p2  ;;  %p86_p10 = scmp.eq.s32.totalorder %s766_s24, 0 }
  0x15   : > { %p124_p11 = scmp.eq.s32.totalorder %s68_s5, 0  ;;  %s126_s10 = sadd.s32 1, %s1070_s13 }
  0x16   : > { %s1232_s8 = scalar_select %p70_p8, %s1082_s16, %s72_s30  }
  0x17   : > { %p1234_p12 = por %p86_p10, %p85_p7  ;;  %p136_p13 = scmp.ne.s32.totalorder %s1070_s13, %s1066_s12 }
  0x18   : > { %1417 = sst [smem:[#allocation12_spill]] %s1232_s8  ;;  %p137_p0 = scmp.eq.s32.totalorder %s766_s24, 26 }
  0x19   : > { %s1240_s11 = scalar_select %p124_p11, %s1070_s13, %s126_s10  }
  0x1a   : > { %p1246_p1 = por %p137_p0, %p136_p13  ;;  %p769_p2 = scmp.ge.s32.totalorder %s1110_s23, 27 }
  0x1c   : > { %s1419_s14 = scalar_select %p1246_p1, 1, 0 }
  0x1d   : > { %159 = sbr.rel (%p769_p2) target bundleno = 72 (0x48), region = 16 }
  0x24   : > { %162 = sbr.rel (!%p1209_p5) target bundleno = 43 (0x2b), region = 20  ;;  %s164_s27 = sand.u32 (%p1209_p5), 1, %s1090_s18  }
  0x25   : > { %s826_s28 = sshll.u32 (%p1209_p5), %s1102_s21, 3  ;;  %s770_s30 = sshll.u32 (%p1209_p5), %s164_s27, 4 }
  0x26   : > { %s172_s10 = scalar_lea.vmem (%p1209_p5), %s1404_s0, %s826_s28  ;;  %s166_s24 = scalar_lea.vmem (%p1209_p5), [#allocation3], %s770_s30 }
  0x27   : > { %v202_v0 = vld [vmem:[%s172_s10] sm:$0xff] (%p1209_p5)  ;;  %v204_v1 = vld [vmem:[%s172_s10 + $0x18] sm:$0xff] (%p1209_p5) }
  0x28   : > { %203 = vst [vmem:[%s166_s24] sm:$0xff] (%p1209_p5), %v202_v0  ;;  %205 = vst [vmem:[%s166_s24 + $0x8] sm:$0xff] (%p1209_p5), %v204_v1 }
  0x2b PF: > { %s212_s29 = sand.u32 1, %s1082_s16   ;;  %s775_s26 = sshll.u32 %s1106_s22, 1 }
  0x2c   : > { %s773_s25 = sshll.u32 %s212_s29, 8  ;;  %s830_s4 = smul.u32 576, %s1102_s21 }
  0x2d   : > { %s216_s18 = scalar_lea.vmem [#allocation4], %s773_s25  ;;  %s1268_s10 = scalar_lea.sflag [#allocation5], %s212_s29 }
  0x2e   : > { %s226_s27 = sshll.u32 %s216_s18, 4  ;;  %s223_s8 = sadd.s32 %s830_s4, %s775_s26  ;;  %s1261_s27 = int_to_ptr.vmem [resolvable:$true] %s226_s27 }
  0x2f   : > { %s777_s28 = sshll.u32 %s223_s8, 6  ;;  %s988_s26 = scalar_lea.hbm %s1405_s1, 110592 }
  0x30   : > { %s1266_s30 = scalar_lea.hbm %s1405_s1, %s777_s28 }
  0x31   : > { %s984_s24 = scalar_lea.hbm %s1266_s30, 4096  ;;  %p989_p6 = scmp.lt.u32.totalorder %s1266_s30, %s1405_s1 }
  0x32   : > { %p985_p3 = scmp.ne.s32.totalorder %s1266_s30, %s984_s24  ;;  %p990_p7 = scmp.lt.u32.totalorder %s988_s26, %s984_s24 }
  0x33   : > { %p992_p10 = scmp.lt.u32.totalorder %s984_s24, %s1266_s30 }
  0x34   : > { %p986_p4 = pnand %p985_p3, %p1225_p9  ;;  %p991_p8 = por %p990_p7, %p989_p6 }
  0x36   : > { %p987_p5 = pneg %p986_p4  ;;  %p993_p11 = por %p992_p10, %p991_p8 }
  0x38   : > { %p994_p13 = pnand %p993_p11, %p987_p5 }
  0x3a   : > { %997 = shalt.err (!%p994_p13)
}
  0x3b   : > { %s998_s29 = scalar_lea.vmem %s1261_s27, 4096  ;;  %s1112_s28 = smov [#allocation4]  }
  0x3c   : > { %p999_p0 = scmp.ne.s32.totalorder %s1261_s27, %s998_s29  ;;  %s1002_s5 = sshll.u32 %s1112_s28, 4  ;;  %s1003_s5 = int_to_ptr.vmem [resolvable:$false] %s1002_s5 }
  0x3d   : > { %s1004_s6 = scalar_lea.vmem %s1003_s5, 8192  ;;  %p1005_p4 = scmp.lt.s32.totalorder %s1261_s27, %s1003_s5 }
  0x3e   : > { %p1000_p2 = pnand %p999_p0, %p1225_p9  ;;  %p1006_p1 = scmp.lt.s32.totalorder %s1004_s6, %s998_s29 }
  0x40   : > { %p1001_p3 = pneg %p1000_p2  ;;  %p1007_p6 = por %p1006_p1, %p1005_p4 }
  0x42   : > { %p1008_p7 = pnand %p1007_p6, %p1001_p3 }
  0x44   : > { %1011 = shalt.err (!%p1008_p7)
}
  0x45   : > { %s1113_s24 = smov 1152   ;;  %s1114_s18 = smov 128  }
  0x46   : > { %s1115_s25 = smov 8  }
  0x47   : > { %831 = dma.hbm_to_vmem [thread:$0]  (%p1225_p9), %s1266_s30, 4096, %s1261_s27, %s1268_s10, %s1113_s24, %s1114_s18, %s1115_s25  }
  0x48 PF: > { %p778_p5 = scmp.ge.s32.totalorder %s1110_s23, 1  ;;  %p242_p8 = scmp.lt.s32.totalorder %s1110_s23, 28 }
  0x4a   : > { %p243_p10 = pnand %p778_p5, %p242_p8 }
  0x4b   : > { %s249_s26 = sand.u32 (!%p243_p10), 1, %s1086_s17   ;;  %s255_s4 = sand.u32 (!%p243_p10), 1, %s1078_s15  }
  0x4c   : > { %246 = sbr.rel (%p243_p10) target bundleno = 399 (0x18f), region = 66  ;;  %s1296_s8 = sshll.u32 (!%p243_p10), %s249_s26, 4 }
  0x4d   : > { %s780_s29 = sshll.u32 (!%p243_p10), %s255_s4, 8  ;;  %s251_s28 = scalar_lea.vmem (!%p243_p10), [#allocation3], %s1296_s8 }
  0x4e   : > { %s256_s5 = scalar_lea.sflag (!%p243_p10), [#allocation5], %s255_s4  ;;  %s1299_s7 = scalar_lea.vmem (!%p243_p10), [#allocation4], %s780_s29 }
  0x53   : > { %1061 = dma.done.wait (%p1234_p12), %s256_s5, 4096  }
  0x54   : > { %1063 = vsyncadd (%p1234_p12), %s256_s5, 4294963200  ;;  %s286_s27 = sand.u32 1, %s1066_s12   ;;  %s782_s30 = sshll.u32 %s1098_s20, 1 }
  0x55   : > { %s781_s10 = sshll.u32 %s286_s27, 4  ;;  %p294_p9 = scmp.lt.s32.totalorder %s782_s30, 17 }
  0x56   : > { %s1313_s18 = scalar_lea.vmem [#allocation6], %s781_s10  ;;  %p783_p1 = scmp.ne.s32.totalorder %s1094_s19, 0 }
  0x57   : > { %s1442_s30 = smov (!%p294_p9, %s782_s30), 17  ;;  %v1116_v2 = vmov (!%p783_p1), 0.0  }
  0x58   : > { %s296_s24 = scalar_lea.vmem %s1406_s2, %s1442_s30  ;;  %303 = sbr.rel (%p783_p1) target bundleno = 95 (0x5f), region = 78  ;;  %304 = vst [vmem:[#allocation2] sm:$0xff] (!%p783_p1), %v1116_v2  ;;  %305 = vst [vmem:[#allocation2 + $0x8] sm:$0xff] (!%p783_p1), %v1116_v2 }
  0x59   : > { %306 = vst [vmem:[#allocation2 + $0x10] sm:$0xff] (!%p783_p1), %v1116_v2  ;;  %307 = vst [vmem:[#allocation2 + $0x18] sm:$0xff] (!%p783_p1), %v1116_v2 }
  0x5f PF: > { %v933_v3 = vld [vmem:[%s1299_s7 + $0x4] ss:$8 sps:$4 sm:$0xff]   ;;  %v935_v4 = vld [vmem:[%s1299_s7] ss:$8 sps:$4 sm:$0xff]   ;;  %v936_v5 = vld [vmem:[%s1299_s7 + $0x14] ss:$8 sps:$4 sm:$0xff]  }
  0x60   : > { %516 = vmatprep.subr.bf16.mxu0 %v933_v3  ;;  %v938_v6 = vld [vmem:[%s1299_s7 + $0x10] ss:$8 sps:$4 sm:$0xff]   ;;  %v939_v7 = vld [vmem:[%s1299_s7 + $0x24] ss:$8 sps:$4 sm:$0xff]   ;;  %v941_v8 = vld [vmem:[%s1299_s7 + $0x20] ss:$8 sps:$4 sm:$0xff]  }
  0x61   : > { %517 = vmatpush1.bf16.msra.mxu0 %v935_v4  ;;  %v942_v9 = vld [vmem:[%s1299_s7 + $0x34] ss:$8 sps:$4 sm:$0xff]   ;;  %v944_v10 = vld [vmem:[%s1299_s7 + $0x30] ss:$8 sps:$4 sm:$0xff]   ;;  %v945_v11 = vld [vmem:[%s1299_s7 + $0x44] ss:$8 sps:$4 sm:$0xff]  }
  0x62   : > { %518 = vmatprep.subr.bf16.mxu0 %v936_v5  ;;  %v947_v12 = vld [vmem:[%s1299_s7 + $0x40] ss:$8 sps:$4 sm:$0xff]   ;;  %v948_v13 = vld [vmem:[%s1299_s7 + $0x54] ss:$8 sps:$4 sm:$0xff]   ;;  %v950_v14 = vld [vmem:[%s1299_s7 + $0x50] ss:$8 sps:$4 sm:$0xff]  }
  0x63   : > { %v951_v15 = vld [vmem:[%s1299_s7 + $0x64] ss:$8 sps:$4 sm:$0xff]   ;;  %v953_v17 = vld [vmem:[%s1299_s7 + $0x60] ss:$8 sps:$4 sm:$0xff]   ;;  %v954_v18 = vld [vmem:[%s1299_s7 + $0x74] ss:$8 sps:$4 sm:$0xff]  }
  0x64   : > { %v983_v16 = vld [vmem:[%s251_s28 + $0x4] ss:$8 sps:$4 sm:$0xff]   ;;  %v956_v19 = vld [vmem:[%s1299_s7 + $0x70] ss:$8 sps:$4 sm:$0xff]   ;;  %v959_v21 = vld [vmem:[%s1299_s7 + $0x80] ss:$8 sps:$4 sm:$0xff]  }
  0x65   : > { %519 = vmatpush1.bf16.msra.mxu0 %v938_v6  ;;  %548 = vmatprep.mubr.bf16.mxu0 %v983_v16  ;;  %v957_v20 = vld [vmem:[%s1299_s7 + $0x84] ss:$8 sps:$4 sm:$0xff]   ;;  %v960_v22 = vld [vmem:[%s1299_s7 + $0x94] ss:$8 sps:$4 sm:$0xff]   ;;  %v962_v23 = vld [vmem:[%s1299_s7 + $0x90] ss:$8 sps:$4 sm:$0xff]  }
  0x66   : > { %520 = vmatprep.subr.bf16.mxu0 %v939_v7  ;;  %v963_v24 = vld [vmem:[%s1299_s7 + $0xa4] ss:$8 sps:$4 sm:$0xff]   ;;  %v965_v25 = vld [vmem:[%s1299_s7 + $0xa0] ss:$8 sps:$4 sm:$0xff]   ;;  %v966_v26 = vld [vmem:[%s1299_s7 + $0xb4] ss:$8 sps:$4 sm:$0xff]  }
  0x67   : > { %v968_v27 = vld [vmem:[%s1299_s7 + $0xb0] ss:$8 sps:$4 sm:$0xff]   ;;  %v969_v28 = vld [vmem:[%s1299_s7 + $0xc4] ss:$8 sps:$4 sm:$0xff]   ;;  %v971_v29 = vld [vmem:[%s1299_s7 + $0xc0] ss:$8 sps:$4 sm:$0xff]  }
  0x68   : > { %v972_v30 = vld [vmem:[%s1299_s7 + $0xd4] ss:$8 sps:$4 sm:$0xff]   ;;  %v974_v31 = vld [vmem:[%s1299_s7 + $0xd0] ss:$8 sps:$4 sm:$0xff]   ;;  %v975_v32 = vld [vmem:[%s1299_s7 + $0xe4] ss:$8 sps:$4 sm:$0xff]  }
  0x69   : > { %521 = vmatpush1.bf16.msra.mxu0 %v941_v8  ;;  %v977_v33 = vld [vmem:[%s1299_s7 + $0xe0] ss:$8 sps:$4 sm:$0xff]   ;;  %v978_v34 = vld [vmem:[%s1299_s7 + $0xf4] ss:$8 sps:$4 sm:$0xff]   ;;  %v980_v35 = vld [vmem:[%s1299_s7 + $0xf0] ss:$8 sps:$4 sm:$0xff]  }
  0x6a   : > { %522 = vmatprep.subr.bf16.mxu0 %v942_v9  ;;  %v981_v36 = vld [vmem:[%s251_s28] ss:$8 sps:$4 sm:$0xff]   ;;  %p818_p12 = scmp.ne.s32.totalorder %s1094_s19, 2 }
  0x6b   : > { %v308_v37 = vld [vmem:[#allocation2] sm:$0xff]  ;;  %v309_v38 = vld [vmem:[#allocation2 + $0x8] sm:$0xff]  ;;  %v310_v40 = vld [vmem:[#allocation2 + $0x10] sm:$0xff]  ;;  %v577_v49 = vlaneseq (!%p818_p12) }
  0x6c   : > { %v311_v43 = vld [vmem:[#allocation2 + $0x18] sm:$0xff]  ;;  %v575_v51 = vld [vmem:[%s296_s24] sm:$0x3] (!%p818_p12) }
  0x6d   : > { %523 = vmatpush1.bf16.msra.mxu0 %v944_v10  ;;  %v578_v50 = vshrl.u32 (!%p818_p12), %v577_v49, 7 }
  0x6e   : > { %524 = vmatprep.subr.bf16.mxu0 %v945_v11 }
  0x6f   : > { %v579_v53 = vsub.s32 (!%p818_p12), 0, %v578_v50  ;;  %v583_v54 = vsub.s32 (!%p818_p12), 1, %v578_v50 }
  0x71   : > { %525 = vmatpush1.bf16.msra.mxu0 %v947_v12  ;;  %v580_v58 = vrot.slane (!%p818_p12), %v575_v51, %v579_v53  ;;  %v584_v59 = vrot.slane (!%p818_p12), %v575_v51, %v583_v54 }
  0x72   : > { %526 = vmatprep.subr.bf16.mxu0 %v948_v13 }
  0x75   : > { %527 = vmatpush1.bf16.msra.mxu0 %v950_v14 }
  0x76   : > { %528 = vmatprep.subr.bf16.mxu0 %v951_v15 }
  0x79   : > { %529 = vmatpush1.bf16.msra.mxu0 %v953_v17 }
  0x7a   : > { %530 = vmatprep.subr.bf16.mxu0 %v954_v18 }
  0x7d   : > { %531 = vmatpush1.bf16.msra.mxu0 %v956_v19 }
  0x7e   : > { %532 = vmatprep.subr.bf16.mxu0 %v957_v20 }
  0x81   : > { %533 = vmatpush1.bf16.msra.mxu0 %v959_v21 }
  0x82   : > { %534 = vmatprep.subr.bf16.mxu0 %v960_v22 }
  0x85   : > { %535 = vmatpush1.bf16.msra.mxu0 %v962_v23 }
  0x86   : > { %536 = vmatprep.subr.bf16.mxu0 %v963_v24 }
  0x89   : > { %537 = vmatpush1.bf16.msra.mxu0 %v965_v25 }
  0x8a   : > { %538 = vmatprep.subr.bf16.mxu0 %v966_v26 }
  0x8d   : > { %539 = vmatpush1.bf16.msra.mxu0 %v968_v27 }
  0x8e   : > { %540 = vmatprep.subr.bf16.mxu0 %v969_v28 }
  0x91   : > { %541 = vmatpush1.bf16.msra.mxu0 %v971_v29 }
  0x92   : > { %542 = vmatprep.subr.bf16.mxu0 %v972_v30 }
  0x95   : > { %543 = vmatpush1.bf16.msra.mxu0 %v974_v31 }
  0x96   : > { %544 = vmatprep.subr.bf16.mxu0 %v975_v32 }
  0x99   : > { %545 = vmatpush1.bf16.msra.mxu0 %v977_v33 }
  0x9a   : > { %546 = vmatprep.subr.bf16.mxu0 %v978_v34 }
  0x9d   : > { %547 = vmatpush1.bf16.msra.mxu0 %v980_v35 }
  0xa0   : > { %549 = vmatmul.mubr.bf16.vlgmr.msra.gmra.mrb[0].mxu0 %v981_v36 }
 0x173   : > { %v550_v39 = vpop.f32.mrb[0].mxu0  ;;  %570 = sbr.rel (%p818_p12) target bundleno = 390 (0x186), region = 82 }
 0x174   : > { %v559_v41 = vadd.f32 %v550_v39, %v308_v37  ;;  %v552_v42 = vpop.f32.mrb[1].mxu0 }
 0x175   : > { %v560_v44 = vadd.f32 %v552_v42, %v309_v38  ;;  %v554_v45 = vpop.f32.mrb[2].mxu0 }
 0x176   : > { %563 = vst [vmem:[#allocation2] sm:$0xff] %v559_v41  ;;  %v561_v46 = vadd.f32 %v554_v45, %v310_v40  ;;  %v556_v47 = vpop.f32.mrb[3].mxu0 }
 0x177   : > { %564 = vst [vmem:[#allocation2 + $0x8] sm:$0xff] %v560_v44  ;;  %v562_v48 = vadd.f32 %v556_v47, %v311_v43 }
 0x178   : > { %565 = vst [vmem:[#allocation2 + $0x10] sm:$0xff] %v561_v46 }
 0x179   : > { %566 = vst [vmem:[#allocation2 + $0x18] sm:$0xff] %v562_v48 }
 0x17d   : > { %v571_v52 = vld [vmem:[#allocation2] sm:$0xff] }
 0x17e   : > { %v572_v55 = vld [vmem:[#allocation2 + $0x8] sm:$0xff]  ;;  %v587_v60 = vadd.f32 %v580_v58, %v571_v52 }
 0x17f   : > { %v573_v56 = vld [vmem:[#allocation2 + $0x10] sm:$0xff]  ;;  %v588_v61 = vadd.f32 %v584_v59, %v572_v55 }
 0x180   : > { %v574_v57 = vld [vmem:[#allocation2 + $0x18] sm:$0xff]  ;;  %v589_v62 = vadd.f32 %v580_v58, %v573_v56 }
 0x181   : > { %v590_v63 = vadd.f32 %v584_v59, %v574_v57  ;;  %v827_v0 = vpack.c.bf16 %v588_v61, %v587_v60 }
 0x183   : > { %v828_v1 = vpack.c.bf16 %v590_v63, %v589_v62  ;;  %603 = vst [vmem:[%s1313_s18] sm:$0xff] %v827_v0 }
 0x185   : > { %604 = vst [vmem:[%s1313_s18 + $0x8] sm:$0xff] %v828_v1 }
 0x186 PF: > { %p1420_p11 = scmp.ne.s32.totalorder %s1419_s14, 0 }
 0x187   : > { %s829_s19 = sshll.u32 (%p1420_p11), %s1098_s20, 3 }
 0x188   : > { %611 = sbr.rel (!%p1420_p11) target bundleno = 399 (0x18f), region = 86  ;;  %s617_s4 = scalar_lea.vmem (%p1420_p11), %s1407_s3, %s829_s19 }
 0x18a   : > { %v647_v2 = vld [vmem:[%s1313_s18] sm:$0xff] (%p1420_p11) }
 0x18b   : > { %648 = vst [vmem:[%s617_s4] sm:$0xff] (%p1420_p11), %v647_v2 }
 0x18c   : > { %v649_v3 = vld [vmem:[%s1313_s18 + $0x8] sm:$0xff] (%p1420_p11) }
 0x18d   : > { %650 = vst [vmem:[%s617_s4 + $0x48] sm:$0xff] (%p1420_p11), %v649_v3 }
 0x18f PF: > { %s16_s23 = sadd.s32 1, %s1110_s23   ;;  %s1421_s8 = sld [smem:[#allocation12_spill]] }
 0x190   : > { %p13_p13 = scmp.ge.s32.totalorder %s16_s23, 29   ;;  %s1422_s17 = sld [smem:[#allocation8_spill]] }
 0x191   : > { %s1423_s18 = sld [smem:[#allocation11_spill]]  ;;  %s1424_s29 = sld [smem:[#allocation9_spill]] }
 0x192   : > { %s1425_s28 = sld [smem:[#allocation10_spill]]  ;;  %s1426_s12 = smov %s1070_s13 }
 0x193   : > { %s1427_s13 = smov %s1240_s11  ;;  %s1428_s14 = smov %s1078_s15 }
 0x194   : > { %s1429_s15 = smov %s1082_s16  ;;  %s1431_s19 = smov %s1102_s21 }
 0x195   : > { %s1430_s16 = smov %s1421_s8  ;;  %s1432_s20 = smov %s1106_s22 }
 0x196   :  { %15 = sbr.rel (!%p13_p13) target bundleno = 7 (0x7), region = 167 }
 0x197   : > { %s1433_s21 = smov %s1424_s29 }
 0x198   : > { %s1434_s22 = smov %s1425_s28 }
 0x19d   :  { %666 = vsyncpa [#allocation5], 1 }
 0x19e   :  { %668 = vsyncpa [#allocation5 + $0x1], 1 }

// kernel: forward.20
= control target key start
LH: loop header
LB: loop body
LE: loop exit
PB: predicated region body
PF: predicated region fallthrough
CT: control target
= control target key end

     0   :  { %s428_s0 = inlined_call_operand.vmem [shape: bf16[16,768], index: 0, kind: input, shape index: {}]   ;;  %s429_s1 = inlined_call_operand.vmem [shape: bf16[16,768], index: 1, kind: input, shape index: {}]   ;;  %s430_s2 = inlined_call_operand.vmem [shape: f32[1,768], index: 2, kind: input, shape index: {}]   ;;  %s431_s3 = inlined_call_operand.vmem [shape: f32[1,768], index: 3, kind: input, shape index: {}]   ;;  %s432_s4 = inlined_call_operand.vmem [shape: bf16[16,768], index: 4, kind: output, shape index: {}]  }
   0x1   :  { %v17_v0 = vld [vmem:[%s428_s0] sm:$0xff]  ;;  %v18_v1 = vld [vmem:[%s428_s0 + $0x8] sm:$0xff]  ;;  %v19_v2 = vld [vmem:[%s428_s0 + $0x10] sm:$0xff] }
   0x2   :  { %v23_v3 = vunpack.c.l.bf16 %v17_v0  ;;  %v24_v4 = vunpack.c.h.bf16 %v17_v0  ;;  %v25_v5 = vunpack.c.l.bf16 %v18_v1  ;;  %v35_v6 = vld [vmem:[%s429_s1] sm:$0xff]  ;;  %v36_v7 = vld [vmem:[%s429_s1 + $0x8] sm:$0xff]  ;;  %v37_v8 = vld [vmem:[%s429_s1 + $0x10] sm:$0xff]  ;;  %v26_v9 = vunpack.c.h.bf16 %v18_v1 }
   0x3   :  { %v41_v10 = vunpack.c.l.bf16 %v35_v6  ;;  %v42_v11 = vunpack.c.h.bf16 %v35_v6  ;;  %v20_v12 = vld [vmem:[%s428_s0 + $0x18] sm:$0xff]  ;;  %v43_v13 = vunpack.c.l.bf16 %v36_v7  ;;  %v44_v14 = vunpack.c.h.bf16 %v36_v7  ;;  %v21_v15 = vld [vmem:[%s428_s0 + $0x20] sm:$0xff]  ;;  %v22_v24 = vld [vmem:[%s428_s0 + $0x28] sm:$0xff] }
   0x4   :  { %v27_v16 = vunpack.c.l.bf16 %v19_v2  ;;  %v45_v17 = vunpack.c.l.bf16 %v37_v8  ;;  %v38_v20 = vld [vmem:[%s429_s1 + $0x18] sm:$0xff]  ;;  %v39_v21 = vld [vmem:[%s429_s1 + $0x20] sm:$0xff]  ;;  %v28_v22 = vunpack.c.h.bf16 %v19_v2  ;;  %v29_v25 = vunpack.c.l.bf16 %v20_v12  ;;  %v40_v31 = vld [vmem:[%s429_s1 + $0x28] sm:$0xff] }
   0x5   :  { %v53_v18 = vadd.f32 %v41_v10, %v23_v3  ;;  %v54_v19 = vadd.f32 %v42_v11, %v24_v4  ;;  %v55_v23 = vadd.f32 %v43_v13, %v25_v5  ;;  %v30_v26 = vunpack.c.h.bf16 %v20_v12 }
   0x6   :  { %v46_v27 = vunpack.c.h.bf16 %v37_v8  ;;  %v56_v28 = vadd.f32 %v44_v14, %v26_v9  ;;  %v31_v30 = vunpack.c.l.bf16 %v21_v15  ;;  %v32_v32 = vunpack.c.h.bf16 %v21_v15 }
   0x7   :  { %v67_v29 = vadd.f32 %v54_v19, %v53_v18  ;;  %v47_v33 = vunpack.c.l.bf16 %v38_v20  ;;  %v48_v34 = vunpack.c.h.bf16 %v38_v20  ;;  %v49_v35 = vunpack.c.l.bf16 %v39_v21 }
   0x8   :  { %v57_v36 = vadd.f32 %v45_v17, %v27_v16  ;;  %v33_v38 = vunpack.c.l.bf16 %v22_v24  ;;  %v50_v39 = vunpack.c.h.bf16 %v39_v21  ;;  %v51_v40 = vunpack.c.l.bf16 %v40_v31 }
   0x9   :  { %v68_v37 = vadd.f32 %v67_v29, %v55_v23  ;;  %v59_v41 = vadd.f32 %v47_v33, %v29_v25  ;;  %v60_v42 = vadd.f32 %v48_v34, %v30_v26  ;;  %v61_v43 = vadd.f32 %v49_v35, %v31_v30 }
   0xa   :  { %v58_v44 = vadd.f32 %v46_v27, %v28_v22  ;;  %v34_v46 = vunpack.c.h.bf16 %v22_v24  ;;  %v52_v47 = vunpack.c.h.bf16 %v40_v31  ;;  %v62_v48 = vadd.f32 %v50_v39, %v32_v32 }
   0xb   :  { %v69_v45 = vadd.f32 %v68_v37, %v56_v28  ;;  %v74_v49 = vadd.f32 %v60_v42, %v59_v41  ;;  %v63_v51 = vadd.f32 %v51_v40, %v33_v38  ;;  %v141_v33 = vlaneseq }
   0xc   :  { %v64_v54 = vadd.f32 %v52_v47, %v34_v46  ;;  %v66_v47 = vld [vmem:[%s431_s3] sm:$0x3f] }
   0xd   :  { %v70_v50 = vadd.f32 %v69_v45, %v57_v36  ;;  %v75_v52 = vadd.f32 %v74_v49, %v61_v43 }
   0xf   :  { %v71_v53 = vadd.f32 %v70_v50, %v58_v44  ;;  %v76_v55 = vadd.f32 %v75_v52, %v62_v48 }
  0x11   :  { %72 = vadd.xlane.f32.xlu0 %v71_v53  ;;  %v77_v56 = vadd.f32 %v76_v55, %v63_v51 }
  0x13   :  { %v78_v57 = vadd.f32 %v77_v56, %v64_v54 }
  0x15   :  { %79 = vadd.xlane.f32.xlu0 %v78_v57 }
  0x9e   :  { %v73_v58 = vpop.xlane.xlu0 %72 }
  0x9f   :  { %v82_v59 = vmul.f32 0.0013020834, %v73_v58 }
  0xa1   :  { %v349_v60 = vsub.f32 %v53_v18, %v82_v59  ;;  %v351_v61 = vsub.f32 %v54_v19, %v82_v59  ;;  %v353_v62 = vsub.f32 %v55_v23, %v82_v59  ;;  %v355_v0 = vsub.f32 %v56_v28, %v82_v59 }
  0xa2   :  { %v80_v63 = vpop.xlane.xlu0 %79  ;;  %v361_v4 = vsub.f32 %v57_v36, %v82_v59  ;;  %v89_v10 = vsub.f32 %v58_v44, %v82_v59  ;;  %v142_v36 = vshrl.u32 %v141_v33, 7 }
  0xa3   :  { %v96_v1 = vmul.f32 %v349_v60, %v349_v60  ;;  %v97_v2 = vmul.f32 %v351_v61, %v351_v61  ;;  %v83_v3 = vmul.f32 0.0013020834, %v80_v63  ;;  %v98_v5 = vmul.f32 %v353_v62, %v353_v62 }
  0xa4   :  { %v99_v11 = vmul.f32 %v355_v0, %v355_v0  ;;  %v100_v16 = vmul.f32 %v361_v4, %v361_v4  ;;  %v101_v21 = vmul.f32 %v89_v10, %v89_v10  ;;  %v143_v40 = vsub.s32 0, %v142_v36 }
  0xa5   :  { %v108_v6 = vadd.f32 %v97_v2, %v96_v1  ;;  %v365_v7 = vsub.f32 %v59_v41, %v83_v3  ;;  %v367_v8 = vsub.f32 %v60_v42, %v83_v3  ;;  %v369_v9 = vsub.f32 %v61_v43, %v83_v3  ;;  %v65_v43 = vld [vmem:[%s430_s2] sm:$0x3f] }
  0xa6   :  { %v373_v13 = vsub.f32 %v62_v48, %v83_v3  ;;  %v381_v18 = vsub.f32 %v63_v51, %v83_v3  ;;  %v385_v23 = vsub.f32 %v64_v54, %v83_v3  ;;  %v147_v41 = vsub.s32 1, %v142_v36 }
  0xa7   :  { %v109_v12 = vadd.f32 %v108_v6, %v98_v5  ;;  %v102_v14 = vmul.f32 %v365_v7, %v365_v7  ;;  %v103_v15 = vmul.f32 %v367_v8, %v367_v8  ;;  %v104_v19 = vmul.f32 %v369_v9, %v369_v9 }
  0xa8   :  { %v105_v24 = vmul.f32 %v373_v13, %v373_v13  ;;  %v106_v27 = vmul.f32 %v381_v18, %v381_v18  ;;  %v107_v29 = vmul.f32 %v385_v23, %v385_v23  ;;  %v151_v42 = vsub.s32 2, %v142_v36 }
  0xa9   :  { %v110_v17 = vadd.f32 %v109_v12, %v99_v11  ;;  %v115_v20 = vadd.f32 %v103_v15, %v102_v14  ;;  %v155_v44 = vsub.s32 3, %v142_v36  ;;  %v159_v45 = vsub.s32 4, %v142_v36 }
  0xaa   :  { %v163_v46 = vsub.s32 5, %v142_v36  ;;  %v144_v48 = vrot.slane %v65_v43, %v143_v40  ;;  %v148_v49 = vrot.slane %v65_v43, %v147_v41  ;;  %v152_v50 = vrot.slane %v65_v43, %v151_v42 }
  0xab   :  { %v111_v22 = vadd.f32 %v110_v17, %v100_v16  ;;  %v116_v25 = vadd.f32 %v115_v20, %v104_v19  ;;  %v156_v51 = vrot.slane %v65_v43, %v155_v44  ;;  %v160_v52 = vrot.slane %v65_v43, %v159_v45 }
  0xac   :  { %v164_v53 = vrot.slane %v65_v43, %v163_v46  ;;  %v187_v55 = vrot.slane %v66_v47, %v143_v40  ;;  %v191_v56 = vrot.slane %v66_v47, %v147_v41  ;;  %v195_v57 = vrot.slane %v66_v47, %v151_v42 }
  0xad   :  { %v112_v26 = vadd.f32 %v111_v22, %v101_v21  ;;  %v117_v28 = vadd.f32 %v116_v25, %v105_v24  ;;  %v199_v58 = vrot.slane %v66_v47, %v155_v44  ;;  %v203_v3 = vrot.slane %v66_v47, %v159_v45 }
  0xae   :  { %v207_v5 = vrot.slane %v66_v47, %v163_v46 }
  0xaf   :  { %113 = vadd.xlane.f32.xlu1 %v112_v26  ;;  %v118_v30 = vadd.f32 %v117_v28, %v106_v27 }
  0xb1   :  { %v119_v31 = vadd.f32 %v118_v30, %v107_v29 }
  0xb3   :  { %120 = vadd.xlane.f32.xlu1 %v119_v31 }
 0x13c   :  { %v114_v32 = vpop.xlane.xlu1 %113 }
 0x13d   :  { %v122_v34 = vmul.f32 0.0013020834, %v114_v32 }
 0x13f   :  { %v124_v35 = vadd.f32 1e-07, %v122_v34 }
 0x140   :  { %v121_v37 = vpop.xlane.xlu1 %120 }
 0x141   :  { %284 = vrsqrt.f32 %v124_v35  ;;  %v123_v38 = vmul.f32 0.0013020834, %v121_v37 }
 0x143   :  { %v125_v39 = vadd.f32 1e-07, %v123_v38 }
 0x145   :  { %286 = vrsqrt.f32 %v125_v39 }
 0x14b   :  { %v285_v54 = vpop.eup %284 }
 0x14c   :  { %v128_v59 = vmul.f32 %v285_v54, %v349_v60  ;;  %v129_v63 = vmul.f32 %v285_v54, %v351_v61  ;;  %v130_v1 = vmul.f32 %v285_v54, %v353_v62  ;;  %v131_v2 = vmul.f32 %v285_v54, %v355_v0 }
 0x14d   :  { %v132_v6 = vmul.f32 %v285_v54, %v361_v4  ;;  %v133_v11 = vmul.f32 %v285_v54, %v89_v10 }
 0x14e   :  { %v171_v12 = vmul.f32 %v144_v48, %v128_v59  ;;  %v172_v14 = vmul.f32 %v148_v49, %v129_v63  ;;  %v173_v15 = vmul.f32 %v152_v50, %v130_v1  ;;  %v174_v16 = vmul.f32 %v156_v51, %v131_v2 }
 0x14f   :  { %v175_v17 = vmul.f32 %v160_v52, %v132_v6  ;;  %v176_v19 = vmul.f32 %v164_v53, %v133_v11  ;;  %v287_v20 = vpop.eup %286 }
 0x150   :  { %v214_v21 = vadd.f32 %v187_v55, %v171_v12  ;;  %v215_v60 = vadd.f32 %v191_v56, %v172_v14  ;;  %v216_v22 = vadd.f32 %v195_v57, %v173_v15  ;;  %v217_v61 = vadd.f32 %v199_v58, %v174_v16 }
 0x151   :  { %v218_v24 = vadd.f32 %v203_v3, %v175_v17  ;;  %v219_v62 = vadd.f32 %v207_v5, %v176_v19  ;;  %v134_v0 = vmul.f32 %v287_v20, %v365_v7  ;;  %v135_v25 = vmul.f32 %v287_v20, %v367_v8 }
 0x152   :  { %v278_v26 = vpack.c.bf16 %v215_v60, %v214_v21  ;;  %v279_v4 = vpack.c.bf16 %v217_v61, %v216_v22  ;;  %v136_v10 = vmul.f32 %v287_v20, %v369_v9  ;;  %v137_v27 = vmul.f32 %v287_v20, %v373_v13 }
 0x153   :  { %v280_v28 = vpack.c.bf16 %v219_v62, %v218_v24  ;;  %v138_v29 = vmul.f32 %v287_v20, %v381_v18  ;;  %v139_v30 = vmul.f32 %v287_v20, %v385_v23  ;;  %v177_v31 = vmul.f32 %v144_v48, %v134_v0 }
 0x154   :  { %262 = vst [vmem:[%s432_s4] sm:$0xff] %v278_v26  ;;  %263 = vst [vmem:[%s432_s4 + $0x8] sm:$0xff] %v279_v4  ;;  %v178_v7 = vmul.f32 %v148_v49, %v135_v25  ;;  %v179_v8 = vmul.f32 %v152_v50, %v136_v10  ;;  %v180_v32 = vmul.f32 %v156_v51, %v137_v27 }
 0x155   :  { %264 = vst [vmem:[%s432_s4 + $0x10] sm:$0xff] %v280_v28  ;;  %v181_v9 = vmul.f32 %v160_v52, %v138_v29  ;;  %v182_v13 = vmul.f32 %v164_v53, %v139_v30  ;;  %v220_v18 = vadd.f32 %v187_v55, %v177_v31 }
 0x156   :  { %v221_v23 = vadd.f32 %v191_v56, %v178_v7  ;;  %v222_v33 = vadd.f32 %v195_v57, %v179_v8  ;;  %v223_v34 = vadd.f32 %v199_v58, %v180_v32 }
 0x157   :  { %v224_v35 = vadd.f32 %v203_v3, %v181_v9  ;;  %v225_v36 = vadd.f32 %v207_v5, %v182_v13 }
 0x158   :  { %v281_v37 = vpack.c.bf16 %v221_v23, %v220_v18  ;;  %v282_v38 = vpack.c.bf16 %v223_v34, %v222_v33 }
 0x159   :  { %v283_v39 = vpack.c.bf16 %v225_v36, %v224_v35 }
 0x15a   :  { %265 = vst [vmem:[%s432_s4 + $0x18] sm:$0xff] %v281_v37  ;;  %266 = vst [vmem:[%s432_s4 + $0x20] sm:$0xff] %v282_v38 }
 0x15b   :  { %267 = vst [vmem:[%s432_s4 + $0x28] sm:$0xff] %v283_v39 }

// kernel: forward.22
= control target key start
LH: loop header
LB: loop body
LE: loop exit
PB: predicated region body
PF: predicated region fallthrough
CT: control target
= control target key end

     0   :  { %s1214_s12 = smov 0   ;;  %s1216_s13 = smov 0   ;;  %s1501_s0 = inlined_call_operand.vmem [shape: bf16[16,3072], index: 0, kind: input, shape index: {}]   ;;  %s1502_s1 = inlined_call_operand.vmem [shape: bf16[3072,768], index: 1, kind: input, shape index: {}]   ;;  %s1503_s2 = inlined_call_operand.vmem [shape: f32[1,768], index: 2, kind: input, shape index: {}]   ;;  %s1504_s3 = inlined_call_operand.vmem [shape: bf16[16,768], index: 3, kind: output, shape index: {}]  }
   0x1   :  { %s1218_s14 = smov 0   ;;  %s1220_s15 = smov 0  }
   0x2   :  { %s1222_s16 = smov 0   ;;  %s1224_s17 = smov 0  }
   0x3   :  { %s1226_s18 = smov 0   ;;  %s1228_s19 = smov 0  }
   0x4   :  { %s1230_s20 = smov 0   ;;  %s1232_s21 = smov 0  }
   0x5   :  { %s1234_s22 = smov 0  }
   0x6 LB: > { %s900_s23 = sadd.s32 4294967295, %s1191_s22   ;;  %s25_s24 = sadd.s32 1, %s1183_s20  ;;  %s1191_s22 = sphi %s1234_s22, %s13_s22   ;;  %s1187_s21 = sphi %s1232_s21, %s1525_s21   ;;  %s1183_s20 = sphi %s1230_s20, %s1524_s20   ;;  %s1179_s19 = sphi %s1228_s19, %s1523_s19   ;;  %s1175_s18 = sphi %s1226_s18, %s1522_s18   ;;  %s1171_s17 = sphi %s1224_s17, %s1521_s17   ;;  %s1167_s16 = sphi %s1222_s16, %s1520_s16   ;;  %s1163_s15 = sphi %s1220_s15, %s1519_s15   ;;  %s1159_s14 = sphi %s1218_s14, %s1518_s14   ;;  %s1155_s13 = sphi %s1216_s13, %s1517_s13   ;;  %s1151_s12 = sphi %s1214_s12, %s1516_s12  }
   0x7   : > { %p26_p0 = scmp.ge.s32.totalorder %s25_s24, 12  ;;  %s28_s25 = sadd.s32 1, %s1187_s21 }
   0x8   : > { %s41_s26 = sadd.s32 1, %s1171_s17  ;;  %p48_p1 = scmp.ne.s32.totalorder %s1171_s17, %s1167_s16 }
   0x9   : > { %s1527_s24 = smov (%p26_p0, %s25_s24), 0  ;;  %s1529_s25 = smov (!%p26_p0, %s28_s25), %s1187_s21 }
   0xa   : > { %1507 = sst [smem:[#allocation6_spill]] %s1527_s24  ;;  %s37_s27 = ssub.s32 %s1183_s20, %s1527_s24 }
   0xb   : > { %p49_p2 = scmp.eq.s32.totalorder %s1191_s22, 0  ;;  %p30_p3 = scmp.ge.s32.totalorder %s1529_s25, 3 }
   0xc   : > { %p39_p4 = scmp.eq.s32.totalorder %s37_s27, 0  ;;  %s69_s29 = sadd.s32 1, %s1163_s15 }
   0xd   : > { %p1281_p5 = por %p49_p2, %p48_p1  ;;  %s1531_s25 = smov (%p30_p3, %s1529_s25), 0 }
   0xe   : > { %1509 = sst [smem:[#allocation7_spill]] %s1531_s25  ;;  %s65_s4 = ssub.s32 %s1187_s21, %s1531_s25 }
   0xf   : > { %s1289_s30 = scalar_select %p39_p4, %s1171_s17, %s41_s26  }
  0x10   : > { %p76_p6 = scmp.ne.s32.totalorder %s1163_s15, %s1159_s14  ;;  %s66_s5 = sor.u32 %s65_s4, %s37_s27 }
  0x11   : > { %1510 = sst [smem:[#allocation8_spill]] %s1289_s30  ;;  %p121_p7 = scmp.eq.s32.totalorder %s65_s4, 0 }
  0x12   : > { %p67_p8 = scmp.eq.s32.totalorder %s66_s5, 0  ;;  %p1295_p9 = por %p76_p6, %p49_p2 }
  0x13   : > { %s123_s7 = sadd.s32 1, %s1155_s13  ;;  %p133_p10 = scmp.ne.s32.totalorder %s1155_s13, %s1151_s12 }
  0x14   : > { %s1303_s8 = scalar_select %p67_p8, %s1163_s15, %s69_s29  }
  0x15   : > { %s1306_s9 = scalar_select %p121_p7, %s1155_s13, %s123_s7  }
  0x16   : > { %p134_p11 = scmp.eq.s32.totalorder %s900_s23, 35  ;;  %p903_p13 = scmp.ge.s32.totalorder %s1191_s22, 36 }
  0x18   : > { %p1308_p12 = por %p134_p11, %p133_p10  ;;  %156 = sbr.rel (%p903_p13) target bundleno = 62 (0x3e), region = 16 }
  0x1f   : > { %159 = sbr.rel (!%p1281_p5) target bundleno = 38 (0x26), region = 20  ;;  %s161_s11 = sand.u32 (%p1281_p5), 1, %s1171_s17  }
  0x20   : > { %s960_s26 = sshll.u32 (%p1281_p5), %s1183_s20, 3  ;;  %s904_s27 = sshll.u32 (%p1281_p5), %s161_s11, 4 }
  0x21   : > { %s169_s5 = scalar_lea.vmem (%p1281_p5), %s1501_s0, %s960_s26  ;;  %s163_s23 = scalar_lea.vmem (%p1281_p5), [#allocation3], %s904_s27 }
  0x22   : > { %v199_v0 = vld [vmem:[%s169_s5] sm:$0xff] (%p1281_p5) }
  0x23   : > { %v201_v1 = vld [vmem:[%s169_s5 + $0x60] sm:$0xff] (%p1281_p5)  ;;  %200 = vst [vmem:[%s163_s23] sm:$0xff] (%p1281_p5), %v199_v0 }
  0x24   : > { %202 = vst [vmem:[%s163_s23 + $0x8] sm:$0xff] (%p1281_p5), %v201_v1 }
  0x26 PF: > { %208 = sbr.rel (!%p1295_p9) target bundleno = 62 (0x3e), region = 58  ;;  %s210_s28 = sand.u32 (%p1295_p9), 1, %s1163_s15  }
  0x27   : > { %s909_s7 = sshll.u32 (%p1295_p9), %s1187_s21, 1  ;;  %s907_s25 = sshll.u32 (%p1295_p9), %s210_s28, 8 }
  0x28   : > { %s964_s11 = smul.u32 (%p1295_p9), 192, %s1183_s20  ;;  %s1333_s6 = scalar_lea.vmem (%p1295_p9), [#allocation4], %s907_s25 }
  0x2a   : > { %s216_s24 = sadd.s32 (%p1295_p9), %s964_s11, %s909_s7 }
  0x2b   : > { %s911_s30 = sshll.u32 (%p1295_p9), %s216_s24, 2 }
  0x2c   : > { %s1328_s4 = scalar_lea.vmem (%p1295_p9), %s1502_s1, %s911_s30 }
  0x2d   : > { %v308_v2 = vld [vmem:[%s1328_s4] sm:$0xff]  ;;  %v310_v3 = vld [vmem:[%s1328_s4 + $0x18] sm:$0xff]  ;;  %v312_v4 = vld [vmem:[%s1328_s4 + $0x30] sm:$0xff] }
  0x2e   : > { %309 = vst [vmem:[%s1333_s6] sm:$0xff] %v308_v2  ;;  %311 = vst [vmem:[%s1333_s6 + $0x8] sm:$0xff] %v310_v3  ;;  %v314_v5 = vld [vmem:[%s1328_s4 + $0x48] sm:$0xff]  ;;  %v316_v6 = vld [vmem:[%s1328_s4 + $0x60] sm:$0xff] }
  0x2f   : > { %313 = vst [vmem:[%s1333_s6 + $0x10] sm:$0xff] %v312_v4  ;;  %v318_v7 = vld [vmem:[%s1328_s4 + $0x78] sm:$0xff]  ;;  %315 = vst [vmem:[%s1333_s6 + $0x18] sm:$0xff] %v314_v5  ;;  %v320_v8 = vld [vmem:[%s1328_s4 + $0x90] sm:$0xff] }
  0x30   : > { %317 = vst [vmem:[%s1333_s6 + $0x20] sm:$0xff] %v316_v6  ;;  %319 = vst [vmem:[%s1333_s6 + $0x28] sm:$0xff] %v318_v7  ;;  %v322_v9 = vld [vmem:[%s1328_s4 + $0xa8] sm:$0xff]  ;;  %v324_v10 = vld [vmem:[%s1328_s4 + $0xc0] sm:$0xff] }
  0x31   : > { %321 = vst [vmem:[%s1333_s6 + $0x30] sm:$0xff] %v320_v8  ;;  %323 = vst [vmem:[%s1333_s6 + $0x38] sm:$0xff] %v322_v9  ;;  %v326_v11 = vld [vmem:[%s1328_s4 + $0xd8] sm:$0xff]  ;;  %v328_v12 = vld [vmem:[%s1328_s4 + $0xf0] sm:$0xff] }
  0x32   : > { %325 = vst [vmem:[%s1333_s6 + $0x40] sm:$0xff] %v324_v10  ;;  %v330_v13 = vld [vmem:[%s1328_s4 + $0x108] sm:$0xff]  ;;  %327 = vst [vmem:[%s1333_s6 + $0x48] sm:$0xff] %v326_v11  ;;  %v332_v14 = vld [vmem:[%s1328_s4 + $0x120] sm:$0xff] }
  0x33   : > { %329 = vst [vmem:[%s1333_s6 + $0x50] sm:$0xff] %v328_v12  ;;  %331 = vst [vmem:[%s1333_s6 + $0x58] sm:$0xff] %v330_v13  ;;  %v334_v15 = vld [vmem:[%s1328_s4 + $0x138] sm:$0xff]  ;;  %v336_v16 = vld [vmem:[%s1328_s4 + $0x150] sm:$0xff] }
  0x34   : > { %333 = vst [vmem:[%s1333_s6 + $0x60] sm:$0xff] %v332_v14  ;;  %335 = vst [vmem:[%s1333_s6 + $0x68] sm:$0xff] %v334_v15  ;;  %v338_v17 = vld [vmem:[%s1328_s4 + $0x168] sm:$0xff]  ;;  %v340_v18 = vld [vmem:[%s1328_s4 + $0x180] sm:$0xff] }
  0x35   : > { %337 = vst [vmem:[%s1333_s6 + $0x70] sm:$0xff] %v336_v16  ;;  %v342_v19 = vld [vmem:[%s1328_s4 + $0x198] sm:$0xff]  ;;  %339 = vst [vmem:[%s1333_s6 + $0x78] sm:$0xff] %v338_v17  ;;  %v344_v20 = vld [vmem:[%s1328_s4 + $0x1b0] sm:$0xff] }
  0x36   : > { %341 = vst [vmem:[%s1333_s6 + $0x80] sm:$0xff] %v340_v18  ;;  %343 = vst [vmem:[%s1333_s6 + $0x88] sm:$0xff] %v342_v19  ;;  %v346_v21 = vld [vmem:[%s1328_s4 + $0x1c8] sm:$0xff]  ;;  %v348_v22 = vld [vmem:[%s1328_s4 + $0x1e0] sm:$0xff] }
  0x37   : > { %345 = vst [vmem:[%s1333_s6 + $0x90] sm:$0xff] %v344_v20  ;;  %347 = vst [vmem:[%s1333_s6 + $0x98] sm:$0xff] %v346_v21  ;;  %v350_v23 = vld [vmem:[%s1328_s4 + $0x1f8] sm:$0xff]  ;;  %v352_v24 = vld [vmem:[%s1328_s4 + $0x210] sm:$0xff] }
  0x38   : > { %349 = vst [vmem:[%s1333_s6 + $0xa0] sm:$0xff] %v348_v22  ;;  %v354_v25 = vld [vmem:[%s1328_s4 + $0x228] sm:$0xff]  ;;  %351 = vst [vmem:[%s1333_s6 + $0xa8] sm:$0xff] %v350_v23  ;;  %v356_v26 = vld [vmem:[%s1328_s4 + $0x240] sm:$0xff] }
  0x39   : > { %353 = vst [vmem:[%s1333_s6 + $0xb0] sm:$0xff] %v352_v24  ;;  %355 = vst [vmem:[%s1333_s6 + $0xb8] sm:$0xff] %v354_v25  ;;  %v358_v27 = vld [vmem:[%s1328_s4 + $0x258] sm:$0xff]  ;;  %v360_v28 = vld [vmem:[%s1328_s4 + $0x270] sm:$0xff] }
  0x3a   : > { %357 = vst [vmem:[%s1333_s6 + $0xc0] sm:$0xff] %v356_v26  ;;  %359 = vst [vmem:[%s1333_s6 + $0xc8] sm:$0xff] %v358_v27  ;;  %v362_v29 = vld [vmem:[%s1328_s4 + $0x288] sm:$0xff]  ;;  %v364_v30 = vld [vmem:[%s1328_s4 + $0x2a0] sm:$0xff] }
  0x3b   : > { %361 = vst [vmem:[%s1333_s6 + $0xd0] sm:$0xff] %v360_v28  ;;  %v366_v31 = vld [vmem:[%s1328_s4 + $0x2b8] sm:$0xff]  ;;  %363 = vst [vmem:[%s1333_s6 + $0xd8] sm:$0xff] %v362_v29  ;;  %v368_v32 = vld [vmem:[%s1328_s4 + $0x2d0] sm:$0xff] }
  0x3c   : > { %365 = vst [vmem:[%s1333_s6 + $0xe0] sm:$0xff] %v364_v30  ;;  %367 = vst [vmem:[%s1333_s6 + $0xe8] sm:$0xff] %v366_v31  ;;  %v370_v33 = vld [vmem:[%s1328_s4 + $0x2e8] sm:$0xff] }
  0x3d   : > { %369 = vst [vmem:[%s1333_s6 + $0xf0] sm:$0xff] %v368_v32  ;;  %371 = vst [vmem:[%s1333_s6 + $0xf8] sm:$0xff] %v370_v33 }
  0x3e PF: > { %p912_p0 = scmp.ge.s32.totalorder %s1191_s22, 1  ;;  %p384_p1 = scmp.lt.s32.totalorder %s1191_s22, 37 }
  0x40   : > { %p385_p2 = pnand %p912_p0, %p384_p1 }
  0x41   : > { %s391_s24 = sand.u32 (!%p385_p2), 1, %s1167_s16   ;;  %s398_s25 = sand.u32 (!%p385_p2), 1, %s1159_s14  }
  0x42   : > { %388 = sbr.rel (%p385_p2) target bundleno = 383 (0x17f), region = 100  ;;  %s1400_s30 = sshll.u32 (!%p385_p2), %s391_s24, 4 }
  0x43   : > { %s914_s27 = sshll.u32 (!%p385_p2), %s398_s25, 8  ;;  %s425_s5 = sand.u32 (!%p385_p2), 1, %s1151_s12  }
  0x44   : > { %s916_s23 = sshll.u32 (!%p385_p2), %s1179_s19, 1  ;;  %s915_s28 = sshll.u32 (!%p385_p2), %s425_s5, 4 }
  0x45   : > { %p433_p3 = scmp.lt.s32.totalorder (!%p385_p2), %s916_s23, 5  ;;  %s393_s26 = scalar_lea.vmem (!%p385_p2), [#allocation3], %s1400_s30 }
  0x46   : > { %s1411_s4 = scalar_lea.vmem (!%p385_p2), [#allocation4], %s914_s27  ;;  %s1413_s16 = scalar_lea.vmem (!%p385_p2), [#allocation5], %s915_s28 }
  0x47   : > { %p917_p4 = scmp.ne.s32.totalorder (!%p385_p2), %s1175_s18, 0 }
  0x49   : > { %s1533_s23 = smov (!%p433_p3, %s916_s23), 5  ;;  %442 = sbr.rel (%p917_p4) target bundleno = 80 (0x50), region = 112 }
  0x4a   : > { %s435_s29 = scalar_lea.vmem %s1503_s2, %s1533_s23  ;;  %v1193_v34 = vmov (!%p917_p4), 0.0  }
  0x4b   : > { %443 = vst [vmem:[#allocation2] sm:$0xff] (!%p917_p4), %v1193_v34  ;;  %444 = vst [vmem:[#allocation2 + $0x8] sm:$0xff] (!%p917_p4), %v1193_v34 }
  0x4c   : > { %445 = vst [vmem:[#allocation2 + $0x10] sm:$0xff] (!%p917_p4), %v1193_v34  ;;  %446 = vst [vmem:[#allocation2 + $0x18] sm:$0xff] (!%p917_p4), %v1193_v34 }
  0x50 PF: > { %v1054_v35 = vld [vmem:[%s1411_s4 + $0x4] ss:$8 sps:$4 sm:$0xff]   ;;  %v1056_v36 = vld [vmem:[%s1411_s4] ss:$8 sps:$4 sm:$0xff]   ;;  %v1057_v37 = vld [vmem:[%s1411_s4 + $0x14] ss:$8 sps:$4 sm:$0xff]  }
  0x51   : > { %655 = vmatprep.subr.bf16.mxu0 %v1054_v35  ;;  %v1059_v38 = vld [vmem:[%s1411_s4 + $0x10] ss:$8 sps:$4 sm:$0xff]   ;;  %v1060_v39 = vld [vmem:[%s1411_s4 + $0x24] ss:$8 sps:$4 sm:$0xff]   ;;  %v1062_v40 = vld [vmem:[%s1411_s4 + $0x20] ss:$8 sps:$4 sm:$0xff]  }
  0x52   : > { %656 = vmatpush1.bf16.msra.mxu0 %v1056_v36  ;;  %v1063_v41 = vld [vmem:[%s1411_s4 + $0x34] ss:$8 sps:$4 sm:$0xff]   ;;  %v1065_v42 = vld [vmem:[%s1411_s4 + $0x30] ss:$8 sps:$4 sm:$0xff]   ;;  %v1066_v43 = vld [vmem:[%s1411_s4 + $0x44] ss:$8 sps:$4 sm:$0xff]  }
  0x53   : > { %657 = vmatprep.subr.bf16.mxu0 %v1057_v37  ;;  %v1068_v44 = vld [vmem:[%s1411_s4 + $0x40] ss:$8 sps:$4 sm:$0xff]   ;;  %v1069_v45 = vld [vmem:[%s1411_s4 + $0x54] ss:$8 sps:$4 sm:$0xff]   ;;  %v1071_v46 = vld [vmem:[%s1411_s4 + $0x50] ss:$8 sps:$4 sm:$0xff]  }
  0x54   : > { %v1072_v47 = vld [vmem:[%s1411_s4 + $0x64] ss:$8 sps:$4 sm:$0xff]   ;;  %v1074_v49 = vld [vmem:[%s1411_s4 + $0x60] ss:$8 sps:$4 sm:$0xff]   ;;  %v1075_v50 = vld [vmem:[%s1411_s4 + $0x74] ss:$8 sps:$4 sm:$0xff]  }
  0x55   : > { %v1104_v48 = vld [vmem:[%s393_s26 + $0x4] ss:$8 sps:$4 sm:$0xff]   ;;  %v1077_v51 = vld [vmem:[%s1411_s4 + $0x70] ss:$8 sps:$4 sm:$0xff]   ;;  %v1080_v53 = vld [vmem:[%s1411_s4 + $0x80] ss:$8 sps:$4 sm:$0xff]  }
  0x56   : > { %658 = vmatpush1.bf16.msra.mxu0 %v1059_v38  ;;  %687 = vmatprep.mubr.bf16.mxu0 %v1104_v48  ;;  %v1078_v52 = vld [vmem:[%s1411_s4 + $0x84] ss:$8 sps:$4 sm:$0xff]   ;;  %v1081_v54 = vld [vmem:[%s1411_s4 + $0x94] ss:$8 sps:$4 sm:$0xff]   ;;  %v1083_v55 = vld [vmem:[%s1411_s4 + $0x90] ss:$8 sps:$4 sm:$0xff]  }
  0x57   : > { %659 = vmatprep.subr.bf16.mxu0 %v1060_v39  ;;  %v1084_v56 = vld [vmem:[%s1411_s4 + $0xa4] ss:$8 sps:$4 sm:$0xff]   ;;  %v1086_v57 = vld [vmem:[%s1411_s4 + $0xa0] ss:$8 sps:$4 sm:$0xff]   ;;  %v1087_v58 = vld [vmem:[%s1411_s4 + $0xb4] ss:$8 sps:$4 sm:$0xff]  }
  0x58   : > { %v1089_v59 = vld [vmem:[%s1411_s4 + $0xb0] ss:$8 sps:$4 sm:$0xff]   ;;  %v1090_v60 = vld [vmem:[%s1411_s4 + $0xc4] ss:$8 sps:$4 sm:$0xff]   ;;  %v1092_v61 = vld [vmem:[%s1411_s4 + $0xc0] ss:$8 sps:$4 sm:$0xff]  }
  0x59   : > { %v1093_v62 = vld [vmem:[%s1411_s4 + $0xd4] ss:$8 sps:$4 sm:$0xff]   ;;  %v1095_v63 = vld [vmem:[%s1411_s4 + $0xd0] ss:$8 sps:$4 sm:$0xff]   ;;  %v1096_v0 = vld [vmem:[%s1411_s4 + $0xe4] ss:$8 sps:$4 sm:$0xff]  }
  0x5a   : > { %660 = vmatpush1.bf16.msra.mxu0 %v1062_v40  ;;  %v1098_v1 = vld [vmem:[%s1411_s4 + $0xe0] ss:$8 sps:$4 sm:$0xff]   ;;  %v1099_v2 = vld [vmem:[%s1411_s4 + $0xf4] ss:$8 sps:$4 sm:$0xff]   ;;  %v1101_v3 = vld [vmem:[%s1411_s4 + $0xf0] ss:$8 sps:$4 sm:$0xff]  }
  0x5b   : > { %661 = vmatprep.subr.bf16.mxu0 %v1063_v41  ;;  %v1102_v4 = vld [vmem:[%s393_s26] ss:$8 sps:$4 sm:$0xff]   ;;  %p952_p5 = scmp.ne.s32.totalorder %s1175_s18, 11 }
  0x5c   : > { %v447_v5 = vld [vmem:[#allocation2] sm:$0xff]  ;;  %v448_v6 = vld [vmem:[#allocation2 + $0x8] sm:$0xff]  ;;  %v449_v8 = vld [vmem:[#allocation2 + $0x10] sm:$0xff]  ;;  %v716_v17 = vlaneseq (!%p952_p5) }
  0x5d   : > { %v450_v11 = vld [vmem:[#allocation2 + $0x18] sm:$0xff]  ;;  %v714_v19 = vld [vmem:[%s435_s29] sm:$0x3] (!%p952_p5) }
  0x5e   : > { %662 = vmatpush1.bf16.msra.mxu0 %v1065_v42  ;;  %v717_v18 = vshrl.u32 (!%p952_p5), %v716_v17, 7 }
  0x5f   : > { %663 = vmatprep.subr.bf16.mxu0 %v1066_v43 }
  0x60   : > { %v718_v21 = vsub.s32 (!%p952_p5), 0, %v717_v18  ;;  %v722_v22 = vsub.s32 (!%p952_p5), 1, %v717_v18 }
  0x62   : > { %664 = vmatpush1.bf16.msra.mxu0 %v1068_v44  ;;  %v719_v26 = vrot.slane (!%p952_p5), %v714_v19, %v718_v21  ;;  %v723_v27 = vrot.slane (!%p952_p5), %v714_v19, %v722_v22 }
  0x63   : > { %665 = vmatprep.subr.bf16.mxu0 %v1069_v45 }
  0x66   : > { %666 = vmatpush1.bf16.msra.mxu0 %v1071_v46 }
  0x67   : > { %667 = vmatprep.subr.bf16.mxu0 %v1072_v47 }
  0x6a   : > { %668 = vmatpush1.bf16.msra.mxu0 %v1074_v49 }
  0x6b   : > { %669 = vmatprep.subr.bf16.mxu0 %v1075_v50 }
  0x6e   : > { %670 = vmatpush1.bf16.msra.mxu0 %v1077_v51 }
  0x6f   : > { %671 = vmatprep.subr.bf16.mxu0 %v1078_v52 }
  0x72   : > { %672 = vmatpush1.bf16.msra.mxu0 %v1080_v53 }
  0x73   : > { %673 = vmatprep.subr.bf16.mxu0 %v1081_v54 }
  0x76   : > { %674 = vmatpush1.bf16.msra.mxu0 %v1083_v55 }
  0x77   : > { %675 = vmatprep.subr.bf16.mxu0 %v1084_v56 }
  0x7a   : > { %676 = vmatpush1.bf16.msra.mxu0 %v1086_v57 }
  0x7b   : > { %677 = vmatprep.subr.bf16.mxu0 %v1087_v58 }
  0x7e   : > { %678 = vmatpush1.bf16.msra.mxu0 %v1089_v59 }
  0x7f   : > { %679 = vmatprep.subr.bf16.mxu0 %v1090_v60 }
  0x82   : > { %680 = vmatpush1.bf16.msra.mxu0 %v1092_v61 }
  0x83   : > { %681 = vmatprep.subr.bf16.mxu0 %v1093_v62 }
  0x86   : > { %682 = vmatpush1.bf16.msra.mxu0 %v1095_v63 }
  0x87   : > { %683 = vmatprep.subr.bf16.mxu0 %v1096_v0 }
  0x8a   : > { %684 = vmatpush1.bf16.msra.mxu0 %v1098_v1 }
  0x8b   : > { %685 = vmatprep.subr.bf16.mxu0 %v1099_v2 }
  0x8e   : > { %686 = vmatpush1.bf16.msra.mxu0 %v1101_v3 }
  0x91   : > { %688 = vmatmul.mubr.bf16.vlgmr.msra.gmra.mrb[0].mxu0 %v1102_v4 }
 0x164   : > { %v689_v7 = vpop.f32.mrb[0].mxu0  ;;  %709 = sbr.rel (%p952_p5) target bundleno = 375 (0x177), region = 116 }
 0x165   : > { %v698_v9 = vadd.f32 %v689_v7, %v447_v5  ;;  %v691_v10 = vpop.f32.mrb[1].mxu0 }
 0x166   : > { %v699_v12 = vadd.f32 %v691_v10, %v448_v6  ;;  %v693_v13 = vpop.f32.mrb[2].mxu0 }
 0x167   : > { %702 = vst [vmem:[#allocation2] sm:$0xff] %v698_v9  ;;  %v700_v14 = vadd.f32 %v693_v13, %v449_v8  ;;  %v695_v15 = vpop.f32.mrb[3].mxu0 }
 0x168   : > { %703 = vst [vmem:[#allocation2 + $0x8] sm:$0xff] %v699_v12  ;;  %v701_v16 = vadd.f32 %v695_v15, %v450_v11 }
 0x169   : > { %704 = vst [vmem:[#allocation2 + $0x10] sm:$0xff] %v700_v14 }
 0x16a   : > { %705 = vst [vmem:[#allocation2 + $0x18] sm:$0xff] %v701_v16 }
 0x16e   : > { %v710_v20 = vld [vmem:[#allocation2] sm:$0xff] }
 0x16f   : > { %v711_v23 = vld [vmem:[#allocation2 + $0x8] sm:$0xff]  ;;  %v726_v28 = vadd.f32 %v719_v26, %v710_v20 }
 0x170   : > { %v712_v24 = vld [vmem:[#allocation2 + $0x10] sm:$0xff]  ;;  %v727_v29 = vadd.f32 %v723_v27, %v711_v23 }
 0x171   : > { %v713_v25 = vld [vmem:[#allocation2 + $0x18] sm:$0xff]  ;;  %v728_v30 = vadd.f32 %v719_v26, %v712_v24 }
 0x172   : > { %v729_v31 = vadd.f32 %v723_v27, %v713_v25  ;;  %v961_v32 = vpack.c.bf16 %v727_v29, %v726_v28 }
 0x174   : > { %v962_v33 = vpack.c.bf16 %v729_v31, %v728_v30  ;;  %742 = vst [vmem:[%s1413_s16] sm:$0xff] %v961_v32 }
 0x176   : > { %743 = vst [vmem:[%s1413_s16 + $0x8] sm:$0xff] %v962_v33 }
 0x177 PF: > { %750 = sbr.rel (!%p1308_p12) target bundleno = 383 (0x17f), region = 120  ;;  %s963_s18 = sshll.u32 (%p1308_p12), %s1179_s19, 3 }
 0x178   : > { %s756_s25 = scalar_lea.vmem (%p1308_p12), %s1504_s3, %s963_s18 }
 0x17b   : > { %v786_v34 = vld [vmem:[%s1413_s16] sm:$0xff] (%p1308_p12) }
 0x17c   : > { %787 = vst [vmem:[%s756_s25] sm:$0xff] (%p1308_p12), %v786_v34 }
 0x17d   : > { %v788_v35 = vld [vmem:[%s1413_s16 + $0x8] sm:$0xff] (%p1308_p12) }
 0x17e   : > { %789 = vst [vmem:[%s756_s25 + $0x18] sm:$0xff] %v788_v35 }
 0x17f PF: > { %s13_s22 = sadd.s32 1, %s1191_s22   ;;  %s1513_s10 = sld [smem:[#allocation8_spill]] }
 0x180   : > { %p10_p6 = scmp.ge.s32.totalorder %s13_s22, 38   ;;  %s1514_s30 = sld [smem:[#allocation6_spill]] }
 0x181   : > { %s1515_s27 = sld [smem:[#allocation7_spill]]  ;;  %s1516_s12 = smov %s1155_s13 }
 0x182   : > { %s1517_s13 = smov %s1306_s9  ;;  %s1518_s14 = smov %s1163_s15 }
 0x183   : > { %s1519_s15 = smov %s1303_s8  ;;  %s1520_s16 = smov %s1171_s17 }
 0x184   : > { %s1522_s18 = smov %s1183_s20  ;;  %s1523_s19 = smov %s1187_s21 }
 0x185   : > { %s1521_s17 = smov %s1513_s10  ;;  %12 = sbr.rel (!%p10_p6) target bundleno = 6 (0x6), region = 200 }
 0x186   : > { %s1524_s20 = smov %s1514_s30 }
 0x187   : > { %s1525_s21 = smov %s1515_s27 }

// kernel: forward.18
= control target key start
LH: loop header
LB: loop body
LE: loop exit
PB: predicated region body
PF: predicated region fallthrough
CT: control target
= control target key end

     0   :  { %s2022_s9 = smov 0   ;;  %s2397_s0 = inlined_call_operand.vmem [shape: bf16[2,8,2304], index: 0, kind: input, shape index: {}]   ;;  %s2398_s1 = inlined_call_operand.vmem [shape: f32[2,1,8], index: 1, kind: input, shape index: {}]   ;;  %s2399_s2 = inlined_call_operand.vmem [shape: bf16[2,8,768], index: 2, kind: output, shape index: {}]  }
   0x1 LB: > { %s1652_s10 = sadd.s32 4294967295, %s2002_s9   ;;  %p1656_p0 = scmp.ge.s32.totalorder %s2002_s9, 1  ;;  %s2002_s9 = sphi %s2022_s9, %s12_s9  }
   0x2   : > { %p120_p1 = scmp.lt.s32.totalorder %s2002_s9, 3 }
   0x4   : > { %p121_p2 = pnand %p1656_p0, %p120_p1 }
   0x5   : > { %p145_p3 = scmp.lt.s32.totalorder (!%p121_p2), %s1652_s10, 1  ;;  %v2004_v0 = vmov (!%p121_p2), 0.0   ;;  %vm2005_vm0 = vmmov (!%p121_p2), 0   ;;  %vm169_vm1 = vcmask (!%p121_p2), 523264   ;;  %vm224_vm2 = vcmask (!%p121_p2), 64512   ;;  %s2006_s18 = smov (!%p121_p2), 64  }
   0x6   : > { %124 = sbr.rel (%p121_p2) target bundleno = 1579 (0x62b), region = 28  ;;  %1758 = vmatprep.subr.bf16.mxu0 (!%p121_p2), %v2004_v0  ;;  %1760 = vmatprep.mubr.msk.bf16.mxu0 (!%p121_p2), %vm2005_vm0, %v2004_v0  ;;  %vm240_vm3 = vcmask (!%p121_p2), 1043456  }
   0x7   : > { %1764 = vmatprep.subr.bf16.mxu1 (!%p121_p2), %v2004_v0  ;;  %1766 = vmatprep.mubr.msk.bf16.mxu1 (!%p121_p2), %vm2005_vm0, %v2004_v0 }
   0xd   : > { %s2401_s10 = smov (!%p145_p3, %s1652_s10), 1 }
   0xe   : > { %s1902_s11 = smul.u32 72, %s2401_s10  ;;  %s152_s17 = scalar_lea.vmem %s2398_s1, %s2401_s10 }
   0xf   : > { %v2055_v4 = vld [vmem:[%s152_s17] ss:$0 sm:$0xff]  ;;  %s1903_s19 = smul.u32 24, %s2401_s10 }
  0x10   : > { %s2042_s14 = scalar_lea.vmem %s2397_s0, %s1902_s11 }
  0x11   : > { %v162_v1 = vld [vmem:[%s2042_s14 + $0x18] sm:$0xff]  ;;  %v159_v3 = vld [vmem:[%s2042_s14] sm:$0xff]  ;;  %v2064_v17 = vld [vmem:[%s2042_s14 + $0x8] sm:$0xff]  ;;  %s157_s22 = scalar_lea.vmem %s2399_s2, %s1903_s19 }
  0x12   : > { %v174_v2 = vsel %vm169_vm1, %v162_v1, 0  ;;  %v1663_v12 = vcombine.low %v162_v1, %v162_v1  ;;  %v1662_v13 = vcombine.low %v159_v3, %v159_v3  ;;  %v1667_v14 = vcombine.high %v159_v3, %v159_v3  ;;  %v163_v15 = vld [vmem:[%s2042_s14 + $0x20] sm:$0xff]  ;;  %v2079_v21 = vld [vmem:[%s2042_s14 + $0x28] sm:$0xff]  ;;  %v2094_v29 = vld [vmem:[%s2042_s14 + $0x30] sm:$0xff] }
  0x13   : > { %1759 = vmatpush3.bf16.xpose.msra.mxu0 %v174_v2  ;;  %v1677_v16 = vcombine.low %v163_v15, %v163_v15  ;;  %v1676_v18 = vcombine.low %v2064_v17, %v2064_v17  ;;  %v2070_v19 = vcombine.high %v163_v15, %v163_v15  ;;  %v2076_v20 = vcombine.high %v2064_v17, %v2064_v17  ;;  %v161_v32 = vld [vmem:[%s2042_s14 + $0x10] sm:$0xff] }
  0x14   : > { %1776 = vmatprep.subr.bf16.mxu0 %v2004_v0  ;;  %292 = vrot.lane.b32.xlu1 %v1663_v12, %s2006_s18  ;;  %v1691_v22 = vcombine.low %v2079_v21, %v2079_v21  ;;  %v2088_v23 = vcombine.high %v2079_v21, %v2079_v21  ;;  %v242_v30 = vsel %vm240_vm3, %v2094_v29, 0  ;;  %v1668_v31 = vcombine.high %v162_v1, %v162_v1 }
  0x15   : > { %1765 = vmatpush3.bf16.msra.mxu1 %v242_v30  ;;  %v1690_v33 = vcombine.low %v161_v32, %v161_v32  ;;  %v2102_v34 = vcombine.high %v161_v32, %v161_v32  ;;  %v633_v46 = vsel %vm169_vm1, %v163_v15, 0  ;;  %v864_v50 = vsel %vm169_vm1, %v2070_v19, 0 }
  0x16   : > { %1770 = vmatprep.subr.bf16.mxu1 %v2004_v0  ;;  %v413_v42 = vsel %vm169_vm1, %v1668_v31, 0  ;;  %v1084_v54 = vsel %vm169_vm1, %v2079_v21, 0  ;;  %v1315_v58 = vsel %vm169_vm1, %v2088_v23, 0 }
  0x18   : > { %287 = vrot.lane.b32.xlu1 %v1662_v13, %s2006_s18 }
  0x1a   : > { %1761 = vmatmul.mubr.msk.bf16.vlgmr.msra.gmra.mrb[0].mxu0 %vm169_vm1, %v159_v3 }
  0x1b   : > { %1778 = vmatprep.mubr.msk.bf16.mxu0 %vm2005_vm0, %v2004_v0 }
  0x1c   : > { %517 = vrot.lane.b32.xlu1 %v1667_v14, %s2006_s18 }
  0x20   : > { %743 = vrot.lane.b32.xlu1 %v1677_v16, %s2006_s18 }
  0x24   : > { %738 = vrot.lane.b32.xlu1 %v1676_v18, %s2006_s18 }
  0x28   : > { %970 = vrot.lane.b32.xlu1 %v2070_v19, %s2006_s18 }
  0x2c   : > { %968 = vrot.lane.b32.xlu1 %v2076_v20, %s2006_s18 }
  0x30   : > { %1194 = vrot.lane.b32.xlu1 %v1691_v22, %s2006_s18 }
  0x34   : > { %1421 = vrot.lane.b32.xlu1 %v2088_v23, %s2006_s18 }
  0x86   : > { %v293_v37 = vpop.permute.xlu1 %292 }
  0x87   : > { %v298_v39 = vsel %vm169_vm1, %v293_v37, 0 }
  0x8a   : > { %v288_v41 = vpop.permute.xlu1 %287 }
  0x8e   : > { %v518_v45 = vpop.permute.xlu1 %517 }
  0x92   : > { %v744_v47 = vpop.permute.xlu1 %743 }
  0x93   : > { %v749_v48 = vsel %vm169_vm1, %v744_v47, 0 }
  0x96   : > { %v739_v49 = vpop.permute.xlu1 %738 }
  0x9a   : > { %v971_v51 = vpop.permute.xlu1 %970 }
  0x9b   : > { %v976_v52 = vsel %vm169_vm1, %v971_v51, 0 }
  0x9e   : > { %v969_v53 = vpop.permute.xlu1 %968 }
  0xa2   : > { %v1195_v55 = vpop.permute.xlu1 %1194 }
  0xa3   : > { %v1200_v56 = vsel %vm169_vm1, %v1195_v55, 0 }
  0xa6   : > { %v1422_v59 = vpop.permute.xlu1 %1421 }
  0xa7   : > { %v1427_v60 = vsel %vm169_vm1, %v1422_v59, 0 }
  0xed   : > { %v210_v5 = vpop.f32.mrb[0].mxu0 }
  0xee   : > { %v216_v6 = vmul.f32 0.125, %v210_v5  ;;  %v1762_v7 = vpop.f32.mrb[1].mxu0 }
  0xef   : > { %v213_v8 = vpop.f32.mrb[2].mxu0 }
  0xf0   : > { %v1763_v9 = vpop.f32.mrb[3].mxu0  ;;  %v223_v10 = vadd.f32 %v2055_v4, %v216_v6 }
  0xf2   : > { %v225_v11 = vsel %vm224_vm2, %v223_v10, -inf }
  0xf3   : > { %226 = vmax.xlane.f32.xlu0 %v225_v11 }
 0x180   : > { %v227_v24 = vpop.xlane.xlu0 %226 }
 0x181   : > { %v228_v25 = vsub.f32 %v223_v10, %v227_v24 }
 0x183   : > { %v229_v26 = vmul.f32 1.442695, %v228_v25 }
 0x185   : > { %1948 = vpow2.f32 %v229_v26 }
 0x18f   : > { %v1949_v27 = vpop.eup %1948 }
 0x190   : > { %v231_v28 = vsel %vm224_vm2, %v1949_v27, 0.0 }
 0x191   : > { %232 = vadd.xlane.f32.xlu0 %v231_v28 }
 0x1a7   : > { %519 = vrot.lane.b32.xlu0 %v1668_v31, %s2006_s18 }
 0x1ab   : > { %1189 = vrot.lane.b32.xlu0 %v1690_v33, %s2006_s18 }
 0x1af   : > { %1419 = vrot.lane.b32.xlu0 %v2102_v34, %s2006_s18 }
 0x21e   : > { %v233_v35 = vpop.xlane.xlu0 %232 }
 0x21f   : > { %1950 = vrcp.f32 %v233_v35 }
 0x222   : > { %v520_v43 = vpop.permute.xlu0 %519 }
 0x223   : > { %v525_v44 = vsel %vm169_vm1, %v520_v43, 0 }
 0x226   : > { %v1190_v57 = vpop.permute.xlu0 %1189 }
 0x229   : > { %v1951_v36 = vpop.eup %1950 }
 0x22a   : > { %v235_v38 = vmul.f32 %v1951_v36, %v1949_v27  ;;  %v1420_v61 = vpop.permute.xlu0 %1419 }
 0x22c   : > { %v236_v40 = vpack.c.bf16 %v235_v38, %v235_v38 }
 0x22e   : > { %1767 = vmatmul.mubr.msk.bf16.vlgmr.msra.gmra.mrb[0].mxu1 %vm224_vm2, %v236_v40 }
 0x22f   : > { %1771 = vmatpush3.bf16.xpose.msra.mxu1 %v298_v39  ;;  %1772 = vmatprep.mubr.msk.bf16.mxu1 %vm2005_vm0, %v2004_v0 }
 0x230   : > { %1782 = vmatprep.subr.bf16.mxu1 %v2004_v0 }
 0x236   : > { %1773 = vmatmul.mubr.msk.bf16.vlgmr.msra.gmra.mrb[4].mxu1 %vm169_vm1, %v288_v41 }
 0x237   : > { %1783 = vmatpush3.bf16.xpose.msra.mxu1 %v413_v42  ;;  %1784 = vmatprep.mubr.msk.bf16.mxu1 %vm2005_vm0, %v2004_v0 }
 0x238   : > { %1794 = vmatprep.subr.bf16.mxu1 %v2004_v0 }
 0x23e   : > { %1785 = vmatmul.mubr.msk.bf16.vlgmr.msra.gmra.mrb[8].mxu1 %vm169_vm1, %v1667_v14 }
 0x23f   : > { %1795 = vmatpush3.bf16.xpose.msra.mxu1 %v525_v44  ;;  %1796 = vmatprep.mubr.msk.bf16.mxu1 %vm2005_vm0, %v2004_v0 }
 0x240   : > { %1806 = vmatprep.subr.bf16.mxu1 %v2004_v0 }
 0x246   : > { %1797 = vmatmul.mubr.msk.bf16.vlgmr.msra.gmra.mrb[12].mxu1 %vm169_vm1, %v518_v45 }
 0x247   : > { %1807 = vmatpush3.bf16.xpose.msra.mxu1 %v633_v46  ;;  %1808 = vmatprep.mubr.msk.bf16.mxu1 %vm2005_vm0, %v2004_v0 }
 0x248   : > { %1818 = vmatprep.subr.bf16.mxu1 %v2004_v0 }
 0x24e   : > { %1809 = vmatmul.mubr.msk.bf16.vlgmr.msra.gmra.mrb[16].mxu1 %vm169_vm1, %v2064_v17 }
 0x24f   : > { %1819 = vmatpush3.bf16.xpose.msra.mxu1 %v749_v48  ;;  %1820 = vmatprep.mubr.msk.bf16.mxu1 %vm2005_vm0, %v2004_v0 }
 0x250   : > { %1830 = vmatprep.subr.bf16.mxu1 %v2004_v0 }
 0x256   : > { %1821 = vmatmul.mubr.msk.bf16.vlgmr.msra.gmra.mrb[20].mxu1 %vm169_vm1, %v739_v49 }
 0x257   : > { %1831 = vmatpush3.bf16.xpose.msra.mxu1 %v864_v50  ;;  %1832 = vmatprep.mubr.msk.bf16.mxu1 %vm2005_vm0, %v2004_v0 }
 0x258   : > { %1842 = vmatprep.subr.bf16.mxu1 %v2004_v0 }
 0x25e   : > { %1833 = vmatmul.mubr.msk.bf16.vlgmr.msra.gmra.mrb[24].mxu1 %vm169_vm1, %v2076_v20 }
 0x25f   : > { %1843 = vmatpush3.bf16.xpose.msra.mxu1 %v976_v52  ;;  %1844 = vmatprep.mubr.msk.bf16.mxu1 %vm2005_vm0, %v2004_v0 }
 0x260   : > { %1854 = vmatprep.subr.bf16.mxu1 %v2004_v0 }
 0x266   : > { %1845 = vmatmul.mubr.msk.bf16.vlgmr.msra.gmra.mrb[28].mxu1 %vm169_vm1, %v969_v53 }
 0x267   : > { %1855 = vmatpush3.bf16.xpose.msra.mxu1 %v1084_v54  ;;  %1856 = vmatprep.mubr.msk.bf16.mxu1 %vm2005_vm0, %v2004_v0 }
 0x268   : > { %1866 = vmatprep.subr.bf16.mxu1 %v2004_v0 }
 0x26e   : > { %1857 = vmatmul.mubr.msk.bf16.vlgmr.msra.gmra.mrb[32].mxu1 %vm169_vm1, %v161_v32 }
 0x26f   : > { %1867 = vmatpush3.bf16.xpose.msra.mxu1 %v1200_v56  ;;  %1868 = vmatprep.mubr.msk.bf16.mxu1 %vm2005_vm0, %v2004_v0 }
 0x270   : > { %1878 = vmatprep.subr.bf16.mxu1 %v2004_v0 }
 0x276   : > { %1869 = vmatmul.mubr.msk.bf16.vlgmr.msra.gmra.mrb[36].mxu1 %vm169_vm1, %v1190_v57 }
 0x277   : > { %1879 = vmatpush3.bf16.xpose.msra.mxu1 %v1315_v58  ;;  %1880 = vmatprep.mubr.msk.bf16.mxu1 %vm2005_vm0, %v2004_v0 }
 0x278   : > { %1890 = vmatprep.subr.bf16.mxu1 %v2004_v0 }
 0x27e   : > { %1881 = vmatmul.mubr.msk.bf16.vlgmr.msra.gmra.mrb[40].mxu1 %vm169_vm1, %v2102_v34 }
 0x27f   : > { %1891 = vmatpush3.bf16.xpose.msra.mxu1 %v1427_v60  ;;  %1892 = vmatprep.mubr.msk.bf16.mxu1 %vm2005_vm0, %v2004_v0 }
 0x286   : > { %1893 = vmatmul.mubr.msk.bf16.vlgmr.msra.gmra.mrb[44].mxu1 %vm169_vm1, %v1420_v61 }
 0x301   : > { %v2167_v62 = vpop.f32.mrb[0].mxu1 }
 0x302   : > { %v1768_v63 = vpop.f32.mrb[1].mxu1 }
 0x303   : > { %v281_v1 = vpop.f32.mrb[2].mxu1 }
 0x304   : > { %v1769_v2 = vpop.f32.mrb[3].mxu1 }
 0x309   : > { %v334_v3 = vpop.f32.mrb[4].mxu1 }
 0x30a   : > { %v340_v5 = vmul.f32 0.125, %v334_v3  ;;  %v1774_v6 = vpop.f32.mrb[5].mxu1 }
 0x30b   : > { %v337_v7 = vpop.f32.mrb[6].mxu1 }
 0x30c   : > { %v1775_v8 = vpop.f32.mrb[7].mxu1  ;;  %v2170_v9 = vadd.f32 %v2055_v4, %v340_v5 }
 0x30e   : > { %v342_v10 = vsel %vm224_vm2, %v2170_v9, -inf }
 0x30f   : > { %343 = vmax.xlane.f32.xlu1 %v342_v10 }
 0x311   : > { %v449_v11 = vpop.f32.mrb[8].mxu1 }
 0x312   : > { %v455_v12 = vmul.f32 0.125, %v449_v11  ;;  %v1786_v13 = vpop.f32.mrb[9].mxu1 }
 0x313   : > { %v452_v14 = vpop.f32.mrb[10].mxu1 }
 0x314   : > { %v1787_v15 = vpop.f32.mrb[11].mxu1  ;;  %v2175_v16 = vadd.f32 %v2055_v4, %v455_v12 }
 0x316   : > { %v457_v17 = vsel %vm224_vm2, %v2175_v16, -inf }
 0x317   : > { %458 = vmax.xlane.f32.xlu0 %v457_v17 }
 0x319   : > { %v561_v18 = vpop.f32.mrb[12].mxu1 }
 0x31a   : > { %v567_v19 = vmul.f32 0.125, %v561_v18  ;;  %v1798_v20 = vpop.f32.mrb[13].mxu1 }
 0x31b   : > { %v564_v21 = vpop.f32.mrb[14].mxu1 }
 0x31c   : > { %v2180_v22 = vadd.f32 %v2055_v4, %v567_v19  ;;  %v1799_v23 = vpop.f32.mrb[15].mxu1 }
 0x31e   : > { %v569_v24 = vsel %vm224_vm2, %v2180_v22, -inf }
 0x31f   : > { %570 = vmax.xlane.f32.xlu0 %v569_v24 }
 0x321   : > { %v669_v25 = vpop.f32.mrb[16].mxu1 }
 0x322   : > { %v675_v26 = vmul.f32 0.125, %v669_v25  ;;  %v1810_v27 = vpop.f32.mrb[17].mxu1 }
 0x323   : > { %v672_v28 = vpop.f32.mrb[18].mxu1 }
 0x324   : > { %v2185_v30 = vadd.f32 %v2055_v4, %v675_v26  ;;  %v1811_v31 = vpop.f32.mrb[19].mxu1 }
 0x326   : > { %v677_v32 = vsel %vm224_vm2, %v2185_v30, -inf }
 0x327   : > { %678 = vmax.xlane.f32.xlu1 %v677_v32 }
 0x329   : > { %v785_v33 = vpop.f32.mrb[20].mxu1 }
 0x32a   : > { %v791_v34 = vmul.f32 0.125, %v785_v33  ;;  %v1822_v35 = vpop.f32.mrb[21].mxu1 }
 0x32b   : > { %v788_v36 = vpop.f32.mrb[22].mxu1 }
 0x32c   : > { %v2190_v37 = vadd.f32 %v2055_v4, %v791_v34  ;;  %v1823_v38 = vpop.f32.mrb[23].mxu1 }
 0x32e   : > { %v793_v39 = vsel %vm224_vm2, %v2190_v37, -inf }
 0x32f   : > { %794 = vmax.xlane.f32.xlu0 %v793_v39  ;;  %v2241_v39 = vcombine.high %v2094_v29, %v2094_v29 }
 0x331   : > { %v900_v40 = vpop.f32.mrb[24].mxu1 }
 0x332   : > { %v906_v41 = vmul.f32 0.125, %v900_v40  ;;  %v1834_v42 = vpop.f32.mrb[25].mxu1 }
 0x333   : > { %v903_v43 = vpop.f32.mrb[26].mxu1 }
 0x334   : > { %v2195_v44 = vadd.f32 %v2055_v4, %v906_v41  ;;  %v1835_v45 = vpop.f32.mrb[27].mxu1 }
 0x336   : > { %v908_v46 = vsel %vm224_vm2, %v2195_v44, -inf }
 0x337   : > { %909 = vmax.xlane.f32.xlu1 %v908_v46 }
 0x339   : > { %v1012_v47 = vpop.f32.mrb[28].mxu1 }
 0x33a   : > { %v1018_v48 = vmul.f32 0.125, %v1012_v47  ;;  %v1846_v49 = vpop.f32.mrb[29].mxu1 }
 0x33b   : > { %v1015_v50 = vpop.f32.mrb[30].mxu1 }
 0x33c   : > { %v2200_v51 = vadd.f32 %v2055_v4, %v1018_v48  ;;  %v1847_v52 = vpop.f32.mrb[31].mxu1 }
 0x33e   : > { %v1020_v53 = vsel %vm224_vm2, %v2200_v51, -inf }
 0x33f   : > { %1021 = vmax.xlane.f32.xlu0 %v1020_v53 }
 0x341   : > { %v1120_v54 = vpop.f32.mrb[32].mxu1 }
 0x342   : > { %v1126_v55 = vmul.f32 0.125, %v1120_v54  ;;  %v1858_v56 = vpop.f32.mrb[33].mxu1 }
 0x343   : > { %v1123_v57 = vpop.f32.mrb[34].mxu1 }
 0x344   : > { %v2205_v58 = vadd.f32 %v2055_v4, %v1126_v55  ;;  %v1859_v59 = vpop.f32.mrb[35].mxu1  ;;  %v2269_v57 = vld [vmem:[%s2042_s14 + $0x38] sm:$0xff] }
 0x345   : > { %v1679_v59 = vcombine.low %v2269_v57, %v2269_v57 }
 0x346   : > { %v1128_v60 = vsel %vm224_vm2, %v2205_v58, -inf }
 0x347   : > { %1129 = vmax.xlane.f32.xlu1 %v1128_v60  ;;  %v2276_v60 = vcombine.high %v2269_v57, %v2269_v57 }
 0x349   : > { %v1236_v61 = vpop.f32.mrb[36].mxu1 }
 0x34a   : > { %v1242_v63 = vmul.f32 0.125, %v1236_v61  ;;  %v1870_v1 = vpop.f32.mrb[37].mxu1 }
 0x34b   : > { %v1239_v2 = vpop.f32.mrb[38].mxu1 }
 0x34c   : > { %v2210_v3 = vadd.f32 %v2055_v4, %v1242_v63  ;;  %v1871_v5 = vpop.f32.mrb[39].mxu1 }
 0x34e   : > { %v1244_v6 = vsel %vm224_vm2, %v2210_v3, -inf }
 0x34f   : > { %1245 = vmax.xlane.f32.xlu0 %v1244_v6 }
 0x351   : > { %v1351_v7 = vpop.f32.mrb[40].mxu1 }
 0x352   : > { %v1357_v8 = vmul.f32 0.125, %v1351_v7  ;;  %v1882_v10 = vpop.f32.mrb[41].mxu1 }
 0x353   : > { %v1354_v11 = vpop.f32.mrb[42].mxu1 }
 0x354   : > { %v2215_v12 = vadd.f32 %v2055_v4, %v1357_v8  ;;  %v1883_v13 = vpop.f32.mrb[43].mxu1 }
 0x356   : > { %v1359_v14 = vsel %vm224_vm2, %v2215_v12, -inf }
 0x357   : > { %1360 = vmax.xlane.f32.xlu1 %v1359_v14 }
 0x359   : > { %v1463_v15 = vpop.f32.mrb[44].mxu1 }
 0x35a   : > { %v1469_v17 = vmul.f32 0.125, %v1463_v15  ;;  %v1894_v18 = vpop.f32.mrb[45].mxu1 }
 0x35b   : > { %v1466_v19 = vpop.f32.mrb[46].mxu1 }
 0x35c   : > { %v2220_v20 = vadd.f32 %v2055_v4, %v1469_v17  ;;  %v1895_v21 = vpop.f32.mrb[47].mxu1 }
 0x35e   : > { %v1471_v23 = vsel %vm224_vm2, %v2220_v20, -inf }
 0x35f   : > { %1472 = vmax.xlane.f32.xlu0 %v1471_v23  ;;  %v2301_v23 = vld [vmem:[%s2042_s14 + $0x40] sm:$0xff] }
 0x39c   : > { %v344_v24 = vpop.xlane.xlu1 %343 }
 0x39d   : > { %v345_v25 = vsub.f32 %v2170_v9, %v344_v24  ;;  %v1693_v24 = vcombine.low %v2301_v23, %v2301_v23 }
 0x39f   : > { %v346_v26 = vmul.f32 1.442695, %v345_v25 }
 0x3a1   : > { %1952 = vpow2.f32 %v346_v26  ;;  %v2308_v26 = vcombine.high %v2301_v23, %v2301_v23 }
 0x3a4   : > { %v459_v27 = vpop.xlane.xlu0 %458 }
 0x3a5   : > { %v460_v28 = vsub.f32 %v2175_v16, %v459_v27 }
 0x3a7   : > { %v461_v31 = vmul.f32 1.442695, %v460_v28 }
 0x3a9   : > { %1954 = vpow2.f32 %v461_v31 }
 0x3ab   : > { %v2226_v32 = vpop.eup %1952 }
 0x3ac   : > { %v571_v33 = vpop.xlane.xlu0 %570  ;;  %v348_v4 = vsel %vm224_vm2, %v2226_v32, 0.0 }
 0x3ad   : > { %v572_v34 = vsub.f32 %v2180_v22, %v571_v33  ;;  %349 = vadd.xlane.f32.xlu1 %v348_v4  ;;  %v1665_v22 = vcombine.low %v2094_v29, %v2094_v29 }
 0x3af   : > { %v573_v35 = vmul.f32 1.442695, %v572_v34 }
 0x3b1   : > { %1956 = vpow2.f32 %v573_v35  ;;  %v475_v35 = vsel %vm240_vm3, %v2241_v39, 0 }
 0x3b3   : > { %v2231_v36 = vpop.eup %1954 }
 0x3b4   : > { %v463_v9 = vsel %vm224_vm2, %v2231_v36, 0.0  ;;  %v679_v40 = vpop.xlane.xlu1 %678 }
 0x3b5   : > { %464 = vadd.xlane.f32.xlu0 %v463_v9  ;;  %v680_v41 = vsub.f32 %v2185_v30, %v679_v40 }
 0x3b7   : > { %v681_v43 = vmul.f32 1.442695, %v680_v41 }
 0x3b9   : > { %1958 = vpow2.f32 %v681_v43 }
 0x3bb   : > { %v2235_v16 = vpop.eup %1956 }
 0x3bc   : > { %v575_v38 = vsel %vm224_vm2, %v2235_v16, 0.0  ;;  %v795_v42 = vpop.xlane.xlu0 %794 }
 0x3bd   : > { %576 = vadd.xlane.f32.xlu1 %v575_v38  ;;  %v796_v45 = vsub.f32 %v2190_v37, %v795_v42 }
 0x3bf   : > { %v797_v49 = vmul.f32 1.442695, %v796_v45 }
 0x3c1   : > { %1960 = vpow2.f32 %v797_v49 }
 0x3c3   : > { %v2252_v53 = vpop.eup %1958 }
 0x3c4   : > { %v910_v46 = vpop.xlane.xlu1 %909  ;;  %v683_v30 = vsel %vm224_vm2, %v2252_v53, 0.0 }
 0x3c5   : > { %v911_v48 = vsub.f32 %v2195_v44, %v910_v46 }
 0x3c7   : > { %v912_v50 = vmul.f32 1.442695, %v911_v48 }
 0x3c9   : > { %1962 = vpow2.f32 %v912_v50 }
 0x3cb   : > { %581 = vrot.lane.b32.xlu0 %v2241_v39, %s2006_s18  ;;  %v2256_v37 = vpop.eup %1960 }
 0x3cc   : > { %v1022_v47 = vpop.xlane.xlu0 %1021  ;;  %v799_v44 = vsel %vm224_vm2, %v2256_v37, 0.0 }
 0x3cd   : > { %v1023_v29 = vsub.f32 %v2200_v51, %v1022_v47 }
 0x3ce   : > { %357 = vrot.lane.b32.xlu1 %v1665_v22, %s2006_s18 }
 0x3cf   : > { %v1024_v52 = vmul.f32 1.442695, %v1023_v29 }
 0x3d1   : > { %1964 = vpow2.f32 %v1024_v52 }
 0x3d3   : > { %v2258_v54 = vpop.eup %1962 }
 0x3d4   : > { %v914_v55 = vsel %vm224_vm2, %v2258_v54, 0.0  ;;  %v1130_v63 = vpop.xlane.xlu1 %1129 }
 0x3d5   : > { %v1131_v2 = vsub.f32 %v2205_v58, %v1130_v63 }
 0x3d7   : > { %v1132_v6 = vmul.f32 1.442695, %v1131_v2 }
 0x3d9   : > { %1966 = vpow2.f32 %v1132_v6 }
 0x3db   : > { %v2262_v51 = vpop.eup %1964 }
 0x3dc   : > { %v1026_v56 = vsel %vm224_vm2, %v2262_v51, 0.0  ;;  %v1246_v61 = vpop.xlane.xlu0 %1245 }
 0x3dd   : > { %v1247_v7 = vsub.f32 %v2210_v3, %v1246_v61 }
 0x3df   : > { %v1248_v11 = vmul.f32 1.442695, %v1247_v7 }
 0x3e3   : > { %v2284_v15 = vpop.eup %1966 }
 0x3e4   : > { %v1361_v10 = vpop.xlane.xlu1 %1360  ;;  %v1134_v58 = vsel %vm224_vm2, %v2284_v15, 0.0 }
 0x3e5   : > { %v1362_v13 = vsub.f32 %v2215_v12, %v1361_v10 }
 0x3e7   : > { %v1363_v14 = vmul.f32 1.442695, %v1362_v13 }
 0x3ea   : > { %684 = vadd.xlane.f32.xlu0 %v683_v30 }
 0x3ec   : > { %v1473_v1 = vpop.xlane.xlu0 %1472 }
 0x3ed   : > { %v1474_v5 = vsub.f32 %v2220_v20, %v1473_v1 }
 0x3ee   : > { %800 = vadd.xlane.f32.xlu0 %v799_v44 }
 0x3ef   : > { %v1475_v8 = vmul.f32 1.442695, %v1474_v5 }
 0x3f1   : > { %1968 = vpow2.f32 %v1475_v8 }
 0x3f2   : > { %915 = vadd.xlane.f32.xlu0 %v914_v55  ;;  %1027 = vadd.xlane.f32.xlu1 %v1026_v56  ;;  %1970 = vpow2.f32 %v1248_v11 }
 0x3f3   : > { %1972 = vpow2.f32 %v1363_v14 }
 0x3fb   : > { %v2286_v17 = vpop.eup %1968 }
 0x3fc   : > { %v1477_v3 = vsel %vm224_vm2, %v2286_v17, 0.0  ;;  %v2292_v18 = vpop.eup %1970 }
 0x3fd   : > { %v1250_v12 = vsel %vm224_vm2, %v2292_v18, 0.0  ;;  %v2296_v19 = vpop.eup %1972 }
 0x3fe   : > { %v1365_v20 = vsel %vm224_vm2, %v2296_v19, 0.0 }
 0x403   : > { %808 = vrot.lane.b32.xlu1 %v1679_v59, %s2006_s18 }
 0x408   : > { %1032 = vrot.lane.b32.xlu0 %v2276_v60, %s2006_s18 }
 0x427   : > { %1135 = vadd.xlane.f32.xlu0 %v1134_v58  ;;  %1478 = vadd.xlane.f32.xlu1 %v1477_v3 }
 0x42b   : > { %1251 = vadd.xlane.f32.xlu0 %v1250_v12 }
 0x42f   : > { %1366 = vadd.xlane.f32.xlu0 %v1365_v20 }
 0x43a   : > { %v350_v21 = vpop.xlane.xlu1 %349 }
 0x43b   : > { %1974 = vrcp.f32 %v350_v21 }
 0x442   : > { %v465_v25 = vpop.xlane.xlu0 %464 }
 0x443   : > { %1976 = vrcp.f32 %v465_v25 }
 0x445   : > { %1259 = vrot.lane.b32.xlu0 %v1693_v24, %s2006_s18  ;;  %v1975_v27 = vpop.eup %1974 }
 0x446   : > { %v352_v31 = vmul.f32 %v1975_v27, %v2226_v32  ;;  %v582_v38 = vpop.permute.xlu0 %581 }
 0x447   : > { %v587_v41 = vsel %vm240_vm3, %v582_v38, 0 }
 0x448   : > { %v353_v34 = vpack.c.bf16 %v352_v31, %v352_v31 }
 0x449   : > { %1483 = vrot.lane.b32.xlu0 %v2308_v26, %s2006_s18 }
 0x44a   : > { %v577_v28 = vpop.xlane.xlu1 %576 }
 0x44b   : > { %1978 = vrcp.f32 %v577_v28 }
 0x44d   : > { %v1977_v9 = vpop.eup %1976 }
 0x44e   : > { %v358_v33 = vpop.permute.xlu1 %357  ;;  %v467_v32 = vmul.f32 %v1977_v9, %v2231_v36  ;;  %v693_v36 = vsel %vm240_vm3, %v2269_v57, 0 }
 0x44f   : > { %v363_v4 = vsel %vm240_vm3, %v358_v33, 0 }
 0x450   : > { %1777 = vmatpush3.bf16.msra.mxu0 %v363_v4  ;;  %v468_v22 = vpack.c.bf16 %v467_v32, %v467_v32 }
 0x451   : > { %1788 = vmatprep.subr.bf16.mxu0 %v2004_v0 }
 0x453   : > { %1779 = vmatmul.mubr.msk.bf16.vlgmr.msra.gmra.mrb[4].mxu0 %vm224_vm2, %v353_v34 }
 0x454   : > { %1789 = vmatpush3.bf16.msra.mxu0 %v475_v35  ;;  %1790 = vmatprep.mubr.msk.bf16.mxu0 %vm2005_vm0, %v2004_v0 }
 0x455   : > { %1800 = vmatprep.subr.bf16.mxu0 %v2004_v0  ;;  %v1979_v40 = vpop.eup %1978 }
 0x456   : > { %v579_v39 = vmul.f32 %v1979_v40, %v2235_v16 }
 0x458   : > { %v580_v42 = vpack.c.bf16 %v579_v39, %v579_v39 }
 0x45b   : > { %1791 = vmatmul.mubr.msk.bf16.vlgmr.msra.gmra.mrb[8].mxu0 %vm224_vm2, %v468_v22 }
 0x45c   : > { %1801 = vmatpush3.bf16.msra.mxu0 %v587_v41  ;;  %1802 = vmatprep.mubr.msk.bf16.mxu0 %vm2005_vm0, %v2004_v0 }
 0x45d   : > { %1812 = vmatprep.subr.bf16.mxu0 %v2004_v0 }
 0x463   : > { %1803 = vmatmul.mubr.msk.bf16.vlgmr.msra.gmra.mrb[12].mxu0 %vm224_vm2, %v580_v42 }
 0x464   : > { %1813 = vmatpush3.bf16.msra.mxu0 %v693_v36  ;;  %1814 = vmatprep.mubr.msk.bf16.mxu0 %vm2005_vm0, %v2004_v0 }
 0x465   : > { %1824 = vmatprep.subr.bf16.mxu0 %v2004_v0 }
 0x477   : > { %v685_v43 = vpop.xlane.xlu0 %684 }
 0x478   : > { %1980 = vrcp.f32 %v685_v43 }
 0x47b   : > { %v801_v45 = vpop.xlane.xlu0 %800 }
 0x47c   : > { %1982 = vrcp.f32 %v801_v45 }
 0x47f   : > { %v1028_v46 = vpop.xlane.xlu1 %1027  ;;  %v916_v16 = vpop.xlane.xlu0 %915 }
 0x480   : > { %1984 = vrcp.f32 %v916_v16 }
 0x481   : > { %1986 = vrcp.f32 %v1028_v46 }
 0x482   : > { %v1981_v47 = vpop.eup %1980 }
 0x483   : > { %v687_v48 = vmul.f32 %v1981_v47, %v2252_v53  ;;  %v809_v49 = vpop.permute.xlu1 %808  ;;  %v926_v53 = vsel %vm240_vm3, %v2276_v60, 0  ;;  %v1033_v57 = vpop.permute.xlu0 %1032 }
 0x484   : > { %v814_v50 = vsel %vm240_vm3, %v809_v49, 0  ;;  %v1038_v61 = vsel %vm240_vm3, %v1033_v57, 0 }
 0x485   : > { %v688_v29 = vpack.c.bf16 %v687_v48, %v687_v48 }
 0x486   : > { %v1983_v52 = vpop.eup %1982 }
 0x487   : > { %1815 = vmatmul.mubr.msk.bf16.vlgmr.msra.gmra.mrb[16].mxu0 %vm224_vm2, %v688_v29  ;;  %v803_v30 = vmul.f32 %v1983_v52, %v2256_v37 }
 0x488   : > { %1825 = vmatpush3.bf16.msra.mxu0 %v814_v50  ;;  %1826 = vmatprep.mubr.msk.bf16.mxu0 %vm2005_vm0, %v2004_v0 }
 0x489   : > { %1836 = vmatprep.subr.bf16.mxu0 %v2004_v0  ;;  %v804_v44 = vpack.c.bf16 %v803_v30, %v803_v30 }
 0x48a   : > { %v1985_v55 = vpop.eup %1984 }
 0x48b   : > { %v918_v56 = vmul.f32 %v1985_v55, %v2258_v54  ;;  %v1987_v59 = vpop.eup %1986  ;;  %v1144_v54 = vsel %vm240_vm3, %v2301_v23, 0 }
 0x48c   : > { %v1030_v60 = vmul.f32 %v1987_v59, %v2262_v51 }
 0x48d   : > { %v919_v37 = vpack.c.bf16 %v918_v56, %v918_v56 }
 0x48e   : > { %v1031_v63 = vpack.c.bf16 %v1030_v60, %v1030_v60 }
 0x48f   : > { %1827 = vmatmul.mubr.msk.bf16.vlgmr.msra.gmra.mrb[20].mxu0 %vm224_vm2, %v804_v44 }
 0x490   : > { %1837 = vmatpush3.bf16.msra.mxu0 %v926_v53  ;;  %1838 = vmatprep.mubr.msk.bf16.mxu0 %vm2005_vm0, %v2004_v0 }
 0x491   : > { %1848 = vmatprep.subr.bf16.mxu0 %v2004_v0 }
 0x497   : > { %1839 = vmatmul.mubr.msk.bf16.vlgmr.msra.gmra.mrb[24].mxu0 %vm224_vm2, %v919_v37 }
 0x498   : > { %1849 = vmatpush3.bf16.msra.mxu0 %v1038_v61  ;;  %1850 = vmatprep.mubr.msk.bf16.mxu0 %vm2005_vm0, %v2004_v0 }
 0x499   : > { %1860 = vmatprep.subr.bf16.mxu0 %v2004_v0 }
 0x49f   : > { %1851 = vmatmul.mubr.msk.bf16.vlgmr.msra.gmra.mrb[28].mxu0 %vm224_vm2, %v1031_v63 }
 0x4a0   : > { %1861 = vmatpush3.bf16.msra.mxu0 %v1144_v54  ;;  %1862 = vmatprep.mubr.msk.bf16.mxu0 %vm2005_vm0, %v2004_v0 }
 0x4a1   : > { %1872 = vmatprep.subr.bf16.mxu0 %v2004_v0 }
 0x4b4   : > { %v1136_v1 = vpop.xlane.xlu0 %1135  ;;  %v1479_v13 = vpop.xlane.xlu1 %1478 }
 0x4b5   : > { %1988 = vrcp.f32 %v1136_v1 }
 0x4b8   : > { %v1252_v2 = vpop.xlane.xlu0 %1251 }
 0x4b9   : > { %1990 = vrcp.f32 %v1252_v2 }
 0x4bc   : > { %v1367_v5 = vpop.xlane.xlu0 %1366 }
 0x4bd   : > { %1992 = vrcp.f32 %v1367_v5 }
 0x4be   : > { %1994 = vrcp.f32 %v1479_v13 }
 0x4bf   : > { %v1989_v51 = vpop.eup %1988 }
 0x4c0   : > { %v1260_v6 = vpop.permute.xlu0 %1259  ;;  %v1138_v7 = vmul.f32 %v1989_v51, %v2284_v15  ;;  %v1377_v15 = vsel %vm240_vm3, %v2308_v26, 0 }
 0x4c1   : > { %v1265_v8 = vsel %vm240_vm3, %v1260_v6, 0 }
 0x4c2   : > { %v1139_v10 = vpack.c.bf16 %v1138_v7, %v1138_v7 }
 0x4c3   : > { %v1991_v11 = vpop.eup %1990 }
 0x4c4   : > { %1863 = vmatmul.mubr.msk.bf16.vlgmr.msra.gmra.mrb[32].mxu0 %vm224_vm2, %v1139_v10  ;;  %v1254_v14 = vmul.f32 %v1991_v11, %v2292_v18  ;;  %v1484_v20 = vpop.permute.xlu0 %1483 }
 0x4c5   : > { %1873 = vmatpush3.bf16.msra.mxu0 %v1265_v8  ;;  %1874 = vmatprep.mubr.msk.bf16.mxu0 %vm2005_vm0, %v2004_v0  ;;  %v1489_v18 = vsel %vm240_vm3, %v1484_v20, 0 }
 0x4c6   : > { %1884 = vmatprep.subr.bf16.mxu0 %v2004_v0  ;;  %v1255_v58 = vpack.c.bf16 %v1254_v14, %v1254_v14 }
 0x4c7   : > { %v1993_v3 = vpop.eup %1992 }
 0x4c8   : > { %v1369_v12 = vmul.f32 %v1993_v3, %v2296_v19  ;;  %v1995_v23 = vpop.eup %1994 }
 0x4c9   : > { %v1481_v24 = vmul.f32 %v1995_v23, %v2286_v17 }
 0x4ca   : > { %v1370_v21 = vpack.c.bf16 %v1369_v12, %v1369_v12 }
 0x4cb   : > { %v1482_v25 = vpack.c.bf16 %v1481_v24, %v1481_v24 }
 0x4cc   : > { %1875 = vmatmul.mubr.msk.bf16.vlgmr.msra.gmra.mrb[36].mxu0 %vm224_vm2, %v1255_v58 }
 0x4cd   : > { %1885 = vmatpush3.bf16.msra.mxu0 %v1377_v15  ;;  %1886 = vmatprep.mubr.msk.bf16.mxu0 %vm2005_vm0, %v2004_v0 }
 0x4ce   : > { %1896 = vmatprep.subr.bf16.mxu0 %v2004_v0 }
 0x4d4   : > { %1887 = vmatmul.mubr.msk.bf16.vlgmr.msra.gmra.mrb[40].mxu0 %vm224_vm2, %v1370_v21 }
 0x4d5   : > { %1897 = vmatpush3.bf16.msra.mxu0 %v1489_v18  ;;  %1898 = vmatprep.mubr.msk.bf16.mxu0 %vm2005_vm0, %v2004_v0 }
 0x4dc   : > { %1899 = vmatmul.mubr.msk.bf16.vlgmr.msra.gmra.mrb[44].mxu0 %vm224_vm2, %v1482_v25 }
 0x526   : > { %v399_v26 = vpop.f32.mrb[4].mxu0 }
 0x527   : > { %v1780_v19 = vpop.f32.mrb[5].mxu0 }
 0x528   : > { %v402_v27 = vpop.f32.mrb[6].mxu0 }
 0x529   : > { %v1781_v28 = vpop.f32.mrb[7].mxu0 }
 0x52e   : > { %v511_v31 = vpop.f32.mrb[8].mxu0 }
 0x52f   : > { %v1792_v33 = vpop.f32.mrb[9].mxu0 }
 0x530   : > { %v514_v4 = vpop.f32.mrb[10].mxu0 }
 0x531   : > { %v1793_v34 = vpop.f32.mrb[11].mxu0 }
 0x536   : > { %v623_v35 = vpop.f32.mrb[12].mxu0 }
 0x537   : > { %v1915_v9 = vpack.i.bf16 %v623_v35, %v399_v26  ;;  %v1804_v32 = vpop.f32.mrb[13].mxu0 }
 0x538   : > { %v626_v38 = vpop.f32.mrb[14].mxu0 }
 0x539   : > { %1916 = vrot.lane.b32.xlu0 %v1915_v9, %s2006_s18  ;;  %v1805_v0 = vpop.f32.mrb[15].mxu0 }
 0x55a   : > { %v729_v22 = vpop.f32.mrb[16].mxu0 }
 0x55b   : > { %v1816_v17 = vpop.f32.mrb[17].mxu0 }
 0x55c   : > { %v732_v40 = vpop.f32.mrb[18].mxu0 }
 0x55d   : > { %v1817_v41 = vpop.f32.mrb[19].mxu0 }
 0x562   : > { %v850_v39 = vpop.f32.mrb[20].mxu0 }
 0x563   : > { %v1828_v42 = vpop.f32.mrb[21].mxu0 }
 0x564   : > { %v853_v36 = vpop.f32.mrb[22].mxu0 }
 0x565   : > { %v1829_v43 = vpop.f32.mrb[23].mxu0 }
 0x56a   : > { %v962_v45 = vpop.f32.mrb[24].mxu0 }
 0x56b   : > { %v1840_v46 = vpop.f32.mrb[25].mxu0 }
 0x56c   : > { %v965_v16 = vpop.f32.mrb[26].mxu0 }
 0x56d   : > { %v1841_v47 = vpop.f32.mrb[27].mxu0 }
 0x572   : > { %v1074_v48 = vpop.f32.mrb[28].mxu0 }
 0x573   : > { %v1920_v49 = vpack.i.bf16 %v1074_v48, %v850_v39  ;;  %v1852_v29 = vpop.f32.mrb[29].mxu0 }
 0x574   : > { %v1077_v50 = vpop.f32.mrb[30].mxu0 }
 0x575   : > { %1921 = vrot.lane.b32.xlu0 %v1920_v49, %s2006_s18  ;;  %v1853_v52 = vpop.f32.mrb[31].mxu0 }
 0x597   : > { %v1180_v30 = vpop.f32.mrb[32].mxu0 }
 0x598   : > { %v1864_v44 = vpop.f32.mrb[33].mxu0 }
 0x599   : > { %v1183_v53 = vpop.f32.mrb[34].mxu0 }
 0x59a   : > { %v1865_v55 = vpop.f32.mrb[35].mxu0 }
 0x59f   : > { %v1301_v56 = vpop.f32.mrb[36].mxu0 }
 0x5a0   : > { %v1876_v57 = vpop.f32.mrb[37].mxu0 }
 0x5a1   : > { %v1304_v37 = vpop.f32.mrb[38].mxu0 }
 0x5a2   : > { %v1877_v59 = vpop.f32.mrb[39].mxu0 }
 0x5a7   : > { %v1413_v61 = vpop.f32.mrb[40].mxu0 }
 0x5a8   : > { %v1888_v60 = vpop.f32.mrb[41].mxu0 }
 0x5a9   : > { %v1416_v63 = vpop.f32.mrb[42].mxu0 }
 0x5aa   : > { %v1889_v54 = vpop.f32.mrb[43].mxu0 }
 0x5ab   : > { %v1917_v1 = vpop.permute.xlu0 %1916 }
 0x5ac   : > { %v1919_v2 = vunpack.i.h.bf16 %v1917_v1  ;;  %v1918_v5 = vunpack.i.l.bf16 %v1917_v1 }
 0x5ae   : > { %v1556_v51 = vsel %vm169_vm1, %v511_v31, %v1919_v2  ;;  %v1555_v6 = vsel %vm169_vm1, %v2167_v62, %v1918_v5 }
 0x5af   : > { %v1707_v7 = vpack.c.bf16 %v1556_v51, %v1555_v6  ;;  %v1525_v8 = vpop.f32.mrb[44].mxu0 }
 0x5b0   : > { %v1925_v10 = vpack.i.bf16 %v1525_v8, %v1301_v56  ;;  %v1900_v11 = vpop.f32.mrb[45].mxu0 }
 0x5b1   : > { %1585 = vst [vmem:[%s157_s22] sm:$0xff] %v1707_v7  ;;  %v1528_v13 = vpop.f32.mrb[46].mxu0 }
 0x5b2   : > { %1926 = vrot.lane.b32.xlu1 %v1925_v10, %s2006_s18  ;;  %v1901_v14 = vpop.f32.mrb[47].mxu0 }
 0x5e7   : > { %v1922_v58 = vpop.permute.xlu0 %1921 }
 0x5e8   : > { %v1924_v15 = vunpack.i.h.bf16 %v1922_v58  ;;  %v1923_v3 = vunpack.i.l.bf16 %v1922_v58 }
 0x5ea   : > { %v1558_v12 = vsel %vm169_vm1, %v962_v45, %v1924_v15  ;;  %v1557_v20 = vsel %vm169_vm1, %v729_v22, %v1923_v3 }
 0x5eb   : > { %v1708_v18 = vpack.c.bf16 %v1558_v12, %v1557_v20 }
 0x5ed   : > { %1586 = vst [vmem:[%s157_s22 + $0x8] sm:$0xff] %v1708_v18 }
 0x624   : > { %v1927_v21 = vpop.permute.xlu1 %1926 }
 0x625   : > { %v1929_v62 = vunpack.i.h.bf16 %v1927_v21  ;;  %v1928_v23 = vunpack.i.l.bf16 %v1927_v21 }
 0x627   : > { %v1560_v24 = vsel %vm169_vm1, %v1413_v61, %v1929_v62  ;;  %v1559_v25 = vsel %vm169_vm1, %v1180_v30, %v1928_v23 }
 0x628   : > { %v1709_v26 = vpack.c.bf16 %v1560_v24, %v1559_v25 }
 0x62a   : > { %1587 = vst [vmem:[%s157_s22 + $0x10] sm:$0xff] %v1709_v26 }
 0x62b PF: > { %s12_s9 = sadd.s32 1, %s2002_s9  }
 0x62c   : > { %p9_p4 = scmp.ge.s32.totalorder %s12_s9, 4  }
 0x62e   :  { %11 = sbr.rel (!%p9_p4) target bundleno = 1 (0x1), region = 61 }

// kernel: forward.21
= control target key start
LH: loop header
LB: loop body
LE: loop exit
PB: predicated region body
PF: predicated region fallthrough
CT: control target
= control target key end

     0   :  { %s1258_s12 = smov 0   ;;  %s1260_s13 = smov 0   ;;  %s1545_s0 = inlined_call_operand.vmem [shape: bf16[16,768], index: 0, kind: input, shape index: {}]   ;;  %s1546_s1 = inlined_call_operand.vmem [shape: bf16[768,3072], index: 1, kind: input, shape index: {}]   ;;  %s1547_s2 = inlined_call_operand.vmem [shape: f32[1,3072], index: 2, kind: input, shape index: {}]   ;;  %s1548_s3 = inlined_call_operand.vmem [shape: bf16[16,3072], index: 3, kind: output, shape index: {}]  }
   0x1   :  { %s1262_s14 = smov 0   ;;  %s1264_s15 = smov 0  }
   0x2   :  { %s1266_s16 = smov 0   ;;  %s1268_s17 = smov 0  }
   0x3   :  { %s1270_s18 = smov 0   ;;  %s1272_s19 = smov 0  }
   0x4   :  { %s1274_s20 = smov 0   ;;  %s1276_s21 = smov 0  }
   0x5   :  { %s1278_s22 = smov 0  }
   0x6 LB: > { %s936_s23 = sadd.s32 4294967295, %s1235_s22   ;;  %s25_s24 = sadd.s32 1, %s1227_s20  ;;  %s1235_s22 = sphi %s1278_s22, %s13_s22   ;;  %s1231_s21 = sphi %s1276_s21, %s1569_s21   ;;  %s1227_s20 = sphi %s1274_s20, %s1568_s20   ;;  %s1223_s19 = sphi %s1272_s19, %s1567_s19   ;;  %s1219_s18 = sphi %s1270_s18, %s1566_s18   ;;  %s1215_s17 = sphi %s1268_s17, %s1565_s17   ;;  %s1211_s16 = sphi %s1266_s16, %s1564_s16   ;;  %s1207_s15 = sphi %s1264_s15, %s1563_s15   ;;  %s1203_s14 = sphi %s1262_s14, %s1562_s14   ;;  %s1199_s13 = sphi %s1260_s13, %s1561_s13   ;;  %s1195_s12 = sphi %s1258_s12, %s1560_s12  }
   0x7   : > { %p26_p0 = scmp.ge.s32.totalorder %s25_s24, 3  ;;  %s28_s25 = sadd.s32 1, %s1231_s21 }
   0x8   : > { %s41_s26 = sadd.s32 1, %s1215_s17  ;;  %p48_p1 = scmp.ne.s32.totalorder %s1215_s17, %s1211_s16 }
   0x9   : > { %s1571_s24 = smov (%p26_p0, %s25_s24), 0  ;;  %s1573_s25 = smov (!%p26_p0, %s28_s25), %s1231_s21 }
   0xa   : > { %1551 = sst [smem:[#allocation6_spill]] %s1571_s24  ;;  %s37_s27 = ssub.s32 %s1227_s20, %s1571_s24 }
   0xb   : > { %p49_p2 = scmp.eq.s32.totalorder %s1235_s22, 0  ;;  %p30_p3 = scmp.ge.s32.totalorder %s1573_s25, 12 }
   0xc   : > { %p39_p4 = scmp.eq.s32.totalorder %s37_s27, 0  ;;  %s69_s29 = sadd.s32 1, %s1207_s15 }
   0xd   : > { %p1325_p5 = por %p49_p2, %p48_p1  ;;  %s1575_s25 = smov (%p30_p3, %s1573_s25), 0 }
   0xe   : > { %1553 = sst [smem:[#allocation7_spill]] %s1575_s25  ;;  %s65_s4 = ssub.s32 %s1231_s21, %s1575_s25 }
   0xf   : > { %s1333_s30 = scalar_select %p39_p4, %s1215_s17, %s41_s26  }
  0x10   : > { %p76_p6 = scmp.ne.s32.totalorder %s1207_s15, %s1203_s14  ;;  %s66_s5 = sor.u32 %s65_s4, %s37_s27 }
  0x11   : > { %1554 = sst [smem:[#allocation8_spill]] %s1333_s30  ;;  %p121_p7 = scmp.eq.s32.totalorder %s65_s4, 0 }
  0x12   : > { %p67_p8 = scmp.eq.s32.totalorder %s66_s5, 0  ;;  %p1339_p9 = por %p76_p6, %p49_p2 }
  0x13   : > { %s123_s7 = sadd.s32 1, %s1199_s13  ;;  %p133_p10 = scmp.ne.s32.totalorder %s1199_s13, %s1195_s12 }
  0x14   : > { %s1347_s8 = scalar_select %p67_p8, %s1207_s15, %s69_s29  }
  0x15   : > { %s1350_s9 = scalar_select %p121_p7, %s1199_s13, %s123_s7  }
  0x16   : > { %p134_p11 = scmp.eq.s32.totalorder %s936_s23, 35  ;;  %p939_p13 = scmp.ge.s32.totalorder %s1235_s22, 36 }
  0x18   : > { %p1352_p12 = por %p134_p11, %p133_p10  ;;  %156 = sbr.rel (%p939_p13) target bundleno = 78 (0x4e), region = 16 }
  0x1f   : > { %159 = sbr.rel (!%p1325_p5) target bundleno = 38 (0x26), region = 20  ;;  %s161_s11 = sand.u32 (%p1325_p5), 1, %s1215_s17  }
  0x20   : > { %s996_s26 = sshll.u32 (%p1325_p5), %s1227_s20, 3  ;;  %s940_s27 = sshll.u32 (%p1325_p5), %s161_s11, 4 }
  0x21   : > { %s169_s5 = scalar_lea.vmem (%p1325_p5), %s1545_s0, %s996_s26  ;;  %s163_s23 = scalar_lea.vmem (%p1325_p5), [#allocation3], %s940_s27 }
  0x22   : > { %v199_v0 = vld [vmem:[%s169_s5] sm:$0xff] (%p1325_p5)  ;;  %v201_v1 = vld [vmem:[%s169_s5 + $0x18] sm:$0xff] (%p1325_p5) }
  0x23   : > { %200 = vst [vmem:[%s163_s23] sm:$0xff] (%p1325_p5), %v199_v0  ;;  %202 = vst [vmem:[%s163_s23 + $0x8] sm:$0xff] (%p1325_p5), %v201_v1 }
  0x26 PF: > { %208 = sbr.rel (!%p1339_p9) target bundleno = 78 (0x4e), region = 58  ;;  %s210_s28 = sand.u32 (%p1339_p9), 1, %s1207_s15  }
  0x27   : > { %s945_s7 = sshll.u32 (%p1339_p9), %s1231_s21, 1  ;;  %s943_s25 = sshll.u32 (%p1339_p9), %s210_s28, 8 }
  0x28   : > { %s1000_s11 = smul.u32 (%p1339_p9), 768, %s1227_s20  ;;  %s1377_s6 = scalar_lea.vmem (%p1339_p9), [#allocation4], %s943_s25 }
  0x2a   : > { %s216_s24 = sadd.s32 (%p1339_p9), %s1000_s11, %s945_s7 }
  0x2b   : > { %s947_s30 = sshll.u32 (%p1339_p9), %s216_s24, 2 }
  0x2c   : > { %s1372_s4 = scalar_lea.vmem (%p1339_p9), %s1546_s1, %s947_s30 }
  0x2d   : > { %v308_v2 = vld [vmem:[%s1372_s4] sm:$0xff] }
  0x2e   : > { %v310_v3 = vld [vmem:[%s1372_s4 + $0x60] sm:$0xff]  ;;  %309 = vst [vmem:[%s1377_s6] sm:$0xff] %v308_v2 }
  0x2f   : > { %v312_v4 = vld [vmem:[%s1372_s4 + $0xc0] sm:$0xff]  ;;  %311 = vst [vmem:[%s1377_s6 + $0x8] sm:$0xff] %v310_v3 }
  0x30   : > { %313 = vst [vmem:[%s1377_s6 + $0x10] sm:$0xff] %v312_v4  ;;  %v314_v5 = vld [vmem:[%s1372_s4 + $0x120] sm:$0xff] }
  0x31   : > { %v316_v6 = vld [vmem:[%s1372_s4 + $0x180] sm:$0xff]  ;;  %315 = vst [vmem:[%s1377_s6 + $0x18] sm:$0xff] %v314_v5 }
  0x32   : > { %v318_v7 = vld [vmem:[%s1372_s4 + $0x1e0] sm:$0xff]  ;;  %317 = vst [vmem:[%s1377_s6 + $0x20] sm:$0xff] %v316_v6 }
  0x33   : > { %319 = vst [vmem:[%s1377_s6 + $0x28] sm:$0xff] %v318_v7  ;;  %v320_v8 = vld [vmem:[%s1372_s4 + $0x240] sm:$0xff] }
  0x34   : > { %v322_v9 = vld [vmem:[%s1372_s4 + $0x2a0] sm:$0xff]  ;;  %321 = vst [vmem:[%s1377_s6 + $0x30] sm:$0xff] %v320_v8 }
  0x35   : > { %v324_v10 = vld [vmem:[%s1372_s4 + $0x300] sm:$0xff]  ;;  %323 = vst [vmem:[%s1377_s6 + $0x38] sm:$0xff] %v322_v9 }
  0x36   : > { %325 = vst [vmem:[%s1377_s6 + $0x40] sm:$0xff] %v324_v10  ;;  %v326_v11 = vld [vmem:[%s1372_s4 + $0x360] sm:$0xff] }
  0x37   : > { %v328_v12 = vld [vmem:[%s1372_s4 + $0x3c0] sm:$0xff]  ;;  %327 = vst [vmem:[%s1377_s6 + $0x48] sm:$0xff] %v326_v11 }
  0x38   : > { %v330_v13 = vld [vmem:[%s1372_s4 + $0x420] sm:$0xff]  ;;  %329 = vst [vmem:[%s1377_s6 + $0x50] sm:$0xff] %v328_v12 }
  0x39   : > { %331 = vst [vmem:[%s1377_s6 + $0x58] sm:$0xff] %v330_v13  ;;  %v332_v14 = vld [vmem:[%s1372_s4 + $0x480] sm:$0xff] }
  0x3a   : > { %v334_v15 = vld [vmem:[%s1372_s4 + $0x4e0] sm:$0xff]  ;;  %333 = vst [vmem:[%s1377_s6 + $0x60] sm:$0xff] %v332_v14 }
  0x3b   : > { %v336_v16 = vld [vmem:[%s1372_s4 + $0x540] sm:$0xff]  ;;  %335 = vst [vmem:[%s1377_s6 + $0x68] sm:$0xff] %v334_v15 }
  0x3c   : > { %337 = vst [vmem:[%s1377_s6 + $0x70] sm:$0xff] %v336_v16  ;;  %v338_v17 = vld [vmem:[%s1372_s4 + $0x5a0] sm:$0xff] }
  0x3d   : > { %v340_v18 = vld [vmem:[%s1372_s4 + $0x600] sm:$0xff]  ;;  %339 = vst [vmem:[%s1377_s6 + $0x78] sm:$0xff] %v338_v17 }
  0x3e   : > { %v342_v19 = vld [vmem:[%s1372_s4 + $0x660] sm:$0xff]  ;;  %341 = vst [vmem:[%s1377_s6 + $0x80] sm:$0xff] %v340_v18 }
  0x3f   : > { %343 = vst [vmem:[%s1377_s6 + $0x88] sm:$0xff] %v342_v19  ;;  %v344_v20 = vld [vmem:[%s1372_s4 + $0x6c0] sm:$0xff] }
  0x40   : > { %v346_v21 = vld [vmem:[%s1372_s4 + $0x720] sm:$0xff]  ;;  %345 = vst [vmem:[%s1377_s6 + $0x90] sm:$0xff] %v344_v20 }
  0x41   : > { %v348_v22 = vld [vmem:[%s1372_s4 + $0x780] sm:$0xff]  ;;  %347 = vst [vmem:[%s1377_s6 + $0x98] sm:$0xff] %v346_v21 }
  0x42   : > { %349 = vst [vmem:[%s1377_s6 + $0xa0] sm:$0xff] %v348_v22  ;;  %v350_v23 = vld [vmem:[%s1372_s4 + $0x7e0] sm:$0xff] }
  0x43   : > { %v352_v24 = vld [vmem:[%s1372_s4 + $0x840] sm:$0xff]  ;;  %351 = vst [vmem:[%s1377_s6 + $0xa8] sm:$0xff] %v350_v23 }
  0x44   : > { %v354_v25 = vld [vmem:[%s1372_s4 + $0x8a0] sm:$0xff]  ;;  %353 = vst [vmem:[%s1377_s6 + $0xb0] sm:$0xff] %v352_v24 }
  0x45   : > { %355 = vst [vmem:[%s1377_s6 + $0xb8] sm:$0xff] %v354_v25  ;;  %v356_v26 = vld [vmem:[%s1372_s4 + $0x900] sm:$0xff] }
  0x46   : > { %v358_v27 = vld [vmem:[%s1372_s4 + $0x960] sm:$0xff]  ;;  %357 = vst [vmem:[%s1377_s6 + $0xc0] sm:$0xff] %v356_v26 }
  0x47   : > { %v360_v28 = vld [vmem:[%s1372_s4 + $0x9c0] sm:$0xff]  ;;  %359 = vst [vmem:[%s1377_s6 + $0xc8] sm:$0xff] %v358_v27 }
  0x48   : > { %361 = vst [vmem:[%s1377_s6 + $0xd0] sm:$0xff] %v360_v28  ;;  %v362_v29 = vld [vmem:[%s1372_s4 + $0xa20] sm:$0xff] }
  0x49   : > { %v364_v30 = vld [vmem:[%s1372_s4 + $0xa80] sm:$0xff]  ;;  %363 = vst [vmem:[%s1377_s6 + $0xd8] sm:$0xff] %v362_v29 }
  0x4a   : > { %v366_v31 = vld [vmem:[%s1372_s4 + $0xae0] sm:$0xff]  ;;  %365 = vst [vmem:[%s1377_s6 + $0xe0] sm:$0xff] %v364_v30 }
  0x4b   : > { %367 = vst [vmem:[%s1377_s6 + $0xe8] sm:$0xff] %v366_v31  ;;  %v368_v32 = vld [vmem:[%s1372_s4 + $0xb40] sm:$0xff] }
  0x4c   : > { %v370_v33 = vld [vmem:[%s1372_s4 + $0xba0] sm:$0xff]  ;;  %369 = vst [vmem:[%s1377_s6 + $0xf0] sm:$0xff] %v368_v32 }
  0x4d   : > { %371 = vst [vmem:[%s1377_s6 + $0xf8] sm:$0xff] %v370_v33 }
  0x4e PF: > { %p948_p0 = scmp.ge.s32.totalorder %s1235_s22, 1  ;;  %p384_p1 = scmp.lt.s32.totalorder %s1235_s22, 37 }
  0x50   : > { %p385_p2 = pnand %p948_p0, %p384_p1 }
  0x51   : > { %s391_s24 = sand.u32 (!%p385_p2), 1, %s1211_s16   ;;  %s398_s25 = sand.u32 (!%p385_p2), 1, %s1203_s14  }
  0x52   : > { %388 = sbr.rel (%p385_p2) target bundleno = 424 (0x1a8), region = 100  ;;  %s1444_s30 = sshll.u32 (!%p385_p2), %s391_s24, 4 }
  0x53   : > { %s950_s27 = sshll.u32 (!%p385_p2), %s398_s25, 8  ;;  %s425_s5 = sand.u32 (!%p385_p2), 1, %s1195_s12  }
  0x54   : > { %s952_s23 = sshll.u32 (!%p385_p2), %s1223_s19, 1  ;;  %s951_s28 = sshll.u32 (!%p385_p2), %s425_s5, 4 }
  0x55   : > { %p433_p3 = scmp.lt.s32.totalorder (!%p385_p2), %s952_s23, 23  ;;  %s393_s26 = scalar_lea.vmem (!%p385_p2), [#allocation3], %s1444_s30 }
  0x56   : > { %s1455_s4 = scalar_lea.vmem (!%p385_p2), [#allocation4], %s950_s27  ;;  %s1457_s16 = scalar_lea.vmem (!%p385_p2), [#allocation5], %s951_s28 }
  0x57   : > { %p953_p4 = scmp.ne.s32.totalorder (!%p385_p2), %s1219_s18, 0 }
  0x59   : > { %s1577_s23 = smov (!%p433_p3, %s952_s23), 23  ;;  %442 = sbr.rel (%p953_p4) target bundleno = 96 (0x60), region = 112 }
  0x5a   : > { %s435_s29 = scalar_lea.vmem %s1547_s2, %s1577_s23  ;;  %v1237_v34 = vmov (!%p953_p4), 0.0  }
  0x5b   : > { %443 = vst [vmem:[#allocation2] sm:$0xff] (!%p953_p4), %v1237_v34  ;;  %444 = vst [vmem:[#allocation2 + $0x8] sm:$0xff] (!%p953_p4), %v1237_v34 }
  0x5c   : > { %445 = vst [vmem:[#allocation2 + $0x10] sm:$0xff] (!%p953_p4), %v1237_v34  ;;  %446 = vst [vmem:[#allocation2 + $0x18] sm:$0xff] (!%p953_p4), %v1237_v34 }
  0x60 PF: > { %v1090_v35 = vld [vmem:[%s1455_s4 + $0x4] ss:$8 sps:$4 sm:$0xff]   ;;  %v1092_v36 = vld [vmem:[%s1455_s4] ss:$8 sps:$4 sm:$0xff]   ;;  %v1093_v37 = vld [vmem:[%s1455_s4 + $0x14] ss:$8 sps:$4 sm:$0xff]  }
  0x61   : > { %655 = vmatprep.subr.bf16.mxu0 %v1090_v35  ;;  %v1095_v38 = vld [vmem:[%s1455_s4 + $0x10] ss:$8 sps:$4 sm:$0xff]   ;;  %v1096_v39 = vld [vmem:[%s1455_s4 + $0x24] ss:$8 sps:$4 sm:$0xff]   ;;  %v1098_v40 = vld [vmem:[%s1455_s4 + $0x20] ss:$8 sps:$4 sm:$0xff]  }
  0x62   : > { %656 = vmatpush1.bf16.msra.mxu0 %v1092_v36  ;;  %v1099_v41 = vld [vmem:[%s1455_s4 + $0x34] ss:$8 sps:$4 sm:$0xff]   ;;  %v1101_v42 = vld [vmem:[%s1455_s4 + $0x30] ss:$8 sps:$4 sm:$0xff]   ;;  %v1102_v43 = vld [vmem:[%s1455_s4 + $0x44] ss:$8 sps:$4 sm:$0xff]  }
  0x63   : > { %657 = vmatprep.subr.bf16.mxu0 %v1093_v37  ;;  %v1104_v44 = vld [vmem:[%s1455_s4 + $0x40] ss:$8 sps:$4 sm:$0xff]   ;;  %v1105_v45 = vld [vmem:[%s1455_s4 + $0x54] ss:$8 sps:$4 sm:$0xff]   ;;  %v1107_v46 = vld [vmem:[%s1455_s4 + $0x50] ss:$8 sps:$4 sm:$0xff]  }
  0x64   : > { %v1108_v47 = vld [vmem:[%s1455_s4 + $0x64] ss:$8 sps:$4 sm:$0xff]   ;;  %v1110_v49 = vld [vmem:[%s1455_s4 + $0x60] ss:$8 sps:$4 sm:$0xff]   ;;  %v1111_v50 = vld [vmem:[%s1455_s4 + $0x74] ss:$8 sps:$4 sm:$0xff]  }
  0x65   : > { %v1140_v48 = vld [vmem:[%s393_s26 + $0x4] ss:$8 sps:$4 sm:$0xff]   ;;  %v1113_v51 = vld [vmem:[%s1455_s4 + $0x70] ss:$8 sps:$4 sm:$0xff]   ;;  %v1116_v53 = vld [vmem:[%s1455_s4 + $0x80] ss:$8 sps:$4 sm:$0xff]  }
  0x66   : > { %658 = vmatpush1.bf16.msra.mxu0 %v1095_v38  ;;  %687 = vmatprep.mubr.bf16.mxu0 %v1140_v48  ;;  %v1114_v52 = vld [vmem:[%s1455_s4 + $0x84] ss:$8 sps:$4 sm:$0xff]   ;;  %v1117_v54 = vld [vmem:[%s1455_s4 + $0x94] ss:$8 sps:$4 sm:$0xff]   ;;  %v1119_v55 = vld [vmem:[%s1455_s4 + $0x90] ss:$8 sps:$4 sm:$0xff]  }
  0x67   : > { %659 = vmatprep.subr.bf16.mxu0 %v1096_v39  ;;  %v1120_v56 = vld [vmem:[%s1455_s4 + $0xa4] ss:$8 sps:$4 sm:$0xff]   ;;  %v1122_v57 = vld [vmem:[%s1455_s4 + $0xa0] ss:$8 sps:$4 sm:$0xff]   ;;  %v1123_v58 = vld [vmem:[%s1455_s4 + $0xb4] ss:$8 sps:$4 sm:$0xff]  }
  0x68   : > { %v1125_v59 = vld [vmem:[%s1455_s4 + $0xb0] ss:$8 sps:$4 sm:$0xff]   ;;  %v1126_v60 = vld [vmem:[%s1455_s4 + $0xc4] ss:$8 sps:$4 sm:$0xff]   ;;  %v1128_v61 = vld [vmem:[%s1455_s4 + $0xc0] ss:$8 sps:$4 sm:$0xff]  }
  0x69   : > { %v1129_v62 = vld [vmem:[%s1455_s4 + $0xd4] ss:$8 sps:$4 sm:$0xff]   ;;  %v1131_v63 = vld [vmem:[%s1455_s4 + $0xd0] ss:$8 sps:$4 sm:$0xff]   ;;  %v1132_v0 = vld [vmem:[%s1455_s4 + $0xe4] ss:$8 sps:$4 sm:$0xff]  }
  0x6a   : > { %660 = vmatpush1.bf16.msra.mxu0 %v1098_v40  ;;  %v1134_v1 = vld [vmem:[%s1455_s4 + $0xe0] ss:$8 sps:$4 sm:$0xff]   ;;  %v1135_v2 = vld [vmem:[%s1455_s4 + $0xf4] ss:$8 sps:$4 sm:$0xff]   ;;  %v1137_v3 = vld [vmem:[%s1455_s4 + $0xf0] ss:$8 sps:$4 sm:$0xff]  }
  0x6b   : > { %661 = vmatprep.subr.bf16.mxu0 %v1099_v41  ;;  %v1138_v4 = vld [vmem:[%s393_s26] ss:$8 sps:$4 sm:$0xff]   ;;  %p988_p5 = scmp.ne.s32.totalorder %s1219_s18, 2 }
  0x6c   : > { %v447_v5 = vld [vmem:[#allocation2] sm:$0xff]  ;;  %v448_v6 = vld [vmem:[#allocation2 + $0x8] sm:$0xff]  ;;  %v449_v8 = vld [vmem:[#allocation2 + $0x10] sm:$0xff]  ;;  %v716_v17 = vlaneseq (!%p988_p5) }
  0x6d   : > { %v450_v11 = vld [vmem:[#allocation2 + $0x18] sm:$0xff]  ;;  %v714_v19 = vld [vmem:[%s435_s29] sm:$0x3] (!%p988_p5) }
  0x6e   : > { %662 = vmatpush1.bf16.msra.mxu0 %v1101_v42  ;;  %v717_v18 = vshrl.u32 (!%p988_p5), %v716_v17, 7 }
  0x6f   : > { %663 = vmatprep.subr.bf16.mxu0 %v1102_v43 }
  0x70   : > { %v718_v21 = vsub.s32 (!%p988_p5), 0, %v717_v18  ;;  %v722_v22 = vsub.s32 (!%p988_p5), 1, %v717_v18 }
  0x72   : > { %664 = vmatpush1.bf16.msra.mxu0 %v1104_v44  ;;  %v719_v26 = vrot.slane (!%p988_p5), %v714_v19, %v718_v21  ;;  %v723_v27 = vrot.slane (!%p988_p5), %v714_v19, %v722_v22 }
  0x73   : > { %665 = vmatprep.subr.bf16.mxu0 %v1105_v45 }
  0x76   : > { %666 = vmatpush1.bf16.msra.mxu0 %v1107_v46 }
  0x77   : > { %667 = vmatprep.subr.bf16.mxu0 %v1108_v47 }
  0x7a   : > { %668 = vmatpush1.bf16.msra.mxu0 %v1110_v49 }
  0x7b   : > { %669 = vmatprep.subr.bf16.mxu0 %v1111_v50 }
  0x7e   : > { %670 = vmatpush1.bf16.msra.mxu0 %v1113_v51 }
  0x7f   : > { %671 = vmatprep.subr.bf16.mxu0 %v1114_v52 }
  0x82   : > { %672 = vmatpush1.bf16.msra.mxu0 %v1116_v53 }
  0x83   : > { %673 = vmatprep.subr.bf16.mxu0 %v1117_v54 }
  0x86   : > { %674 = vmatpush1.bf16.msra.mxu0 %v1119_v55 }
  0x87   : > { %675 = vmatprep.subr.bf16.mxu0 %v1120_v56 }
  0x8a   : > { %676 = vmatpush1.bf16.msra.mxu0 %v1122_v57 }
  0x8b   : > { %677 = vmatprep.subr.bf16.mxu0 %v1123_v58 }
  0x8e   : > { %678 = vmatpush1.bf16.msra.mxu0 %v1125_v59 }
  0x8f   : > { %679 = vmatprep.subr.bf16.mxu0 %v1126_v60 }
  0x92   : > { %680 = vmatpush1.bf16.msra.mxu0 %v1128_v61 }
  0x93   : > { %681 = vmatprep.subr.bf16.mxu0 %v1129_v62 }
  0x96   : > { %682 = vmatpush1.bf16.msra.mxu0 %v1131_v63 }
  0x97   : > { %683 = vmatprep.subr.bf16.mxu0 %v1132_v0 }
  0x9a   : > { %684 = vmatpush1.bf16.msra.mxu0 %v1134_v1 }
  0x9b   : > { %685 = vmatprep.subr.bf16.mxu0 %v1135_v2 }
  0x9e   : > { %686 = vmatpush1.bf16.msra.mxu0 %v1137_v3 }
  0xa1   : > { %688 = vmatmul.mubr.bf16.vlgmr.msra.gmra.mrb[0].mxu0 %v1138_v4 }
 0x174   : > { %v689_v7 = vpop.f32.mrb[0].mxu0  ;;  %709 = sbr.rel (%p988_p5) target bundleno = 416 (0x1a0), region = 116 }
 0x175   : > { %v698_v9 = vadd.f32 %v689_v7, %v447_v5  ;;  %v691_v10 = vpop.f32.mrb[1].mxu0 }
 0x176   : > { %v699_v12 = vadd.f32 %v691_v10, %v448_v6  ;;  %v693_v13 = vpop.f32.mrb[2].mxu0 }
 0x177   : > { %702 = vst [vmem:[#allocation2] sm:$0xff] %v698_v9  ;;  %v700_v14 = vadd.f32 %v693_v13, %v449_v8  ;;  %v695_v15 = vpop.f32.mrb[3].mxu0 }
 0x178   : > { %703 = vst [vmem:[#allocation2 + $0x8] sm:$0xff] %v699_v12  ;;  %v701_v16 = vadd.f32 %v695_v15, %v450_v11 }
 0x179   : > { %704 = vst [vmem:[#allocation2 + $0x10] sm:$0xff] %v700_v14 }
 0x17a   : > { %705 = vst [vmem:[#allocation2 + $0x18] sm:$0xff] %v701_v16 }
 0x17e   : > { %v710_v20 = vld [vmem:[#allocation2] sm:$0xff] }
 0x17f   : > { %v711_v23 = vld [vmem:[#allocation2 + $0x8] sm:$0xff]  ;;  %v726_v28 = vadd.f32 %v719_v26, %v710_v20 }
 0x180   : > { %v712_v24 = vld [vmem:[#allocation2 + $0x10] sm:$0xff]  ;;  %v727_v29 = vadd.f32 %v723_v27, %v711_v23 }
 0x181   : > { %v713_v25 = vld [vmem:[#allocation2 + $0x18] sm:$0xff]  ;;  %v728_v30 = vadd.f32 %v719_v26, %v712_v24  ;;  %v734_v32 = vmul.f32 0.044715, %v726_v28  ;;  %v730_v52 = vmul.f32 0.5, %v726_v28 }
 0x182   : > { %v729_v31 = vadd.f32 %v723_v27, %v713_v25  ;;  %v735_v33 = vmul.f32 0.044715, %v727_v29  ;;  %v731_v54 = vmul.f32 0.5, %v727_v29 }
 0x183   : > { %v736_v34 = vmul.f32 0.044715, %v728_v30  ;;  %v738_v36 = vmul.f32 %v734_v32, %v726_v28  ;;  %v732_v57 = vmul.f32 0.5, %v728_v30 }
 0x184   : > { %v737_v35 = vmul.f32 0.044715, %v729_v31  ;;  %v739_v37 = vmul.f32 %v735_v33, %v727_v29  ;;  %v733_v60 = vmul.f32 0.5, %v729_v31 }
 0x185   : > { %v740_v38 = vmul.f32 %v736_v34, %v728_v30  ;;  %v742_v40 = vmul.f32 %v738_v36, %v726_v28 }
 0x186   : > { %v741_v39 = vmul.f32 %v737_v35, %v729_v31  ;;  %v743_v41 = vmul.f32 %v739_v37, %v727_v29 }
 0x187   : > { %v744_v42 = vmul.f32 %v740_v38, %v728_v30  ;;  %v746_v44 = vadd.f32 %v742_v40, %v726_v28 }
 0x188   : > { %v745_v43 = vmul.f32 %v741_v39, %v729_v31  ;;  %v747_v45 = vadd.f32 %v743_v41, %v727_v29 }
 0x189   : > { %v748_v46 = vadd.f32 %v744_v42, %v728_v30  ;;  %v750_v48 = vmul.f32 0.7978846, %v746_v44 }
 0x18a   : > { %v749_v47 = vadd.f32 %v745_v43, %v729_v31  ;;  %v751_v49 = vmul.f32 0.7978846, %v747_v45 }
 0x18b   : > { %v752_v50 = vmul.f32 0.7978846, %v748_v46  ;;  %1141 = vtanh.f32 %v750_v48 }
 0x18c   : > { %v753_v51 = vmul.f32 0.7978846, %v749_v47  ;;  %1143 = vtanh.f32 %v751_v49 }
 0x18d   : > { %1145 = vtanh.f32 %v752_v50 }
 0x18e   : > { %1147 = vtanh.f32 %v753_v51 }
 0x195   : > { %v1142_v53 = vpop.eup %1141 }
 0x196   : > { %v1144_v55 = vpop.eup %1143  ;;  %v758_v56 = vadd.f32 1.0, %v1142_v53 }
 0x197   : > { %v1146_v58 = vpop.eup %1145  ;;  %v759_v59 = vadd.f32 1.0, %v1144_v55 }
 0x198   : > { %v1148_v61 = vpop.eup %1147  ;;  %v762_v62 = vmul.f32 %v758_v56, %v730_v52  ;;  %v760_v63 = vadd.f32 1.0, %v1146_v58 }
 0x199   : > { %v763_v0 = vmul.f32 %v759_v59, %v731_v54  ;;  %v761_v1 = vadd.f32 1.0, %v1148_v61 }
 0x19a   : > { %v764_v2 = vmul.f32 %v760_v63, %v732_v57 }
 0x19b   : > { %v997_v3 = vpack.c.bf16 %v763_v0, %v762_v62  ;;  %v765_v4 = vmul.f32 %v761_v1, %v733_v60 }
 0x19d   : > { %778 = vst [vmem:[%s1457_s16] sm:$0xff] %v997_v3  ;;  %v998_v5 = vpack.c.bf16 %v765_v4, %v764_v2 }
 0x19f   : > { %779 = vst [vmem:[%s1457_s16 + $0x8] sm:$0xff] %v998_v5 }
 0x1a0 PF: > { %786 = sbr.rel (!%p1352_p12) target bundleno = 424 (0x1a8), region = 120  ;;  %s999_s18 = sshll.u32 (%p1352_p12), %s1223_s19, 3 }
 0x1a1   : > { %s792_s25 = scalar_lea.vmem (%p1352_p12), %s1548_s3, %s999_s18 }
 0x1a4   : > { %v822_v6 = vld [vmem:[%s1457_s16] sm:$0xff] (%p1352_p12) }
 0x1a5   : > { %823 = vst [vmem:[%s792_s25] sm:$0xff] (%p1352_p12), %v822_v6 }
 0x1a6   : > { %v824_v7 = vld [vmem:[%s1457_s16 + $0x8] sm:$0xff] (%p1352_p12) }
 0x1a7   : > { %825 = vst [vmem:[%s792_s25 + $0x60] sm:$0xff] %v824_v7 }
 0x1a8 PF: > { %s13_s22 = sadd.s32 1, %s1235_s22   ;;  %s1557_s10 = sld [smem:[#allocation8_spill]] }
 0x1a9   : > { %p10_p6 = scmp.ge.s32.totalorder %s13_s22, 38   ;;  %s1558_s30 = sld [smem:[#allocation6_spill]] }
 0x1aa   : > { %s1559_s27 = sld [smem:[#allocation7_spill]]  ;;  %s1560_s12 = smov %s1199_s13 }
 0x1ab   : > { %s1561_s13 = smov %s1350_s9  ;;  %s1562_s14 = smov %s1207_s15 }
 0x1ac   : > { %s1563_s15 = smov %s1347_s8  ;;  %s1564_s16 = smov %s1215_s17 }
 0x1ad   : > { %s1566_s18 = smov %s1227_s20  ;;  %s1567_s19 = smov %s1231_s21 }
 0x1ae   : > { %s1565_s17 = smov %s1557_s10  ;;  %12 = sbr.rel (!%p10_p6) target bundleno = 6 (0x6), region = 200 }
 0x1af   : > { %s1568_s20 = smov %s1558_s30 }
 0x1b0   : > { %s1569_s21 = smov %s1559_s27 }

// kernel: forward.24
= control target key start
LH: loop header
LB: loop body
LE: loop exit
PB: predicated region body
PF: predicated region fallthrough
CT: control target
= control target key end

     0   :  { %s1214_s12 = smov 0   ;;  %s1216_s13 = smov 0   ;;  %s1501_s0 = inlined_call_operand.vmem [shape: bf16[16,768], index: 0, kind: input, shape index: {}]   ;;  %s1502_s1 = inlined_call_operand.vmem [shape: bf16[768,2304], index: 1, kind: input, shape index: {}]   ;;  %s1503_s2 = inlined_call_operand.vmem [shape: f32[1,2304], index: 2, kind: input, shape index: {}]   ;;  %s1504_s3 = inlined_call_operand.vmem [shape: bf16[16,2304], index: 3, kind: output, shape index: {}]  }
   0x1   :  { %s1218_s14 = smov 0   ;;  %s1220_s15 = smov 0  }
   0x2   :  { %s1222_s16 = smov 0   ;;  %s1224_s17 = smov 0  }
   0x3   :  { %s1226_s18 = smov 0   ;;  %s1228_s19 = smov 0  }
   0x4   :  { %s1230_s20 = smov 0   ;;  %s1232_s21 = smov 0  }
   0x5   :  { %s1234_s22 = smov 0  }
   0x6 LB: > { %s900_s23 = sadd.s32 4294967295, %s1191_s22   ;;  %s25_s24 = sadd.s32 1, %s1183_s20  ;;  %s1191_s22 = sphi %s1234_s22, %s13_s22   ;;  %s1187_s21 = sphi %s1232_s21, %s1525_s21   ;;  %s1183_s20 = sphi %s1230_s20, %s1524_s20   ;;  %s1179_s19 = sphi %s1228_s19, %s1523_s19   ;;  %s1175_s18 = sphi %s1226_s18, %s1522_s18   ;;  %s1171_s17 = sphi %s1224_s17, %s1521_s17   ;;  %s1167_s16 = sphi %s1222_s16, %s1520_s16   ;;  %s1163_s15 = sphi %s1220_s15, %s1519_s15   ;;  %s1159_s14 = sphi %s1218_s14, %s1518_s14   ;;  %s1155_s13 = sphi %s1216_s13, %s1517_s13   ;;  %s1151_s12 = sphi %s1214_s12, %s1516_s12  }
   0x7   : > { %p26_p0 = scmp.ge.s32.totalorder %s25_s24, 3  ;;  %s28_s25 = sadd.s32 1, %s1187_s21 }
   0x8   : > { %s41_s26 = sadd.s32 1, %s1171_s17  ;;  %p48_p1 = scmp.ne.s32.totalorder %s1171_s17, %s1167_s16 }
   0x9   : > { %s1527_s24 = smov (%p26_p0, %s25_s24), 0  ;;  %s1529_s25 = smov (!%p26_p0, %s28_s25), %s1187_s21 }
   0xa   : > { %1507 = sst [smem:[#allocation6_spill]] %s1527_s24  ;;  %s37_s27 = ssub.s32 %s1183_s20, %s1527_s24 }
   0xb   : > { %p49_p2 = scmp.eq.s32.totalorder %s1191_s22, 0  ;;  %p30_p3 = scmp.ge.s32.totalorder %s1529_s25, 9 }
   0xc   : > { %p39_p4 = scmp.eq.s32.totalorder %s37_s27, 0  ;;  %s69_s29 = sadd.s32 1, %s1163_s15 }
   0xd   : > { %p1281_p5 = por %p49_p2, %p48_p1  ;;  %s1531_s25 = smov (%p30_p3, %s1529_s25), 0 }
   0xe   : > { %1509 = sst [smem:[#allocation7_spill]] %s1531_s25  ;;  %s65_s4 = ssub.s32 %s1187_s21, %s1531_s25 }
   0xf   : > { %s1289_s30 = scalar_select %p39_p4, %s1171_s17, %s41_s26  }
  0x10   : > { %p76_p6 = scmp.ne.s32.totalorder %s1163_s15, %s1159_s14  ;;  %s66_s5 = sor.u32 %s65_s4, %s37_s27 }
  0x11   : > { %1510 = sst [smem:[#allocation8_spill]] %s1289_s30  ;;  %p121_p7 = scmp.eq.s32.totalorder %s65_s4, 0 }
  0x12   : > { %p67_p8 = scmp.eq.s32.totalorder %s66_s5, 0  ;;  %p1295_p9 = por %p76_p6, %p49_p2 }
  0x13   : > { %s123_s7 = sadd.s32 1, %s1155_s13  ;;  %p133_p10 = scmp.ne.s32.totalorder %s1155_s13, %s1151_s12 }
  0x14   : > { %s1303_s8 = scalar_select %p67_p8, %s1163_s15, %s69_s29  }
  0x15   : > { %s1306_s9 = scalar_select %p121_p7, %s1155_s13, %s123_s7  }
  0x16   : > { %p134_p11 = scmp.eq.s32.totalorder %s900_s23, 26  ;;  %p903_p13 = scmp.ge.s32.totalorder %s1191_s22, 27 }
  0x18   : > { %p1308_p12 = por %p134_p11, %p133_p10  ;;  %156 = sbr.rel (%p903_p13) target bundleno = 62 (0x3e), region = 16 }
  0x1f   : > { %159 = sbr.rel (!%p1281_p5) target bundleno = 38 (0x26), region = 20  ;;  %s161_s11 = sand.u32 (%p1281_p5), 1, %s1171_s17  }
  0x20   : > { %s960_s26 = sshll.u32 (%p1281_p5), %s1183_s20, 3  ;;  %s904_s27 = sshll.u32 (%p1281_p5), %s161_s11, 4 }
  0x21   : > { %s169_s5 = scalar_lea.vmem (%p1281_p5), %s1501_s0, %s960_s26  ;;  %s163_s23 = scalar_lea.vmem (%p1281_p5), [#allocation3], %s904_s27 }
  0x22   : > { %v199_v0 = vld [vmem:[%s169_s5] sm:$0xff] (%p1281_p5)  ;;  %v201_v1 = vld [vmem:[%s169_s5 + $0x18] sm:$0xff] (%p1281_p5) }
  0x23   : > { %200 = vst [vmem:[%s163_s23] sm:$0xff] (%p1281_p5), %v199_v0  ;;  %202 = vst [vmem:[%s163_s23 + $0x8] sm:$0xff] (%p1281_p5), %v201_v1 }
  0x26 PF: > { %208 = sbr.rel (!%p1295_p9) target bundleno = 62 (0x3e), region = 58  ;;  %s210_s28 = sand.u32 (%p1295_p9), 1, %s1163_s15  }
  0x27   : > { %s909_s7 = sshll.u32 (%p1295_p9), %s1187_s21, 1  ;;  %s907_s25 = sshll.u32 (%p1295_p9), %s210_s28, 8 }
  0x28   : > { %s964_s11 = smul.u32 (%p1295_p9), 576, %s1183_s20  ;;  %s1333_s6 = scalar_lea.vmem (%p1295_p9), [#allocation4], %s907_s25 }
  0x2a   : > { %s216_s24 = sadd.s32 (%p1295_p9), %s964_s11, %s909_s7 }
  0x2b   : > { %s911_s30 = sshll.u32 (%p1295_p9), %s216_s24, 2 }
  0x2c   : > { %s1328_s4 = scalar_lea.vmem (%p1295_p9), %s1502_s1, %s911_s30 }
  0x2d   : > { %v308_v2 = vld [vmem:[%s1328_s4] sm:$0xff]  ;;  %v310_v3 = vld [vmem:[%s1328_s4 + $0x48] sm:$0xff]  ;;  %v312_v4 = vld [vmem:[%s1328_s4 + $0x90] sm:$0xff] }
  0x2e   : > { %309 = vst [vmem:[%s1333_s6] sm:$0xff] %v308_v2  ;;  %311 = vst [vmem:[%s1333_s6 + $0x8] sm:$0xff] %v310_v3  ;;  %v314_v5 = vld [vmem:[%s1328_s4 + $0xd8] sm:$0xff]  ;;  %v316_v6 = vld [vmem:[%s1328_s4 + $0x120] sm:$0xff] }
  0x2f   : > { %313 = vst [vmem:[%s1333_s6 + $0x10] sm:$0xff] %v312_v4  ;;  %v318_v7 = vld [vmem:[%s1328_s4 + $0x168] sm:$0xff]  ;;  %315 = vst [vmem:[%s1333_s6 + $0x18] sm:$0xff] %v314_v5  ;;  %v320_v8 = vld [vmem:[%s1328_s4 + $0x1b0] sm:$0xff] }
  0x30   : > { %317 = vst [vmem:[%s1333_s6 + $0x20] sm:$0xff] %v316_v6  ;;  %319 = vst [vmem:[%s1333_s6 + $0x28] sm:$0xff] %v318_v7  ;;  %v322_v9 = vld [vmem:[%s1328_s4 + $0x1f8] sm:$0xff]  ;;  %v324_v10 = vld [vmem:[%s1328_s4 + $0x240] sm:$0xff] }
  0x31   : > { %321 = vst [vmem:[%s1333_s6 + $0x30] sm:$0xff] %v320_v8  ;;  %323 = vst [vmem:[%s1333_s6 + $0x38] sm:$0xff] %v322_v9  ;;  %v326_v11 = vld [vmem:[%s1328_s4 + $0x288] sm:$0xff]  ;;  %v328_v12 = vld [vmem:[%s1328_s4 + $0x2d0] sm:$0xff] }
  0x32   : > { %325 = vst [vmem:[%s1333_s6 + $0x40] sm:$0xff] %v324_v10  ;;  %v330_v13 = vld [vmem:[%s1328_s4 + $0x318] sm:$0xff]  ;;  %327 = vst [vmem:[%s1333_s6 + $0x48] sm:$0xff] %v326_v11  ;;  %v332_v14 = vld [vmem:[%s1328_s4 + $0x360] sm:$0xff] }
  0x33   : > { %329 = vst [vmem:[%s1333_s6 + $0x50] sm:$0xff] %v328_v12  ;;  %331 = vst [vmem:[%s1333_s6 + $0x58] sm:$0xff] %v330_v13  ;;  %v334_v15 = vld [vmem:[%s1328_s4 + $0x3a8] sm:$0xff]  ;;  %v336_v16 = vld [vmem:[%s1328_s4 + $0x3f0] sm:$0xff] }
  0x34   : > { %333 = vst [vmem:[%s1333_s6 + $0x60] sm:$0xff] %v332_v14  ;;  %335 = vst [vmem:[%s1333_s6 + $0x68] sm:$0xff] %v334_v15  ;;  %v338_v17 = vld [vmem:[%s1328_s4 + $0x438] sm:$0xff]  ;;  %v340_v18 = vld [vmem:[%s1328_s4 + $0x480] sm:$0xff] }
  0x35   : > { %337 = vst [vmem:[%s1333_s6 + $0x70] sm:$0xff] %v336_v16  ;;  %v342_v19 = vld [vmem:[%s1328_s4 + $0x4c8] sm:$0xff]  ;;  %339 = vst [vmem:[%s1333_s6 + $0x78] sm:$0xff] %v338_v17  ;;  %v344_v20 = vld [vmem:[%s1328_s4 + $0x510] sm:$0xff] }
  0x36   : > { %341 = vst [vmem:[%s1333_s6 + $0x80] sm:$0xff] %v340_v18  ;;  %343 = vst [vmem:[%s1333_s6 + $0x88] sm:$0xff] %v342_v19  ;;  %v346_v21 = vld [vmem:[%s1328_s4 + $0x558] sm:$0xff]  ;;  %v348_v22 = vld [vmem:[%s1328_s4 + $0x5a0] sm:$0xff] }
  0x37   : > { %345 = vst [vmem:[%s1333_s6 + $0x90] sm:$0xff] %v344_v20  ;;  %347 = vst [vmem:[%s1333_s6 + $0x98] sm:$0xff] %v346_v21  ;;  %v350_v23 = vld [vmem:[%s1328_s4 + $0x5e8] sm:$0xff]  ;;  %v352_v24 = vld [vmem:[%s1328_s4 + $0x630] sm:$0xff] }
  0x38   : > { %349 = vst [vmem:[%s1333_s6 + $0xa0] sm:$0xff] %v348_v22  ;;  %v354_v25 = vld [vmem:[%s1328_s4 + $0x678] sm:$0xff]  ;;  %351 = vst [vmem:[%s1333_s6 + $0xa8] sm:$0xff] %v350_v23  ;;  %v356_v26 = vld [vmem:[%s1328_s4 + $0x6c0] sm:$0xff] }
  0x39   : > { %353 = vst [vmem:[%s1333_s6 + $0xb0] sm:$0xff] %v352_v24  ;;  %355 = vst [vmem:[%s1333_s6 + $0xb8] sm:$0xff] %v354_v25  ;;  %v358_v27 = vld [vmem:[%s1328_s4 + $0x708] sm:$0xff]  ;;  %v360_v28 = vld [vmem:[%s1328_s4 + $0x750] sm:$0xff] }
  0x3a   : > { %357 = vst [vmem:[%s1333_s6 + $0xc0] sm:$0xff] %v356_v26  ;;  %359 = vst [vmem:[%s1333_s6 + $0xc8] sm:$0xff] %v358_v27  ;;  %v362_v29 = vld [vmem:[%s1328_s4 + $0x798] sm:$0xff]  ;;  %v364_v30 = vld [vmem:[%s1328_s4 + $0x7e0] sm:$0xff] }
  0x3b   : > { %361 = vst [vmem:[%s1333_s6 + $0xd0] sm:$0xff] %v360_v28  ;;  %v366_v31 = vld [vmem:[%s1328_s4 + $0x828] sm:$0xff]  ;;  %363 = vst [vmem:[%s1333_s6 + $0xd8] sm:$0xff] %v362_v29  ;;  %v368_v32 = vld [vmem:[%s1328_s4 + $0x870] sm:$0xff] }
  0x3c   : > { %365 = vst [vmem:[%s1333_s6 + $0xe0] sm:$0xff] %v364_v30  ;;  %367 = vst [vmem:[%s1333_s6 + $0xe8] sm:$0xff] %v366_v31  ;;  %v370_v33 = vld [vmem:[%s1328_s4 + $0x8b8] sm:$0xff] }
  0x3d   : > { %369 = vst [vmem:[%s1333_s6 + $0xf0] sm:$0xff] %v368_v32  ;;  %371 = vst [vmem:[%s1333_s6 + $0xf8] sm:$0xff] %v370_v33 }
  0x3e PF: > { %p912_p0 = scmp.ge.s32.totalorder %s1191_s22, 1  ;;  %p384_p1 = scmp.lt.s32.totalorder %s1191_s22, 28 }
  0x40   : > { %p385_p2 = pnand %p912_p0, %p384_p1 }
  0x41   : > { %s391_s24 = sand.u32 (!%p385_p2), 1, %s1167_s16   ;;  %s398_s25 = sand.u32 (!%p385_p2), 1, %s1159_s14  }
  0x42   : > { %388 = sbr.rel (%p385_p2) target bundleno = 383 (0x17f), region = 100  ;;  %s1400_s30 = sshll.u32 (!%p385_p2), %s391_s24, 4 }
  0x43   : > { %s914_s27 = sshll.u32 (!%p385_p2), %s398_s25, 8  ;;  %s425_s5 = sand.u32 (!%p385_p2), 1, %s1151_s12  }
  0x44   : > { %s916_s23 = sshll.u32 (!%p385_p2), %s1179_s19, 1  ;;  %s915_s28 = sshll.u32 (!%p385_p2), %s425_s5, 4 }
  0x45   : > { %p433_p3 = scmp.lt.s32.totalorder (!%p385_p2), %s916_s23, 17  ;;  %s393_s26 = scalar_lea.vmem (!%p385_p2), [#allocation3], %s1400_s30 }
  0x46   : > { %s1411_s4 = scalar_lea.vmem (!%p385_p2), [#allocation4], %s914_s27  ;;  %s1413_s16 = scalar_lea.vmem (!%p385_p2), [#allocation5], %s915_s28 }
  0x47   : > { %p917_p4 = scmp.ne.s32.totalorder (!%p385_p2), %s1175_s18, 0 }
  0x49   : > { %s1533_s23 = smov (!%p433_p3, %s916_s23), 17  ;;  %442 = sbr.rel (%p917_p4) target bundleno = 80 (0x50), region = 112 }
  0x4a   : > { %s435_s29 = scalar_lea.vmem %s1503_s2, %s1533_s23  ;;  %v1193_v34 = vmov (!%p917_p4), 0.0  }
  0x4b   : > { %443 = vst [vmem:[#allocation2] sm:$0xff] (!%p917_p4), %v1193_v34  ;;  %444 = vst [vmem:[#allocation2 + $0x8] sm:$0xff] (!%p917_p4), %v1193_v34 }
  0x4c   : > { %445 = vst [vmem:[#allocation2 + $0x10] sm:$0xff] (!%p917_p4), %v1193_v34  ;;  %446 = vst [vmem:[#allocation2 + $0x18] sm:$0xff] (!%p917_p4), %v1193_v34 }
  0x50 PF: > { %v1054_v35 = vld [vmem:[%s1411_s4 + $0x4] ss:$8 sps:$4 sm:$0xff]   ;;  %v1056_v36 = vld [vmem:[%s1411_s4] ss:$8 sps:$4 sm:$0xff]   ;;  %v1057_v37 = vld [vmem:[%s1411_s4 + $0x14] ss:$8 sps:$4 sm:$0xff]  }
  0x51   : > { %655 = vmatprep.subr.bf16.mxu0 %v1054_v35  ;;  %v1059_v38 = vld [vmem:[%s1411_s4 + $0x10] ss:$8 sps:$4 sm:$0xff]   ;;  %v1060_v39 = vld [vmem:[%s1411_s4 + $0x24] ss:$8 sps:$4 sm:$0xff]   ;;  %v1062_v40 = vld [vmem:[%s1411_s4 + $0x20] ss:$8 sps:$4 sm:$0xff]  }
  0x52   : > { %656 = vmatpush1.bf16.msra.mxu0 %v1056_v36  ;;  %v1063_v41 = vld [vmem:[%s1411_s4 + $0x34] ss:$8 sps:$4 sm:$0xff]   ;;  %v1065_v42 = vld [vmem:[%s1411_s4 + $0x30] ss:$8 sps:$4 sm:$0xff]   ;;  %v1066_v43 = vld [vmem:[%s1411_s4 + $0x44] ss:$8 sps:$4 sm:$0xff]  }
  0x53   : > { %657 = vmatprep.subr.bf16.mxu0 %v1057_v37  ;;  %v1068_v44 = vld [vmem:[%s1411_s4 + $0x40] ss:$8 sps:$4 sm:$0xff]   ;;  %v1069_v45 = vld [vmem:[%s1411_s4 + $0x54] ss:$8 sps:$4 sm:$0xff]   ;;  %v1071_v46 = vld [vmem:[%s1411_s4 + $0x50] ss:$8 sps:$4 sm:$0xff]  }
  0x54   : > { %v1072_v47 = vld [vmem:[%s1411_s4 + $0x64] ss:$8 sps:$4 sm:$0xff]   ;;  %v1074_v49 = vld [vmem:[%s1411_s4 + $0x60] ss:$8 sps:$4 sm:$0xff]   ;;  %v1075_v50 = vld [vmem:[%s1411_s4 + $0x74] ss:$8 sps:$4 sm:$0xff]  }
  0x55   : > { %v1104_v48 = vld [vmem:[%s393_s26 + $0x4] ss:$8 sps:$4 sm:$0xff]   ;;  %v1077_v51 = vld [vmem:[%s1411_s4 + $0x70] ss:$8 sps:$4 sm:$0xff]   ;;  %v1080_v53 = vld [vmem:[%s1411_s4 + $0x80] ss:$8 sps:$4 sm:$0xff]  }
  0x56   : > { %658 = vmatpush1.bf16.msra.mxu0 %v1059_v38  ;;  %687 = vmatprep.mubr.bf16.mxu0 %v1104_v48  ;;  %v1078_v52 = vld [vmem:[%s1411_s4 + $0x84] ss:$8 sps:$4 sm:$0xff]   ;;  %v1081_v54 = vld [vmem:[%s1411_s4 + $0x94] ss:$8 sps:$4 sm:$0xff]   ;;  %v1083_v55 = vld [vmem:[%s1411_s4 + $0x90] ss:$8 sps:$4 sm:$0xff]  }
  0x57   : > { %659 = vmatprep.subr.bf16.mxu0 %v1060_v39  ;;  %v1084_v56 = vld [vmem:[%s1411_s4 + $0xa4] ss:$8 sps:$4 sm:$0xff]   ;;  %v1086_v57 = vld [vmem:[%s1411_s4 + $0xa0] ss:$8 sps:$4 sm:$0xff]   ;;  %v1087_v58 = vld [vmem:[%s1411_s4 + $0xb4] ss:$8 sps:$4 sm:$0xff]  }
  0x58   : > { %v1089_v59 = vld [vmem:[%s1411_s4 + $0xb0] ss:$8 sps:$4 sm:$0xff]   ;;  %v1090_v60 = vld [vmem:[%s1411_s4 + $0xc4] ss:$8 sps:$4 sm:$0xff]   ;;  %v1092_v61 = vld [vmem:[%s1411_s4 + $0xc0] ss:$8 sps:$4 sm:$0xff]  }
  0x59   : > { %v1093_v62 = vld [vmem:[%s1411_s4 + $0xd4] ss:$8 sps:$4 sm:$0xff]   ;;  %v1095_v63 = vld [vmem:[%s1411_s4 + $0xd0] ss:$8 sps:$4 sm:$0xff]   ;;  %v1096_v0 = vld [vmem:[%s1411_s4 + $0xe4] ss:$8 sps:$4 sm:$0xff]  }
  0x5a   : > { %660 = vmatpush1.bf16.msra.mxu0 %v1062_v40  ;;  %v1098_v1 = vld [vmem:[%s1411_s4 + $0xe0] ss:$8 sps:$4 sm:$0xff]   ;;  %v1099_v2 = vld [vmem:[%s1411_s4 + $0xf4] ss:$8 sps:$4 sm:$0xff]   ;;  %v1101_v3 = vld [vmem:[%s1411_s4 + $0xf0] ss:$8 sps:$4 sm:$0xff]  }
  0x5b   : > { %661 = vmatprep.subr.bf16.mxu0 %v1063_v41  ;;  %v1102_v4 = vld [vmem:[%s393_s26] ss:$8 sps:$4 sm:$0xff]   ;;  %p952_p5 = scmp.ne.s32.totalorder %s1175_s18, 2 }
  0x5c   : > { %v447_v5 = vld [vmem:[#allocation2] sm:$0xff]  ;;  %v448_v6 = vld [vmem:[#allocation2 + $0x8] sm:$0xff]  ;;  %v449_v8 = vld [vmem:[#allocation2 + $0x10] sm:$0xff]  ;;  %v716_v17 = vlaneseq (!%p952_p5) }
  0x5d   : > { %v450_v11 = vld [vmem:[#allocation2 + $0x18] sm:$0xff]  ;;  %v714_v19 = vld [vmem:[%s435_s29] sm:$0x3] (!%p952_p5) }
  0x5e   : > { %662 = vmatpush1.bf16.msra.mxu0 %v1065_v42  ;;  %v717_v18 = vshrl.u32 (!%p952_p5), %v716_v17, 7 }
  0x5f   : > { %663 = vmatprep.subr.bf16.mxu0 %v1066_v43 }
  0x60   : > { %v718_v21 = vsub.s32 (!%p952_p5), 0, %v717_v18  ;;  %v722_v22 = vsub.s32 (!%p952_p5), 1, %v717_v18 }
  0x62   : > { %664 = vmatpush1.bf16.msra.mxu0 %v1068_v44  ;;  %v719_v26 = vrot.slane (!%p952_p5), %v714_v19, %v718_v21  ;;  %v723_v27 = vrot.slane (!%p952_p5), %v714_v19, %v722_v22 }
  0x63   : > { %665 = vmatprep.subr.bf16.mxu0 %v1069_v45 }
  0x66   : > { %666 = vmatpush1.bf16.msra.mxu0 %v1071_v46 }
  0x67   : > { %667 = vmatprep.subr.bf16.mxu0 %v1072_v47 }
  0x6a   : > { %668 = vmatpush1.bf16.msra.mxu0 %v1074_v49 }
  0x6b   : > { %669 = vmatprep.subr.bf16.mxu0 %v1075_v50 }
  0x6e   : > { %670 = vmatpush1.bf16.msra.mxu0 %v1077_v51 }
  0x6f   : > { %671 = vmatprep.subr.bf16.mxu0 %v1078_v52 }
  0x72   : > { %672 = vmatpush1.bf16.msra.mxu0 %v1080_v53 }
  0x73   : > { %673 = vmatprep.subr.bf16.mxu0 %v1081_v54 }
  0x76   : > { %674 = vmatpush1.bf16.msra.mxu0 %v1083_v55 }
  0x77   : > { %675 = vmatprep.subr.bf16.mxu0 %v1084_v56 }
  0x7a   : > { %676 = vmatpush1.bf16.msra.mxu0 %v1086_v57 }
  0x7b   : > { %677 = vmatprep.subr.bf16.mxu0 %v1087_v58 }
  0x7e   : > { %678 = vmatpush1.bf16.msra.mxu0 %v1089_v59 }
  0x7f   : > { %679 = vmatprep.subr.bf16.mxu0 %v1090_v60 }
  0x82   : > { %680 = vmatpush1.bf16.msra.mxu0 %v1092_v61 }
  0x83   : > { %681 = vmatprep.subr.bf16.mxu0 %v1093_v62 }
  0x86   : > { %682 = vmatpush1.bf16.msra.mxu0 %v1095_v63 }
  0x87   : > { %683 = vmatprep.subr.bf16.mxu0 %v1096_v0 }
  0x8a   : > { %684 = vmatpush1.bf16.msra.mxu0 %v1098_v1 }
  0x8b   : > { %685 = vmatprep.subr.bf16.mxu0 %v1099_v2 }
  0x8e   : > { %686 = vmatpush1.bf16.msra.mxu0 %v1101_v3 }
  0x91   : > { %688 = vmatmul.mubr.bf16.vlgmr.msra.gmra.mrb[0].mxu0 %v1102_v4 }
 0x164   : > { %v689_v7 = vpop.f32.mrb[0].mxu0  ;;  %709 = sbr.rel (%p952_p5) target bundleno = 375 (0x177), region = 116 }
 0x165   : > { %v698_v9 = vadd.f32 %v689_v7, %v447_v5  ;;  %v691_v10 = vpop.f32.mrb[1].mxu0 }
 0x166   : > { %v699_v12 = vadd.f32 %v691_v10, %v448_v6  ;;  %v693_v13 = vpop.f32.mrb[2].mxu0 }
 0x167   : > { %702 = vst [vmem:[#allocation2] sm:$0xff] %v698_v9  ;;  %v700_v14 = vadd.f32 %v693_v13, %v449_v8  ;;  %v695_v15 = vpop.f32.mrb[3].mxu0 }
 0x168   : > { %703 = vst [vmem:[#allocation2 + $0x8] sm:$0xff] %v699_v12  ;;  %v701_v16 = vadd.f32 %v695_v15, %v450_v11 }
 0x169   : > { %704 = vst [vmem:[#allocation2 + $0x10] sm:$0xff] %v700_v14 }
 0x16a   : > { %705 = vst [vmem:[#allocation2 + $0x18] sm:$0xff] %v701_v16 }
 0x16e   : > { %v710_v20 = vld [vmem:[#allocation2] sm:$0xff] }
 0x16f   : > { %v711_v23 = vld [vmem:[#allocation2 + $0x8] sm:$0xff]  ;;  %v726_v28 = vadd.f32 %v719_v26, %v710_v20 }
 0x170   : > { %v712_v24 = vld [vmem:[#allocation2 + $0x10] sm:$0xff]  ;;  %v727_v29 = vadd.f32 %v723_v27, %v711_v23 }
 0x171   : > { %v713_v25 = vld [vmem:[#allocation2 + $0x18] sm:$0xff]  ;;  %v728_v30 = vadd.f32 %v719_v26, %v712_v24 }
 0x172   : > { %v729_v31 = vadd.f32 %v723_v27, %v713_v25  ;;  %v961_v32 = vpack.c.bf16 %v727_v29, %v726_v28 }
 0x174   : > { %v962_v33 = vpack.c.bf16 %v729_v31, %v728_v30  ;;  %742 = vst [vmem:[%s1413_s16] sm:$0xff] %v961_v32 }
 0x176   : > { %743 = vst [vmem:[%s1413_s16 + $0x8] sm:$0xff] %v962_v33 }
 0x177 PF: > { %750 = sbr.rel (!%p1308_p12) target bundleno = 383 (0x17f), region = 120  ;;  %s963_s18 = sshll.u32 (%p1308_p12), %s1179_s19, 3 }
 0x178   : > { %s756_s25 = scalar_lea.vmem (%p1308_p12), %s1504_s3, %s963_s18 }
 0x17b   : > { %v786_v34 = vld [vmem:[%s1413_s16] sm:$0xff] (%p1308_p12) }
 0x17c   : > { %787 = vst [vmem:[%s756_s25] sm:$0xff] (%p1308_p12), %v786_v34 }
 0x17d   : > { %v788_v35 = vld [vmem:[%s1413_s16 + $0x8] sm:$0xff] (%p1308_p12) }
 0x17e   : > { %789 = vst [vmem:[%s756_s25 + $0x48] sm:$0xff] %v788_v35 }
 0x17f PF: > { %s13_s22 = sadd.s32 1, %s1191_s22   ;;  %s1513_s10 = sld [smem:[#allocation8_spill]] }
 0x180   : > { %p10_p6 = scmp.ge.s32.totalorder %s13_s22, 29   ;;  %s1514_s30 = sld [smem:[#allocation6_spill]] }
 0x181   : > { %s1515_s27 = sld [smem:[#allocation7_spill]]  ;;  %s1516_s12 = smov %s1155_s13 }
 0x182   : > { %s1517_s13 = smov %s1306_s9  ;;  %s1518_s14 = smov %s1163_s15 }
 0x183   : > { %s1519_s15 = smov %s1303_s8  ;;  %s1520_s16 = smov %s1171_s17 }
 0x184   : > { %s1522_s18 = smov %s1183_s20  ;;  %s1523_s19 = smov %s1187_s21 }
 0x185   : > { %s1521_s17 = smov %s1513_s10  ;;  %12 = sbr.rel (!%p10_p6) target bundleno = 6 (0x6), region = 200 }
 0x186   : > { %s1524_s20 = smov %s1514_s30 }
 0x187   : > { %s1525_s21 = smov %s1515_s27 }

// kernel: forward.31
= control target key start
LH: loop header
LB: loop body
LE: loop exit
PB: predicated region body
PF: predicated region fallthrough
CT: control target
= control target key end

     0   :  { %vm1519_vm0 = vcmask 7168   ;;  %vm1629_vm1 = vcmask 1040384   ;;  %vm2025_vm2 = vcmask 1024   ;;  %s4142_s1 = inlined_call_operand.vmem [shape: bf16[768,512], index: 1, kind: input, shape index: {}]   ;;  %s4143_s0 = inlined_call_operand.vmem [shape: bf16[2,8,768], index: 0, kind: input, shape index: {}]   ;;  %s4144_s2 = inlined_call_operand.vmem [shape: f32[1,512], index: 2, kind: input, shape index: {}]   ;;  %s4145_s3 = inlined_call_operand.vmem [shape: f32[1,512], index: 3, kind: input, shape index: {}]   ;;  %s4146_s4 = inlined_call_operand.<no memory space> [shape: f32[1,1], index: 4, kind: input, shape index: {}]   ;;  %s4147_s6 = inlined_call_operand.<no memory space> [shape: f32[1,1], index: 6, kind: input, shape index: {}]   ;;  %s4148_s5 = inlined_call_operand.vmem [shape: f32[1,768], index: 5, kind: input, shape index: {}]   ;;  %s4149_s7 = inlined_call_operand.vmem [shape: f32[2,1], index: 7, kind: output, shape index: {}]  }
   0x1   :  { %v2282_v0 = vld [vmem:[%s4142_s1 + $0x4] ss:$16 sps:$4 sm:$0xff]   ;;  %v2284_v1 = vld [vmem:[%s4142_s1 + $0xc] ss:$16 sps:$4 sm:$0xff]   ;;  %v2286_v2 = vld [vmem:[%s4142_s1] ss:$16 sps:$4 sm:$0xff]  }
   0x2   :  { %1232 = vmatprep.subr.bf16.mxu0 %v2282_v0  ;;  %v2287_v3 = vld [vmem:[%s4142_s1 + $0x8] ss:$16 sps:$4 sm:$0xff]   ;;  %1355 = vmatprep.subr.bf16.mxu1 %v2284_v1  ;;  %v2288_v4 = vld [vmem:[%s4142_s1 + $0x24] ss:$16 sps:$4 sm:$0xff]   ;;  %v2290_v5 = vld [vmem:[%s4142_s1 + $0x2c] ss:$16 sps:$4 sm:$0xff]  }
   0x3   :  { %1233 = vmatpush1.bf16.msra.mxu0 %v2286_v2  ;;  %1356 = vmatpush1.bf16.msra.mxu1 %v2287_v3  ;;  %v2292_v6 = vld [vmem:[%s4142_s1 + $0x20] ss:$16 sps:$4 sm:$0xff]   ;;  %v2293_v7 = vld [vmem:[%s4142_s1 + $0x28] ss:$16 sps:$4 sm:$0xff]   ;;  %v2294_v8 = vld [vmem:[%s4142_s1 + $0x44] ss:$16 sps:$4 sm:$0xff]  }
   0x4   :  { %1234 = vmatprep.subr.bf16.mxu0 %v2288_v4  ;;  %1357 = vmatprep.subr.bf16.mxu1 %v2290_v5  ;;  %v2296_v9 = vld [vmem:[%s4142_s1 + $0x4c] ss:$16 sps:$4 sm:$0xff]   ;;  %v2298_v10 = vld [vmem:[%s4142_s1 + $0x40] ss:$16 sps:$4 sm:$0xff]   ;;  %v2299_v11 = vld [vmem:[%s4142_s1 + $0x48] ss:$16 sps:$4 sm:$0xff]  }
   0x5   :  { %v2300_v12 = vld [vmem:[%s4142_s1 + $0x64] ss:$16 sps:$4 sm:$0xff]   ;;  %v2302_v13 = vld [vmem:[%s4142_s1 + $0x6c] ss:$16 sps:$4 sm:$0xff]   ;;  %v2304_v14 = vld [vmem:[%s4142_s1 + $0x60] ss:$16 sps:$4 sm:$0xff]  }
   0x6   :  { %v2305_v15 = vld [vmem:[%s4142_s1 + $0x68] ss:$16 sps:$4 sm:$0xff]   ;;  %v2306_v16 = vld [vmem:[%s4142_s1 + $0x84] ss:$16 sps:$4 sm:$0xff]   ;;  %v2308_v17 = vld [vmem:[%s4142_s1 + $0x8c] ss:$16 sps:$4 sm:$0xff]  }
   0x7   :  { %1235 = vmatpush1.bf16.msra.mxu0 %v2292_v6  ;;  %1358 = vmatpush1.bf16.msra.mxu1 %v2293_v7  ;;  %v2310_v18 = vld [vmem:[%s4142_s1 + $0x80] ss:$16 sps:$4 sm:$0xff]   ;;  %v2311_v19 = vld [vmem:[%s4142_s1 + $0x88] ss:$16 sps:$4 sm:$0xff]   ;;  %v2312_v20 = vld [vmem:[%s4142_s1 + $0xa4] ss:$16 sps:$4 sm:$0xff]  }
   0x8   :  { %1236 = vmatprep.subr.bf16.mxu0 %v2294_v8  ;;  %1359 = vmatprep.subr.bf16.mxu1 %v2296_v9  ;;  %v2314_v21 = vld [vmem:[%s4142_s1 + $0xac] ss:$16 sps:$4 sm:$0xff]   ;;  %v2316_v22 = vld [vmem:[%s4142_s1 + $0xa0] ss:$16 sps:$4 sm:$0xff]   ;;  %v2317_v23 = vld [vmem:[%s4142_s1 + $0xa8] ss:$16 sps:$4 sm:$0xff]  }
   0x9   :  { %v2318_v24 = vld [vmem:[%s4142_s1 + $0xc4] ss:$16 sps:$4 sm:$0xff]   ;;  %v2320_v25 = vld [vmem:[%s4142_s1 + $0xcc] ss:$16 sps:$4 sm:$0xff]   ;;  %v2322_v26 = vld [vmem:[%s4142_s1 + $0xc0] ss:$16 sps:$4 sm:$0xff]  }
   0xa   :  { %v2323_v27 = vld [vmem:[%s4142_s1 + $0xc8] ss:$16 sps:$4 sm:$0xff]   ;;  %v2324_v28 = vld [vmem:[%s4142_s1 + $0xe4] ss:$16 sps:$4 sm:$0xff]   ;;  %v2326_v29 = vld [vmem:[%s4142_s1 + $0xec] ss:$16 sps:$4 sm:$0xff]  }
   0xb   :  { %1237 = vmatpush1.bf16.msra.mxu0 %v2298_v10  ;;  %1360 = vmatpush1.bf16.msra.mxu1 %v2299_v11  ;;  %v2328_v30 = vld [vmem:[%s4142_s1 + $0xe0] ss:$16 sps:$4 sm:$0xff]   ;;  %v2329_v31 = vld [vmem:[%s4142_s1 + $0xe8] ss:$16 sps:$4 sm:$0xff]   ;;  %v2330_v32 = vld [vmem:[%s4142_s1 + $0x104] ss:$16 sps:$4 sm:$0xff]  }
   0xc   :  { %1238 = vmatprep.subr.bf16.mxu0 %v2300_v12  ;;  %1361 = vmatprep.subr.bf16.mxu1 %v2302_v13  ;;  %v2332_v33 = vld [vmem:[%s4142_s1 + $0x10c] ss:$16 sps:$4 sm:$0xff]   ;;  %v2334_v34 = vld [vmem:[%s4142_s1 + $0x100] ss:$16 sps:$4 sm:$0xff]   ;;  %v2335_v35 = vld [vmem:[%s4142_s1 + $0x108] ss:$16 sps:$4 sm:$0xff]  }
   0xd   :  { %v2336_v36 = vld [vmem:[%s4142_s1 + $0x124] ss:$16 sps:$4 sm:$0xff]   ;;  %v2338_v37 = vld [vmem:[%s4142_s1 + $0x12c] ss:$16 sps:$4 sm:$0xff]   ;;  %v2340_v38 = vld [vmem:[%s4142_s1 + $0x120] ss:$16 sps:$4 sm:$0xff]  }
   0xe   :  { %v2808_v39 = vld [vmem:[%s4142_s1 + $0x128] ss:$16 sps:$4 sm:$0xff]   ;;  %v2813_v40 = vld [vmem:[%s4142_s1 + $0x144] ss:$16 sps:$4 sm:$0xff]   ;;  %v2818_v41 = vld [vmem:[%s4142_s1 + $0x14c] ss:$16 sps:$4 sm:$0xff]  }
   0xf   :  { %1239 = vmatpush1.bf16.msra.mxu0 %v2304_v14  ;;  %1362 = vmatpush1.bf16.msra.mxu1 %v2305_v15  ;;  %v2823_v42 = vld [vmem:[%s4142_s1 + $0x140] ss:$16 sps:$4 sm:$0xff]   ;;  %v2828_v43 = vld [vmem:[%s4142_s1 + $0x148] ss:$16 sps:$4 sm:$0xff]   ;;  %v2834_v44 = vld [vmem:[%s4142_s1 + $0x164] ss:$16 sps:$4 sm:$0xff]  }
  0x10   :  { %1240 = vmatprep.subr.bf16.mxu0 %v2306_v16  ;;  %1363 = vmatprep.subr.bf16.mxu1 %v2308_v17  ;;  %v2841_v45 = vld [vmem:[%s4142_s1 + $0x16c] ss:$16 sps:$4 sm:$0xff]   ;;  %v227_v46 = vld [vmem:[%s4143_s0] sm:$0xff]  ;;  %v2856_v49 = vld [vmem:[%s4142_s1 + $0x168] ss:$16 sps:$4 sm:$0xff]  }
  0x11   :  { %v2849_v47 = vld [vmem:[%s4142_s1 + $0x160] ss:$16 sps:$4 sm:$0xff]   ;;  %v2032_v48 = vcombine.high %v227_v46, %v227_v46  ;;  %v2863_v50 = vld [vmem:[%s4142_s1 + $0x184] ss:$16 sps:$4 sm:$0xff]   ;;  %v2868_v51 = vld [vmem:[%s4142_s1 + $0x18c] ss:$16 sps:$4 sm:$0xff]   ;;  %v2031_v5 = vcombine.low %v227_v46, %v227_v46 }
  0x12   :  { %v2873_v52 = vld [vmem:[%s4142_s1 + $0x180] ss:$16 sps:$4 sm:$0xff]   ;;  %v2880_v53 = vld [vmem:[%s4142_s1 + $0x188] ss:$16 sps:$4 sm:$0xff]   ;;  %v2887_v54 = vld [vmem:[%s4142_s1 + $0x1a4] ss:$16 sps:$4 sm:$0xff]  }
  0x13   :  { %1241 = vmatpush1.bf16.msra.mxu0 %v2310_v18  ;;  %1364 = vmatpush1.bf16.msra.mxu1 %v2311_v19  ;;  %v2892_v55 = vld [vmem:[%s4142_s1 + $0x1ac] ss:$16 sps:$4 sm:$0xff]   ;;  %v2897_v56 = vld [vmem:[%s4142_s1 + $0x1a0] ss:$16 sps:$4 sm:$0xff]   ;;  %v2904_v57 = vld [vmem:[%s4142_s1 + $0x1a8] ss:$16 sps:$4 sm:$0xff]  }
  0x14   :  { %1242 = vmatprep.subr.bf16.mxu0 %v2312_v20  ;;  %1365 = vmatprep.subr.bf16.mxu1 %v2314_v21  ;;  %v2911_v58 = vld [vmem:[%s4142_s1 + $0x1c4] ss:$16 sps:$4 sm:$0xff]   ;;  %v2916_v59 = vld [vmem:[%s4142_s1 + $0x1cc] ss:$16 sps:$4 sm:$0xff]   ;;  %v2921_v60 = vld [vmem:[%s4142_s1 + $0x1c0] ss:$16 sps:$4 sm:$0xff]  }
  0x15   :  { %1264 = vmatprep.mubr.bf16.mxu0 %v2032_v48  ;;  %1387 = vmatprep.mubr.bf16.mxu1 %v2032_v48  ;;  %v2928_v61 = vld [vmem:[%s4142_s1 + $0x1c8] ss:$16 sps:$4 sm:$0xff]   ;;  %v2935_v62 = vld [vmem:[%s4142_s1 + $0x1e4] ss:$16 sps:$4 sm:$0xff]   ;;  %v2940_v63 = vld [vmem:[%s4142_s1 + $0x1ec] ss:$16 sps:$4 sm:$0xff]  }
  0x16   :  { %v2945_v0 = vld [vmem:[%s4142_s1 + $0x1e0] ss:$16 sps:$4 sm:$0xff]   ;;  %v2952_v1 = vld [vmem:[%s4142_s1 + $0x1e8] ss:$16 sps:$4 sm:$0xff]   ;;  %v2959_v2 = vld [vmem:[%s4142_s1 + $0x204] ss:$16 sps:$4 sm:$0xff]  }
  0x17   :  { %1243 = vmatpush1.bf16.msra.mxu0 %v2316_v22  ;;  %1366 = vmatpush1.bf16.msra.mxu1 %v2317_v23  ;;  %v2964_v3 = vld [vmem:[%s4142_s1 + $0x20c] ss:$16 sps:$4 sm:$0xff]   ;;  %v2969_v4 = vld [vmem:[%s4142_s1 + $0x200] ss:$16 sps:$4 sm:$0xff]   ;;  %v2976_v6 = vld [vmem:[%s4142_s1 + $0x208] ss:$16 sps:$4 sm:$0xff]  }
  0x18   :  { %1244 = vmatprep.subr.bf16.mxu0 %v2318_v24  ;;  %1367 = vmatprep.subr.bf16.mxu1 %v2320_v25  ;;  %v2983_v7 = vld [vmem:[%s4142_s1 + $0x224] ss:$16 sps:$4 sm:$0xff]   ;;  %v2988_v8 = vld [vmem:[%s4142_s1 + $0x22c] ss:$16 sps:$4 sm:$0xff]   ;;  %v2993_v9 = vld [vmem:[%s4142_s1 + $0x220] ss:$16 sps:$4 sm:$0xff]  }
  0x19   :  { %v3000_v10 = vld [vmem:[%s4142_s1 + $0x228] ss:$16 sps:$4 sm:$0xff]   ;;  %v3007_v11 = vld [vmem:[%s4142_s1 + $0x244] ss:$16 sps:$4 sm:$0xff]   ;;  %v3012_v12 = vld [vmem:[%s4142_s1 + $0x24c] ss:$16 sps:$4 sm:$0xff]  }
  0x1a   :  { %v3017_v13 = vld [vmem:[%s4142_s1 + $0x240] ss:$16 sps:$4 sm:$0xff]   ;;  %v3024_v14 = vld [vmem:[%s4142_s1 + $0x248] ss:$16 sps:$4 sm:$0xff]   ;;  %v3031_v15 = vld [vmem:[%s4142_s1 + $0x264] ss:$16 sps:$4 sm:$0xff]  }
  0x1b   :  { %1245 = vmatpush1.bf16.msra.mxu0 %v2322_v26  ;;  %1368 = vmatpush1.bf16.msra.mxu1 %v2323_v27  ;;  %v3036_v16 = vld [vmem:[%s4142_s1 + $0x26c] ss:$16 sps:$4 sm:$0xff]   ;;  %v3041_v17 = vld [vmem:[%s4142_s1 + $0x260] ss:$16 sps:$4 sm:$0xff]   ;;  %v3048_v18 = vld [vmem:[%s4142_s1 + $0x268] ss:$16 sps:$4 sm:$0xff]  }
  0x1c   :  { %1246 = vmatprep.subr.bf16.mxu0 %v2324_v28  ;;  %1369 = vmatprep.subr.bf16.mxu1 %v2326_v29  ;;  %v3055_v19 = vld [vmem:[%s4142_s1 + $0x284] ss:$16 sps:$4 sm:$0xff]   ;;  %v3060_v20 = vld [vmem:[%s4142_s1 + $0x28c] ss:$16 sps:$4 sm:$0xff]   ;;  %v3065_v21 = vld [vmem:[%s4142_s1 + $0x280] ss:$16 sps:$4 sm:$0xff]  }
  0x1d   :  { %v3072_v22 = vld [vmem:[%s4142_s1 + $0x288] ss:$16 sps:$4 sm:$0xff]   ;;  %v3079_v23 = vld [vmem:[%s4142_s1 + $0x2a4] ss:$16 sps:$4 sm:$0xff]   ;;  %v3084_v24 = vld [vmem:[%s4142_s1 + $0x2ac] ss:$16 sps:$4 sm:$0xff]  }
  0x1e   :  { %v3089_v25 = vld [vmem:[%s4142_s1 + $0x2a0] ss:$16 sps:$4 sm:$0xff]   ;;  %v3096_v26 = vld [vmem:[%s4142_s1 + $0x2a8] ss:$16 sps:$4 sm:$0xff]   ;;  %v3103_v27 = vld [vmem:[%s4142_s1 + $0x2c4] ss:$16 sps:$4 sm:$0xff]  }
  0x1f   :  { %1247 = vmatpush1.bf16.msra.mxu0 %v2328_v30  ;;  %1370 = vmatpush1.bf16.msra.mxu1 %v2329_v31  ;;  %v3108_v28 = vld [vmem:[%s4142_s1 + $0x2cc] ss:$16 sps:$4 sm:$0xff]   ;;  %v3122_v31 = vld [vmem:[%s4142_s1 + $0x2c0] ss:$16 sps:$4 sm:$0xff]   ;;  %v3175_v48 = vld [vmem:[%s4142_s1 + $0x308] ss:$16 sps:$4 sm:$0xff]  }
  0x20   :  { %1248 = vmatprep.subr.bf16.mxu0 %v2330_v32  ;;  %1371 = vmatprep.subr.bf16.mxu1 %v2332_v33  ;;  %v3113_v29 = vld [vmem:[%s4143_s0 + $0x8] sm:$0xff]  ;;  %v3134_v33 = vld [vmem:[%s4142_s1 + $0x2e4] ss:$16 sps:$4 sm:$0xff]   ;;  %v3170_v46 = vld [vmem:[%s4142_s1 + $0x300] ss:$16 sps:$4 sm:$0xff]   ;;  %4253 = vst [vmem:[#allocation9_spill] sm:$0xff] %v3175_v48 }
  0x21   :  { %v2034_v30 = vcombine.high %v3113_v29, %v3113_v29  ;;  %v3127_v32 = vld [vmem:[%s4142_s1 + $0x2c8] ss:$16 sps:$4 sm:$0xff]   ;;  %4252 = vst [vmem:[#allocation8_spill] sm:$0xff] %v3170_v46 }
  0x23   :  { %1249 = vmatpush1.bf16.msra.mxu0 %v2334_v34  ;;  %1372 = vmatpush1.bf16.msra.mxu1 %v2335_v35  ;;  %v3139_v34 = vld [vmem:[%s4142_s1 + $0x2ec] ss:$16 sps:$4 sm:$0xff]   ;;  %v3146_v35 = vld [vmem:[%s4142_s1 + $0x2e0] ss:$16 sps:$4 sm:$0xff]  }
  0x24   :  { %1250 = vmatprep.subr.bf16.mxu0 %v2336_v36  ;;  %1373 = vmatprep.subr.bf16.mxu1 %v2338_v37  ;;  %4248 = vst [vmem:[#allocation4_spill] sm:$0xff] %v3146_v35  ;;  %v3151_v36 = vld [vmem:[%s4142_s1 + $0x2e8] ss:$16 sps:$4 sm:$0xff]   ;;  %v3158_v37 = vld [vmem:[%s4142_s1 + $0x304] ss:$16 sps:$4 sm:$0xff]  }
  0x25   :  { %4249 = vst [vmem:[#allocation5_spill] sm:$0xff] %v3151_v36  ;;  %4250 = vst [vmem:[#allocation6_spill] sm:$0xff] %v3158_v37 }
  0x27   :  { %1251 = vmatpush1.bf16.msra.mxu0 %v2340_v38  ;;  %1374 = vmatpush1.bf16.msra.mxu1 %v2808_v39  ;;  %v3163_v38 = vld [vmem:[%s4142_s1 + $0x30c] ss:$16 sps:$4 sm:$0xff]  }
  0x28   :  { %1252 = vmatprep.subr.bf16.mxu0 %v2813_v40  ;;  %1375 = vmatprep.subr.bf16.mxu1 %v2818_v41  ;;  %4251 = vst [vmem:[#allocation7_spill] sm:$0xff] %v3163_v38 }
  0x2b   :  { %1253 = vmatpush1.bf16.msra.mxu0 %v2823_v42  ;;  %1376 = vmatpush1.bf16.msra.mxu1 %v2828_v43 }
  0x2c   :  { %1254 = vmatprep.subr.bf16.mxu0 %v2834_v44  ;;  %1377 = vmatprep.subr.bf16.mxu1 %v2841_v45 }
  0x2f   :  { %1255 = vmatpush1.bf16.msra.mxu0 %v2849_v47  ;;  %1378 = vmatpush1.bf16.msra.mxu1 %v2856_v49 }
  0x30   :  { %1256 = vmatprep.subr.bf16.mxu0 %v2863_v50  ;;  %1379 = vmatprep.subr.bf16.mxu1 %v2868_v51 }
  0x33   :  { %1257 = vmatpush1.bf16.msra.mxu0 %v2873_v52  ;;  %1380 = vmatpush1.bf16.msra.mxu1 %v2880_v53 }
  0x34   :  { %1258 = vmatprep.subr.bf16.mxu0 %v2887_v54  ;;  %1381 = vmatprep.subr.bf16.mxu1 %v2892_v55 }
  0x37   :  { %1259 = vmatpush1.bf16.msra.mxu0 %v2897_v56  ;;  %1382 = vmatpush1.bf16.msra.mxu1 %v2904_v57 }
  0x38   :  { %1260 = vmatprep.subr.bf16.mxu0 %v2911_v58  ;;  %1383 = vmatprep.subr.bf16.mxu1 %v2916_v59 }
  0x3b   :  { %1261 = vmatpush1.bf16.msra.mxu0 %v2921_v60  ;;  %1384 = vmatpush1.bf16.msra.mxu1 %v2928_v61 }
  0x3c   :  { %1262 = vmatprep.subr.bf16.mxu0 %v2935_v62  ;;  %1385 = vmatprep.subr.bf16.mxu1 %v2940_v63 }
  0x3f   :  { %1263 = vmatpush1.bf16.msra.mxu0 %v2945_v0  ;;  %1386 = vmatpush1.bf16.msra.mxu1 %v2952_v1 }
  0x40   :  { %1273 = vmatprep.subr.bf16.mxu0 %v2959_v2  ;;  %1396 = vmatprep.subr.bf16.mxu1 %v2964_v3 }
  0x42   :  { %1265 = vmatmul.mubr.bf16.vlgmr.msra.gmra.mrb[0].mxu0 %v2031_v5  ;;  %1388 = vmatmul.mubr.bf16.vlgmr.msra.gmra.mrb[0].mxu1 %v2031_v5  ;;  %v3182_v5 = vld [vmem:[%s4142_s1 + $0x324] ss:$16 sps:$4 sm:$0xff]  }
  0x43   :  { %1274 = vmatpush1.bf16.msra.mxu0 %v2969_v4  ;;  %1397 = vmatpush1.bf16.msra.mxu1 %v2976_v6  ;;  %4254 = vst [vmem:[#allocation10_spill] sm:$0xff] %v3182_v5 }
  0x44   :  { %1275 = vmatprep.subr.bf16.mxu0 %v2983_v7  ;;  %1398 = vmatprep.subr.bf16.mxu1 %v2988_v8 }
  0x45   :  { %1305 = vmatprep.mubr.bf16.mxu0 %v2034_v30  ;;  %1428 = vmatprep.mubr.bf16.mxu1 %v2034_v30  ;;  %v3187_v30 = vld [vmem:[%s4142_s1 + $0x32c] ss:$16 sps:$4 sm:$0xff]  }
  0x46   :  { %4255 = vst [vmem:[#allocation11_spill] sm:$0xff] %v3187_v30 }
  0x47   :  { %1276 = vmatpush1.bf16.msra.mxu0 %v2993_v9  ;;  %1399 = vmatpush1.bf16.msra.mxu1 %v3000_v10 }
  0x48   :  { %1277 = vmatprep.subr.bf16.mxu0 %v3007_v11  ;;  %1400 = vmatprep.subr.bf16.mxu1 %v3012_v12 }
  0x4b   :  { %1278 = vmatpush1.bf16.msra.mxu0 %v3017_v13  ;;  %1401 = vmatpush1.bf16.msra.mxu1 %v3024_v14 }
  0x4c   :  { %1279 = vmatprep.subr.bf16.mxu0 %v3031_v15  ;;  %1402 = vmatprep.subr.bf16.mxu1 %v3036_v16 }
  0x4f   :  { %1280 = vmatpush1.bf16.msra.mxu0 %v3041_v17  ;;  %1403 = vmatpush1.bf16.msra.mxu1 %v3048_v18 }
  0x50   :  { %1281 = vmatprep.subr.bf16.mxu0 %v3055_v19  ;;  %1404 = vmatprep.subr.bf16.mxu1 %v3060_v20 }
  0x53   :  { %1282 = vmatpush1.bf16.msra.mxu0 %v3065_v21  ;;  %1405 = vmatpush1.bf16.msra.mxu1 %v3072_v22 }
  0x54   :  { %1283 = vmatprep.subr.bf16.mxu0 %v3079_v23  ;;  %1406 = vmatprep.subr.bf16.mxu1 %v3084_v24 }
  0x57   :  { %1284 = vmatpush1.bf16.msra.mxu0 %v3089_v25  ;;  %1407 = vmatpush1.bf16.msra.mxu1 %v3096_v26 }
  0x58   :  { %1285 = vmatprep.subr.bf16.mxu0 %v3103_v27  ;;  %1408 = vmatprep.subr.bf16.mxu1 %v3108_v28 }
  0x5b   :  { %1286 = vmatpush1.bf16.msra.mxu0 %v3122_v31  ;;  %1409 = vmatpush1.bf16.msra.mxu1 %v3127_v32 }
  0x5c   :  { %1287 = vmatprep.subr.bf16.mxu0 %v3134_v33  ;;  %1410 = vmatprep.subr.bf16.mxu1 %v3139_v34 }
  0x5f   :  { %1288 = vmatpush1.bf16.msra.mxu0 %v3146_v35  ;;  %1411 = vmatpush1.bf16.msra.mxu1 %v3151_v36  ;;  %v2033_v36 = vcombine.low %v3113_v29, %v3113_v29  ;;  %v3374_v35 = vld [vmem:[%s4143_s0 + $0x10] sm:$0xff] }
  0x60   :  { %1289 = vmatprep.subr.bf16.mxu0 %v3158_v37  ;;  %1412 = vmatprep.subr.bf16.mxu1 %v3163_v38  ;;  %v3194_v37 = vld [vmem:[%s4142_s1 + $0x320] ss:$16 sps:$4 sm:$0xff]   ;;  %v3199_v38 = vld [vmem:[%s4142_s1 + $0x328] ss:$16 sps:$4 sm:$0xff]   ;;  %4285 = vst [vmem:[#allocation41_spill] sm:$0xff] %v3374_v35 }
  0x61   :  { %4256 = vst [vmem:[#allocation12_spill] sm:$0xff] %v3194_v37  ;;  %4257 = vst [vmem:[#allocation13_spill] sm:$0xff] %v3199_v38  ;;  %v3381_v29 = vld [vmem:[%s4142_s1 + $0x424] ss:$16 sps:$4 sm:$0xff]  }
  0x62   :  { %4286 = vst [vmem:[#allocation42_spill] sm:$0xff] %v3381_v29 }
  0x63   :  { %1290 = vmatpush1.bf16.msra.mxu0 %v3170_v46  ;;  %1413 = vmatpush1.bf16.msra.mxu1 %v3175_v48  ;;  %v3206_v46 = vld [vmem:[%s4142_s1 + $0x344] ss:$16 sps:$4 sm:$0xff]   ;;  %v3211_v48 = vld [vmem:[%s4142_s1 + $0x34c] ss:$16 sps:$4 sm:$0xff]  }
  0x64   :  { %1291 = vmatprep.subr.bf16.mxu0 %v3182_v5  ;;  %1414 = vmatprep.subr.bf16.mxu1 %v3187_v30  ;;  %4258 = vst [vmem:[#allocation14_spill] sm:$0xff] %v3206_v46  ;;  %4259 = vst [vmem:[#allocation15_spill] sm:$0xff] %v3211_v48  ;;  %v3218_v5 = vld [vmem:[%s4142_s1 + $0x340] ss:$16 sps:$4 sm:$0xff]   ;;  %v3223_v30 = vld [vmem:[%s4142_s1 + $0x348] ss:$16 sps:$4 sm:$0xff]  }
  0x65   :  { %4260 = vst [vmem:[#allocation16_spill] sm:$0xff] %v3218_v5  ;;  %4261 = vst [vmem:[#allocation17_spill] sm:$0xff] %v3223_v30 }
  0x67   :  { %1292 = vmatpush1.bf16.msra.mxu0 %v3194_v37  ;;  %1415 = vmatpush1.bf16.msra.mxu1 %v3199_v38  ;;  %v3230_v37 = vld [vmem:[%s4142_s1 + $0x364] ss:$16 sps:$4 sm:$0xff]   ;;  %v3235_v38 = vld [vmem:[%s4142_s1 + $0x36c] ss:$16 sps:$4 sm:$0xff]  }
  0x68   :  { %1293 = vmatprep.subr.bf16.mxu0 %v3206_v46  ;;  %1416 = vmatprep.subr.bf16.mxu1 %v3211_v48  ;;  %4262 = vst [vmem:[#allocation18_spill] sm:$0xff] %v3230_v37  ;;  %4263 = vst [vmem:[#allocation19_spill] sm:$0xff] %v3235_v38  ;;  %v3242_v46 = vld [vmem:[%s4142_s1 + $0x360] ss:$16 sps:$4 sm:$0xff]   ;;  %v3247_v48 = vld [vmem:[%s4142_s1 + $0x368] ss:$16 sps:$4 sm:$0xff]  }
  0x69   :  { %4264 = vst [vmem:[#allocation20_spill] sm:$0xff] %v3242_v46  ;;  %4265 = vst [vmem:[#allocation21_spill] sm:$0xff] %v3247_v48 }
  0x6b   :  { %1294 = vmatpush1.bf16.msra.mxu0 %v3218_v5  ;;  %1417 = vmatpush1.bf16.msra.mxu1 %v3223_v30  ;;  %v3254_v5 = vld [vmem:[%s4142_s1 + $0x384] ss:$16 sps:$4 sm:$0xff]   ;;  %v3259_v30 = vld [vmem:[%s4142_s1 + $0x38c] ss:$16 sps:$4 sm:$0xff]  }
  0x6c   :  { %1295 = vmatprep.subr.bf16.mxu0 %v3230_v37  ;;  %1418 = vmatprep.subr.bf16.mxu1 %v3235_v38  ;;  %4266 = vst [vmem:[#allocation22_spill] sm:$0xff] %v3254_v5  ;;  %4267 = vst [vmem:[#allocation23_spill] sm:$0xff] %v3259_v30  ;;  %v3266_v37 = vld [vmem:[%s4142_s1 + $0x380] ss:$16 sps:$4 sm:$0xff]   ;;  %v3271_v38 = vld [vmem:[%s4142_s1 + $0x388] ss:$16 sps:$4 sm:$0xff]  }
  0x6d   :  { %4268 = vst [vmem:[#allocation24_spill] sm:$0xff] %v3266_v37  ;;  %4269 = vst [vmem:[#allocation25_spill] sm:$0xff] %v3271_v38 }
  0x6f   :  { %1296 = vmatpush1.bf16.msra.mxu0 %v3242_v46  ;;  %1419 = vmatpush1.bf16.msra.mxu1 %v3247_v48  ;;  %v3278_v46 = vld [vmem:[%s4142_s1 + $0x3a4] ss:$16 sps:$4 sm:$0xff]   ;;  %v3283_v48 = vld [vmem:[%s4142_s1 + $0x3ac] ss:$16 sps:$4 sm:$0xff]  }
  0x70   :  { %1297 = vmatprep.subr.bf16.mxu0 %v3254_v5  ;;  %1420 = vmatprep.subr.bf16.mxu1 %v3259_v30  ;;  %4270 = vst [vmem:[#allocation26_spill] sm:$0xff] %v3278_v46  ;;  %4271 = vst [vmem:[#allocation27_spill] sm:$0xff] %v3283_v48  ;;  %v3290_v5 = vld [vmem:[%s4142_s1 + $0x3a0] ss:$16 sps:$4 sm:$0xff]   ;;  %v3295_v30 = vld [vmem:[%s4142_s1 + $0x3a8] ss:$16 sps:$4 sm:$0xff]  }
  0x71   :  { %4272 = vst [vmem:[#allocation28_spill] sm:$0xff] %v3290_v5  ;;  %4273 = vst [vmem:[#allocation29_spill] sm:$0xff] %v3295_v30 }
  0x73   :  { %1298 = vmatpush1.bf16.msra.mxu0 %v3266_v37  ;;  %1421 = vmatpush1.bf16.msra.mxu1 %v3271_v38  ;;  %v3302_v37 = vld [vmem:[%s4142_s1 + $0x3c4] ss:$16 sps:$4 sm:$0xff]   ;;  %v3307_v38 = vld [vmem:[%s4142_s1 + $0x3cc] ss:$16 sps:$4 sm:$0xff]  }
  0x74   :  { %1299 = vmatprep.subr.bf16.mxu0 %v3278_v46  ;;  %1422 = vmatprep.subr.bf16.mxu1 %v3283_v48  ;;  %4274 = vst [vmem:[#allocation30_spill] sm:$0xff] %v3302_v37  ;;  %4275 = vst [vmem:[#allocation31_spill] sm:$0xff] %v3307_v38  ;;  %v3314_v46 = vld [vmem:[%s4142_s1 + $0x3c0] ss:$16 sps:$4 sm:$0xff]   ;;  %v3319_v48 = vld [vmem:[%s4142_s1 + $0x3c8] ss:$16 sps:$4 sm:$0xff]  }
  0x75   :  { %4276 = vst [vmem:[#allocation32_spill] sm:$0xff] %v3314_v46  ;;  %4277 = vst [vmem:[#allocation33_spill] sm:$0xff] %v3319_v48 }
  0x77   :  { %1300 = vmatpush1.bf16.msra.mxu0 %v3290_v5  ;;  %1423 = vmatpush1.bf16.msra.mxu1 %v3295_v30  ;;  %v3326_v5 = vld [vmem:[%s4142_s1 + $0x3e4] ss:$16 sps:$4 sm:$0xff]   ;;  %v3331_v30 = vld [vmem:[%s4142_s1 + $0x3ec] ss:$16 sps:$4 sm:$0xff]  }
  0x78   :  { %1301 = vmatprep.subr.bf16.mxu0 %v3302_v37  ;;  %1424 = vmatprep.subr.bf16.mxu1 %v3307_v38  ;;  %4278 = vst [vmem:[#allocation34_spill] sm:$0xff] %v3326_v5  ;;  %4279 = vst [vmem:[#allocation35_spill] sm:$0xff] %v3331_v30  ;;  %v3338_v37 = vld [vmem:[%s4142_s1 + $0x3e0] ss:$16 sps:$4 sm:$0xff]   ;;  %v3343_v38 = vld [vmem:[%s4142_s1 + $0x3e8] ss:$16 sps:$4 sm:$0xff]  }
  0x79   :  { %4280 = vst [vmem:[#allocation36_spill] sm:$0xff] %v3338_v37  ;;  %4281 = vst [vmem:[#allocation37_spill] sm:$0xff] %v3343_v38 }
  0x7b   :  { %1302 = vmatpush1.bf16.msra.mxu0 %v3314_v46  ;;  %1425 = vmatpush1.bf16.msra.mxu1 %v3319_v48  ;;  %v3350_v46 = vld [vmem:[%s4142_s1 + $0x404] ss:$16 sps:$4 sm:$0xff]   ;;  %v3355_v48 = vld [vmem:[%s4142_s1 + $0x40c] ss:$16 sps:$4 sm:$0xff]  }
  0x7c   :  { %1303 = vmatprep.subr.bf16.mxu0 %v3326_v5  ;;  %1426 = vmatprep.subr.bf16.mxu1 %v3331_v30  ;;  %4282 = vst [vmem:[#allocation38_spill] sm:$0xff] %v3350_v46  ;;  %4283 = vst [vmem:[#allocation39_spill] sm:$0xff] %v3355_v48  ;;  %v3364_v30 = vld [vmem:[%s4142_s1 + $0x400] ss:$16 sps:$4 sm:$0xff]   ;;  %v3369_v5 = vld [vmem:[%s4142_s1 + $0x408] ss:$16 sps:$4 sm:$0xff]  }
  0x7d   :  { %4284 = vst [vmem:[#allocation40_spill] sm:$0xff] %v3369_v5 }
  0x7f   :  { %1304 = vmatpush1.bf16.msra.mxu0 %v3338_v37  ;;  %1427 = vmatpush1.bf16.msra.mxu1 %v3343_v38  ;;  %v3386_v38 = vld [vmem:[%s4142_s1 + $0x42c] ss:$16 sps:$4 sm:$0xff]   ;;  %v2036_v37 = vcombine.high %v3374_v35, %v3374_v35 }
  0x80   :  { %1314 = vmatprep.subr.bf16.mxu0 %v3350_v46  ;;  %1437 = vmatprep.subr.bf16.mxu1 %v3355_v48  ;;  %4287 = vst [vmem:[#allocation43_spill] sm:$0xff] %v3386_v38  ;;  %v3395_v48 = vld [vmem:[%s4142_s1 + $0x420] ss:$16 sps:$4 sm:$0xff]   ;;  %v3400_v46 = vld [vmem:[%s4142_s1 + $0x428] ss:$16 sps:$4 sm:$0xff]  }
  0x81   :  { %4288 = vst [vmem:[#allocation44_spill] sm:$0xff] %v3395_v48  ;;  %4289 = vst [vmem:[#allocation45_spill] sm:$0xff] %v3400_v46 }
  0x82   :  { %1306 = vmatmul.mubr.bf16.vlgmr.msra.gmra.mrb[0].mxu0 %v2033_v36  ;;  %1429 = vmatmul.mubr.bf16.vlgmr.msra.gmra.mrb[0].mxu1 %v2033_v36  ;;  %v3407_v36 = vld [vmem:[%s4142_s1 + $0x444] ss:$16 sps:$4 sm:$0xff]  }
  0x83   :  { %1315 = vmatpush1.bf16.msra.mxu0 %v3364_v30  ;;  %1438 = vmatpush1.bf16.msra.mxu1 %v3369_v5  ;;  %4290 = vst [vmem:[#allocation46_spill] sm:$0xff] %v3407_v36  ;;  %v3412_v5 = vld [vmem:[%s4142_s1 + $0x44c] ss:$16 sps:$4 sm:$0xff]  }
  0x84   :  { %1316 = vmatprep.subr.bf16.mxu0 %v3381_v29  ;;  %1439 = vmatprep.subr.bf16.mxu1 %v3386_v38  ;;  %4291 = vst [vmem:[#allocation47_spill] sm:$0xff] %v3412_v5  ;;  %v3419_v38 = vld [vmem:[%s4142_s1 + $0x440] ss:$16 sps:$4 sm:$0xff]   ;;  %v3424_v29 = vld [vmem:[%s4142_s1 + $0x448] ss:$16 sps:$4 sm:$0xff]  }
  0x85   :  { %1346 = vmatprep.mubr.bf16.mxu0 %v2036_v37  ;;  %1469 = vmatprep.mubr.bf16.mxu1 %v2036_v37  ;;  %4292 = vst [vmem:[#allocation48_spill] sm:$0xff] %v3419_v38  ;;  %4293 = vst [vmem:[#allocation49_spill] sm:$0xff] %v3424_v29  ;;  %v3431_v37 = vld [vmem:[%s4142_s1 + $0x464] ss:$16 sps:$4 sm:$0xff]  }
  0x86   :  { %4294 = vst [vmem:[#allocation50_spill] sm:$0xff] %v3431_v37 }
  0x87   :  { %1317 = vmatpush1.bf16.msra.mxu0 %v3395_v48  ;;  %1440 = vmatpush1.bf16.msra.mxu1 %v3400_v46  ;;  %v3436_v46 = vld [vmem:[%s4142_s1 + $0x46c] ss:$16 sps:$4 sm:$0xff]   ;;  %v2035_v48 = vcombine.low %v3374_v35, %v3374_v35 }
  0x88   :  { %1318 = vmatprep.subr.bf16.mxu0 %v3407_v36  ;;  %1441 = vmatprep.subr.bf16.mxu1 %v3412_v5  ;;  %4295 = vst [vmem:[#allocation51_spill] sm:$0xff] %v3436_v46  ;;  %v3443_v36 = vld [vmem:[%s4142_s1 + $0x460] ss:$16 sps:$4 sm:$0xff]   ;;  %v3448_v5 = vld [vmem:[%s4142_s1 + $0x468] ss:$16 sps:$4 sm:$0xff]  }
  0x89   :  { %4296 = vst [vmem:[#allocation52_spill] sm:$0xff] %v3443_v36  ;;  %4297 = vst [vmem:[#allocation53_spill] sm:$0xff] %v3448_v5 }
  0x8b   :  { %1319 = vmatpush1.bf16.msra.mxu0 %v3419_v38  ;;  %1442 = vmatpush1.bf16.msra.mxu1 %v3424_v29  ;;  %v3455_v38 = vld [vmem:[%s4142_s1 + $0x484] ss:$16 sps:$4 sm:$0xff]   ;;  %v3460_v29 = vld [vmem:[%s4142_s1 + $0x48c] ss:$16 sps:$4 sm:$0xff]  }
  0x8c   :  { %1320 = vmatprep.subr.bf16.mxu0 %v3431_v37  ;;  %1443 = vmatprep.subr.bf16.mxu1 %v3436_v46  ;;  %4298 = vst [vmem:[#allocation54_spill] sm:$0xff] %v3455_v38  ;;  %4299 = vst [vmem:[#allocation55_spill] sm:$0xff] %v3460_v29  ;;  %v3467_v37 = vld [vmem:[%s4142_s1 + $0x480] ss:$16 sps:$4 sm:$0xff]   ;;  %v3472_v46 = vld [vmem:[%s4142_s1 + $0x488] ss:$16 sps:$4 sm:$0xff]  }
  0x8d   :  { %4300 = vst [vmem:[#allocation56_spill] sm:$0xff] %v3467_v37  ;;  %4301 = vst [vmem:[#allocation57_spill] sm:$0xff] %v3472_v46 }
  0x8f   :  { %1321 = vmatpush1.bf16.msra.mxu0 %v3443_v36  ;;  %1444 = vmatpush1.bf16.msra.mxu1 %v3448_v5  ;;  %v3479_v36 = vld [vmem:[%s4142_s1 + $0x4a4] ss:$16 sps:$4 sm:$0xff]   ;;  %v3484_v5 = vld [vmem:[%s4142_s1 + $0x4ac] ss:$16 sps:$4 sm:$0xff]  }
  0x90   :  { %1322 = vmatprep.subr.bf16.mxu0 %v3455_v38  ;;  %1445 = vmatprep.subr.bf16.mxu1 %v3460_v29  ;;  %4302 = vst [vmem:[#allocation58_spill] sm:$0xff] %v3479_v36  ;;  %4303 = vst [vmem:[#allocation59_spill] sm:$0xff] %v3484_v5  ;;  %v3491_v38 = vld [vmem:[%s4142_s1 + $0x4a0] ss:$16 sps:$4 sm:$0xff]   ;;  %v3496_v29 = vld [vmem:[%s4142_s1 + $0x4a8] ss:$16 sps:$4 sm:$0xff]  }
  0x91   :  { %4304 = vst [vmem:[#allocation60_spill] sm:$0xff] %v3491_v38  ;;  %4305 = vst [vmem:[#allocation61_spill] sm:$0xff] %v3496_v29 }
  0x93   :  { %1323 = vmatpush1.bf16.msra.mxu0 %v3467_v37  ;;  %1446 = vmatpush1.bf16.msra.mxu1 %v3472_v46  ;;  %v3503_v37 = vld [vmem:[%s4142_s1 + $0x4c4] ss:$16 sps:$4 sm:$0xff]   ;;  %v3508_v46 = vld [vmem:[%s4142_s1 + $0x4cc] ss:$16 sps:$4 sm:$0xff]  }
  0x94   :  { %1324 = vmatprep.subr.bf16.mxu0 %v3479_v36  ;;  %1447 = vmatprep.subr.bf16.mxu1 %v3484_v5  ;;  %4306 = vst [vmem:[#allocation62_spill] sm:$0xff] %v3503_v37  ;;  %4307 = vst [vmem:[#allocation63_spill] sm:$0xff] %v3508_v46  ;;  %v3515_v36 = vld [vmem:[%s4142_s1 + $0x4c0] ss:$16 sps:$4 sm:$0xff]   ;;  %v3520_v5 = vld [vmem:[%s4142_s1 + $0x4c8] ss:$16 sps:$4 sm:$0xff]  }
  0x95   :  { %4308 = vst [vmem:[#allocation64_spill] sm:$0xff] %v3515_v36  ;;  %4309 = vst [vmem:[#allocation65_spill] sm:$0xff] %v3520_v5 }
  0x97   :  { %1325 = vmatpush1.bf16.msra.mxu0 %v3491_v38  ;;  %1448 = vmatpush1.bf16.msra.mxu1 %v3496_v29  ;;  %v3527_v38 = vld [vmem:[%s4142_s1 + $0x4e4] ss:$16 sps:$4 sm:$0xff]   ;;  %v3532_v29 = vld [vmem:[%s4142_s1 + $0x4ec] ss:$16 sps:$4 sm:$0xff]  }
  0x98   :  { %1326 = vmatprep.subr.bf16.mxu0 %v3503_v37  ;;  %1449 = vmatprep.subr.bf16.mxu1 %v3508_v46  ;;  %4310 = vst [vmem:[#allocation66_spill] sm:$0xff] %v3527_v38  ;;  %4311 = vst [vmem:[#allocation67_spill] sm:$0xff] %v3532_v29  ;;  %v3539_v37 = vld [vmem:[%s4142_s1 + $0x4e0] ss:$16 sps:$4 sm:$0xff]   ;;  %v3544_v46 = vld [vmem:[%s4142_s1 + $0x4e8] ss:$16 sps:$4 sm:$0xff]  }
  0x99   :  { %4312 = vst [vmem:[#allocation68_spill] sm:$0xff] %v3539_v37  ;;  %4313 = vst [vmem:[#allocation69_spill] sm:$0xff] %v3544_v46 }
  0x9b   :  { %1327 = vmatpush1.bf16.msra.mxu0 %v3515_v36  ;;  %1450 = vmatpush1.bf16.msra.mxu1 %v3520_v5  ;;  %v3551_v36 = vld [vmem:[%s4142_s1 + $0x504] ss:$16 sps:$4 sm:$0xff]   ;;  %v3556_v5 = vld [vmem:[%s4142_s1 + $0x50c] ss:$16 sps:$4 sm:$0xff]  }
  0x9c   :  { %1328 = vmatprep.subr.bf16.mxu0 %v3527_v38  ;;  %1451 = vmatprep.subr.bf16.mxu1 %v3532_v29  ;;  %4314 = vst [vmem:[#allocation70_spill] sm:$0xff] %v3551_v36  ;;  %4315 = vst [vmem:[#allocation71_spill] sm:$0xff] %v3556_v5  ;;  %v3563_v38 = vld [vmem:[%s4142_s1 + $0x500] ss:$16 sps:$4 sm:$0xff]   ;;  %v3568_v29 = vld [vmem:[%s4142_s1 + $0x508] ss:$16 sps:$4 sm:$0xff]  }
  0x9d   :  { %4316 = vst [vmem:[#allocation72_spill] sm:$0xff] %v3563_v38  ;;  %4317 = vst [vmem:[#allocation73_spill] sm:$0xff] %v3568_v29 }
  0x9f   :  { %1329 = vmatpush1.bf16.msra.mxu0 %v3539_v37  ;;  %1452 = vmatpush1.bf16.msra.mxu1 %v3544_v46  ;;  %v3575_v37 = vld [vmem:[%s4142_s1 + $0x524] ss:$16 sps:$4 sm:$0xff]   ;;  %v3580_v46 = vld [vmem:[%s4142_s1 + $0x52c] ss:$16 sps:$4 sm:$0xff]  }
  0xa0   :  { %1330 = vmatprep.subr.bf16.mxu0 %v3551_v36  ;;  %1453 = vmatprep.subr.bf16.mxu1 %v3556_v5  ;;  %4318 = vst [vmem:[#allocation74_spill] sm:$0xff] %v3575_v37  ;;  %4319 = vst [vmem:[#allocation75_spill] sm:$0xff] %v3580_v46  ;;  %v3587_v36 = vld [vmem:[%s4142_s1 + $0x520] ss:$16 sps:$4 sm:$0xff]   ;;  %v3592_v5 = vld [vmem:[%s4142_s1 + $0x528] ss:$16 sps:$4 sm:$0xff]  }
  0xa1   :  { %4320 = vst [vmem:[#allocation76_spill] sm:$0xff] %v3587_v36  ;;  %4321 = vst [vmem:[#allocation77_spill] sm:$0xff] %v3592_v5 }
  0xa3   :  { %1331 = vmatpush1.bf16.msra.mxu0 %v3563_v38  ;;  %1454 = vmatpush1.bf16.msra.mxu1 %v3568_v29  ;;  %v3599_v38 = vld [vmem:[%s4142_s1 + $0x544] ss:$16 sps:$4 sm:$0xff]   ;;  %v3604_v29 = vld [vmem:[%s4142_s1 + $0x54c] ss:$16 sps:$4 sm:$0xff]  }
  0xa4   :  { %1332 = vmatprep.subr.bf16.mxu0 %v3575_v37  ;;  %1455 = vmatprep.subr.bf16.mxu1 %v3580_v46  ;;  %4322 = vst [vmem:[#allocation78_spill] sm:$0xff] %v3599_v38  ;;  %4323 = vst [vmem:[#allocation79_spill] sm:$0xff] %v3604_v29  ;;  %v3611_v37 = vld [vmem:[%s4142_s1 + $0x540] ss:$16 sps:$4 sm:$0xff]   ;;  %v3616_v46 = vld [vmem:[%s4142_s1 + $0x548] ss:$16 sps:$4 sm:$0xff]  }
  0xa5   :  { %4324 = vst [vmem:[#allocation80_spill] sm:$0xff] %v3611_v37  ;;  %4325 = vst [vmem:[#allocation81_spill] sm:$0xff] %v3616_v46 }
  0xa7   :  { %1333 = vmatpush1.bf16.msra.mxu0 %v3587_v36  ;;  %1456 = vmatpush1.bf16.msra.mxu1 %v3592_v5  ;;  %v3623_v36 = vld [vmem:[%s4142_s1 + $0x564] ss:$16 sps:$4 sm:$0xff]   ;;  %v3628_v5 = vld [vmem:[%s4142_s1 + $0x56c] ss:$16 sps:$4 sm:$0xff]  }
  0xa8   :  { %1334 = vmatprep.subr.bf16.mxu0 %v3599_v38  ;;  %1457 = vmatprep.subr.bf16.mxu1 %v3604_v29  ;;  %4326 = vst [vmem:[#allocation82_spill] sm:$0xff] %v3623_v36  ;;  %4327 = vst [vmem:[#allocation83_spill] sm:$0xff] %v3628_v5  ;;  %v3635_v38 = vld [vmem:[%s4142_s1 + $0x560] ss:$16 sps:$4 sm:$0xff]   ;;  %v3640_v29 = vld [vmem:[%s4142_s1 + $0x568] ss:$16 sps:$4 sm:$0xff]  }
  0xa9   :  { %4328 = vst [vmem:[#allocation84_spill] sm:$0xff] %v3635_v38  ;;  %4329 = vst [vmem:[#allocation85_spill] sm:$0xff] %v3640_v29 }
  0xab   :  { %1335 = vmatpush1.bf16.msra.mxu0 %v3611_v37  ;;  %1458 = vmatpush1.bf16.msra.mxu1 %v3616_v46  ;;  %v3647_v37 = vld [vmem:[%s4142_s1 + $0x584] ss:$16 sps:$4 sm:$0xff]   ;;  %v3652_v46 = vld [vmem:[%s4142_s1 + $0x58c] ss:$16 sps:$4 sm:$0xff]  }
  0xac   :  { %1336 = vmatprep.subr.bf16.mxu0 %v3623_v36  ;;  %1459 = vmatprep.subr.bf16.mxu1 %v3628_v5  ;;  %4330 = vst [vmem:[#allocation86_spill] sm:$0xff] %v3647_v37  ;;  %4331 = vst [vmem:[#allocation87_spill] sm:$0xff] %v3652_v46  ;;  %v3659_v36 = vld [vmem:[%s4142_s1 + $0x580] ss:$16 sps:$4 sm:$0xff]   ;;  %v3664_v5 = vld [vmem:[%s4142_s1 + $0x588] ss:$16 sps:$4 sm:$0xff]  }
  0xad   :  { %4332 = vst [vmem:[#allocation88_spill] sm:$0xff] %v3659_v36  ;;  %4333 = vst [vmem:[#allocation89_spill] sm:$0xff] %v3664_v5 }
  0xaf   :  { %1337 = vmatpush1.bf16.msra.mxu0 %v3635_v38  ;;  %1460 = vmatpush1.bf16.msra.mxu1 %v3640_v29  ;;  %v3671_v38 = vld [vmem:[%s4142_s1 + $0x5a4] ss:$16 sps:$4 sm:$0xff]   ;;  %v3676_v29 = vld [vmem:[%s4142_s1 + $0x5ac] ss:$16 sps:$4 sm:$0xff]  }
  0xb0   :  { %1338 = vmatprep.subr.bf16.mxu0 %v3647_v37  ;;  %1461 = vmatprep.subr.bf16.mxu1 %v3652_v46  ;;  %4334 = vst [vmem:[#allocation90_spill] sm:$0xff] %v3671_v38  ;;  %4335 = vst [vmem:[#allocation91_spill] sm:$0xff] %v3676_v29  ;;  %v3683_v37 = vld [vmem:[%s4142_s1 + $0x5a0] ss:$16 sps:$4 sm:$0xff]   ;;  %v3688_v46 = vld [vmem:[%s4142_s1 + $0x5a8] ss:$16 sps:$4 sm:$0xff]  }
  0xb1   :  { %4336 = vst [vmem:[#allocation92_spill] sm:$0xff] %v3683_v37  ;;  %4337 = vst [vmem:[#allocation93_spill] sm:$0xff] %v3688_v46 }
  0xb3   :  { %1339 = vmatpush1.bf16.msra.mxu0 %v3659_v36  ;;  %1462 = vmatpush1.bf16.msra.mxu1 %v3664_v5  ;;  %v3695_v36 = vld [vmem:[%s4142_s1 + $0x5c4] ss:$16 sps:$4 sm:$0xff]   ;;  %v3700_v5 = vld [vmem:[%s4142_s1 + $0x5cc] ss:$16 sps:$4 sm:$0xff]  }
  0xb4   :  { %1340 = vmatprep.subr.bf16.mxu0 %v3671_v38  ;;  %1463 = vmatprep.subr.bf16.mxu1 %v3676_v29  ;;  %4338 = vst [vmem:[#allocation94_spill] sm:$0xff] %v3695_v36  ;;  %4339 = vst [vmem:[#allocation95_spill] sm:$0xff] %v3700_v5  ;;  %v3707_v38 = vld [vmem:[%s4142_s1 + $0x5c0] ss:$16 sps:$4 sm:$0xff]   ;;  %v3712_v29 = vld [vmem:[%s4142_s1 + $0x5c8] ss:$16 sps:$4 sm:$0xff]  }
  0xb5   :  { %4340 = vst [vmem:[#allocation96_spill] sm:$0xff] %v3707_v38  ;;  %4341 = vst [vmem:[#allocation97_spill] sm:$0xff] %v3712_v29 }
  0xb7   :  { %1341 = vmatpush1.bf16.msra.mxu0 %v3683_v37  ;;  %1464 = vmatpush1.bf16.msra.mxu1 %v3688_v46  ;;  %v3719_v37 = vld [vmem:[%s4142_s1 + $0x5e4] ss:$16 sps:$4 sm:$0xff]   ;;  %v3724_v46 = vld [vmem:[%s4142_s1 + $0x5ec] ss:$16 sps:$4 sm:$0xff]  }
  0xb8   :  { %1342 = vmatprep.subr.bf16.mxu0 %v3695_v36  ;;  %1465 = vmatprep.subr.bf16.mxu1 %v3700_v5  ;;  %4342 = vst [vmem:[#allocation98_spill] sm:$0xff] %v3724_v46  ;;  %v3731_v36 = vld [vmem:[%s4142_s1 + $0x5e0] ss:$16 sps:$4 sm:$0xff]   ;;  %v3736_v5 = vld [vmem:[%s4142_s1 + $0x5e8] ss:$16 sps:$4 sm:$0xff]  }
  0xb9   :  { %4343 = vst [vmem:[#allocation99_spill] sm:$0xff] %v3731_v36  ;;  %4344 = vst [vmem:[#allocation100_spill] sm:$0xff] %v3736_v5 }
  0xbb   :  { %1343 = vmatpush1.bf16.msra.mxu0 %v3707_v38  ;;  %1466 = vmatpush1.bf16.msra.mxu1 %v3712_v29  ;;  %v3745_v29 = vld [vmem:[%s4143_s0 + $0x18] sm:$0xff]  ;;  %v2606_v38 = vld [vmem:[%s4142_s1 + $0x4] ss:$16 sps:$4 sm:$0xff]  }
  0xbc   :  { %1344 = vmatprep.subr.bf16.mxu0 %v3719_v37  ;;  %1467 = vmatprep.subr.bf16.mxu1 %v3724_v46  ;;  %v2607_v46 = vld [vmem:[%s4142_s1 + $0xc] ss:$16 sps:$4 sm:$0xff]   ;;  %v2234_v35 = vcombine.high %v3745_v29, %v3745_v29 }
  0xbf   :  { %1345 = vmatpush1.bf16.msra.mxu0 %v3731_v36  ;;  %1468 = vmatpush1.bf16.msra.mxu1 %v3736_v5  ;;  %v2608_v36 = vld [vmem:[%s4142_s1] ss:$16 sps:$4 sm:$0xff]   ;;  %v2609_v5 = vld [vmem:[%s4142_s1 + $0x8] ss:$16 sps:$4 sm:$0xff]  }
  0xc0   :  { %1669 = vmatprep.subr.bf16.mxu0 %v2606_v38  ;;  %1792 = vmatprep.subr.bf16.mxu1 %v2607_v46  ;;  %v2610_v38 = vld [vmem:[%s4142_s1 + $0x24] ss:$16 sps:$4 sm:$0xff]   ;;  %v2611_v46 = vld [vmem:[%s4142_s1 + $0x2c] ss:$16 sps:$4 sm:$0xff]  }
  0xc2   :  { %1347 = vmatmul.mubr.bf16.vlgmr.msra.gmra.mrb[0].mxu0 %v2035_v48  ;;  %1470 = vmatmul.mubr.bf16.vlgmr.msra.gmra.mrb[0].mxu1 %v2035_v48  ;;  %v2612_v48 = vld [vmem:[%s4142_s1 + $0x20] ss:$16 sps:$4 sm:$0xff]  }
  0xc3   :  { %1670 = vmatpush1.bf16.msra.mxu0 %v2608_v36  ;;  %1793 = vmatpush1.bf16.msra.mxu1 %v2609_v5  ;;  %v2613_v5 = vld [vmem:[%s4142_s1 + $0x28] ss:$16 sps:$4 sm:$0xff]   ;;  %v2614_v36 = vld [vmem:[%s4142_s1 + $0x44] ss:$16 sps:$4 sm:$0xff]  }
  0xc4   :  { %1671 = vmatprep.subr.bf16.mxu0 %v2610_v38  ;;  %1794 = vmatprep.subr.bf16.mxu1 %v2611_v46  ;;  %v2615_v38 = vld [vmem:[%s4142_s1 + $0x4c] ss:$16 sps:$4 sm:$0xff]   ;;  %v2617_v46 = vld [vmem:[%s4142_s1 + $0x48] ss:$16 sps:$4 sm:$0xff]  }
  0xc5   :  { %1701 = vmatprep.mubr.bf16.mxu0 %v2234_v35  ;;  %1824 = vmatprep.mubr.bf16.mxu1 %v2234_v35  ;;  %v2616_v35 = vld [vmem:[%s4142_s1 + $0x40] ss:$16 sps:$4 sm:$0xff]  }
  0xc7   :  { %1672 = vmatpush1.bf16.msra.mxu0 %v2612_v48  ;;  %1795 = vmatpush1.bf16.msra.mxu1 %v2613_v5  ;;  %v2618_v48 = vld [vmem:[%s4142_s1 + $0x64] ss:$16 sps:$4 sm:$0xff]   ;;  %v2619_v5 = vld [vmem:[%s4142_s1 + $0x6c] ss:$16 sps:$4 sm:$0xff]  }
  0xc8   :  { %1673 = vmatprep.subr.bf16.mxu0 %v2614_v36  ;;  %1796 = vmatprep.subr.bf16.mxu1 %v2615_v38  ;;  %v2620_v36 = vld [vmem:[%s4142_s1 + $0x60] ss:$16 sps:$4 sm:$0xff]   ;;  %v2621_v38 = vld [vmem:[%s4142_s1 + $0x68] ss:$16 sps:$4 sm:$0xff]  }
  0xcb   :  { %1674 = vmatpush1.bf16.msra.mxu0 %v2616_v35  ;;  %1797 = vmatpush1.bf16.msra.mxu1 %v2617_v46  ;;  %v2622_v35 = vld [vmem:[%s4142_s1 + $0x84] ss:$16 sps:$4 sm:$0xff]   ;;  %v2623_v46 = vld [vmem:[%s4142_s1 + $0x8c] ss:$16 sps:$4 sm:$0xff]  }
  0xcc   :  { %1675 = vmatprep.subr.bf16.mxu0 %v2618_v48  ;;  %1798 = vmatprep.subr.bf16.mxu1 %v2619_v5  ;;  %v2624_v48 = vld [vmem:[%s4142_s1 + $0x80] ss:$16 sps:$4 sm:$0xff]   ;;  %v2625_v5 = vld [vmem:[%s4142_s1 + $0x88] ss:$16 sps:$4 sm:$0xff]  }
  0xcf   :  { %1676 = vmatpush1.bf16.msra.mxu0 %v2620_v36  ;;  %1799 = vmatpush1.bf16.msra.mxu1 %v2621_v38  ;;  %v2626_v36 = vld [vmem:[%s4142_s1 + $0xa4] ss:$16 sps:$4 sm:$0xff]   ;;  %v2627_v38 = vld [vmem:[%s4142_s1 + $0xac] ss:$16 sps:$4 sm:$0xff]  }
  0xd0   :  { %1677 = vmatprep.subr.bf16.mxu0 %v2622_v35  ;;  %1800 = vmatprep.subr.bf16.mxu1 %v2623_v46  ;;  %v2628_v35 = vld [vmem:[%s4142_s1 + $0xa0] ss:$16 sps:$4 sm:$0xff]   ;;  %v2629_v46 = vld [vmem:[%s4142_s1 + $0xa8] ss:$16 sps:$4 sm:$0xff]  }
  0xd3   :  { %1678 = vmatpush1.bf16.msra.mxu0 %v2624_v48  ;;  %1801 = vmatpush1.bf16.msra.mxu1 %v2625_v5  ;;  %v2630_v48 = vld [vmem:[%s4142_s1 + $0xc4] ss:$16 sps:$4 sm:$0xff]   ;;  %v2631_v5 = vld [vmem:[%s4142_s1 + $0xcc] ss:$16 sps:$4 sm:$0xff]  }
  0xd4   :  { %1679 = vmatprep.subr.bf16.mxu0 %v2626_v36  ;;  %1802 = vmatprep.subr.bf16.mxu1 %v2627_v38  ;;  %v2632_v36 = vld [vmem:[%s4142_s1 + $0xc0] ss:$16 sps:$4 sm:$0xff]   ;;  %v2633_v38 = vld [vmem:[%s4142_s1 + $0xc8] ss:$16 sps:$4 sm:$0xff]  }
  0xd7   :  { %1680 = vmatpush1.bf16.msra.mxu0 %v2628_v35  ;;  %1803 = vmatpush1.bf16.msra.mxu1 %v2629_v46  ;;  %v2634_v35 = vld [vmem:[%s4142_s1 + $0xe4] ss:$16 sps:$4 sm:$0xff]   ;;  %v2635_v46 = vld [vmem:[%s4142_s1 + $0xec] ss:$16 sps:$4 sm:$0xff]  }
  0xd8   :  { %1681 = vmatprep.subr.bf16.mxu0 %v2630_v48  ;;  %1804 = vmatprep.subr.bf16.mxu1 %v2631_v5  ;;  %v2636_v48 = vld [vmem:[%s4142_s1 + $0xe0] ss:$16 sps:$4 sm:$0xff]   ;;  %v2637_v5 = vld [vmem:[%s4142_s1 + $0xe8] ss:$16 sps:$4 sm:$0xff]  }
  0xdb   :  { %1682 = vmatpush1.bf16.msra.mxu0 %v2632_v36  ;;  %1805 = vmatpush1.bf16.msra.mxu1 %v2633_v38  ;;  %v2638_v36 = vld [vmem:[%s4142_s1 + $0x104] ss:$16 sps:$4 sm:$0xff]   ;;  %v2639_v38 = vld [vmem:[%s4142_s1 + $0x10c] ss:$16 sps:$4 sm:$0xff]  }
  0xdc   :  { %1683 = vmatprep.subr.bf16.mxu0 %v2634_v35  ;;  %1806 = vmatprep.subr.bf16.mxu1 %v2635_v46  ;;  %v2640_v35 = vld [vmem:[%s4142_s1 + $0x100] ss:$16 sps:$4 sm:$0xff]   ;;  %v2641_v46 = vld [vmem:[%s4142_s1 + $0x108] ss:$16 sps:$4 sm:$0xff]  }
  0xdf   :  { %1684 = vmatpush1.bf16.msra.mxu0 %v2636_v48  ;;  %1807 = vmatpush1.bf16.msra.mxu1 %v2637_v5  ;;  %v2642_v48 = vld [vmem:[%s4142_s1 + $0x124] ss:$16 sps:$4 sm:$0xff]   ;;  %v2643_v5 = vld [vmem:[%s4142_s1 + $0x12c] ss:$16 sps:$4 sm:$0xff]  }
  0xe0   :  { %1685 = vmatprep.subr.bf16.mxu0 %v2638_v36  ;;  %1808 = vmatprep.subr.bf16.mxu1 %v2639_v38  ;;  %v2644_v36 = vld [vmem:[%s4142_s1 + $0x120] ss:$16 sps:$4 sm:$0xff]  }
  0xe1   :  { %v4395_v38 = vld [vmem:[#allocation55_spill] sm:$0xff] }
  0xe3   :  { %1686 = vmatpush1.bf16.msra.mxu0 %v2640_v35  ;;  %1809 = vmatpush1.bf16.msra.mxu1 %v2641_v46  ;;  %v4396_v35 = vld [vmem:[#allocation56_spill] sm:$0xff]  ;;  %v4397_v46 = vld [vmem:[#allocation57_spill] sm:$0xff] }
  0xe4   :  { %1687 = vmatprep.subr.bf16.mxu0 %v2642_v48  ;;  %1810 = vmatprep.subr.bf16.mxu1 %v2643_v5  ;;  %v4398_v48 = vld [vmem:[#allocation58_spill] sm:$0xff]  ;;  %v4399_v5 = vld [vmem:[#allocation59_spill] sm:$0xff] }
  0xe7   :  { %1688 = vmatpush1.bf16.msra.mxu0 %v2644_v36  ;;  %1811 = vmatpush1.bf16.msra.mxu1 %v2808_v39  ;;  %v2233_v39 = vcombine.low %v3745_v29, %v3745_v29  ;;  %v4400_v36 = vld [vmem:[#allocation60_spill] sm:$0xff] }
  0xe8   :  { %1689 = vmatprep.subr.bf16.mxu0 %v2813_v40  ;;  %1812 = vmatprep.subr.bf16.mxu1 %v2818_v41  ;;  %v3896_v40 = vld [vmem:[%s4143_s0 + $0x20] sm:$0xff] }
  0xe9   :  { %v2236_v41 = vcombine.high %v3896_v40, %v3896_v40 }
  0xeb   :  { %1690 = vmatpush1.bf16.msra.mxu0 %v2823_v42  ;;  %1813 = vmatpush1.bf16.msra.mxu1 %v2828_v43  ;;  %v4345_v42 = vld [vmem:[#allocation4_spill] sm:$0xff]  ;;  %v4346_v43 = vld [vmem:[#allocation5_spill] sm:$0xff] }
  0xec   :  { %1691 = vmatprep.subr.bf16.mxu0 %v2834_v44  ;;  %1814 = vmatprep.subr.bf16.mxu1 %v2841_v45  ;;  %v4347_v44 = vld [vmem:[#allocation6_spill] sm:$0xff]  ;;  %v4348_v45 = vld [vmem:[#allocation7_spill] sm:$0xff] }
  0xef   :  { %1692 = vmatpush1.bf16.msra.mxu0 %v2849_v47  ;;  %1815 = vmatpush1.bf16.msra.mxu1 %v2856_v49  ;;  %v4349_v47 = vld [vmem:[#allocation8_spill] sm:$0xff]  ;;  %v4350_v49 = vld [vmem:[#allocation9_spill] sm:$0xff] }
  0xf0   :  { %1693 = vmatprep.subr.bf16.mxu0 %v2863_v50  ;;  %1816 = vmatprep.subr.bf16.mxu1 %v2868_v51  ;;  %v4351_v50 = vld [vmem:[#allocation10_spill] sm:$0xff]  ;;  %v4352_v51 = vld [vmem:[#allocation11_spill] sm:$0xff] }
  0xf3   :  { %1694 = vmatpush1.bf16.msra.mxu0 %v2873_v52  ;;  %1817 = vmatpush1.bf16.msra.mxu1 %v2880_v53  ;;  %v4353_v52 = vld [vmem:[#allocation12_spill] sm:$0xff]  ;;  %v4354_v53 = vld [vmem:[#allocation13_spill] sm:$0xff] }
  0xf4   :  { %1695 = vmatprep.subr.bf16.mxu0 %v2887_v54  ;;  %1818 = vmatprep.subr.bf16.mxu1 %v2892_v55  ;;  %v4355_v54 = vld [vmem:[#allocation14_spill] sm:$0xff]  ;;  %v4356_v55 = vld [vmem:[#allocation15_spill] sm:$0xff] }
  0xf7   :  { %1696 = vmatpush1.bf16.msra.mxu0 %v2897_v56  ;;  %1819 = vmatpush1.bf16.msra.mxu1 %v2904_v57  ;;  %v4357_v56 = vld [vmem:[#allocation16_spill] sm:$0xff]  ;;  %v4358_v57 = vld [vmem:[#allocation17_spill] sm:$0xff] }
  0xf8   :  { %1697 = vmatprep.subr.bf16.mxu0 %v2911_v58  ;;  %1820 = vmatprep.subr.bf16.mxu1 %v2916_v59  ;;  %v4359_v58 = vld [vmem:[#allocation18_spill] sm:$0xff]  ;;  %v4360_v59 = vld [vmem:[#allocation19_spill] sm:$0xff] }
  0xfb   :  { %1698 = vmatpush1.bf16.msra.mxu0 %v2921_v60  ;;  %1821 = vmatpush1.bf16.msra.mxu1 %v2928_v61  ;;  %v4361_v60 = vld [vmem:[#allocation20_spill] sm:$0xff]  ;;  %v4362_v61 = vld [vmem:[#allocation21_spill] sm:$0xff] }
  0xfc   :  { %1699 = vmatprep.subr.bf16.mxu0 %v2935_v62  ;;  %1822 = vmatprep.subr.bf16.mxu1 %v2940_v63  ;;  %v4363_v62 = vld [vmem:[#allocation22_spill] sm:$0xff]  ;;  %v4364_v63 = vld [vmem:[#allocation23_spill] sm:$0xff] }
  0xff   :  { %1700 = vmatpush1.bf16.msra.mxu0 %v2945_v0  ;;  %1823 = vmatpush1.bf16.msra.mxu1 %v2952_v1  ;;  %v4365_v0 = vld [vmem:[#allocation24_spill] sm:$0xff]  ;;  %v4366_v1 = vld [vmem:[#allocation25_spill] sm:$0xff] }
 0x100   :  { %1710 = vmatprep.subr.bf16.mxu0 %v2959_v2  ;;  %1833 = vmatprep.subr.bf16.mxu1 %v2964_v3  ;;  %v4367_v2 = vld [vmem:[#allocation26_spill] sm:$0xff]  ;;  %v4368_v3 = vld [vmem:[#allocation27_spill] sm:$0xff] }
 0x102   :  { %1702 = vmatmul.mubr.bf16.vlgmr.msra.gmra.mrb[4].mxu0 %v2233_v39  ;;  %1825 = vmatmul.mubr.bf16.vlgmr.msra.gmra.mrb[4].mxu1 %v2233_v39  ;;  %v4401_v39 = vld [vmem:[#allocation61_spill] sm:$0xff] }
 0x103   :  { %1711 = vmatpush1.bf16.msra.mxu0 %v2969_v4  ;;  %1834 = vmatpush1.bf16.msra.mxu1 %v2976_v6  ;;  %v4369_v4 = vld [vmem:[#allocation28_spill] sm:$0xff]  ;;  %v4370_v6 = vld [vmem:[#allocation29_spill] sm:$0xff] }
 0x104   :  { %1712 = vmatprep.subr.bf16.mxu0 %v2983_v7  ;;  %1835 = vmatprep.subr.bf16.mxu1 %v2988_v8  ;;  %v4371_v7 = vld [vmem:[#allocation30_spill] sm:$0xff]  ;;  %v4372_v8 = vld [vmem:[#allocation31_spill] sm:$0xff] }
 0x105   :  { %1742 = vmatprep.mubr.bf16.mxu0 %v2236_v41  ;;  %1865 = vmatprep.mubr.bf16.mxu1 %v2236_v41  ;;  %v4402_v41 = vld [vmem:[#allocation62_spill] sm:$0xff] }
 0x107   :  { %1713 = vmatpush1.bf16.msra.mxu0 %v2993_v9  ;;  %1836 = vmatpush1.bf16.msra.mxu1 %v3000_v10  ;;  %v4373_v9 = vld [vmem:[#allocation32_spill] sm:$0xff]  ;;  %v4374_v10 = vld [vmem:[#allocation33_spill] sm:$0xff] }
 0x108   :  { %1714 = vmatprep.subr.bf16.mxu0 %v3007_v11  ;;  %1837 = vmatprep.subr.bf16.mxu1 %v3012_v12  ;;  %v4375_v11 = vld [vmem:[#allocation34_spill] sm:$0xff]  ;;  %v4376_v12 = vld [vmem:[#allocation35_spill] sm:$0xff] }
 0x10b   :  { %1715 = vmatpush1.bf16.msra.mxu0 %v3017_v13  ;;  %1838 = vmatpush1.bf16.msra.mxu1 %v3024_v14  ;;  %v2235_v13 = vcombine.low %v3896_v40, %v3896_v40  ;;  %v3969_v14 = vld [vmem:[%s4143_s0 + $0x28] sm:$0xff] }
 0x10c   :  { %1716 = vmatprep.subr.bf16.mxu0 %v3031_v15  ;;  %1839 = vmatprep.subr.bf16.mxu1 %v3036_v16  ;;  %v4377_v15 = vld [vmem:[#allocation36_spill] sm:$0xff]  ;;  %v4378_v16 = vld [vmem:[#allocation37_spill] sm:$0xff] }
 0x10f   :  { %1717 = vmatpush1.bf16.msra.mxu0 %v3041_v17  ;;  %1840 = vmatpush1.bf16.msra.mxu1 %v3048_v18  ;;  %v4379_v17 = vld [vmem:[#allocation38_spill] sm:$0xff]  ;;  %v4380_v18 = vld [vmem:[#allocation39_spill] sm:$0xff] }
 0x110   :  { %1718 = vmatprep.subr.bf16.mxu0 %v3055_v19  ;;  %1841 = vmatprep.subr.bf16.mxu1 %v3060_v20  ;;  %v2238_v19 = vcombine.high %v3969_v14, %v3969_v14  ;;  %v4381_v20 = vld [vmem:[#allocation40_spill] sm:$0xff] }
 0x113   :  { %1719 = vmatpush1.bf16.msra.mxu0 %v3065_v21  ;;  %1842 = vmatpush1.bf16.msra.mxu1 %v3072_v22  ;;  %v4382_v21 = vld [vmem:[#allocation42_spill] sm:$0xff]  ;;  %v4383_v22 = vld [vmem:[#allocation43_spill] sm:$0xff] }
 0x114   :  { %1720 = vmatprep.subr.bf16.mxu0 %v3079_v23  ;;  %1843 = vmatprep.subr.bf16.mxu1 %v3084_v24  ;;  %v4384_v23 = vld [vmem:[#allocation44_spill] sm:$0xff]  ;;  %v4385_v24 = vld [vmem:[#allocation45_spill] sm:$0xff] }
 0x117   :  { %1721 = vmatpush1.bf16.msra.mxu0 %v3089_v25  ;;  %1844 = vmatpush1.bf16.msra.mxu1 %v3096_v26  ;;  %v4386_v25 = vld [vmem:[#allocation46_spill] sm:$0xff]  ;;  %v4387_v26 = vld [vmem:[#allocation47_spill] sm:$0xff] }
 0x118   :  { %1722 = vmatprep.subr.bf16.mxu0 %v3103_v27  ;;  %1845 = vmatprep.subr.bf16.mxu1 %v3108_v28  ;;  %v4388_v27 = vld [vmem:[#allocation48_spill] sm:$0xff]  ;;  %v4389_v28 = vld [vmem:[#allocation49_spill] sm:$0xff] }
 0x11b   :  { %1723 = vmatpush1.bf16.msra.mxu0 %v3122_v31  ;;  %1846 = vmatpush1.bf16.msra.mxu1 %v3127_v32  ;;  %v4390_v31 = vld [vmem:[#allocation50_spill] sm:$0xff]  ;;  %v4391_v32 = vld [vmem:[#allocation51_spill] sm:$0xff] }
 0x11c   :  { %1724 = vmatprep.subr.bf16.mxu0 %v3134_v33  ;;  %1847 = vmatprep.subr.bf16.mxu1 %v3139_v34  ;;  %v4392_v33 = vld [vmem:[#allocation52_spill] sm:$0xff]  ;;  %v4393_v34 = vld [vmem:[#allocation53_spill] sm:$0xff] }
 0x11f   :  { %1725 = vmatpush1.bf16.msra.mxu0 %v4345_v42  ;;  %1848 = vmatpush1.bf16.msra.mxu1 %v4346_v43  ;;  %v4403_v42 = vld [vmem:[#allocation63_spill] sm:$0xff]  ;;  %v4404_v43 = vld [vmem:[#allocation64_spill] sm:$0xff] }
 0x120   :  { %1726 = vmatprep.subr.bf16.mxu0 %v4347_v44  ;;  %1849 = vmatprep.subr.bf16.mxu1 %v4348_v45  ;;  %v4405_v44 = vld [vmem:[#allocation65_spill] sm:$0xff]  ;;  %v4406_v45 = vld [vmem:[#allocation66_spill] sm:$0xff] }
 0x123   :  { %1727 = vmatpush1.bf16.msra.mxu0 %v4349_v47  ;;  %1850 = vmatpush1.bf16.msra.mxu1 %v4350_v49  ;;  %v4407_v47 = vld [vmem:[#allocation67_spill] sm:$0xff]  ;;  %v4408_v49 = vld [vmem:[#allocation68_spill] sm:$0xff] }
 0x124   :  { %1728 = vmatprep.subr.bf16.mxu0 %v4351_v50  ;;  %1851 = vmatprep.subr.bf16.mxu1 %v4352_v51  ;;  %v4409_v50 = vld [vmem:[#allocation69_spill] sm:$0xff]  ;;  %v4410_v51 = vld [vmem:[#allocation70_spill] sm:$0xff] }
 0x127   :  { %1729 = vmatpush1.bf16.msra.mxu0 %v4353_v52  ;;  %1852 = vmatpush1.bf16.msra.mxu1 %v4354_v53  ;;  %v4411_v52 = vld [vmem:[#allocation71_spill] sm:$0xff]  ;;  %v4412_v53 = vld [vmem:[#allocation72_spill] sm:$0xff] }
 0x128   :  { %1730 = vmatprep.subr.bf16.mxu0 %v4355_v54  ;;  %1853 = vmatprep.subr.bf16.mxu1 %v4356_v55  ;;  %v4413_v54 = vld [vmem:[#allocation73_spill] sm:$0xff]  ;;  %v4414_v55 = vld [vmem:[#allocation74_spill] sm:$0xff] }
 0x12b   :  { %1731 = vmatpush1.bf16.msra.mxu0 %v4357_v56  ;;  %1854 = vmatpush1.bf16.msra.mxu1 %v4358_v57  ;;  %v4415_v56 = vld [vmem:[#allocation75_spill] sm:$0xff]  ;;  %v4416_v57 = vld [vmem:[#allocation76_spill] sm:$0xff] }
 0x12c   :  { %1732 = vmatprep.subr.bf16.mxu0 %v4359_v58  ;;  %1855 = vmatprep.subr.bf16.mxu1 %v4360_v59  ;;  %v4417_v58 = vld [vmem:[#allocation77_spill] sm:$0xff]  ;;  %v4418_v59 = vld [vmem:[#allocation78_spill] sm:$0xff] }
 0x12f   :  { %1733 = vmatpush1.bf16.msra.mxu0 %v4361_v60  ;;  %1856 = vmatpush1.bf16.msra.mxu1 %v4362_v61  ;;  %v4419_v60 = vld [vmem:[#allocation79_spill] sm:$0xff]  ;;  %v4420_v61 = vld [vmem:[#allocation80_spill] sm:$0xff] }
 0x130   :  { %1734 = vmatprep.subr.bf16.mxu0 %v4363_v62  ;;  %1857 = vmatprep.subr.bf16.mxu1 %v4364_v63  ;;  %v4421_v62 = vld [vmem:[#allocation81_spill] sm:$0xff]  ;;  %v4422_v63 = vld [vmem:[#allocation82_spill] sm:$0xff] }
 0x133   :  { %1735 = vmatpush1.bf16.msra.mxu0 %v4365_v0  ;;  %1858 = vmatpush1.bf16.msra.mxu1 %v4366_v1  ;;  %v4423_v0 = vld [vmem:[#allocation83_spill] sm:$0xff]  ;;  %v4424_v1 = vld [vmem:[#allocation84_spill] sm:$0xff] }
 0x134   :  { %1736 = vmatprep.subr.bf16.mxu0 %v4367_v2  ;;  %1859 = vmatprep.subr.bf16.mxu1 %v4368_v3  ;;  %v4425_v2 = vld [vmem:[#allocation85_spill] sm:$0xff]  ;;  %v4426_v3 = vld [vmem:[#allocation86_spill] sm:$0xff] }
 0x137   :  { %1737 = vmatpush1.bf16.msra.mxu0 %v4369_v4  ;;  %1860 = vmatpush1.bf16.msra.mxu1 %v4370_v6  ;;  %v4427_v4 = vld [vmem:[#allocation87_spill] sm:$0xff]  ;;  %v4428_v6 = vld [vmem:[#allocation88_spill] sm:$0xff] }
 0x138   :  { %1738 = vmatprep.subr.bf16.mxu0 %v4371_v7  ;;  %1861 = vmatprep.subr.bf16.mxu1 %v4372_v8  ;;  %v4429_v7 = vld [vmem:[#allocation89_spill] sm:$0xff]  ;;  %v4430_v8 = vld [vmem:[#allocation90_spill] sm:$0xff] }
 0x13b   :  { %1739 = vmatpush1.bf16.msra.mxu0 %v4373_v9  ;;  %1862 = vmatpush1.bf16.msra.mxu1 %v4374_v10  ;;  %v4431_v9 = vld [vmem:[#allocation91_spill] sm:$0xff]  ;;  %v4432_v10 = vld [vmem:[#allocation92_spill] sm:$0xff] }
 0x13c   :  { %1740 = vmatprep.subr.bf16.mxu0 %v4375_v11  ;;  %1863 = vmatprep.subr.bf16.mxu1 %v4376_v12  ;;  %v4433_v11 = vld [vmem:[#allocation93_spill] sm:$0xff]  ;;  %v4434_v12 = vld [vmem:[#allocation94_spill] sm:$0xff] }
 0x13f   :  { %1741 = vmatpush1.bf16.msra.mxu0 %v4377_v15  ;;  %1864 = vmatpush1.bf16.msra.mxu1 %v4378_v16  ;;  %v4436_v15 = vld [vmem:[#allocation96_spill] sm:$0xff]  ;;  %v4437_v16 = vld [vmem:[#allocation97_spill] sm:$0xff] }
 0x140   :  { %1751 = vmatprep.subr.bf16.mxu0 %v4379_v17  ;;  %1874 = vmatprep.subr.bf16.mxu1 %v4380_v18  ;;  %v4438_v17 = vld [vmem:[#allocation98_spill] sm:$0xff]  ;;  %v2237_v18 = vcombine.low %v3969_v14, %v3969_v14 }
 0x142   :  { %1743 = vmatmul.mubr.bf16.vlgmr.msra.gmra.mrb[4].mxu0 %v2235_v13  ;;  %1866 = vmatmul.mubr.bf16.vlgmr.msra.gmra.mrb[4].mxu1 %v2235_v13  ;;  %v4435_v13 = vld [vmem:[#allocation95_spill] sm:$0xff] }
 0x143   :  { %1752 = vmatpush1.bf16.msra.mxu0 %v3364_v30  ;;  %1875 = vmatpush1.bf16.msra.mxu1 %v4381_v20  ;;  %v4394_v30 = vld [vmem:[#allocation54_spill] sm:$0xff]  ;;  %v4440_v20 = vld [vmem:[#allocation100_spill] sm:$0xff] }
 0x144   :  { %1753 = vmatprep.subr.bf16.mxu0 %v4382_v21  ;;  %1876 = vmatprep.subr.bf16.mxu1 %v4383_v22  ;;  %v231_v21 = vlaneseq }
 0x145   :  { %1783 = vmatprep.mubr.bf16.mxu0 %v2238_v19  ;;  %1906 = vmatprep.mubr.bf16.mxu1 %v2238_v19  ;;  %v4439_v19 = vld [vmem:[#allocation99_spill] sm:$0xff] }
 0x146   :  { %v4041_v22 = vshrl.u32 %v231_v21, 7 }
 0x147   :  { %1754 = vmatpush1.bf16.msra.mxu0 %v4384_v23  ;;  %1877 = vmatpush1.bf16.msra.mxu1 %v4385_v24 }
 0x148   :  { %1755 = vmatprep.subr.bf16.mxu0 %v4386_v25  ;;  %1878 = vmatprep.subr.bf16.mxu1 %v4387_v26  ;;  %v4044_v23 = vsub.s32 0, %v4041_v22  ;;  %v4047_v24 = vsub.s32 2, %v4041_v22  ;;  %v4053_v25 = vsub.s32 1, %v4041_v22  ;;  %v4056_v26 = vsub.s32 3, %v4041_v22 }
 0x14b   :  { %1756 = vmatpush1.bf16.msra.mxu0 %v4388_v27  ;;  %1879 = vmatpush1.bf16.msra.mxu1 %v4389_v28 }
 0x14c   :  { %1757 = vmatprep.subr.bf16.mxu0 %v4390_v31  ;;  %1880 = vmatprep.subr.bf16.mxu1 %v4391_v32 }
 0x14f   :  { %1758 = vmatpush1.bf16.msra.mxu0 %v4392_v33  ;;  %1881 = vmatpush1.bf16.msra.mxu1 %v4393_v34 }
 0x150   :  { %1759 = vmatprep.subr.bf16.mxu0 %v4394_v30  ;;  %1882 = vmatprep.subr.bf16.mxu1 %v4395_v38 }
 0x153   :  { %1760 = vmatpush1.bf16.msra.mxu0 %v4396_v35  ;;  %1883 = vmatpush1.bf16.msra.mxu1 %v4397_v46 }
 0x154   :  { %1761 = vmatprep.subr.bf16.mxu0 %v4398_v48  ;;  %1884 = vmatprep.subr.bf16.mxu1 %v4399_v5 }
 0x157   :  { %1762 = vmatpush1.bf16.msra.mxu0 %v4400_v36  ;;  %1885 = vmatpush1.bf16.msra.mxu1 %v4401_v39 }
 0x158   :  { %1763 = vmatprep.subr.bf16.mxu0 %v4402_v41  ;;  %1886 = vmatprep.subr.bf16.mxu1 %v4403_v42 }
 0x15b   :  { %1764 = vmatpush1.bf16.msra.mxu0 %v4404_v43  ;;  %1887 = vmatpush1.bf16.msra.mxu1 %v4405_v44  ;;  %v223_v43 = vld [vmem:[%s4145_s3] sm:$0xf] }
 0x15c   :  { %1765 = vmatprep.subr.bf16.mxu0 %v4406_v45  ;;  %1888 = vmatprep.subr.bf16.mxu1 %v4407_v47  ;;  %v1486_v44 = vrot.slane %v223_v43, %v4044_v23  ;;  %v1490_v45 = vrot.slane %v223_v43, %v4053_v25 }
 0x15f   :  { %1766 = vmatpush1.bf16.msra.mxu0 %v4408_v49  ;;  %1889 = vmatpush1.bf16.msra.mxu1 %v4409_v50  ;;  %v1494_v50 = vrot.slane %v223_v43, %v4047_v24 }
 0x160   :  { %1767 = vmatprep.subr.bf16.mxu0 %v4410_v51  ;;  %1890 = vmatprep.subr.bf16.mxu1 %v4411_v52 }
 0x163   :  { %1768 = vmatpush1.bf16.msra.mxu0 %v4412_v53  ;;  %1891 = vmatpush1.bf16.msra.mxu1 %v4413_v54  ;;  %v1498_v53 = vrot.slane %v223_v43, %v4056_v26 }
 0x164   :  { %1769 = vmatprep.subr.bf16.mxu0 %v4414_v55  ;;  %1892 = vmatprep.subr.bf16.mxu1 %v4415_v56 }
 0x167   :  { %1770 = vmatpush1.bf16.msra.mxu0 %v4416_v57  ;;  %1893 = vmatpush1.bf16.msra.mxu1 %v4417_v58 }
 0x168   :  { %1771 = vmatprep.subr.bf16.mxu0 %v4418_v59  ;;  %1894 = vmatprep.subr.bf16.mxu1 %v4419_v60 }
 0x16b   :  { %1772 = vmatpush1.bf16.msra.mxu0 %v4420_v61  ;;  %1895 = vmatpush1.bf16.msra.mxu1 %v4421_v62  ;;  %v12_v61 = vstv %s4146_s4 }
 0x16c   :  { %1773 = vmatprep.subr.bf16.mxu0 %v4422_v63  ;;  %1896 = vmatprep.subr.bf16.mxu1 %v4423_v0  ;;  %13 = vst [vmem:[#allocation2] sm:$0x1] %v12_v61 }
 0x16f   :  { %1774 = vmatpush1.bf16.msra.mxu0 %v4424_v1  ;;  %1897 = vmatpush1.bf16.msra.mxu1 %v4425_v2 }
 0x170   :  { %1775 = vmatprep.subr.bf16.mxu0 %v4426_v3  ;;  %1898 = vmatprep.subr.bf16.mxu1 %v4427_v4 }
 0x173   :  { %1776 = vmatpush1.bf16.msra.mxu0 %v4428_v6  ;;  %1899 = vmatpush1.bf16.msra.mxu1 %v4429_v7 }
 0x174   :  { %1777 = vmatprep.subr.bf16.mxu0 %v4430_v8  ;;  %1900 = vmatprep.subr.bf16.mxu1 %v4431_v9 }
 0x177   :  { %1778 = vmatpush1.bf16.msra.mxu0 %v4432_v10  ;;  %1901 = vmatpush1.bf16.msra.mxu1 %v4433_v11 }
 0x178   :  { %1779 = vmatprep.subr.bf16.mxu0 %v4434_v12  ;;  %1902 = vmatprep.subr.bf16.mxu1 %v4435_v13 }
 0x17b   :  { %1780 = vmatpush1.bf16.msra.mxu0 %v4436_v15  ;;  %1903 = vmatpush1.bf16.msra.mxu1 %v4437_v16 }
 0x17c   :  { %1781 = vmatprep.subr.bf16.mxu0 %v3719_v37  ;;  %1904 = vmatprep.subr.bf16.mxu1 %v4438_v17  ;;  %v222_v37 = vld [vmem:[%s4144_s2] sm:$0xf] }
 0x17d   :  { %v234_v27 = vrot.slane %v222_v37, %v4044_v23  ;;  %v242_v28 = vrot.slane %v222_v37, %v4047_v24  ;;  %v238_v31 = vrot.slane %v222_v37, %v4053_v25  ;;  %v246_v32 = vrot.slane %v222_v37, %v4056_v26 }
 0x17f   :  { %1782 = vmatpush1.bf16.msra.mxu0 %v4439_v19  ;;  %1905 = vmatpush1.bf16.msra.mxu1 %v4440_v20 }
 0x182   :  { %1784 = vmatmul.mubr.bf16.vlgmr.msra.gmra.mrb[4].mxu0 %v2237_v18  ;;  %1907 = vmatmul.mubr.bf16.vlgmr.msra.gmra.mrb[4].mxu1 %v2237_v18 }
 0x195   :  { %v1348_v33 = vpop.f32.mrb[0].mxu0  ;;  %v1471_v34 = vpop.f32.mrb[0].mxu1 }
 0x196   :  { %v2239_v30 = vadd.f32 %v1348_v33, %v234_v27  ;;  %v2241_v38 = vadd.f32 %v1471_v34, %v242_v28  ;;  %v1350_v35 = vpop.f32.mrb[1].mxu0  ;;  %v1473_v46 = vpop.f32.mrb[1].mxu1 }
 0x197   :  { %v2240_v48 = vadd.f32 %v1350_v35, %v238_v31  ;;  %v1352_v5 = vpop.f32.mrb[2].mxu0  ;;  %v1475_v36 = vpop.f32.mrb[2].mxu1  ;;  %v2242_v39 = vadd.f32 %v1473_v46, %v246_v32 }
 0x198   :  { %2582 = vtanh.f32 %v2239_v30  ;;  %v1353_v41 = vpop.f32.mrb[3].mxu0  ;;  %v1476_v42 = vpop.f32.mrb[3].mxu1 }
 0x199   :  { %2584 = vtanh.f32 %v2241_v38 }
 0x19a   :  { %2586 = vtanh.f32 %v2240_v48 }
 0x19b   :  { %2588 = vtanh.f32 %v2242_v39 }
 0x1a2   :  { %v2583_v47 = vpop.eup %2582 }
 0x1a3   :  { %v2585_v49 = vpop.eup %2584  ;;  %v1503_v51 = vmul.f32 %v2583_v47, %v1486_v44 }
 0x1a4   :  { %v2587_v52 = vpop.eup %2586  ;;  %v1505_v56 = vmul.f32 %v2585_v49, %v1494_v50 }
 0x1a5   :  { %v1504_v54 = vmul.f32 %v2587_v52, %v1490_v45  ;;  %v2589_v55 = vpop.eup %2588 }
 0x1a6   :  { %v1506_v58 = vmul.f32 %v2589_v55, %v1498_v53 }
 0x1a7   :  { %v1507_v57 = vadd.f32 %v1504_v54, %v1503_v51 }
 0x1a9   :  { %v1508_v59 = vadd.f32 %v1507_v57, %v1505_v56 }
 0x1ab   :  { %v1509_v60 = vadd.f32 %v1508_v59, %v1506_v58 }
 0x255   :  { %v1785_v62 = vpop.f32.mrb[4].mxu0  ;;  %v1908_v63 = vpop.f32.mrb[4].mxu1 }
 0x256   :  { %v2243_v0 = vadd.f32 %v1785_v62, %v234_v27  ;;  %v2245_v1 = vadd.f32 %v1908_v63, %v242_v28  ;;  %v1787_v2 = vpop.f32.mrb[5].mxu0  ;;  %v1910_v3 = vpop.f32.mrb[5].mxu1  ;;  %v2647_v27 = vmov 0   ;;  %v2229_v28 = vld [vmem:[#allocation2] ss:$0 sm:$0xff] }
 0x257   :  { %v2244_v4 = vadd.f32 %v1787_v2, %v238_v31  ;;  %v1789_v6 = vpop.f32.mrb[6].mxu0  ;;  %v1912_v7 = vpop.f32.mrb[6].mxu1  ;;  %v2246_v8 = vadd.f32 %v1910_v3, %v246_v32  ;;  %2280 = vset.pattern.permute.xlu1 %v2647_v27  ;;  %2281 = vset.pattern.permute.xlu0 %v2647_v27  ;;  %v4441_v27 = vld [vmem:[#allocation41_spill] sm:$0xff] }
 0x258   :  { %2590 = vtanh.f32 %v2243_v0  ;;  %v1790_v9 = vpop.f32.mrb[7].mxu0  ;;  %v1913_v10 = vpop.f32.mrb[7].mxu1 }
 0x259   :  { %2592 = vtanh.f32 %v2245_v1  ;;  %v14_v10 = vstv %s4147_s6 }
 0x25a   :  { %2594 = vtanh.f32 %v2244_v4  ;;  %15 = vst [vmem:[#allocation3] sm:$0x1] %v14_v10 }
 0x25b   :  { %2596 = vtanh.f32 %v2246_v8 }
 0x262   :  { %v2591_v11 = vpop.eup %2590 }
 0x263   :  { %v2593_v12 = vpop.eup %2592  ;;  %v1919_v13 = vmul.f32 %v2591_v11, %v1486_v44  ;;  %v1948_v11 = vunpack.c.l.bf16 %v3745_v29 }
 0x264   :  { %v2595_v15 = vpop.eup %2594  ;;  %v1921_v18 = vmul.f32 %v2593_v12, %v1494_v50  ;;  %v1949_v12 = vunpack.c.h.bf16 %v3745_v29  ;;  %v2646_v29 = vld [vmem:[%s4143_s0 + $0x8] sm:$0xff] }
 0x265   :  { %v1920_v16 = vmul.f32 %v2595_v15, %v1490_v45  ;;  %v2597_v17 = vpop.eup %2596  ;;  %v1951_v15 = vunpack.c.h.bf16 %v3896_v40 }
 0x266   :  { %v1922_v20 = vmul.f32 %v2597_v17, %v1498_v53  ;;  %v2645_v17 = vld [vmem:[%s4143_s0] sm:$0xff] }
 0x267   :  { %v1923_v19 = vadd.f32 %v1920_v16, %v1919_v13  ;;  %v1950_v13 = vunpack.c.l.bf16 %v3896_v40  ;;  %v225_v16 = vld [vmem:[%s4148_s5] sm:$0x3f]  ;;  %v1542_v40 = vunpack.c.h.bf16 %v2646_v29 }
 0x269   :  { %v1924_v21 = vadd.f32 %v1923_v19, %v1921_v18  ;;  %v1539_v18 = vunpack.c.l.bf16 %v2645_v17  ;;  %v1540_v19 = vunpack.c.h.bf16 %v2645_v17 }
 0x26b   :  { %v1925_v37 = vadd.f32 %v1924_v21, %v1922_v20  ;;  %v1952_v20 = vunpack.c.l.bf16 %v3969_v14  ;;  %v1953_v21 = vunpack.c.h.bf16 %v3969_v14  ;;  %v1615_v14 = vsub.s32 5, %v4041_v22 }
 0x26d   :  { %1926 = vadd.xlane.f32.xlu0 %v1925_v37  ;;  %v1541_v37 = vunpack.c.l.bf16 %v2646_v29 }
 0x271   :  { %1510 = vadd.xlane.f32.xlu0 %v1509_v60 }
 0x2fa   :  { %v1927_v31 = vpop.xlane.xlu0 %1926 }
 0x2fb   :  { %v1928_v32 = vadd.f32 %v2229_v28, %v1927_v31  ;;  %v1544_v31 = vunpack.c.h.bf16 %v4441_v27 }
 0x2fd   :  { %v1929_v33 = vsel %vm1519_vm0, %v1928_v32, -inf }
 0x2fe   :  { %v1930_v34 = vrot.slane %v1929_v33, 4  ;;  %v1511_v30 = vpop.xlane.xlu0 %1510 }
 0x2ff   :  { %v1518_v38 = vadd.f32 %v2229_v28, %v1511_v30  ;;  %v1543_v28 = vunpack.c.l.bf16 %v4441_v27  ;;  %v1611_v30 = vsub.s32 4, %v4041_v22  ;;  %v4112_v22 = vrot.slane %v225_v16, %v1615_v14 }
 0x300   :  { %v1931_v35 = vmax.f32 %v1929_v33, %v1930_v34  ;;  %v4100_v33 = vrot.slane %v225_v16, %v4047_v24 }
 0x301   :  { %v1520_v46 = vsel %vm1519_vm0, %v1518_v38, -inf }
 0x302   :  { %v1932_v48 = vrot.slane %v1931_v35, 2  ;;  %v1521_v5 = vrot.slane %v1520_v46, 4 }
 0x304   :  { %v1933_v36 = vmax.f32 %v1931_v35, %v1932_v48  ;;  %v1522_v39 = vmax.f32 %v1520_v46, %v1521_v5  ;;  %v4105_v5 = vrot.slane %v225_v16, %v4053_v25 }
 0x306   :  { %v1934_v41 = vrot.slane %v1933_v36, 1  ;;  %v1523_v42 = vrot.slane %v1522_v39, 2 }
 0x308   :  { %v1935_v43 = vmax.f32 %v1933_v36, %v1934_v41  ;;  %v1524_v44 = vmax.f32 %v1522_v39, %v1523_v42 }
 0x30a   :  { %v1936_v45 = vsub.f32 %v1928_v32, %v1935_v43  ;;  %v1525_v47 = vrot.slane %v1524_v44, 1  ;;  %v4097_v32 = vrot.slane %v225_v16, %v4044_v23  ;;  %v4108_v23 = vrot.slane %v225_v16, %v4056_v26 }
 0x30c   :  { %v1937_v49 = vmul.f32 1.442695, %v1936_v45  ;;  %v1526_v50 = vmax.f32 %v1524_v44, %v1525_v47  ;;  %v4110_v47 = vrot.slane %v225_v16, %v1611_v30 }
 0x30e   :  { %2598 = vpow2.f32 %v1937_v49  ;;  %v1527_v51 = vsub.f32 %v1518_v38, %v1526_v50 }
 0x310   :  { %v1528_v52 = vmul.f32 1.442695, %v1527_v51 }
 0x312   :  { %2600 = vpow2.f32 %v1528_v52 }
 0x318   :  { %v2599_v53 = vpop.eup %2598 }
 0x319   :  { %v1939_v54 = vsel %vm1519_vm0, %v2599_v53, 0.0 }
 0x31a   :  { %v1940_v55 = vrot.slane %v1939_v54, 4 }
 0x31c   :  { %v2601_v56 = vpop.eup %2600  ;;  %v1941_v57 = vadd.f32 %v1940_v55, %v1939_v54 }
 0x31d   :  { %v1530_v58 = vsel %vm1519_vm0, %v2601_v56, 0.0 }
 0x31e   :  { %v1942_v59 = vrot.slane %v1941_v57, 2  ;;  %v1531_v60 = vrot.slane %v1530_v58, 4 }
 0x320   :  { %v1943_v61 = vadd.f32 %v1942_v59, %v1941_v57  ;;  %v1532_v62 = vadd.f32 %v1531_v60, %v1530_v58 }
 0x322   :  { %v1533_v63 = vrot.slane %v1532_v62, 2  ;;  %v1944_v0 = vrot.slane %v1943_v61, 1 }
 0x324   :  { %v1945_v1 = vadd.f32 %v1944_v0, %v1943_v61  ;;  %v1534_v2 = vadd.f32 %v1533_v63, %v1532_v62 }
 0x326   :  { %2602 = vrcp.f32 %v1945_v1  ;;  %v1535_v3 = vrot.slane %v1534_v2, 1 }
 0x328   :  { %v1536_v4 = vadd.f32 %v1535_v3, %v1534_v2 }
 0x32a   :  { %2604 = vrcp.f32 %v1536_v4 }
 0x330   :  { %v2603_v6 = vpop.eup %2602 }
 0x331   :  { %v1947_v7 = vmul.f32 %v2603_v6, %v2599_v53 }
 0x333   :  { %1956 = vperm.xlu1 %2280, %v1947_v7  }
 0x334   :  { %v2605_v8 = vpop.eup %2604 }
 0x335   :  { %v1538_v9 = vmul.f32 %v2605_v8, %v2601_v56 }
 0x337   :  { %1547 = vperm.xlu1 %2280, %v1538_v9  }
 0x3b2   :  { %v1957_v34 = vpop.permute.xlu1 %1956 }
 0x3b3   :  { %v1959_v38 = vmul.f32 %v1957_v34, %v1948_v11  ;;  %v1960_v35 = vmul.f32 %v1957_v34, %v1949_v12  ;;  %v1961_v46 = vmul.f32 %v1957_v34, %v1950_v13  ;;  %v1962_v48 = vmul.f32 %v1957_v34, %v1951_v15 }
 0x3b4   :  { %v1963_v36 = vmul.f32 %v1957_v34, %v1952_v20  ;;  %v1964_v39 = vmul.f32 %v1957_v34, %v1953_v21 }
 0x3b5   :  { %v1965_v41 = vrot.slane %v1959_v38, 4  ;;  %v1971_v24 = vrot.slane %v1960_v35, 4  ;;  %v1977_v42 = vrot.slane %v1961_v46, 4  ;;  %v1983_v43 = vrot.slane %v1962_v48, 4 }
 0x3b6   :  { %v1989_v44 = vrot.slane %v1963_v36, 4  ;;  %v1548_v45 = vpop.permute.xlu1 %1547  ;;  %v1995_v49 = vrot.slane %v1964_v39, 4 }
 0x3b7   :  { %v1966_v50 = vadd.f32 %v1965_v41, %v1959_v38  ;;  %v1972_v51 = vadd.f32 %v1971_v24, %v1960_v35  ;;  %v1978_v25 = vadd.f32 %v1977_v42, %v1961_v46  ;;  %v1984_v52 = vadd.f32 %v1983_v43, %v1962_v48 }
 0x3b8   :  { %v1550_v53 = vmul.f32 %v1548_v45, %v1539_v18  ;;  %v1551_v54 = vmul.f32 %v1548_v45, %v1540_v19  ;;  %v1552_v55 = vmul.f32 %v1548_v45, %v1541_v37  ;;  %v1553_v26 = vmul.f32 %v1548_v45, %v1542_v40 }
 0x3b9   :  { %v1967_v56 = vrot.slane %v1966_v50, 2  ;;  %v1973_v57 = vrot.slane %v1972_v51, 2  ;;  %v1979_v58 = vrot.slane %v1978_v25, 2  ;;  %v1554_v59 = vmul.f32 %v1548_v45, %v1543_v28 }
 0x3ba   :  { %v1555_v60 = vmul.f32 %v1548_v45, %v1544_v31  ;;  %v1556_v61 = vrot.slane %v1550_v53, 4  ;;  %v1562_v62 = vrot.slane %v1551_v54, 4  ;;  %v1568_v63 = vrot.slane %v1552_v55, 4 }
 0x3bb   :  { %v1968_v0 = vadd.f32 %v1967_v56, %v1966_v50  ;;  %v1974_v1 = vadd.f32 %v1973_v57, %v1972_v51  ;;  %v1574_v2 = vrot.slane %v1553_v26, 4  ;;  %v1580_v3 = vrot.slane %v1554_v59, 4 }
 0x3bc   :  { %v1557_v4 = vadd.f32 %v1556_v61, %v1550_v53  ;;  %v1563_v6 = vadd.f32 %v1562_v62, %v1551_v54  ;;  %v1569_v7 = vadd.f32 %v1568_v63, %v1552_v55  ;;  %v1980_v8 = vadd.f32 %v1979_v58, %v1978_v25 }
 0x3bd   :  { %v1575_v9 = vadd.f32 %v1574_v2, %v1553_v26  ;;  %v1969_v10 = vrot.slane %v1968_v0, 1  ;;  %v1975_v11 = vrot.slane %v1974_v1, 1  ;;  %v1985_v12 = vrot.slane %v1984_v52, 2 }
 0x3be   :  { %v1558_v13 = vrot.slane %v1557_v4, 2  ;;  %v1564_v15 = vrot.slane %v1563_v6, 2  ;;  %v1570_v16 = vrot.slane %v1569_v7, 2  ;;  %v1981_v17 = vrot.slane %v1980_v8, 1 }
 0x3bf   :  { %v1970_v18 = vadd.f32 %v1969_v10, %v1968_v0  ;;  %v1976_v19 = vadd.f32 %v1975_v11, %v1974_v1  ;;  %v1986_v20 = vadd.f32 %v1985_v12, %v1984_v52  ;;  %v1990_v21 = vadd.f32 %v1989_v44, %v1963_v36 }
 0x3c0   :  { %v1559_v29 = vadd.f32 %v1558_v13, %v1557_v4  ;;  %v1565_v37 = vadd.f32 %v1564_v15, %v1563_v6  ;;  %v1982_v40 = vadd.f32 %v1981_v17, %v1980_v8  ;;  %v1996_v27 = vadd.f32 %v1995_v49, %v1964_v39 }
 0x3c1   :  { %v1987_v28 = vrot.slane %v1986_v20, 1  ;;  %v1991_v31 = vrot.slane %v1990_v21, 2  ;;  %v2001_v34 = vmul.f32 %v1970_v18, %v4097_v32  ;;  %v2002_v30 = vmul.f32 %v1976_v19, %v4105_v5 }
 0x3c2   :  { %v1997_v14 = vrot.slane %v1996_v27, 2  ;;  %v2003_v38 = vmul.f32 %v1982_v40, %v4100_v33  ;;  %v1560_v35 = vrot.slane %v1559_v29, 1  ;;  %v1566_v46 = vrot.slane %v1565_v37, 1 }
 0x3c3   :  { %v1988_v48 = vadd.f32 %v1987_v28, %v1986_v20  ;;  %v1992_v41 = vadd.f32 %v1991_v31, %v1990_v21  ;;  %v2007_v24 = vsel %vm1629_vm1, %v2001_v34, 0.0  ;;  %v2008_v36 = vsel %vm1629_vm1, %v2002_v30, 0.0 }
 0x3c4   :  { %v1998_v42 = vadd.f32 %v1997_v14, %v1996_v27  ;;  %v2009_v43 = vadd.f32 %v2008_v36, %v2007_v24  ;;  %v2010_v39 = vsel %vm1629_vm1, %v2003_v38, 0.0  ;;  %v1561_v44 = vadd.f32 %v1560_v35, %v1559_v29  ;;  %v226_v14 = vld [vmem:[#allocation3] sm:$0x1] }
 0x3c5   :  { %v1993_v45 = vrot.slane %v1992_v41, 1  ;;  %v2004_v49 = vmul.f32 %v1988_v48, %v4108_v23  ;;  %v1567_v50 = vadd.f32 %v1566_v46, %v1565_v37  ;;  %v1571_v51 = vadd.f32 %v1570_v16, %v1569_v7 }
 0x3c6   :  { %v1999_v25 = vrot.slane %v1998_v42, 1  ;;  %v2011_v52 = vadd.f32 %v2010_v39, %v2009_v43  ;;  %v1576_v53 = vrot.slane %v1575_v9, 2  ;;  %v1581_v54 = vadd.f32 %v1580_v3, %v1554_v59 }
 0x3c7   :  { %v1994_v55 = vadd.f32 %v1993_v45, %v1992_v41  ;;  %v2012_v26 = vsel %vm1629_vm1, %v2004_v49, 0.0  ;;  %v1572_v56 = vrot.slane %v1571_v51, 1  ;;  %v1586_v57 = vrot.slane %v1555_v60, 4 }
 0x3c8   :  { %v2000_v58 = vadd.f32 %v1999_v25, %v1998_v42  ;;  %v2013_v61 = vadd.f32 %v2012_v26, %v2011_v52  ;;  %v1577_v62 = vadd.f32 %v1576_v53, %v1575_v9  ;;  %v1582_v63 = vrot.slane %v1581_v54, 2 }
 0x3c9   :  { %v2005_v0 = vmul.f32 %v1994_v55, %v4110_v47  ;;  %v1573_v1 = vadd.f32 %v1572_v56, %v1571_v51  ;;  %v1587_v2 = vadd.f32 %v1586_v57, %v1555_v60  ;;  %v1623_v4 = vmul.f32 %v4097_v32, %v1561_v44 }
 0x3ca   :  { %v2006_v6 = vmul.f32 %v2000_v58, %v4112_v22  ;;  %v1578_v7 = vrot.slane %v1577_v62, 1  ;;  %v1583_v8 = vadd.f32 %v1582_v63, %v1581_v54  ;;  %v1624_v59 = vmul.f32 %v4105_v5, %v1567_v50 }
 0x3cb   :  { %v2014_v3 = vsel %vm1629_vm1, %v2005_v0, 0.0  ;;  %v1588_v10 = vrot.slane %v1587_v2, 2  ;;  %v1625_v11 = vmul.f32 %v4100_v33, %v1573_v1  ;;  %v1630_v9 = vsel %vm1629_vm1, %v1623_v4, 0.0 }
 0x3cc   :  { %v2015_v12 = vadd.f32 %v2014_v3, %v2013_v61  ;;  %v1579_v13 = vadd.f32 %v1578_v7, %v1577_v62  ;;  %v1584_v15 = vrot.slane %v1583_v8, 1  ;;  %v2016_v60 = vsel %vm1629_vm1, %v2006_v6, 0.0 }
 0x3cd   :  { %v1589_v16 = vadd.f32 %v1588_v10, %v1587_v2  ;;  %v1631_v32 = vsel %vm1629_vm1, %v1624_v59, 0.0  ;;  %v1633_v21 = vsel %vm1629_vm1, %v1625_v11, 0.0 }
 0x3ce   :  { %v2017_v17 = vadd.f32 %v2016_v60, %v2015_v12  ;;  %v1585_v18 = vadd.f32 %v1584_v15, %v1583_v8  ;;  %v1626_v19 = vmul.f32 %v4108_v23, %v1579_v13  ;;  %v1632_v5 = vadd.f32 %v1631_v32, %v1630_v9 }
 0x3cf   :  { %v1590_v20 = vrot.slane %v1589_v16, 1 }
 0x3d0   :  { %2018 = vadd.xlane.f32.xlu0 %v2017_v17  ;;  %v1627_v33 = vmul.f32 %v4110_v47, %v1585_v18  ;;  %v1634_v29 = vadd.f32 %v1633_v21, %v1632_v5  ;;  %v1635_v40 = vsel %vm1629_vm1, %v1626_v19, 0.0 }
 0x3d1   :  { %v1591_v37 = vadd.f32 %v1590_v20, %v1589_v16 }
 0x3d2   :  { %v1636_v27 = vadd.f32 %v1635_v40, %v1634_v29  ;;  %v1637_v31 = vsel %vm1629_vm1, %v1627_v33, 0.0 }
 0x3d3   :  { %v1628_v28 = vmul.f32 %v4112_v22, %v1591_v37 }
 0x3d4   :  { %v1638_v34 = vadd.f32 %v1637_v31, %v1636_v27 }
 0x3d5   :  { %v1639_v30 = vsel %vm1629_vm1, %v1628_v28, 0.0 }
 0x3d6   :  { %v1640_v23 = vadd.f32 %v1639_v30, %v1638_v34 }
 0x3d8   :  { %1641 = vadd.xlane.f32.xlu1 %v1640_v23 }
 0x45d   :  { %v2019_v38 = vpop.xlane.xlu0 %2018 }
 0x45e   :  { %v2020_v35 = vadd.f32 %v2019_v38, %v226_v14 }
 0x460   :  { %v2022_v48 = vrot.slane %v2020_v35, 7 }
 0x465   :  { %v1642_v46 = vpop.xlane.xlu1 %1641 }
 0x466   :  { %v1643_v47 = vadd.f32 %v1642_v46, %v226_v14 }
 0x468   :  { %v2024_v41 = vsel %vm1629_vm1, %v1643_v47, %v2022_v48 }
 0x469   :  { %2026 = vst.msk [vmem:[%s4149_s7] sm:$0x3] %vm2025_vm2, %v2024_v41 }

</bundles_post_ra>
